<compile_context>
chip_gen: v7x
topology: tpu7x:2x2x1
jax: 0.10.0
libtpu: 0.0.40
codegen_flags: <defaults>
</compile_context>

<pallas_src>
import functools

import jax
import jax.numpy as jnp
from jax.experimental import pallas as pl
from jax.experimental.pallas import tpu as pltpu


def _gelu(x):
    c = 0.7978845608028654  # sqrt(2/pi)
    return 0.5 * x * (1.0 + jnp.tanh(c * (x + 0.044715 * x * x * x)))


def _utfusion_kernel(n_head, use_mask,
                     x_ref,
                     w_in_ref, b_in_ref,
                     ln1_g_ref, ln1_b_ref,
                     wq_ref, bq_ref,
                     wk_ref, bk_ref,
                     wv_ref, bv_ref,
                     wo_ref, bo_ref,
                     ln2_g_ref, ln2_b_ref,
                     w1_ref, b1_ref, w2_ref, b2_ref,
                     w_out_ref, b_out_ref,
                     hseg_ref,
                     o_ref):
    S, TP, D = x_ref.shape
    M = S * TP
    depth = wq_ref.shape[0]
    hd = D // n_head
    scale = 1.0 / (hd ** 0.5)
    f32 = jnp.float32

    w_in = w_in_ref[...]
    cdt = w_in.dtype            # MXU operand dtype (bf16 by default)
    hseg = hseg_ref[...]        # (D, D) block-diagonal: per-head sum + broadcast over head lanes

    def ln(h, g, b, eps=1e-5):
        # one-pass statistics (var = E[h^2] - E[h]^2), f32
        mu = jnp.mean(h, axis=-1, keepdims=True)
        ms = jnp.mean(h * h, axis=-1, keepdims=True)
        var = ms - mu * mu
        return (h - mu) * jax.lax.rsqrt(var + eps) * g + b

    def attend(qb, kb, vb):
        # qb: (Sq, TP, D), kb/vb: (Sk, TP, D), f32; 1/sqrt(hd) already folded into qb.
        # All Sq*Sk token-pair score matmuls batched into ONE lane-dense MXU call.
        Sq, Sk = qb.shape[0], kb.shape[0]
        prod = (qb[:, None, :, :] * kb[None, :, :, :]).reshape(Sq * Sk * TP, D)
        sc = jnp.dot(prod.astype(cdt), hseg, preferred_element_type=f32)
        sc = sc.reshape(Sq, Sk * TP, D)
        m = sc[:, :TP, :]
        for j in range(1, Sk):
            m = jnp.maximum(m, sc[:, j * TP:(j + 1) * TP, :])
        e = jnp.exp(sc[:, :TP, :] - m)
        den = e
        num = e * vb[0]
        for j in range(1, Sk):
            e = jnp.exp(sc[:, j * TP:(j + 1) * TP, :] - m)
            den = den + e
            num = num + e * vb[j]
        return num * pl.reciprocal(den, approx=True)            # (Sq, TP, D)

    # ---- in_proj on the whole (S*TP, D) slab (token axis folded into the matmul M) ----
    x = x_ref[...].reshape(M, D)
    xs = jnp.dot(x, w_in, preferred_element_type=f32) + b_in_ref[...]       # (M, D) f32

    # depth/S are small, so the layer loop is unrolled in Python.
    xf = None
    for l in range(depth):
        last = (l == depth - 1)

        # --- multi-head self-attention over the S fusion tokens (per position) ---
        xn = ln(xs, ln1_g_ref[l], ln1_b_ref[l])
        xn_c = xn.astype(cdt)

        # wq/wk/wv as separate matmuls: at D < 128 a fused (D,3D) weight would produce
        # lane-misaligned k/v slices; MXU cost is identical at this tiny K.
        k = (jnp.dot(xn_c, wk_ref[l], preferred_element_type=f32)
             + bk_ref[l]).reshape(S, TP, D)
        v = (jnp.dot(xn_c, wv_ref[l], preferred_element_type=f32)
             + bv_ref[l]).reshape(S, TP, D)

        if not last:
            q = ((jnp.dot(xn_c, wq_ref[l], preferred_element_type=f32) + bq_ref[l])
                 * scale).reshape(S, TP, D)
            if use_mask:
                # Non-fused queries never attend to the fused (last) key: skip those
                # score matmuls entirely instead of masking with -inf.
                attn = jnp.concatenate(
                    [attend(q[:S - 1], k[:S - 1], v[:S - 1]),
                     attend(q[S - 1:], k, v)], axis=0)
            else:
                attn = attend(q, k, v)
            attn = attn.reshape(M, D)
            xs = xs + jnp.dot(attn.astype(cdt), wo_ref[l],
                              preferred_element_type=f32) + bo_ref[l]
            h = ln(xs, ln2_g_ref[l], ln2_b_ref[l])
            h = jnp.dot(h.astype(cdt), w1_ref[l], preferred_element_type=f32) + b1_ref[l]
            h = _gelu(h)
            xs = xs + jnp.dot(h.astype(cdt), w2_ref[l], preferred_element_type=f32) + b2_ref[l]
        else:
            # Last layer: only the fused (last) token feeds out_proj, so compute q, WO
            # and the MLP for that token only (k/v still need every token).
            xn_f = xn_c[(S - 1) * TP:, :]
            qf = ((jnp.dot(xn_f, wq_ref[l], preferred_element_type=f32) + bq_ref[l])
                  * scale).reshape(1, TP, D)
            attn = attend(qf, k, v).reshape(TP, D)
            xf = xs[(S - 1) * TP:, :] + jnp.dot(attn.astype(cdt), wo_ref[l],
                                                preferred_element_type=f32) + bo_ref[l]
            h = ln(xf, ln2_g_ref[l], ln2_b_ref[l])
            h = jnp.dot(h.astype(cdt), w1_ref[l], preferred_element_type=f32) + b1_ref[l]
            h = _gelu(h)
            xf = xf + jnp.dot(h.astype(cdt), w2_ref[l], preferred_element_type=f32) + b2_ref[l]

    # out_proj on the fused (last) token only
    o_ref[...] = jnp.dot(xf.astype(cdt), w_out_ref[...],
                         preferred_element_type=f32) + b_out_ref[...]


def init_params(key, in_ch=1, n_head=8, patch_size=8, depth=6):
    assert depth >= 1
    D = in_ch * patch_size ** 2
    ks = jax.random.split(key, 10)

    def w(k, shape, s=0.05):
        return jax.random.normal(k, shape, jnp.float32) * s

    z = lambda *shape: jnp.zeros(shape, jnp.float32)
    o = lambda *shape: jnp.ones(shape, jnp.float32)
    return dict(
        emb=w(ks[0], (2, D), 0.2),
        w_in=w(ks[1], (D, D)), b_in=z(1, D),
        ln1_g=o(depth, 1, D), ln1_b=z(depth, 1, D),
        wq=w(ks[2], (depth, D, D)), bq=z(depth, 1, D),
        wk=w(ks[3], (depth, D, D)), bk=z(depth, 1, D),
        wv=w(ks[4], (depth, D, D)), bv=z(depth, 1, D),
        wo=w(ks[5], (depth, D, D)), bo=z(depth, 1, D),
        ln2_g=o(depth, 1, D), ln2_b=z(depth, 1, D),
        w1=w(ks[6], (depth, D, 2 * D)), b1=z(depth, 1, 2 * D),
        w2=w(ks[7], (depth, 2 * D, D)), b2=z(depth, 1, D),
        w_out=w(ks[8], (D, D)), b_out=z(1, D),
    )


def _round_up(v, m):
    return ((v + m - 1) // m) * m


def _full_spec(a):
    nd = a.ndim
    return pl.BlockSpec(a.shape, lambda i, nd=nd: (0,) * nd)


def _num_tensorcores_per_chip():
    # v7x has 2 TensorCores per chip (grid needs >= 2 steps to use both); v5e/v6e have 1.
    try:
        kind = jax.devices()[0].device_kind.lower()
    except Exception:
        return 1
    return 2 if ("v7" in kind or "7x" in kind) else 1


def utfusion_forward(images, params, *, n_head=8, patch_size=8,
                     use_mask=False, fused_scheme=None, tile_p=None,
                     mxu_dtype=jnp.bfloat16):
    # images: (N, B, C, H, W)  — the list of >= 2 input images, NCHW each
    N, B, C, H, W = images.shape
    assert N >= 2, "num of image must more than 2"
    ps = patch_size
    D = C * ps * ps
    assert D % n_head == 0

    # check_image_size: reflect pad to a multiple of patch_size, stack on axis 1
    pad_h = (ps - H % ps) % ps
    pad_w = (ps - W % ps) % ps
    imgs = jnp.pad(images, ((0, 0), (0, 0), (0, 0), (0, pad_h), (0, pad_w)), mode='reflect')
    Hpad, Wpad = H + pad_h, W + pad_w
    Hp, Wp = Hpad // ps, Wpad // ps
    outs = jnp.transpose(imgs, (1, 0, 2, 3, 4))                    # (B, N, C, Hpad, Wpad)

    # pixel_unshuffle(ps) then permute(0,1,3,4,2)
    outs = outs.reshape(B, N, C, Hp, ps, Wp, ps)
    outs = jnp.transpose(outs, (0, 1, 2, 4, 6, 3, 5))              # (B,N,C,ps,ps,Hp,Wp)
    outs = outs.reshape(B, N, D, Hp, Wp)
    outs = jnp.transpose(outs, (0, 1, 3, 4, 2))                    # (B, N, Hp, Wp, D)

    # fused-embedding token
    if fused_scheme is None:
        fused_scheme = jnp.ones((B,), jnp.int32)
    patch = params['emb'][fused_scheme]                            # (B, D)
    patch = jnp.broadcast_to(patch[:, None, None, None, :], (B, 1, Hp, Wp, D))
    outs = jnp.concatenate([outs, patch], axis=1)                  # (B, S, Hp, Wp, D)
    S = N + 1

    # token-major layout for the kernel: (S, P, D), P = B*Hp*Wp
    P = B * Hp * Wp
    x = jnp.transpose(outs, (1, 0, 2, 3, 4)).reshape(S, P, D)

    # Tile size: as big as useful (matmul M = S*tile_p). Only v7x (2 TensorCores) needs
    # >= 2 grid steps; single-TC chips (v5e/v6e) get the full requested tile.
    n_tc = _num_tensorcores_per_chip()
    if tile_p is None:
        tile_p = 512
    if n_tc >= 2:
        tile_p = min(int(tile_p), _round_up(-(-P // 2), 32))
    else:
        tile_p = min(int(tile_p), _round_up(P, 32))
    tile_p = max(32, tile_p)
    P_pad = _round_up(P, tile_p)
    if P_pad != P:
        x = jnp.pad(x, ((0, 0), (0, P_pad - P), (0, 0)))
    x = x.astype(mxu_dtype)

    # block-diagonal per-head "sum + broadcast" matrix for the attention scores
    cdt = mxu_dtype
    head_id = jnp.arange(D) // (D // n_head)
    hseg = (head_id[:, None] == head_id[None, :]).astype(cdt)      # (D, D)

    weights = [
        params['w_in'].astype(cdt), params['b_in'],
        params['ln1_g'], params['ln1_b'],
        params['wq'].astype(cdt), params['bq'],
        params['wk'].astype(cdt), params['bk'],
        params['wv'].astype(cdt), params['bv'],
        params['wo'].astype(cdt), params['bo'],
        params['ln2_g'], params['ln2_b'],
        params['w1'].astype(cdt), params['b1'],
        params['w2'].astype(cdt), params['b2'],
        params['w_out'].astype(cdt), params['b_out'],
        hseg,
    ]

    # Right-sized VMEM limit: input double-buffer + resident weights + live f32 slabs,
    # with 3x headroom; capped at 32 MiB on v7x (64 MiB physical) and 48 MiB elsewhere.
    M_blk = S * tile_p
    vmem_need = (2 * S * tile_p * D * jnp.dtype(mxu_dtype).itemsize
                 + sum(int(a.size) * a.dtype.itemsize for a in weights)
                 + 4 * M_blk * D * (8 + 2 * S)      # xs/xn/q/k/v/attn + score/exp slabs
                 + 4 * M_blk * 2 * D)               # MLP hidden
    vmem_cap = (32 << 20) if n_tc >= 2 else (48 << 20)
    vmem_limit = int(min(vmem_cap, max(24 << 20, 3 * vmem_need)))

    kernel = functools.partial(_utfusion_kernel, n_head, use_mask)
    out_flat = pl.pallas_call(
        kernel,
        out_shape=jax.ShapeDtypeStruct((P_pad, D), jnp.float32),
        grid_spec=pltpu.PrefetchScalarGridSpec(
            num_scalar_prefetch=0,
            grid=(P_pad // tile_p,),
            in_specs=[pl.BlockSpec((S, tile_p, D), lambda i: (0, i, 0))]
                     + [_full_spec(a) for a in weights],
            out_specs=pl.BlockSpec((tile_p, D), lambda i: (i, 0)),
        ),
        compiler_params=pltpu.CompilerParams(
            # "parallel" lets the grid steps shard across v7x's two TensorCores.
            dimension_semantics=("parallel",),
            vmem_limit_bytes=vmem_limit,
        ),
    )(x, *weights)

    # out_proj already applied in-kernel; permute + pixel_shuffle + crop
    out = out_flat[:P].reshape(B, Hp, Wp, D)
    out = jnp.transpose(out, (0, 3, 1, 2))                         # (B, D, Hp, Wp)
    out = out.reshape(B, C, ps, ps, Hp, Wp)
    out = jnp.transpose(out, (0, 1, 4, 2, 5, 3))                   # (B, C, Hp, ps, Wp, ps)
    out = out.reshape(B, C, Hpad, Wpad)
    return out[..., :H, :W]


if __name__ == "__main__":
    key = jax.random.PRNGKey(0)
    k_img, k_param = jax.random.split(key)

    # small, module-consistent shapes
    B, C, H, W = 2, 1, 36, 36     # in_ch=1, non-multiple-of-8 spatial exercises reflect pad
    N = 2                         # number of images to fuse (>= 2)
    n_head, ps, depth = 8, 8, 2   # dim = 1 * 8**2 = 64

    images = jax.random.normal(k_img, (N, B, C, H, W), jnp.float32)
    params = init_params(k_param, in_ch=C, n_head=n_head, patch_size=ps, depth=depth)

    out = utfusion_forward(images, params, n_head=n_head, patch_size=ps, use_mask=False)
    out = jax.block_until_ready(out)

    assert out.shape == (B, C, H, W), out.shape
    assert bool(jnp.all(jnp.isfinite(out)))
    print("KERNEL_OK")
</pallas_src>

<mosaic_0001>
module attributes {stable_mosaic.version = 11 : i64} {
  func.func @_utfusion_kernel(%arg0: i32, %arg1: memref<3x64x64xbf16, #tpu.memory_space<vmem>>, %arg2: memref<64x64xbf16, #tpu.memory_space<vmem>>, %arg3: memref<1x64xf32, #tpu.memory_space<vmem>>, %arg4: memref<2x1x64xf32, #tpu.memory_space<vmem>>, %arg5: memref<2x1x64xf32, #tpu.memory_space<vmem>>, %arg6: memref<2x64x64xbf16, #tpu.memory_space<vmem>>, %arg7: memref<2x1x64xf32, #tpu.memory_space<vmem>>, %arg8: memref<2x64x64xbf16, #tpu.memory_space<vmem>>, %arg9: memref<2x1x64xf32, #tpu.memory_space<vmem>>, %arg10: memref<2x64x64xbf16, #tpu.memory_space<vmem>>, %arg11: memref<2x1x64xf32, #tpu.memory_space<vmem>>, %arg12: memref<2x64x64xbf16, #tpu.memory_space<vmem>>, %arg13: memref<2x1x64xf32, #tpu.memory_space<vmem>>, %arg14: memref<2x1x64xf32, #tpu.memory_space<vmem>>, %arg15: memref<2x1x64xf32, #tpu.memory_space<vmem>>, %arg16: memref<2x64x128xbf16, #tpu.memory_space<vmem>>, %arg17: memref<2x1x128xf32, #tpu.memory_space<vmem>>, %arg18: memref<2x128x64xbf16, #tpu.memory_space<vmem>>, %arg19: memref<2x1x64xf32, #tpu.memory_space<vmem>>, %arg20: memref<64x64xbf16, #tpu.memory_space<vmem>>, %arg21: memref<1x64xf32, #tpu.memory_space<vmem>>, %arg22: memref<64x64xbf16, #tpu.memory_space<vmem>>, %arg23: memref<64x64xf32, #tpu.memory_space<vmem>>) attributes {dimension_semantics = [#tpu.dimension_semantics<parallel>], iteration_bounds = array<i64: 1>, scalar_prefetch = 0 : i64, scratch_operands = 0 : i64, tpu.core_type = #tpu.core_type<tc>, window_params = [{transform_indices = @transform_0, window_bounds = array<i64: 3, 64, 64>}, {pipeline_mode = #tpu.pipeline_mode<synchronous>, transform_indices = @transform_1, window_bounds = array<i64: 64, 64>}, {pipeline_mode = #tpu.pipeline_mode<synchronous>, transform_indices = @transform_2, window_bounds = array<i64: 1, 64>}, {pipeline_mode = #tpu.pipeline_mode<synchronous>, transform_indices = @transform_3, window_bounds = array<i64: 2, 1, 64>}, {pipeline_mode = #tpu.pipeline_mode<synchronous>, transform_indices = @transform_4, window_bounds = array<i64: 2, 1, 64>}, {pipeline_mode = #tpu.pipeline_mode<synchronous>, transform_indices = @transform_5, window_bounds = array<i64: 2, 64, 64>}, {pipeline_mode = #tpu.pipeline_mode<synchronous>, transform_indices = @transform_6, window_bounds = array<i64: 2, 1, 64>}, {pipeline_mode = #tpu.pipeline_mode<synchronous>, transform_indices = @transform_7, window_bounds = array<i64: 2, 64, 64>}, {pipeline_mode = #tpu.pipeline_mode<synchronous>, transform_indices = @transform_8, window_bounds = array<i64: 2, 1, 64>}, {pipeline_mode = #tpu.pipeline_mode<synchronous>, transform_indices = @transform_9, window_bounds = array<i64: 2, 64, 64>}, {pipeline_mode = #tpu.pipeline_mode<synchronous>, transform_indices = @transform_10, window_bounds = array<i64: 2, 1, 64>}, {pipeline_mode = #tpu.pipeline_mode<synchronous>, transform_indices = @transform_11, window_bounds = array<i64: 2, 64, 64>}, {pipeline_mode = #tpu.pipeline_mode<synchronous>, transform_indices = @transform_12, window_bounds = array<i64: 2, 1, 64>}, {pipeline_mode = #tpu.pipeline_mode<synchronous>, transform_indices = @transform_13, window_bounds = array<i64: 2, 1, 64>}, {pipeline_mode = #tpu.pipeline_mode<synchronous>, transform_indices = @transform_14, window_bounds = array<i64: 2, 1, 64>}, {pipeline_mode = #tpu.pipeline_mode<synchronous>, transform_indices = @transform_15, window_bounds = array<i64: 2, 64, 128>}, {pipeline_mode = #tpu.pipeline_mode<synchronous>, transform_indices = @transform_16, window_bounds = array<i64: 2, 1, 128>}, {pipeline_mode = #tpu.pipeline_mode<synchronous>, transform_indices = @transform_17, window_bounds = array<i64: 2, 128, 64>}, {pipeline_mode = #tpu.pipeline_mode<synchronous>, transform_indices = @transform_18, window_bounds = array<i64: 2, 1, 64>}, {pipeline_mode = #tpu.pipeline_mode<synchronous>, transform_indices = @transform_19, window_bounds = array<i64: 64, 64>}, {pipeline_mode = #tpu.pipeline_mode<synchronous>, transform_indices = @transform_20, window_bounds = array<i64: 1, 64>}, {pipeline_mode = #tpu.pipeline_mode<synchronous>, transform_indices = @transform_21, window_bounds = array<i64: 64, 64>}, {transform_indices = @transform_22, window_bounds = array<i64: 64, 64>}]} {
    %c0 = arith.constant 0 : index
    %c0_0 = arith.constant 0 : index
    %0 = vector.load %arg2[%c0, %c0_0] : memref<64x64xbf16, #tpu.memory_space<vmem>>, vector<64x64xbf16>
    %c0_1 = arith.constant 0 : index
    %c0_2 = arith.constant 0 : index
    %1 = vector.load %arg22[%c0_1, %c0_2] : memref<64x64xbf16, #tpu.memory_space<vmem>>, vector<64x64xbf16>
    %c0_3 = arith.constant 0 : index
    %c0_4 = arith.constant 0 : index
    %c0_5 = arith.constant 0 : index
    %2 = vector.load %arg1[%c0_3, %c0_4, %c0_5] : memref<3x64x64xbf16, #tpu.memory_space<vmem>>, vector<3x64x64xbf16>
    %3 = vector.shape_cast %2 : vector<3x64x64xbf16> to vector<192x64xbf16>
    %cst = arith.constant dense<0.000000e+00> : vector<192x64xf32>
    %4 = tpu.matmul %3, %0, %cst {dimension_numbers = #tpu.dot_dimension_numbers<[1], [0], [0], [1], [0, 0, 1, 1], [], []>} : vector<192x64xbf16>, vector<64x64xbf16>, vector<192x64xf32> -> vector<192x64xf32>
    %c0_6 = arith.constant 0 : index
    %c0_7 = arith.constant 0 : index
    %5 = vector.load %arg3[%c0_6, %c0_7] : memref<1x64xf32, #tpu.memory_space<vmem>>, vector<1x64xf32>
    %6 = vector.broadcast %5 : vector<1x64xf32> to vector<192x64xf32>
    %7 = arith.addf %4, %6 : vector<192x64xf32>
    %c0_8 = arith.constant 0 : index
    %c0_9 = arith.constant 0 : index
    %c0_10 = arith.constant 0 : index
    %8 = vector.load %arg4[%c0_8, %c0_9, %c0_10] : memref<2x1x64xf32, #tpu.memory_space<vmem>>, vector<1x1x64xf32>
    %9 = vector.shape_cast %8 : vector<1x1x64xf32> to vector<1x64xf32>
    %c0_11 = arith.constant 0 : index
    %c0_12 = arith.constant 0 : index
    %c0_13 = arith.constant 0 : index
    %10 = vector.load %arg5[%c0_11, %c0_12, %c0_13] : memref<2x1x64xf32, #tpu.memory_space<vmem>>, vector<1x1x64xf32>
    %11 = vector.shape_cast %10 : vector<1x1x64xf32> to vector<1x64xf32>
    %cst_14 = arith.constant dense<0.000000e+00> : vector<192xf32>
    %12 = vector.multi_reduction <add>, %7, %cst_14 [1] : vector<192x64xf32> to vector<192xf32>
    %13 = vector.shape_cast %12 : vector<192xf32> to vector<192x1xf32>
    %cst_15 = arith.constant 6.400000e+01 : f32
    %14 = vector.broadcast %cst_15 : f32 to vector<192x1xf32>
    %15 = arith.divf %13, %14 : vector<192x1xf32>
    %16 = arith.mulf %7, %7 : vector<192x64xf32>
    %cst_16 = arith.constant dense<0.000000e+00> : vector<192xf32>
    %17 = vector.multi_reduction <add>, %16, %cst_16 [1] : vector<192x64xf32> to vector<192xf32>
    %18 = vector.shape_cast %17 : vector<192xf32> to vector<192x1xf32>
    %cst_17 = arith.constant 6.400000e+01 : f32
    %19 = vector.broadcast %cst_17 : f32 to vector<192x1xf32>
    %20 = arith.divf %18, %19 : vector<192x1xf32>
    %21 = arith.mulf %15, %15 : vector<192x1xf32>
    %22 = arith.subf %20, %21 : vector<192x1xf32>
    %23 = vector.broadcast %15 : vector<192x1xf32> to vector<192x64xf32>
    %24 = arith.subf %7, %23 : vector<192x64xf32>
    %cst_18 = arith.constant 9.99999974E-6 : f32
    %25 = vector.broadcast %cst_18 : f32 to vector<192x1xf32>
    %26 = arith.addf %22, %25 : vector<192x1xf32>
    %27 = math.rsqrt %26 : vector<192x1xf32>
    %28 = vector.broadcast %27 : vector<192x1xf32> to vector<192x64xf32>
    %29 = arith.mulf %24, %28 : vector<192x64xf32>
    %30 = vector.broadcast %9 : vector<1x64xf32> to vector<192x64xf32>
    %31 = arith.mulf %29, %30 : vector<192x64xf32>
    %32 = vector.broadcast %11 : vector<1x64xf32> to vector<192x64xf32>
    %33 = arith.addf %31, %32 : vector<192x64xf32>
    %34 = arith.truncf %33 : vector<192x64xf32> to vector<192x64xbf16>
    %c0_19 = arith.constant 0 : index
    %c0_20 = arith.constant 0 : index
    %c0_21 = arith.constant 0 : index
    %35 = vector.load %arg8[%c0_19, %c0_20, %c0_21] : memref<2x64x64xbf16, #tpu.memory_space<vmem>>, vector<1x64x64xbf16>
    %36 = vector.shape_cast %35 : vector<1x64x64xbf16> to vector<64x64xbf16>
    %cst_22 = arith.constant dense<0.000000e+00> : vector<192x64xf32>
    %37 = tpu.matmul %34, %36, %cst_22 {dimension_numbers = #tpu.dot_dimension_numbers<[1], [0], [0], [1], [0, 0, 1, 1], [], []>} : vector<192x64xbf16>, vector<64x64xbf16>, vector<192x64xf32> -> vector<192x64xf32>
    %c0_23 = arith.constant 0 : index
    %c0_24 = arith.constant 0 : index
    %c0_25 = arith.constant 0 : index
    %38 = vector.load %arg9[%c0_23, %c0_24, %c0_25] : memref<2x1x64xf32, #tpu.memory_space<vmem>>, vector<1x1x64xf32>
    %39 = vector.shape_cast %38 : vector<1x1x64xf32> to vector<1x64xf32>
    %40 = vector.broadcast %39 : vector<1x64xf32> to vector<192x64xf32>
    %41 = arith.addf %37, %40 : vector<192x64xf32>
    %42 = vector.shape_cast %41 : vector<192x64xf32> to vector<3x64x64xf32>
    %c0_26 = arith.constant 0 : index
    %c0_27 = arith.constant 0 : index
    %c0_28 = arith.constant 0 : index
    %43 = vector.load %arg10[%c0_26, %c0_27, %c0_28] : memref<2x64x64xbf16, #tpu.memory_space<vmem>>, vector<1x64x64xbf16>
    %44 = vector.shape_cast %43 : vector<1x64x64xbf16> to vector<64x64xbf16>
    %cst_29 = arith.constant dense<0.000000e+00> : vector<192x64xf32>
    %45 = tpu.matmul %34, %44, %cst_29 {dimension_numbers = #tpu.dot_dimension_numbers<[1], [0], [0], [1], [0, 0, 1, 1], [], []>} : vector<192x64xbf16>, vector<64x64xbf16>, vector<192x64xf32> -> vector<192x64xf32>
    %c0_30 = arith.constant 0 : index
    %c0_31 = arith.constant 0 : index
    %c0_32 = arith.constant 0 : index
    %46 = vector.load %arg11[%c0_30, %c0_31, %c0_32] : memref<2x1x64xf32, #tpu.memory_space<vmem>>, vector<1x1x64xf32>
    %47 = vector.shape_cast %46 : vector<1x1x64xf32> to vector<1x64xf32>
    %48 = vector.broadcast %47 : vector<1x64xf32> to vector<192x64xf32>
    %49 = arith.addf %45, %48 : vector<192x64xf32>
    %50 = vector.shape_cast %49 : vector<192x64xf32> to vector<3x64x64xf32>
    %c0_33 = arith.constant 0 : index
    %c0_34 = arith.constant 0 : index
    %c0_35 = arith.constant 0 : index
    %51 = vector.load %arg6[%c0_33, %c0_34, %c0_35] : memref<2x64x64xbf16, #tpu.memory_space<vmem>>, vector<1x64x64xbf16>
    %52 = vector.shape_cast %51 : vector<1x64x64xbf16> to vector<64x64xbf16>
    %cst_36 = arith.constant dense<0.000000e+00> : vector<192x64xf32>
    %53 = tpu.matmul %34, %52, %cst_36 {dimension_numbers = #tpu.dot_dimension_numbers<[1], [0], [0], [1], [0, 0, 1, 1], [], []>} : vector<192x64xbf16>, vector<64x64xbf16>, vector<192x64xf32> -> vector<192x64xf32>
    %c0_37 = arith.constant 0 : index
    %c0_38 = arith.constant 0 : index
    %c0_39 = arith.constant 0 : index
    %54 = vector.load %arg7[%c0_37, %c0_38, %c0_39] : memref<2x1x64xf32, #tpu.memory_space<vmem>>, vector<1x1x64xf32>
    %55 = vector.shape_cast %54 : vector<1x1x64xf32> to vector<1x64xf32>
    %56 = vector.broadcast %55 : vector<1x64xf32> to vector<192x64xf32>
    %57 = arith.addf %53, %56 : vector<192x64xf32>
    %cst_40 = arith.constant 0.353553385 : f32
    %58 = vector.broadcast %cst_40 : f32 to vector<192x64xf32>
    %59 = arith.mulf %57, %58 : vector<192x64xf32>
    %60 = vector.shape_cast %59 : vector<192x64xf32> to vector<3x64x64xf32>
    %61 = vector.shape_cast %60 : vector<3x64x64xf32> to vector<3x1x64x64xf32>
    %62 = vector.shape_cast %42 : vector<3x64x64xf32> to vector<1x3x64x64xf32>
    %63 = vector.broadcast %61 : vector<3x1x64x64xf32> to vector<3x3x64x64xf32>
    %64 = vector.broadcast %62 : vector<1x3x64x64xf32> to vector<3x3x64x64xf32>
    %65 = arith.mulf %63, %64 : vector<3x3x64x64xf32>
    %66 = vector.shape_cast %65 : vector<3x3x64x64xf32> to vector<576x64xf32>
    %67 = arith.truncf %66 : vector<576x64xf32> to vector<576x64xbf16>
    %cst_41 = arith.constant dense<0.000000e+00> : vector<576x64xf32>
    %68 = tpu.matmul %67, %1, %cst_41 {dimension_numbers = #tpu.dot_dimension_numbers<[1], [0], [0], [1], [0, 0, 1, 1], [], []>} : vector<576x64xbf16>, vector<64x64xbf16>, vector<576x64xf32> -> vector<576x64xf32>
    %69 = vector.shape_cast %68 : vector<576x64xf32> to vector<3x192x64xf32>
    %70 = vector.extract_strided_slice %69 {offsets = [0, 0, 0], sizes = [3, 64, 64], strides = [1, 1, 1]} : vector<3x192x64xf32> to vector<3x64x64xf32>
    %71 = vector.extract_strided_slice %69 {offsets = [0, 64, 0], sizes = [3, 64, 64], strides = [1, 1, 1]} : vector<3x192x64xf32> to vector<3x64x64xf32>
    %72 = arith.maximumf %70, %71 : vector<3x64x64xf32>
    %73 = vector.extract_strided_slice %69 {offsets = [0, 128, 0], sizes = [3, 64, 64], strides = [1, 1, 1]} : vector<3x192x64xf32> to vector<3x64x64xf32>
    %74 = arith.maximumf %72, %73 : vector<3x64x64xf32>
    %75 = vector.extract_strided_slice %69 {offsets = [0, 0, 0], sizes = [3, 64, 64], strides = [1, 1, 1]} : vector<3x192x64xf32> to vector<3x64x64xf32>
    %76 = arith.subf %75, %74 : vector<3x64x64xf32>
    %77 = math.exp %76 : vector<3x64x64xf32>
    %78 = vector.extract_strided_slice %50 {offsets = [0, 0, 0], sizes = [1, 64, 64], strides = [1, 1, 1]} : vector<3x64x64xf32> to vector<1x64x64xf32>
    %79 = vector.shape_cast %78 : vector<1x64x64xf32> to vector<64x64xf32>
    %80 = vector.shape_cast %79 : vector<64x64xf32> to vector<1x64x64xf32>
    %81 = vector.broadcast %80 : vector<1x64x64xf32> to vector<3x64x64xf32>
    %82 = arith.mulf %77, %81 : vector<3x64x64xf32>
    %83 = vector.extract_strided_slice %69 {offsets = [0, 64, 0], sizes = [3, 64, 64], strides = [1, 1, 1]} : vector<3x192x64xf32> to vector<3x64x64xf32>
    %84 = arith.subf %83, %74 : vector<3x64x64xf32>
    %85 = math.exp %84 : vector<3x64x64xf32>
    %86 = arith.addf %77, %85 : vector<3x64x64xf32>
    %87 = vector.extract_strided_slice %50 {offsets = [1, 0, 0], sizes = [1, 64, 64], strides = [1, 1, 1]} : vector<3x64x64xf32> to vector<1x64x64xf32>
    %88 = vector.shape_cast %87 : vector<1x64x64xf32> to vector<64x64xf32>
    %89 = vector.shape_cast %88 : vector<64x64xf32> to vector<1x64x64xf32>
    %90 = vector.broadcast %89 : vector<1x64x64xf32> to vector<3x64x64xf32>
    %91 = arith.mulf %85, %90 : vector<3x64x64xf32>
    %92 = arith.addf %82, %91 : vector<3x64x64xf32>
    %93 = vector.extract_strided_slice %69 {offsets = [0, 128, 0], sizes = [3, 64, 64], strides = [1, 1, 1]} : vector<3x192x64xf32> to vector<3x64x64xf32>
    %94 = arith.subf %93, %74 : vector<3x64x64xf32>
    %95 = math.exp %94 : vector<3x64x64xf32>
    %96 = arith.addf %86, %95 : vector<3x64x64xf32>
    %97 = vector.extract_strided_slice %50 {offsets = [2, 0, 0], sizes = [1, 64, 64], strides = [1, 1, 1]} : vector<3x64x64xf32> to vector<1x64x64xf32>
    %98 = vector.shape_cast %97 : vector<1x64x64xf32> to vector<64x64xf32>
    %99 = vector.shape_cast %98 : vector<64x64xf32> to vector<1x64x64xf32>
    %100 = vector.broadcast %99 : vector<1x64x64xf32> to vector<3x64x64xf32>
    %101 = arith.mulf %95, %100 : vector<3x64x64xf32>
    %102 = arith.addf %92, %101 : vector<3x64x64xf32>
    %103 = tpu.reciprocal %96 {approx = true} : vector<3x64x64xf32> -> vector<3x64x64xf32>
    %104 = arith.mulf %102, %103 : vector<3x64x64xf32>
    %105 = vector.shape_cast %104 : vector<3x64x64xf32> to vector<192x64xf32>
    %106 = arith.truncf %105 : vector<192x64xf32> to vector<192x64xbf16>
    %c0_42 = arith.constant 0 : index
    %c0_43 = arith.constant 0 : index
    %c0_44 = arith.constant 0 : index
    %107 = vector.load %arg12[%c0_42, %c0_43, %c0_44] : memref<2x64x64xbf16, #tpu.memory_space<vmem>>, vector<1x64x64xbf16>
    %108 = vector.shape_cast %107 : vector<1x64x64xbf16> to vector<64x64xbf16>
    %cst_45 = arith.constant dense<0.000000e+00> : vector<192x64xf32>
    %109 = tpu.matmul %106, %108, %cst_45 {dimension_numbers = #tpu.dot_dimension_numbers<[1], [0], [0], [1], [0, 0, 1, 1], [], []>} : vector<192x64xbf16>, vector<64x64xbf16>, vector<192x64xf32> -> vector<192x64xf32>
    %110 = arith.addf %7, %109 : vector<192x64xf32>
    %c0_46 = arith.constant 0 : index
    %c0_47 = arith.constant 0 : index
    %c0_48 = arith.constant 0 : index
    %111 = vector.load %arg13[%c0_46, %c0_47, %c0_48] : memref<2x1x64xf32, #tpu.memory_space<vmem>>, vector<1x1x64xf32>
    %112 = vector.shape_cast %111 : vector<1x1x64xf32> to vector<1x64xf32>
    %113 = vector.broadcast %112 : vector<1x64xf32> to vector<192x64xf32>
    %114 = arith.addf %110, %113 : vector<192x64xf32>
    %c0_49 = arith.constant 0 : index
    %c0_50 = arith.constant 0 : index
    %c0_51 = arith.constant 0 : index
    %115 = vector.load %arg14[%c0_49, %c0_50, %c0_51] : memref<2x1x64xf32, #tpu.memory_space<vmem>>, vector<1x1x64xf32>
    %116 = vector.shape_cast %115 : vector<1x1x64xf32> to vector<1x64xf32>
    %c0_52 = arith.constant 0 : index
    %c0_53 = arith.constant 0 : index
    %c0_54 = arith.constant 0 : index
    %117 = vector.load %arg15[%c0_52, %c0_53, %c0_54] : memref<2x1x64xf32, #tpu.memory_space<vmem>>, vector<1x1x64xf32>
    %118 = vector.shape_cast %117 : vector<1x1x64xf32> to vector<1x64xf32>
    %cst_55 = arith.constant dense<0.000000e+00> : vector<192xf32>
    %119 = vector.multi_reduction <add>, %114, %cst_55 [1] : vector<192x64xf32> to vector<192xf32>
    %120 = vector.shape_cast %119 : vector<192xf32> to vector<192x1xf32>
    %cst_56 = arith.constant 6.400000e+01 : f32
    %121 = vector.broadcast %cst_56 : f32 to vector<192x1xf32>
    %122 = arith.divf %120, %121 : vector<192x1xf32>
    %123 = arith.mulf %114, %114 : vector<192x64xf32>
    %cst_57 = arith.constant dense<0.000000e+00> : vector<192xf32>
    %124 = vector.multi_reduction <add>, %123, %cst_57 [1] : vector<192x64xf32> to vector<192xf32>
    %125 = vector.shape_cast %124 : vector<192xf32> to vector<192x1xf32>
    %cst_58 = arith.constant 6.400000e+01 : f32
    %126 = vector.broadcast %cst_58 : f32 to vector<192x1xf32>
    %127 = arith.divf %125, %126 : vector<192x1xf32>
    %128 = arith.mulf %122, %122 : vector<192x1xf32>
    %129 = arith.subf %127, %128 : vector<192x1xf32>
    %130 = vector.broadcast %122 : vector<192x1xf32> to vector<192x64xf32>
    %131 = arith.subf %114, %130 : vector<192x64xf32>
    %cst_59 = arith.constant 9.99999974E-6 : f32
    %132 = vector.broadcast %cst_59 : f32 to vector<192x1xf32>
    %133 = arith.addf %129, %132 : vector<192x1xf32>
    %134 = math.rsqrt %133 : vector<192x1xf32>
    %135 = vector.broadcast %134 : vector<192x1xf32> to vector<192x64xf32>
    %136 = arith.mulf %131, %135 : vector<192x64xf32>
    %137 = vector.broadcast %116 : vector<1x64xf32> to vector<192x64xf32>
    %138 = arith.mulf %136, %137 : vector<192x64xf32>
    %139 = vector.broadcast %118 : vector<1x64xf32> to vector<192x64xf32>
    %140 = arith.addf %138, %139 : vector<192x64xf32>
    %141 = arith.truncf %140 : vector<192x64xf32> to vector<192x64xbf16>
    %c0_60 = arith.constant 0 : index
    %c0_61 = arith.constant 0 : index
    %c0_62 = arith.constant 0 : index
    %142 = vector.load %arg16[%c0_60, %c0_61, %c0_62] : memref<2x64x128xbf16, #tpu.memory_space<vmem>>, vector<1x64x128xbf16>
    %143 = vector.shape_cast %142 : vector<1x64x128xbf16> to vector<64x128xbf16>
    %cst_63 = arith.constant dense<0.000000e+00> : vector<192x128xf32>
    %144 = tpu.matmul %141, %143, %cst_63 {dimension_numbers = #tpu.dot_dimension_numbers<[1], [0], [0], [1], [0, 0, 1, 1], [], []>} : vector<192x64xbf16>, vector<64x128xbf16>, vector<192x128xf32> -> vector<192x128xf32>
    %c0_64 = arith.constant 0 : index
    %c0_65 = arith.constant 0 : index
    %c0_66 = arith.constant 0 : index
    %145 = vector.load %arg17[%c0_64, %c0_65, %c0_66] : memref<2x1x128xf32, #tpu.memory_space<vmem>>, vector<1x1x128xf32>
    %146 = vector.shape_cast %145 : vector<1x1x128xf32> to vector<1x128xf32>
    %147 = vector.broadcast %146 : vector<1x128xf32> to vector<192x128xf32>
    %148 = arith.addf %144, %147 : vector<192x128xf32>
    %cst_67 = arith.constant 5.000000e-01 : f32
    %149 = vector.broadcast %cst_67 : f32 to vector<192x128xf32>
    %150 = arith.mulf %149, %148 : vector<192x128xf32>
    %cst_68 = arith.constant 4.471500e-02 : f32
    %151 = vector.broadcast %cst_68 : f32 to vector<192x128xf32>
    %152 = arith.mulf %151, %148 : vector<192x128xf32>
    %153 = arith.mulf %152, %148 : vector<192x128xf32>
    %154 = arith.mulf %153, %148 : vector<192x128xf32>
    %155 = arith.addf %148, %154 : vector<192x128xf32>
    %cst_69 = arith.constant 0.797884583 : f32
    %156 = vector.broadcast %cst_69 : f32 to vector<192x128xf32>
    %157 = arith.mulf %156, %155 : vector<192x128xf32>
    %158 = math.tanh %157 : vector<192x128xf32>
    %cst_70 = arith.constant 1.000000e+00 : f32
    %159 = vector.broadcast %cst_70 : f32 to vector<192x128xf32>
    %160 = arith.addf %159, %158 : vector<192x128xf32>
    %161 = arith.mulf %150, %160 : vector<192x128xf32>
    %162 = arith.truncf %161 : vector<192x128xf32> to vector<192x128xbf16>
    %c0_71 = arith.constant 0 : index
    %c0_72 = arith.constant 0 : index
    %c0_73 = arith.constant 0 : index
    %163 = vector.load %arg18[%c0_71, %c0_72, %c0_73] : memref<2x128x64xbf16, #tpu.memory_space<vmem>>, vector<1x128x64xbf16>
    %164 = vector.shape_cast %163 : vector<1x128x64xbf16> to vector<128x64xbf16>
    %cst_74 = arith.constant dense<0.000000e+00> : vector<192x64xf32>
    %165 = tpu.matmul %162, %164, %cst_74 {dimension_numbers = #tpu.dot_dimension_numbers<[1], [0], [0], [1], [0, 0, 1, 1], [], []>} : vector<192x128xbf16>, vector<128x64xbf16>, vector<192x64xf32> -> vector<192x64xf32>
    %166 = arith.addf %114, %165 : vector<192x64xf32>
    %c0_75 = arith.constant 0 : index
    %c0_76 = arith.constant 0 : index
    %c0_77 = arith.constant 0 : index
    %167 = vector.load %arg19[%c0_75, %c0_76, %c0_77] : memref<2x1x64xf32, #tpu.memory_space<vmem>>, vector<1x1x64xf32>
    %168 = vector.shape_cast %167 : vector<1x1x64xf32> to vector<1x64xf32>
    %169 = vector.broadcast %168 : vector<1x64xf32> to vector<192x64xf32>
    %170 = arith.addf %166, %169 : vector<192x64xf32>
    %c1 = arith.constant 1 : index
    %c0_78 = arith.constant 0 : index
    %c0_79 = arith.constant 0 : index
    %171 = vector.load %arg4[%c1, %c0_78, %c0_79] : memref<2x1x64xf32, #tpu.memory_space<vmem>>, vector<1x1x64xf32>
    %172 = vector.shape_cast %171 : vector<1x1x64xf32> to vector<1x64xf32>
    %c1_80 = arith.constant 1 : index
    %c0_81 = arith.constant 0 : index
    %c0_82 = arith.constant 0 : index
    %173 = vector.load %arg5[%c1_80, %c0_81, %c0_82] : memref<2x1x64xf32, #tpu.memory_space<vmem>>, vector<1x1x64xf32>
    %174 = vector.shape_cast %173 : vector<1x1x64xf32> to vector<1x64xf32>
    %cst_83 = arith.constant dense<0.000000e+00> : vector<192xf32>
    %175 = vector.multi_reduction <add>, %170, %cst_83 [1] : vector<192x64xf32> to vector<192xf32>
    %176 = vector.shape_cast %175 : vector<192xf32> to vector<192x1xf32>
    %cst_84 = arith.constant 6.400000e+01 : f32
    %177 = vector.broadcast %cst_84 : f32 to vector<192x1xf32>
    %178 = arith.divf %176, %177 : vector<192x1xf32>
    %179 = arith.mulf %170, %170 : vector<192x64xf32>
    %cst_85 = arith.constant dense<0.000000e+00> : vector<192xf32>
    %180 = vector.multi_reduction <add>, %179, %cst_85 [1] : vector<192x64xf32> to vector<192xf32>
    %181 = vector.shape_cast %180 : vector<192xf32> to vector<192x1xf32>
    %cst_86 = arith.constant 6.400000e+01 : f32
    %182 = vector.broadcast %cst_86 : f32 to vector<192x1xf32>
    %183 = arith.divf %181, %182 : vector<192x1xf32>
    %184 = arith.mulf %178, %178 : vector<192x1xf32>
    %185 = arith.subf %183, %184 : vector<192x1xf32>
    %186 = vector.broadcast %178 : vector<192x1xf32> to vector<192x64xf32>
    %187 = arith.subf %170, %186 : vector<192x64xf32>
    %cst_87 = arith.constant 9.99999974E-6 : f32
    %188 = vector.broadcast %cst_87 : f32 to vector<192x1xf32>
    %189 = arith.addf %185, %188 : vector<192x1xf32>
    %190 = math.rsqrt %189 : vector<192x1xf32>
    %191 = vector.broadcast %190 : vector<192x1xf32> to vector<192x64xf32>
    %192 = arith.mulf %187, %191 : vector<192x64xf32>
    %193 = vector.broadcast %172 : vector<1x64xf32> to vector<192x64xf32>
    %194 = arith.mulf %192, %193 : vector<192x64xf32>
    %195 = vector.broadcast %174 : vector<1x64xf32> to vector<192x64xf32>
    %196 = arith.addf %194, %195 : vector<192x64xf32>
    %197 = arith.truncf %196 : vector<192x64xf32> to vector<192x64xbf16>
    %c1_88 = arith.constant 1 : index
    %c0_89 = arith.constant 0 : index
    %c0_90 = arith.constant 0 : index
    %198 = vector.load %arg8[%c1_88, %c0_89, %c0_90] : memref<2x64x64xbf16, #tpu.memory_space<vmem>>, vector<1x64x64xbf16>
    %199 = vector.shape_cast %198 : vector<1x64x64xbf16> to vector<64x64xbf16>
    %cst_91 = arith.constant dense<0.000000e+00> : vector<192x64xf32>
    %200 = tpu.matmul %197, %199, %cst_91 {dimension_numbers = #tpu.dot_dimension_numbers<[1], [0], [0], [1], [0, 0, 1, 1], [], []>} : vector<192x64xbf16>, vector<64x64xbf16>, vector<192x64xf32> -> vector<192x64xf32>
    %c1_92 = arith.constant 1 : index
    %c0_93 = arith.constant 0 : index
    %c0_94 = arith.constant 0 : index
    %201 = vector.load %arg9[%c1_92, %c0_93, %c0_94] : memref<2x1x64xf32, #tpu.memory_space<vmem>>, vector<1x1x64xf32>
    %202 = vector.shape_cast %201 : vector<1x1x64xf32> to vector<1x64xf32>
    %203 = vector.broadcast %202 : vector<1x64xf32> to vector<192x64xf32>
    %204 = arith.addf %200, %203 : vector<192x64xf32>
    %205 = vector.shape_cast %204 : vector<192x64xf32> to vector<3x64x64xf32>
    %c1_95 = arith.constant 1 : index
    %c0_96 = arith.constant 0 : index
    %c0_97 = arith.constant 0 : index
    %206 = vector.load %arg10[%c1_95, %c0_96, %c0_97] : memref<2x64x64xbf16, #tpu.memory_space<vmem>>, vector<1x64x64xbf16>
    %207 = vector.shape_cast %206 : vector<1x64x64xbf16> to vector<64x64xbf16>
    %cst_98 = arith.constant dense<0.000000e+00> : vector<192x64xf32>
    %208 = tpu.matmul %197, %207, %cst_98 {dimension_numbers = #tpu.dot_dimension_numbers<[1], [0], [0], [1], [0, 0, 1, 1], [], []>} : vector<192x64xbf16>, vector<64x64xbf16>, vector<192x64xf32> -> vector<192x64xf32>
    %c1_99 = arith.constant 1 : index
    %c0_100 = arith.constant 0 : index
    %c0_101 = arith.constant 0 : index
    %209 = vector.load %arg11[%c1_99, %c0_100, %c0_101] : memref<2x1x64xf32, #tpu.memory_space<vmem>>, vector<1x1x64xf32>
    %210 = vector.shape_cast %209 : vector<1x1x64xf32> to vector<1x64xf32>
    %211 = vector.broadcast %210 : vector<1x64xf32> to vector<192x64xf32>
    %212 = arith.addf %208, %211 : vector<192x64xf32>
    %213 = vector.shape_cast %212 : vector<192x64xf32> to vector<3x64x64xf32>
    %214 = vector.extract_strided_slice %197 {offsets = [128, 0], sizes = [64, 64], strides = [1, 1]} : vector<192x64xbf16> to vector<64x64xbf16>
    %c1_102 = arith.constant 1 : index
    %c0_103 = arith.constant 0 : index
    %c0_104 = arith.constant 0 : index
    %215 = vector.load %arg6[%c1_102, %c0_103, %c0_104] : memref<2x64x64xbf16, #tpu.memory_space<vmem>>, vector<1x64x64xbf16>
    %216 = vector.shape_cast %215 : vector<1x64x64xbf16> to vector<64x64xbf16>
    %cst_105 = arith.constant dense<0.000000e+00> : vector<64x64xf32>
    %217 = tpu.matmul %214, %216, %cst_105 {dimension_numbers = #tpu.dot_dimension_numbers<[1], [0], [0], [1], [0, 0, 1, 1], [], []>} : vector<64x64xbf16>, vector<64x64xbf16>, vector<64x64xf32> -> vector<64x64xf32>
    %c1_106 = arith.constant 1 : index
    %c0_107 = arith.constant 0 : index
    %c0_108 = arith.constant 0 : index
    %218 = vector.load %arg7[%c1_106, %c0_107, %c0_108] : memref<2x1x64xf32, #tpu.memory_space<vmem>>, vector<1x1x64xf32>
    %219 = vector.shape_cast %218 : vector<1x1x64xf32> to vector<1x64xf32>
    %220 = vector.broadcast %219 : vector<1x64xf32> to vector<64x64xf32>
    %221 = arith.addf %217, %220 : vector<64x64xf32>
    %cst_109 = arith.constant 0.353553385 : f32
    %222 = vector.broadcast %cst_109 : f32 to vector<64x64xf32>
    %223 = arith.mulf %221, %222 : vector<64x64xf32>
    %224 = vector.shape_cast %223 : vector<64x64xf32> to vector<1x64x64xf32>
    %225 = vector.shape_cast %224 : vector<1x64x64xf32> to vector<1x1x64x64xf32>
    %226 = vector.shape_cast %205 : vector<3x64x64xf32> to vector<1x3x64x64xf32>
    %227 = vector.broadcast %225 : vector<1x1x64x64xf32> to vector<1x3x64x64xf32>
    %228 = arith.mulf %227, %226 : vector<1x3x64x64xf32>
    %229 = vector.shape_cast %228 : vector<1x3x64x64xf32> to vector<192x64xf32>
    %230 = arith.truncf %229 : vector<192x64xf32> to vector<192x64xbf16>
    %cst_110 = arith.constant dense<0.000000e+00> : vector<192x64xf32>
    %231 = tpu.matmul %230, %1, %cst_110 {dimension_numbers = #tpu.dot_dimension_numbers<[1], [0], [0], [1], [0, 0, 1, 1], [], []>} : vector<192x64xbf16>, vector<64x64xbf16>, vector<192x64xf32> -> vector<192x64xf32>
    %232 = vector.shape_cast %231 : vector<192x64xf32> to vector<1x192x64xf32>
    %233 = vector.extract_strided_slice %232 {offsets = [0, 0, 0], sizes = [1, 64, 64], strides = [1, 1, 1]} : vector<1x192x64xf32> to vector<1x64x64xf32>
    %234 = vector.extract_strided_slice %232 {offsets = [0, 64, 0], sizes = [1, 64, 64], strides = [1, 1, 1]} : vector<1x192x64xf32> to vector<1x64x64xf32>
    %235 = arith.maximumf %233, %234 : vector<1x64x64xf32>
    %236 = vector.extract_strided_slice %232 {offsets = [0, 128, 0], sizes = [1, 64, 64], strides = [1, 1, 1]} : vector<1x192x64xf32> to vector<1x64x64xf32>
    %237 = arith.maximumf %235, %236 : vector<1x64x64xf32>
    %238 = vector.extract_strided_slice %232 {offsets = [0, 0, 0], sizes = [1, 64, 64], strides = [1, 1, 1]} : vector<1x192x64xf32> to vector<1x64x64xf32>
    %239 = arith.subf %238, %237 : vector<1x64x64xf32>
    %240 = math.exp %239 : vector<1x64x64xf32>
    %241 = vector.extract_strided_slice %213 {offsets = [0, 0, 0], sizes = [1, 64, 64], strides = [1, 1, 1]} : vector<3x64x64xf32> to vector<1x64x64xf32>
    %242 = vector.shape_cast %241 : vector<1x64x64xf32> to vector<64x64xf32>
    %243 = vector.shape_cast %242 : vector<64x64xf32> to vector<1x64x64xf32>
    %244 = arith.mulf %240, %243 : vector<1x64x64xf32>
    %245 = vector.extract_strided_slice %232 {offsets = [0, 64, 0], sizes = [1, 64, 64], strides = [1, 1, 1]} : vector<1x192x64xf32> to vector<1x64x64xf32>
    %246 = arith.subf %245, %237 : vector<1x64x64xf32>
    %247 = math.exp %246 : vector<1x64x64xf32>
    %248 = arith.addf %240, %247 : vector<1x64x64xf32>
    %249 = vector.extract_strided_slice %213 {offsets = [1, 0, 0], sizes = [1, 64, 64], strides = [1, 1, 1]} : vector<3x64x64xf32> to vector<1x64x64xf32>
    %250 = vector.shape_cast %249 : vector<1x64x64xf32> to vector<64x64xf32>
    %251 = vector.shape_cast %250 : vector<64x64xf32> to vector<1x64x64xf32>
    %252 = arith.mulf %247, %251 : vector<1x64x64xf32>
    %253 = arith.addf %244, %252 : vector<1x64x64xf32>
    %254 = vector.extract_strided_slice %232 {offsets = [0, 128, 0], sizes = [1, 64, 64], strides = [1, 1, 1]} : vector<1x192x64xf32> to vector<1x64x64xf32>
    %255 = arith.subf %254, %237 : vector<1x64x64xf32>
    %256 = math.exp %255 : vector<1x64x64xf32>
    %257 = arith.addf %248, %256 : vector<1x64x64xf32>
    %258 = vector.extract_strided_slice %213 {offsets = [2, 0, 0], sizes = [1, 64, 64], strides = [1, 1, 1]} : vector<3x64x64xf32> to vector<1x64x64xf32>
    %259 = vector.shape_cast %258 : vector<1x64x64xf32> to vector<64x64xf32>
    %260 = vector.shape_cast %259 : vector<64x64xf32> to vector<1x64x64xf32>
    %261 = arith.mulf %256, %260 : vector<1x64x64xf32>
    %262 = arith.addf %253, %261 : vector<1x64x64xf32>
    %263 = tpu.reciprocal %257 {approx = true} : vector<1x64x64xf32> -> vector<1x64x64xf32>
    %264 = arith.mulf %262, %263 : vector<1x64x64xf32>
    %265 = vector.shape_cast %264 : vector<1x64x64xf32> to vector<64x64xf32>
    %266 = vector.extract_strided_slice %170 {offsets = [128, 0], sizes = [64, 64], strides = [1, 1]} : vector<192x64xf32> to vector<64x64xf32>
    %267 = arith.truncf %265 : vector<64x64xf32> to vector<64x64xbf16>
    %c1_111 = arith.constant 1 : index
    %c0_112 = arith.constant 0 : index
    %c0_113 = arith.constant 0 : index
    %268 = vector.load %arg12[%c1_111, %c0_112, %c0_113] : memref<2x64x64xbf16, #tpu.memory_space<vmem>>, vector<1x64x64xbf16>
    %269 = vector.shape_cast %268 : vector<1x64x64xbf16> to vector<64x64xbf16>
    %cst_114 = arith.constant dense<0.000000e+00> : vector<64x64xf32>
    %270 = tpu.matmul %267, %269, %cst_114 {dimension_numbers = #tpu.dot_dimension_numbers<[1], [0], [0], [1], [0, 0, 1, 1], [], []>} : vector<64x64xbf16>, vector<64x64xbf16>, vector<64x64xf32> -> vector<64x64xf32>
    %271 = arith.addf %266, %270 : vector<64x64xf32>
    %c1_115 = arith.constant 1 : index
    %c0_116 = arith.constant 0 : index
    %c0_117 = arith.constant 0 : index
    %272 = vector.load %arg13[%c1_115, %c0_116, %c0_117] : memref<2x1x64xf32, #tpu.memory_space<vmem>>, vector<1x1x64xf32>
    %273 = vector.shape_cast %272 : vector<1x1x64xf32> to vector<1x64xf32>
    %274 = vector.broadcast %273 : vector<1x64xf32> to vector<64x64xf32>
    %275 = arith.addf %271, %274 : vector<64x64xf32>
    %c1_118 = arith.constant 1 : index
    %c0_119 = arith.constant 0 : index
    %c0_120 = arith.constant 0 : index
    %276 = vector.load %arg14[%c1_118, %c0_119, %c0_120] : memref<2x1x64xf32, #tpu.memory_space<vmem>>, vector<1x1x64xf32>
    %277 = vector.shape_cast %276 : vector<1x1x64xf32> to vector<1x64xf32>
    %c1_121 = arith.constant 1 : index
    %c0_122 = arith.constant 0 : index
    %c0_123 = arith.constant 0 : index
    %278 = vector.load %arg15[%c1_121, %c0_122, %c0_123] : memref<2x1x64xf32, #tpu.memory_space<vmem>>, vector<1x1x64xf32>
    %279 = vector.shape_cast %278 : vector<1x1x64xf32> to vector<1x64xf32>
    %cst_124 = arith.constant dense<0.000000e+00> : vector<64xf32>
    %280 = vector.multi_reduction <add>, %275, %cst_124 [1] : vector<64x64xf32> to vector<64xf32>
    %281 = vector.shape_cast %280 : vector<64xf32> to vector<64x1xf32>
    %cst_125 = arith.constant 6.400000e+01 : f32
    %282 = vector.broadcast %cst_125 : f32 to vector<64x1xf32>
    %283 = arith.divf %281, %282 : vector<64x1xf32>
    %284 = arith.mulf %275, %275 : vector<64x64xf32>
    %cst_126 = arith.constant dense<0.000000e+00> : vector<64xf32>
    %285 = vector.multi_reduction <add>, %284, %cst_126 [1] : vector<64x64xf32> to vector<64xf32>
    %286 = vector.shape_cast %285 : vector<64xf32> to vector<64x1xf32>
    %cst_127 = arith.constant 6.400000e+01 : f32
    %287 = vector.broadcast %cst_127 : f32 to vector<64x1xf32>
    %288 = arith.divf %286, %287 : vector<64x1xf32>
    %289 = arith.mulf %283, %283 : vector<64x1xf32>
    %290 = arith.subf %288, %289 : vector<64x1xf32>
    %291 = vector.broadcast %283 : vector<64x1xf32> to vector<64x64xf32>
    %292 = arith.subf %275, %291 : vector<64x64xf32>
    %cst_128 = arith.constant 9.99999974E-6 : f32
    %293 = vector.broadcast %cst_128 : f32 to vector<64x1xf32>
    %294 = arith.addf %290, %293 : vector<64x1xf32>
    %295 = math.rsqrt %294 : vector<64x1xf32>
    %296 = vector.broadcast %295 : vector<64x1xf32> to vector<64x64xf32>
    %297 = arith.mulf %292, %296 : vector<64x64xf32>
    %298 = vector.broadcast %277 : vector<1x64xf32> to vector<64x64xf32>
    %299 = arith.mulf %297, %298 : vector<64x64xf32>
    %300 = vector.broadcast %279 : vector<1x64xf32> to vector<64x64xf32>
    %301 = arith.addf %299, %300 : vector<64x64xf32>
    %302 = arith.truncf %301 : vector<64x64xf32> to vector<64x64xbf16>
    %c1_129 = arith.constant 1 : index
    %c0_130 = arith.constant 0 : index
    %c0_131 = arith.constant 0 : index
    %303 = vector.load %arg16[%c1_129, %c0_130, %c0_131] : memref<2x64x128xbf16, #tpu.memory_space<vmem>>, vector<1x64x128xbf16>
    %304 = vector.shape_cast %303 : vector<1x64x128xbf16> to vector<64x128xbf16>
    %cst_132 = arith.constant dense<0.000000e+00> : vector<64x128xf32>
    %305 = tpu.matmul %302, %304, %cst_132 {dimension_numbers = #tpu.dot_dimension_numbers<[1], [0], [0], [1], [0, 0, 1, 1], [], []>} : vector<64x64xbf16>, vector<64x128xbf16>, vector<64x128xf32> -> vector<64x128xf32>
    %c1_133 = arith.constant 1 : index
    %c0_134 = arith.constant 0 : index
    %c0_135 = arith.constant 0 : index
    %306 = vector.load %arg17[%c1_133, %c0_134, %c0_135] : memref<2x1x128xf32, #tpu.memory_space<vmem>>, vector<1x1x128xf32>
    %307 = vector.shape_cast %306 : vector<1x1x128xf32> to vector<1x128xf32>
    %308 = vector.broadcast %307 : vector<1x128xf32> to vector<64x128xf32>
    %309 = arith.addf %305, %308 : vector<64x128xf32>
    %cst_136 = arith.constant 5.000000e-01 : f32
    %310 = vector.broadcast %cst_136 : f32 to vector<64x128xf32>
    %311 = arith.mulf %310, %309 : vector<64x128xf32>
    %cst_137 = arith.constant 4.471500e-02 : f32
    %312 = vector.broadcast %cst_137 : f32 to vector<64x128xf32>
    %313 = arith.mulf %312, %309 : vector<64x128xf32>
    %314 = arith.mulf %313, %309 : vector<64x128xf32>
    %315 = arith.mulf %314, %309 : vector<64x128xf32>
    %316 = arith.addf %309, %315 : vector<64x128xf32>
    %cst_138 = arith.constant 0.797884583 : f32
    %317 = vector.broadcast %cst_138 : f32 to vector<64x128xf32>
    %318 = arith.mulf %317, %316 : vector<64x128xf32>
    %319 = math.tanh %318 : vector<64x128xf32>
    %cst_139 = arith.constant 1.000000e+00 : f32
    %320 = vector.broadcast %cst_139 : f32 to vector<64x128xf32>
    %321 = arith.addf %320, %319 : vector<64x128xf32>
    %322 = arith.mulf %311, %321 : vector<64x128xf32>
    %323 = arith.truncf %322 : vector<64x128xf32> to vector<64x128xbf16>
    %c1_140 = arith.constant 1 : index
    %c0_141 = arith.constant 0 : index
    %c0_142 = arith.constant 0 : index
    %324 = vector.load %arg18[%c1_140, %c0_141, %c0_142] : memref<2x128x64xbf16, #tpu.memory_space<vmem>>, vector<1x128x64xbf16>
    %325 = vector.shape_cast %324 : vector<1x128x64xbf16> to vector<128x64xbf16>
    %cst_143 = arith.constant dense<0.000000e+00> : vector<64x64xf32>
    %326 = tpu.matmul %323, %325, %cst_143 {dimension_numbers = #tpu.dot_dimension_numbers<[1], [0], [0], [1], [0, 0, 1, 1], [], []>} : vector<64x128xbf16>, vector<128x64xbf16>, vector<64x64xf32> -> vector<64x64xf32>
    %327 = arith.addf %275, %326 : vector<64x64xf32>
    %c1_144 = arith.constant 1 : index
    %c0_145 = arith.constant 0 : index
    %c0_146 = arith.constant 0 : index
    %328 = vector.load %arg19[%c1_144, %c0_145, %c0_146] : memref<2x1x64xf32, #tpu.memory_space<vmem>>, vector<1x1x64xf32>
    %329 = vector.shape_cast %328 : vector<1x1x64xf32> to vector<1x64xf32>
    %330 = vector.broadcast %329 : vector<1x64xf32> to vector<64x64xf32>
    %331 = arith.addf %327, %330 : vector<64x64xf32>
    %332 = arith.truncf %331 : vector<64x64xf32> to vector<64x64xbf16>
    %c0_147 = arith.constant 0 : index
    %c0_148 = arith.constant 0 : index
    %333 = vector.load %arg20[%c0_147, %c0_148] : memref<64x64xbf16, #tpu.memory_space<vmem>>, vector<64x64xbf16>
    %cst_149 = arith.constant dense<0.000000e+00> : vector<64x64xf32>
    %334 = tpu.matmul %332, %333, %cst_149 {dimension_numbers = #tpu.dot_dimension_numbers<[1], [0], [0], [1], [0, 0, 1, 1], [], []>} : vector<64x64xbf16>, vector<64x64xbf16>, vector<64x64xf32> -> vector<64x64xf32>
    %c0_150 = arith.constant 0 : index
    %c0_151 = arith.constant 0 : index
    %335 = vector.load %arg21[%c0_150, %c0_151] : memref<1x64xf32, #tpu.memory_space<vmem>>, vector<1x64xf32>
    %336 = vector.broadcast %335 : vector<1x64xf32> to vector<64x64xf32>
    %337 = arith.addf %334, %336 : vector<64x64xf32>
    %c0_152 = arith.constant 0 : index
    %c0_153 = arith.constant 0 : index
    %338 = vector.load %arg23[%c0_152, %c0_153] : memref<64x64xf32, #tpu.memory_space<vmem>>, vector<64x64xf32>
    tpu.vector_store %arg23[%c0_152, %c0_153], %337 {strides = array<i32>} : memref<64x64xf32, #tpu.memory_space<vmem>>, vector<64x64xf32>,
    return
  }
  func.func @transform_0(%arg0: i32) -> (i32, i32, i32) {
    %c0_i32 = arith.constant 0 : i32
    %c0_i32_0 = arith.constant 0 : i32
    %c0_i32_1 = arith.constant 0 : i32
    return %c0_i32, %arg0, %c0_i32_0 : i32, i32, i32
  }
  func.func @transform_1(%arg0: i32) -> (i32, i32) {
    %c0_i32 = arith.constant 0 : i32
    %c0_i32_0 = arith.constant 0 : i32
    %c0_i32_1 = arith.constant 0 : i32
    return %c0_i32, %c0_i32_0 : i32, i32
  }
  func.func @transform_2(%arg0: i32) -> (i32, i32) {
    %c0_i32 = arith.constant 0 : i32
    %c0_i32_0 = arith.constant 0 : i32
    %c0_i32_1 = arith.constant 0 : i32
    return %c0_i32, %c0_i32_0 : i32, i32
  }
  func.func @transform_3(%arg0: i32) -> (i32, i32, i32) {
    %c0_i32 = arith.constant 0 : i32
    %c0_i32_0 = arith.constant 0 : i32
    %c0_i32_1 = arith.constant 0 : i32
    %c0_i32_2 = arith.constant 0 : i32
    return %c0_i32, %c0_i32_0, %c0_i32_1 : i32, i32, i32
  }
  func.func @transform_4(%arg0: i32) -> (i32, i32, i32) {
    %c0_i32 = arith.constant 0 : i32
    %c0_i32_0 = arith.constant 0 : i32
    %c0_i32_1 = arith.constant 0 : i32
    %c0_i32_2 = arith.constant 0 : i32
    return %c0_i32, %c0_i32_0, %c0_i32_1 : i32, i32, i32
  }
  func.func @transform_5(%arg0: i32) -> (i32, i32, i32) {
    %c0_i32 = arith.constant 0 : i32
    %c0_i32_0 = arith.constant 0 : i32
    %c0_i32_1 = arith.constant 0 : i32
    %c0_i32_2 = arith.constant 0 : i32
    return %c0_i32, %c0_i32_0, %c0_i32_1 : i32, i32, i32
  }
  func.func @transform_6(%arg0: i32) -> (i32, i32, i32) {
    %c0_i32 = arith.constant 0 : i32
    %c0_i32_0 = arith.constant 0 : i32
    %c0_i32_1 = arith.constant 0 : i32
    %c0_i32_2 = arith.constant 0 : i32
    return %c0_i32, %c0_i32_0, %c0_i32_1 : i32, i32, i32
  }
  func.func @transform_7(%arg0: i32) -> (i32, i32, i32) {
    %c0_i32 = arith.constant 0 : i32
    %c0_i32_0 = arith.constant 0 : i32
    %c0_i32_1 = arith.constant 0 : i32
    %c0_i32_2 = arith.constant 0 : i32
    return %c0_i32, %c0_i32_0, %c0_i32_1 : i32, i32, i32
  }
  func.func @transform_8(%arg0: i32) -> (i32, i32, i32) {
    %c0_i32 = arith.constant 0 : i32
    %c0_i32_0 = arith.constant 0 : i32
    %c0_i32_1 = arith.constant 0 : i32
    %c0_i32_2 = arith.constant 0 : i32
    return %c0_i32, %c0_i32_0, %c0_i32_1 : i32, i32, i32
  }
  func.func @transform_9(%arg0: i32) -> (i32, i32, i32) {
    %c0_i32 = arith.constant 0 : i32
    %c0_i32_0 = arith.constant 0 : i32
    %c0_i32_1 = arith.constant 0 : i32
    %c0_i32_2 = arith.constant 0 : i32
    return %c0_i32, %c0_i32_0, %c0_i32_1 : i32, i32, i32
  }
  func.func @transform_10(%arg0: i32) -> (i32, i32, i32) {
    %c0_i32 = arith.constant 0 : i32
    %c0_i32_0 = arith.constant 0 : i32
    %c0_i32_1 = arith.constant 0 : i32
    %c0_i32_2 = arith.constant 0 : i32
    return %c0_i32, %c0_i32_0, %c0_i32_1 : i32, i32, i32
  }
  func.func @transform_11(%arg0: i32) -> (i32, i32, i32) {
    %c0_i32 = arith.constant 0 : i32
    %c0_i32_0 = arith.constant 0 : i32
    %c0_i32_1 = arith.constant 0 : i32
    %c0_i32_2 = arith.constant 0 : i32
    return %c0_i32, %c0_i32_0, %c0_i32_1 : i32, i32, i32
  }
  func.func @transform_12(%arg0: i32) -> (i32, i32, i32) {
    %c0_i32 = arith.constant 0 : i32
    %c0_i32_0 = arith.constant 0 : i32
    %c0_i32_1 = arith.constant 0 : i32
    %c0_i32_2 = arith.constant 0 : i32
    return %c0_i32, %c0_i32_0, %c0_i32_1 : i32, i32, i32
  }
  func.func @transform_13(%arg0: i32) -> (i32, i32, i32) {
    %c0_i32 = arith.constant 0 : i32
    %c0_i32_0 = arith.constant 0 : i32
    %c0_i32_1 = arith.constant 0 : i32
    %c0_i32_2 = arith.constant 0 : i32
    return %c0_i32, %c0_i32_0, %c0_i32_1 : i32, i32, i32
  }
  func.func @transform_14(%arg0: i32) -> (i32, i32, i32) {
    %c0_i32 = arith.constant 0 : i32
    %c0_i32_0 = arith.constant 0 : i32
    %c0_i32_1 = arith.constant 0 : i32
    %c0_i32_2 = arith.constant 0 : i32
    return %c0_i32, %c0_i32_0, %c0_i32_1 : i32, i32, i32
  }
  func.func @transform_15(%arg0: i32) -> (i32, i32, i32) {
    %c0_i32 = arith.constant 0 : i32
    %c0_i32_0 = arith.constant 0 : i32
    %c0_i32_1 = arith.constant 0 : i32
    %c0_i32_2 = arith.constant 0 : i32
    return %c0_i32, %c0_i32_0, %c0_i32_1 : i32, i32, i32
  }
  func.func @transform_16(%arg0: i32) -> (i32, i32, i32) {
    %c0_i32 = arith.constant 0 : i32
    %c0_i32_0 = arith.constant 0 : i32
    %c0_i32_1 = arith.constant 0 : i32
    %c0_i32_2 = arith.constant 0 : i32
    return %c0_i32, %c0_i32_0, %c0_i32_1 : i32, i32, i32
  }
  func.func @transform_17(%arg0: i32) -> (i32, i32, i32) {
    %c0_i32 = arith.constant 0 : i32
    %c0_i32_0 = arith.constant 0 : i32
    %c0_i32_1 = arith.constant 0 : i32
    %c0_i32_2 = arith.constant 0 : i32
    return %c0_i32, %c0_i32_0, %c0_i32_1 : i32, i32, i32
  }
  func.func @transform_18(%arg0: i32) -> (i32, i32, i32) {
    %c0_i32 = arith.constant 0 : i32
    %c0_i32_0 = arith.constant 0 : i32
    %c0_i32_1 = arith.constant 0 : i32
    %c0_i32_2 = arith.constant 0 : i32
    return %c0_i32, %c0_i32_0, %c0_i32_1 : i32, i32, i32
  }
  func.func @transform_19(%arg0: i32) -> (i32, i32) {
    %c0_i32 = arith.constant 0 : i32
    %c0_i32_0 = arith.constant 0 : i32
    %c0_i32_1 = arith.constant 0 : i32
    return %c0_i32, %c0_i32_0 : i32, i32
  }
  func.func @transform_20(%arg0: i32) -> (i32, i32) {
    %c0_i32 = arith.constant 0 : i32
    %c0_i32_0 = arith.constant 0 : i32
    %c0_i32_1 = arith.constant 0 : i32
    return %c0_i32, %c0_i32_0 : i32, i32
  }
  func.func @transform_21(%arg0: i32) -> (i32, i32) {
    %c0_i32 = arith.constant 0 : i32
    %c0_i32_0 = arith.constant 0 : i32
    %c0_i32_1 = arith.constant 0 : i32
    return %c0_i32, %c0_i32_0 : i32, i32
  }
  func.func @transform_22(%arg0: i32) -> (i32, i32) {
    %c0_i32 = arith.constant 0 : i32
    %c0_i32_0 = arith.constant 0 : i32
    return %arg0, %c0_i32 : i32, i32
  }
}

</mosaic_0001>

<bundles_post_ra>
// kernel: tpu_custom_call.1
= control target key start
LH: loop header
LB: loop body
LE: loop exit
PB: predicated region body
PF: predicated region fallthrough
CT: control target
= control target key end

     0   :  { %s11094_s0 = inlined_call_operand.vmem [shape: bf16[3,64,64], index: 0, kind: input, shape index: {}]   ;;  %s11095_s1 = inlined_call_operand.vmem [shape: bf16[64,64], index: 1, kind: input, shape index: {}]   ;;  %s11096_s2 = inlined_call_operand.hbm [shape: f32[1,64], index: 2, kind: input, shape index: {}]   ;;  %s11097_s3 = inlined_call_operand.hbm [shape: f32[2,1,64], index: 3, kind: input, shape index: {}]   ;;  %s11098_s4 = inlined_call_operand.hbm [shape: f32[2,1,64], index: 4, kind: input, shape index: {}]   ;;  %s11099_s5 = inlined_call_operand.vmem [shape: bf16[2,64,64], index: 5, kind: input, shape index: {}]   ;;  %s11100_s6 = inlined_call_operand.hbm [shape: f32[2,1,64], index: 6, kind: input, shape index: {}]   ;;  %s11101_s7 = inlined_call_operand.hbm [shape: bf16[2,64,64], index: 7, kind: input, shape index: {}]   ;;  %s11102_s8 = inlined_call_operand.hbm [shape: f32[2,1,64], index: 8, kind: input, shape index: {}]   ;;  %s11103_s9 = inlined_call_operand.hbm [shape: bf16[2,64,64], index: 9, kind: input, shape index: {}]   ;;  %s11104_s10 = inlined_call_operand.hbm [shape: f32[2,1,64], index: 10, kind: input, shape index: {}]   ;;  %s11105_s11 = inlined_call_operand.hbm [shape: bf16[2,64,64], index: 11, kind: input, shape index: {}]   ;;  %s11106_s12 = inlined_call_operand.hbm [shape: f32[2,1,64], index: 12, kind: input, shape index: {}]   ;;  %s11107_s13 = inlined_call_operand.hbm [shape: f32[2,1,64], index: 13, kind: input, shape index: {}]   ;;  %s11108_s14 = inlined_call_operand.hbm [shape: f32[2,1,64], index: 14, kind: input, shape index: {}]   ;;  %s11109_s15 = inlined_call_operand.hbm [shape: bf16[2,64,128], index: 15, kind: input, shape index: {}]   ;;  %s11110_s16 = inlined_call_operand.hbm [shape: f32[2,1,128], index: 16, kind: input, shape index: {}]   ;;  %s11111_s17 = inlined_call_operand.vmem [shape: bf16[2,128,64], index: 17, kind: input, shape index: {}]   ;;  %s11112_s18 = inlined_call_operand.vmem [shape: f32[2,1,64], index: 18, kind: input, shape index: {}]   ;;  %s11113_s19 = inlined_call_operand.hbm [shape: bf16[64,64], index: 19, kind: input, shape index: {}]   ;;  %s11114_s20 = inlined_call_operand.vmem [shape: f32[1,64], index: 20, kind: input, shape index: {}]   ;;  %s11115_s21 = inlined_call_operand.hbm [shape: bf16[64,64], index: 21, kind: input, shape index: {}]   ;;  %s11116_s22 = inlined_call_operand.hbm [shape: f32[64,64], index: 22, kind: output, shape index: {}]  }
   0x1   :  { %11168 = sst [smem:[#allocation95_spill]] %s11094_s0 }
   0x2   :  { %11169 = sst [smem:[#allocation96_spill]] %s11095_s1 }
   0x3   :  { %11170 = sst [smem:[#allocation97_spill]] %s11096_s2 }
   0x4   :  { %11171 = sst [smem:[#allocation98_spill]] %s11097_s3 }
   0x5   :  { %11172 = sst [smem:[#allocation99_spill]] %s11098_s4 }
   0x6   :  { %11173 = sst [smem:[#allocation100_spill]] %s11099_s5 }
   0x7   :  { %11174 = sst [smem:[#allocation101_spill]] %s11100_s6 }
   0x8   :  { %11175 = sst [smem:[#allocation102_spill]] %s11112_s18 }
   0x9   :  { %11176 = sst [smem:[#allocation103_spill]] %s11114_s20 }
   0xa   :  { %11177 = sst [smem:[#allocation104_spill]] %s11116_s22 }
   0xb   :  { %27 = vsyncpa [#allocation3], 0 }
   0xc   :  { %28 = vsyncpa [#allocation6], 0 }
   0xd   :  { %29 = vsyncpa [#allocation9], 0 }
   0xe   :  { %30 = vsyncpa [#allocation12], 0 }
   0xf   :  { %31 = vsyncpa [#allocation15], 0 }
  0x10   :  { %32 = vsyncpa [#allocation18], 0 }
  0x11   :  { %33 = vsyncpa [#allocation21], 0 }
  0x12   :  { %34 = vsyncpa [#allocation24], 0 }
  0x13   :  { %35 = vsyncpa [#allocation27], 0 }
  0x14   :  { %36 = vsyncpa [#allocation4], 0  ;;  %s8097_s3 = smov [#allocation5]   ;;  %s11178_s4 = sld [smem:[#allocation98_spill]] }
  0x15   :  { %s56_s28 = sshll.u32 %s8097_s3, 4  ;;  %s57_s28 = int_to_ptr.vmem [resolvable:$true] %s56_s28 }
  0x1a   :  { %s7703_s0 = scalar_lea.hbm %s11178_s4, 32 }
  0x1b   :  { %p7704_p0 = scmp.ne.s32.totalorder %s11178_s4, %s7703_s0  ;;  %p7707_p1 = scmp.lt.u32.totalorder %s7703_s0, %s11178_s4 }
  0x1d   :  { %p7709_p2 = pnand %p7707_p1, %p7704_p0 }
  0x1f   :  { %7712 = shalt.err (!%p7709_p2)
}
  0x20   :  { %s7713_s6 = scalar_lea.vmem %s57_s28, 32  ;;  %p7718_p4 = scmp.lt.s32.totalorder %s57_s28, %s57_s28 }
  0x21   :  { %p7714_p3 = scmp.ne.s32.totalorder %s57_s28, %s7713_s6  ;;  %p7719_p5 = scmp.lt.s32.totalorder %s7713_s6, %s7713_s6 }
  0x23   :  { %p7720_p6 = por %p7719_p5, %p7718_p4 }
  0x25   :  { %p7721_p7 = pnand %p7720_p6, %p7714_p3 }
  0x27   :  { %7724 = shalt.err (!%p7721_p7)
}
  0x28   :  { %s8098_s25 = smov 16   ;;  %s8099_s26 = smov 1  }
  0x29   :  { %62 = dma.hbm_to_vmem [thread:$0]  %s11178_s4, 32, %s57_s28, [#allocation6], %s8098_s25, %s8098_s25, %s8099_s26  }
  0x2a   :  { %s8100_s3 = smov [#allocation8]   ;;  %s8101_s30 = smov [#allocation11]  }
  0x2b   :  { %s82_s29 = sshll.u32 %s8100_s3, 4  ;;  %s106_s0 = sshll.u32 %s8101_s30, 4  ;;  %s83_s29 = int_to_ptr.vmem [resolvable:$true] %s82_s29  ;;  %s107_s0 = int_to_ptr.vmem [resolvable:$true] %s106_s0 }
  0x2c   :  { %s11179_s5 = sld [smem:[#allocation101_spill]] }
  0x32   :  { %s7725_s24 = scalar_lea.hbm %s11179_s5, 32 }
  0x33   :  { %p7726_p8 = scmp.ne.s32.totalorder %s11179_s5, %s7725_s24  ;;  %p7729_p9 = scmp.lt.u32.totalorder %s7725_s24, %s11179_s5 }
  0x35   :  { %p7731_p10 = pnand %p7729_p9, %p7726_p8 }
  0x37   :  { %7734 = shalt.err (!%p7731_p10)
}
  0x38   :  { %s7735_s28 = scalar_lea.vmem %s83_s29, 32  ;;  %p7740_p12 = scmp.lt.s32.totalorder %s83_s29, %s83_s29 }
  0x39   :  { %p7736_p11 = scmp.ne.s32.totalorder %s83_s29, %s7735_s28  ;;  %p7741_p13 = scmp.lt.s32.totalorder %s7735_s28, %s7735_s28 }
  0x3b   :  { %p7742_p0 = por %p7741_p13, %p7740_p12 }
  0x3d   :  { %p7743_p1 = pnand %p7742_p0, %p7736_p11 }
  0x3f   :  { %7746 = shalt.err (!%p7743_p1)
}
  0x40   :  { %88 = dma.hbm_to_vmem [thread:$0]  %s11179_s5, 32, %s83_s29, [#allocation9], %s8098_s25, %s8098_s25, %s8099_s26  }
  0x41   :  { %s7747_s20 = scalar_lea.hbm %s11102_s8, 32 }
  0x42   :  { %p7748_p2 = scmp.ne.s32.totalorder %s11102_s8, %s7747_s20  ;;  %p7751_p3 = scmp.lt.u32.totalorder %s7747_s20, %s11102_s8 }
  0x44   :  { %p7753_p4 = pnand %p7751_p3, %p7748_p2 }
  0x46   :  { %7756 = shalt.err (!%p7753_p4)
}
  0x47   :  { %s7757_s1 = scalar_lea.vmem %s107_s0, 32  ;;  %p7762_p6 = scmp.lt.s32.totalorder %s107_s0, %s107_s0 }
  0x48   :  { %p7758_p5 = scmp.ne.s32.totalorder %s107_s0, %s7757_s1  ;;  %p7763_p7 = scmp.lt.s32.totalorder %s7757_s1, %s7757_s1 }
  0x4a   :  { %p7764_p8 = por %p7763_p7, %p7762_p6 }
  0x4c   :  { %p7765_p9 = pnand %p7764_p8, %p7758_p5 }
  0x4e   :  { %7768 = shalt.err (!%p7765_p9)
}
  0x4f   :  { %112 = dma.hbm_to_vmem [thread:$0]  %s11102_s8, 32, %s107_s0, [#allocation12], %s8098_s25, %s8098_s25, %s8099_s26  }
  0x50   :  { %s8102_s24 = smov [#allocation14]   ;;  %s8103_s28 = smov [#allocation17]  }
  0x51   :  { %s130_s6 = sshll.u32 %s8102_s24, 4  ;;  %s154_s4 = sshll.u32 %s8103_s28, 4  ;;  %s131_s6 = int_to_ptr.vmem [resolvable:$true] %s130_s6  ;;  %s155_s4 = int_to_ptr.vmem [resolvable:$true] %s154_s4 }
  0x52   :  { %s7769_s18 = scalar_lea.hbm %s11104_s10, 32 }
  0x53   :  { %p7770_p10 = scmp.ne.s32.totalorder %s11104_s10, %s7769_s18  ;;  %p7773_p11 = scmp.lt.u32.totalorder %s7769_s18, %s11104_s10 }
  0x55   :  { %p7775_p12 = pnand %p7773_p11, %p7770_p10 }
  0x57   :  { %7778 = shalt.err (!%p7775_p12)
}
  0x58   :  { %s7779_s8 = scalar_lea.vmem %s131_s6, 32  ;;  %p7784_p0 = scmp.lt.s32.totalorder %s131_s6, %s131_s6 }
  0x59   :  { %p7780_p13 = scmp.ne.s32.totalorder %s131_s6, %s7779_s8  ;;  %p7785_p1 = scmp.lt.s32.totalorder %s7779_s8, %s7779_s8 }
  0x5b   :  { %p7786_p2 = por %p7785_p1, %p7784_p0 }
  0x5d   :  { %p7787_p3 = pnand %p7786_p2, %p7780_p13 }
  0x5f   :  { %7790 = shalt.err (!%p7787_p3)
}
  0x60   :  { %136 = dma.hbm_to_vmem [thread:$0]  %s11104_s10, 32, %s131_s6, [#allocation15], %s8098_s25, %s8098_s25, %s8099_s26  }
  0x61   :  { %s7791_s5 = scalar_lea.hbm %s11106_s12, 32 }
  0x62   :  { %p7792_p4 = scmp.ne.s32.totalorder %s11106_s12, %s7791_s5  ;;  %p7795_p5 = scmp.lt.u32.totalorder %s7791_s5, %s11106_s12 }
  0x64   :  { %p7797_p6 = pnand %p7795_p5, %p7792_p4 }
  0x66   :  { %7800 = shalt.err (!%p7797_p6)
}
  0x67   :  { %s7801_s18 = scalar_lea.vmem %s155_s4, 32  ;;  %p7806_p8 = scmp.lt.s32.totalorder %s155_s4, %s155_s4 }
  0x68   :  { %p7802_p7 = scmp.ne.s32.totalorder %s155_s4, %s7801_s18  ;;  %p7807_p9 = scmp.lt.s32.totalorder %s7801_s18, %s7801_s18 }
  0x6a   :  { %p7808_p10 = por %p7807_p9, %p7806_p8 }
  0x6c   :  { %p7809_p11 = pnand %p7808_p10, %p7802_p7 }
  0x6e   :  { %7812 = shalt.err (!%p7809_p11)
}
  0x6f   :  { %160 = dma.hbm_to_vmem [thread:$0]  %s11106_s12, 32, %s155_s4, [#allocation18], %s8098_s25, %s8098_s25, %s8099_s26  }
  0x70   :  { %s8104_s20 = smov [#allocation20]   ;;  %s8105_s3 = smov [#allocation23]  }
  0x71   :  { %s178_s27 = sshll.u32 %s8104_s20, 4  ;;  %s202_s30 = sshll.u32 %s8105_s3, 4  ;;  %s179_s27 = int_to_ptr.vmem [resolvable:$true] %s178_s27  ;;  %s203_s30 = int_to_ptr.vmem [resolvable:$true] %s202_s30 }
  0x72   :  { %s7813_s23 = scalar_lea.hbm %s11108_s14, 32 }
  0x73   :  { %p7814_p12 = scmp.ne.s32.totalorder %s11108_s14, %s7813_s23  ;;  %p7817_p13 = scmp.lt.u32.totalorder %s7813_s23, %s11108_s14 }
  0x75   :  { %p7819_p0 = pnand %p7817_p13, %p7814_p12 }
  0x77   :  { %7822 = shalt.err (!%p7819_p0)
}
  0x78   :  { %s7823_s12 = scalar_lea.vmem %s179_s27, 32  ;;  %p7828_p2 = scmp.lt.s32.totalorder %s179_s27, %s179_s27 }
  0x79   :  { %p7824_p1 = scmp.ne.s32.totalorder %s179_s27, %s7823_s12  ;;  %p7829_p3 = scmp.lt.s32.totalorder %s7823_s12, %s7823_s12 }
  0x7b   :  { %p7830_p4 = por %p7829_p3, %p7828_p2 }
  0x7d   :  { %p7831_p5 = pnand %p7830_p4, %p7824_p1 }
  0x7f   :  { %7834 = shalt.err (!%p7831_p5)
}
  0x80   :  { %184 = dma.hbm_to_vmem [thread:$0]  %s11108_s14, 32, %s179_s27, [#allocation21], %s8098_s25, %s8098_s25, %s8099_s26  }
  0x81   :  { %s7835_s18 = scalar_lea.hbm %s11110_s16, 32 }
  0x82   :  { %p7836_p6 = scmp.ne.s32.totalorder %s11110_s16, %s7835_s18  ;;  %p7839_p7 = scmp.lt.u32.totalorder %s7835_s18, %s11110_s16 }
  0x84   :  { %p7841_p8 = pnand %p7839_p7, %p7836_p6 }
  0x86   :  { %7844 = shalt.err (!%p7841_p8)
}
  0x87   :  { %s7845_s8 = scalar_lea.vmem %s203_s30, 32  ;;  %p7850_p10 = scmp.lt.s32.totalorder %s203_s30, %s203_s30 }
  0x88   :  { %p7846_p9 = scmp.ne.s32.totalorder %s203_s30, %s7845_s8  ;;  %p7851_p11 = scmp.lt.s32.totalorder %s7845_s8, %s7845_s8 }
  0x8a   :  { %p7852_p12 = por %p7851_p11, %p7850_p10 }
  0x8c   :  { %p7853_p13 = pnand %p7852_p12, %p7846_p9 }
  0x8e   :  { %7856 = shalt.err (!%p7853_p13)
}
  0x8f   :  { %208 = dma.hbm_to_vmem [thread:$0]  %s11110_s16, 32, %s203_s30, [#allocation24], %s8098_s25, %s8098_s25, %s8099_s26  }
  0x90   :  { %s8106_s0 = smov [#allocation2]   ;;  %s8107_s1 = smov [#allocation7]  }
  0x91   :  { %s47_s23 = sshll.u32 %s8106_s0, 4  ;;  %s68_s29 = sshll.u32 %s8107_s1, 4  ;;  %s48_s23 = int_to_ptr.vmem [resolvable:$true] %s47_s23  ;;  %s69_s29 = int_to_ptr.vmem [resolvable:$true] %s68_s29 }
  0x92   :  { %s11180_s12 = sld [smem:[#allocation97_spill]] }
  0x98   :  { %s7857_s4 = scalar_lea.hbm %s11180_s12, 16 }
  0x99   :  { %p7858_p0 = scmp.ne.s32.totalorder %s11180_s12, %s7857_s4  ;;  %p7861_p1 = scmp.lt.u32.totalorder %s7857_s4, %s11180_s12 }
  0x9b   :  { %p7863_p2 = pnand %p7861_p1, %p7858_p0 }
  0x9d   :  { %7866 = shalt.err (!%p7863_p2)
}
  0x9e   :  { %s7867_s16 = scalar_lea.vmem %s48_s23, 16  ;;  %s7871_s30 = scalar_lea.vmem %s48_s23, 32 }
  0x9f   :  { %p7868_p3 = scmp.ne.s32.totalorder %s48_s23, %s7867_s16  ;;  %p7872_p4 = scmp.lt.s32.totalorder %s48_s23, %s48_s23 }
  0xa0   :  { %p7873_p5 = scmp.lt.s32.totalorder %s7871_s30, %s7867_s16 }
  0xa2   :  { %p7874_p6 = por %p7873_p5, %p7872_p4 }
  0xa4   :  { %p7875_p7 = pnand %p7874_p6, %p7868_p3 }
  0xa6   :  { %7878 = shalt.err (!%p7875_p7)
}
  0xa7   :  { %50 = dma.hbm_to_vmem [thread:$0]  %s11180_s12, 16, %s48_s23, [#allocation3]  }
  0xa8   :  { %s11181_s8 = sld [smem:[#allocation99_spill]] }
  0xae   :  { %s7879_s14 = scalar_lea.hbm %s11181_s8, 32 }
  0xaf   :  { %p7880_p8 = scmp.ne.s32.totalorder %s11181_s8, %s7879_s14  ;;  %p7883_p9 = scmp.lt.u32.totalorder %s7879_s14, %s11181_s8 }
  0xb1   :  { %p7885_p10 = pnand %p7883_p9, %p7880_p8 }
  0xb3   :  { %7888 = shalt.err (!%p7885_p10)
}
  0xb4   :  { %s7889_s24 = scalar_lea.vmem %s69_s29, 32  ;;  %p7894_p12 = scmp.lt.s32.totalorder %s69_s29, %s69_s29 }
  0xb5   :  { %p7890_p11 = scmp.ne.s32.totalorder %s69_s29, %s7889_s24  ;;  %p7895_p13 = scmp.lt.s32.totalorder %s7889_s24, %s7889_s24 }
  0xb7   :  { %p7896_p0 = por %p7895_p13, %p7894_p12 }
  0xb9   :  { %p7897_p1 = pnand %p7896_p0, %p7890_p11 }
  0xbb   :  { %7900 = shalt.err (!%p7897_p1)
}
  0xbc   :  { %74 = dma.hbm_to_vmem [thread:$0]  %s11181_s8, 32, %s69_s29, [#allocation6], %s8098_s25, %s8098_s25, %s8099_s26  }
  0xbd   :  { %s8108_s4 = smov [#allocation10]   ;;  %s7901_s18 = scalar_lea.hbm %s11101_s7, 1024 }
  0xbe   :  { %s94_s28 = sshll.u32 %s8108_s4, 4  ;;  %p7902_p2 = scmp.ne.s32.totalorder %s11101_s7, %s7901_s18  ;;  %s95_s28 = int_to_ptr.vmem [resolvable:$true] %s94_s28 }
  0xbf   :  { %p7905_p3 = scmp.lt.u32.totalorder %s7901_s18, %s11101_s7 }
  0xc1   :  { %p7907_p4 = pnand %p7905_p3, %p7902_p2 }
  0xc3   :  { %7910 = shalt.err (!%p7907_p4)
}
  0xc4   :  { %s7911_s20 = scalar_lea.vmem %s95_s28, 1024  ;;  %p7916_p6 = scmp.lt.s32.totalorder %s95_s28, %s95_s28 }
  0xc5   :  { %p7912_p5 = scmp.ne.s32.totalorder %s95_s28, %s7911_s20  ;;  %p7917_p7 = scmp.lt.s32.totalorder %s7911_s20, %s7911_s20 }
  0xc7   :  { %p7918_p8 = por %p7917_p7, %p7916_p6 }
  0xc9   :  { %p7919_p9 = pnand %p7918_p8, %p7912_p5 }
  0xcb   :  { %7922 = shalt.err (!%p7919_p9)
}
  0xcc   :  { %s8109_s29 = smov 64   ;;  %s8110_s3 = smov 4  }
  0xcd   :  { %100 = dma.hbm_to_vmem [thread:$0]  %s11101_s7, 1024, %s95_s28, [#allocation9], %s8109_s29, %s8109_s29, %s8110_s3  }
  0xce   :  { %s8111_s27 = smov [#allocation13]   ;;  %s8112_s1 = smov [#allocation16]  }
  0xcf   :  { %s118_s0 = sshll.u32 %s8111_s27, 4  ;;  %s142_s5 = sshll.u32 %s8112_s1, 4  ;;  %s119_s0 = int_to_ptr.vmem [resolvable:$true] %s118_s0  ;;  %s8382_s5 = int_to_ptr.vmem [resolvable:$true] %s142_s5 }
  0xd0   :  { %s7923_s12 = scalar_lea.hbm %s11103_s9, 1024 }
  0xd1   :  { %p7924_p10 = scmp.ne.s32.totalorder %s11103_s9, %s7923_s12  ;;  %p7927_p11 = scmp.lt.u32.totalorder %s7923_s12, %s11103_s9 }
  0xd3   :  { %p7929_p12 = pnand %p7927_p11, %p7924_p10 }
  0xd5   :  { %7932 = shalt.err (!%p7929_p12)
}
  0xd6   :  { %s7933_s7 = scalar_lea.vmem %s119_s0, 1024  ;;  %p7938_p0 = scmp.lt.s32.totalorder %s119_s0, %s119_s0 }
  0xd7   :  { %p7934_p13 = scmp.ne.s32.totalorder %s119_s0, %s7933_s7  ;;  %p7939_p1 = scmp.lt.s32.totalorder %s7933_s7, %s7933_s7 }
  0xd9   :  { %p7940_p2 = por %p7939_p1, %p7938_p0 }
  0xdb   :  { %p7941_p3 = pnand %p7940_p2, %p7934_p13 }
  0xdd   :  { %7944 = shalt.err (!%p7941_p3)
}
  0xde   :  { %124 = dma.hbm_to_vmem [thread:$0]  %s11103_s9, 1024, %s119_s0, [#allocation12], %s8109_s29, %s8109_s29, %s8110_s3  }
  0xdf   :  { %s7945_s6 = scalar_lea.hbm %s11105_s11, 1024 }
  0xe0   :  { %p7946_p4 = scmp.ne.s32.totalorder %s11105_s11, %s7945_s6  ;;  %p7949_p5 = scmp.lt.u32.totalorder %s7945_s6, %s11105_s11 }
  0xe2   :  { %p7951_p6 = pnand %p7949_p5, %p7946_p4 }
  0xe4   :  { %7954 = shalt.err (!%p7951_p6)
}
  0xe5   :  { %s7955_s1 = scalar_lea.vmem %s8382_s5, 1024  ;;  %p7960_p8 = scmp.lt.s32.totalorder %s8382_s5, %s8382_s5 }
  0xe6   :  { %p7956_p7 = scmp.ne.s32.totalorder %s8382_s5, %s7955_s1  ;;  %p7961_p9 = scmp.lt.s32.totalorder %s7955_s1, %s7955_s1 }
  0xe8   :  { %p7962_p10 = por %p7961_p9, %p7960_p8 }
  0xea   :  { %p7963_p11 = pnand %p7962_p10, %p7956_p7 }
  0xec   :  { %7966 = shalt.err (!%p7963_p11)
}
  0xed   :  { %148 = dma.hbm_to_vmem [thread:$0]  %s11105_s11, 1024, %s8382_s5, [#allocation15], %s8109_s29, %s8109_s29, %s8110_s3  }
  0xee   :  { %s8113_s24 = smov [#allocation19]   ;;  %s8114_s12 = smov [#allocation22]  }
  0xef   :  { %s166_s23 = sshll.u32 %s8113_s24, 4  ;;  %s190_s4 = sshll.u32 %s8114_s12, 4  ;;  %s167_s23 = int_to_ptr.vmem [resolvable:$true] %s166_s23  ;;  %s8419_s4 = int_to_ptr.vmem [resolvable:$true] %s190_s4 }
  0xf0   :  { %s7967_s18 = scalar_lea.hbm %s11107_s13, 32 }
  0xf1   :  { %p7968_p12 = scmp.ne.s32.totalorder %s11107_s13, %s7967_s18  ;;  %p7971_p13 = scmp.lt.u32.totalorder %s7967_s18, %s11107_s13 }
  0xf3   :  { %p7973_p0 = pnand %p7971_p13, %p7968_p12 }
  0xf5   :  { %7976 = shalt.err (!%p7973_p0)
}
  0xf6   :  { %s7977_s11 = scalar_lea.vmem %s167_s23, 32  ;;  %p7982_p2 = scmp.lt.s32.totalorder %s167_s23, %s167_s23 }
  0xf7   :  { %p7978_p1 = scmp.ne.s32.totalorder %s167_s23, %s7977_s11  ;;  %p7983_p3 = scmp.lt.s32.totalorder %s7977_s11, %s7977_s11 }
  0xf9   :  { %p7984_p4 = por %p7983_p3, %p7982_p2 }
  0xfb   :  { %p7985_p5 = pnand %p7984_p4, %p7978_p1 }
  0xfd   :  { %7988 = shalt.err (!%p7985_p5)
}
  0xfe   :  { %172 = dma.hbm_to_vmem [thread:$0]  %s11107_s13, 32, %s167_s23, [#allocation18], %s8098_s25, %s8098_s25, %s8099_s26  }
  0xff   :  { %s7989_s8 = scalar_lea.hbm %s11109_s15, 1024 }
 0x100   :  { %p7990_p6 = scmp.ne.s32.totalorder %s11109_s15, %s7989_s8  ;;  %p7993_p7 = scmp.lt.u32.totalorder %s7989_s8, %s11109_s15 }
 0x102   :  { %p7995_p8 = pnand %p7993_p7, %p7990_p6 }
 0x104   :  { %7998 = shalt.err (!%p7995_p8)
}
 0x105   :  { %s7999_s0 = scalar_lea.vmem %s8419_s4, 1024  ;;  %p8004_p10 = scmp.lt.s32.totalorder %s8419_s4, %s8419_s4 }
 0x106   :  { %p8000_p9 = scmp.ne.s32.totalorder %s8419_s4, %s7999_s0  ;;  %p8005_p11 = scmp.lt.s32.totalorder %s7999_s0, %s7999_s0 }
 0x108   :  { %p8006_p12 = por %p8005_p11, %p8004_p10 }
 0x10a   :  { %p8007_p13 = pnand %p8006_p12, %p8000_p9 }
 0x10c   :  { %8010 = shalt.err (!%p8007_p13)
}
 0x10d   :  { %196 = dma.hbm_to_vmem [thread:$0]  %s11109_s15, 1024, %s8419_s4, [#allocation21], %s8109_s29, %s8109_s29, %s8110_s3  }
 0x10e   :  { %s8115_s26 = smov [#allocation25]   ;;  %s8116_s23 = smov [#allocation26]  }
 0x10f   :  { %s218_s24 = sshll.u32 %s8115_s26, 4  ;;  %s232_s12 = sshll.u32 %s8116_s23, 4  ;;  %s219_s24 = int_to_ptr.vmem [resolvable:$true] %s218_s24  ;;  %s8456_s12 = int_to_ptr.vmem [resolvable:$true] %s232_s12 }
 0x110   :  { %s8011_s18 = scalar_lea.hbm %s11113_s19, 512 }
 0x111   :  { %p8012_p0 = scmp.ne.s32.totalorder %s11113_s19, %s8011_s18  ;;  %p8015_p1 = scmp.lt.u32.totalorder %s8011_s18, %s11113_s19 }
 0x113   :  { %p8017_p2 = pnand %p8015_p1, %p8012_p0 }
 0x115   :  { %8020 = shalt.err (!%p8017_p2)
}
 0x116   :  { %s8021_s15 = scalar_lea.vmem %s219_s24, 512  ;;  %p8026_p4 = scmp.lt.s32.totalorder %s219_s24, %s219_s24 }
 0x117   :  { %p8022_p3 = scmp.ne.s32.totalorder %s219_s24, %s8021_s15  ;;  %p8027_p5 = scmp.lt.s32.totalorder %s8021_s15, %s8021_s15 }
 0x119   :  { %p8028_p6 = por %p8027_p5, %p8026_p4 }
 0x11b   :  { %p8029_p7 = pnand %p8028_p6, %p8022_p3 }
 0x11d   :  { %8032 = shalt.err (!%p8029_p7)
}
 0x11e   :  { %224 = dma.hbm_to_vmem [thread:$0]  %s11113_s19, 512, %s219_s24, [#allocation24], %s8109_s29, %s8109_s29, %s8110_s3  }
 0x11f   :  { %s8033_s6 = scalar_lea.hbm %s11115_s21, 512 }
 0x120   :  { %p8034_p8 = scmp.ne.s32.totalorder %s11115_s21, %s8033_s6  ;;  %p8037_p9 = scmp.lt.u32.totalorder %s8033_s6, %s11115_s21 }
 0x122   :  { %p8039_p10 = pnand %p8037_p9, %p8034_p8 }
 0x124   :  { %8042 = shalt.err (!%p8039_p10)
}
 0x125   :  { %s8043_s1 = scalar_lea.vmem %s8456_s12, 512  ;;  %p8048_p12 = scmp.lt.s32.totalorder %s8456_s12, %s8456_s12 }
 0x126   :  { %p8044_p11 = scmp.ne.s32.totalorder %s8456_s12, %s8043_s1  ;;  %p8049_p13 = scmp.lt.s32.totalorder %s8043_s1, %s8043_s1 }
 0x128   :  { %p8050_p0 = por %p8049_p13, %p8048_p12 }
 0x12a   :  { %p8051_p1 = pnand %p8050_p0, %p8044_p11 }
 0x12c   :  { %8054 = shalt.err (!%p8051_p1)
}
 0x12d   :  { %238 = dma.hbm_to_vmem [thread:$0]  %s11115_s21, 512, %s8456_s12, [#allocation27], %s8109_s29, %s8109_s29, %s8110_s3  }
 0x12e   :  { %8077 = dma.done.wait [#allocation3], 16  }
 0x12f   :  { %8078 = vsyncadd [#allocation3], 4294967280 }
 0x130   :  { %8079 = dma.done.wait [#allocation6], 64  }
 0x131   :  { %8080 = vsyncadd [#allocation6], 4294967232 }
 0x132   :  { %8081 = dma.done.wait [#allocation9], 1056  }
 0x133   :  { %8082 = vsyncadd [#allocation9], 4294966240 }
 0x134   :  { %8083 = dma.done.wait [#allocation12], 1056  }
 0x135   :  { %8084 = vsyncadd [#allocation12], 4294966240 }
 0x136   :  { %8085 = dma.done.wait [#allocation15], 1056  }
 0x137   :  { %8086 = vsyncadd [#allocation15], 4294966240 }
 0x138   :  { %8087 = dma.done.wait [#allocation18], 64  }
 0x139   :  { %8088 = vsyncadd [#allocation18], 4294967232 }
 0x13a   :  { %8089 = dma.done.wait [#allocation21], 1056  }
 0x13b   :  { %8090 = vsyncadd [#allocation21], 4294966240 }
 0x13c   :  { %8091 = dma.done.wait [#allocation24], 544  }
 0x13d   :  { %8092 = vsyncadd [#allocation24], 4294966752 }
 0x13e   :  { %8093 = dma.done.wait [#allocation27], 512  }
 0x13f   :  { %8094 = vsyncadd [#allocation27], 4294966784  ;;  %s11182_s29 = sld [smem:[#allocation96_spill]]  ;;  %vm419_vm0 = vcmask 523264   ;;  %s11183_s12 = sld [smem:[#allocation95_spill]] }
 0x140   :  { %v8553_v16 = vld [vmem:[#allocation2] ss:$0 sm:$0xff]  ;;  %s11208_s26 = sld [smem:[#allocation100_spill]]  ;;  %s11332_s21 = sld [smem:[#allocation102_spill]] }
 0x141   :  { %s11363_s9 = sld [smem:[#allocation103_spill]]  ;;  %s8117_s0 = smov [#allocation28]  }
 0x145   :  { %v7139_v0 = vld [vmem:[%s11182_s29] sm:$0xff]   ;;  %v7140_v1 = vld [vmem:[%s11182_s29 + $0x8] sm:$0xff]   ;;  %v7141_v2 = vld [vmem:[%s11182_s29 + $0x10] sm:$0xff]  }
 0x146   :  { %6620 = vmatprep.subr.bf16.mxu0 %v7139_v0  ;;  %v7143_v3 = vld [vmem:[%s11183_s12] sm:$0xff]   ;;  %v7142_v4 = vld [vmem:[%s11182_s29 + $0x18] sm:$0xff]   ;;  %v7144_v5 = vld [vmem:[%s11183_s12 + $0x8] sm:$0xff]  }
 0x147   :  { %6621 = vmatpush3.bf16.msra.mxu0 %v7139_v0  ;;  %6628 = vmatprep.mubr.msk.bf16.mxu0 %vm419_vm0, %v7143_v3  ;;  %v7145_v6 = vld [vmem:[%s11183_s12 + $0x10] sm:$0xff]   ;;  %v7146_v7 = vld [vmem:[%s11183_s12 + $0x18] sm:$0xff]   ;;  %v7147_v8 = vld [vmem:[%s11183_s12 + $0x20] sm:$0xff]  }
 0x148   :  { %6622 = vmatprep.subr.bf16.mxu0 %v7140_v1  ;;  %v7148_v9 = vld [vmem:[%s11183_s12 + $0x28] sm:$0xff]   ;;  %v7149_v10 = vld [vmem:[%s11183_s12 + $0x30] sm:$0xff]   ;;  %v7150_v11 = vld [vmem:[%s11183_s12 + $0x38] sm:$0xff]  }
 0x149   :  { %v7151_v12 = vld [vmem:[%s11183_s12 + $0x40] sm:$0xff]   ;;  %v7152_v13 = vld [vmem:[%s11183_s12 + $0x48] sm:$0xff]   ;;  %v7153_v14 = vld [vmem:[%s11183_s12 + $0x50] sm:$0xff]  }
 0x14a   :  { %v7154_v15 = vld [vmem:[%s11183_s12 + $0x58] sm:$0xff]  }
 0x14b   :  { %6623 = vmatpush3.bf16.msra.mxu0 %v7140_v1 }
 0x14c   :  { %6624 = vmatprep.subr.bf16.mxu0 %v7141_v2 }
 0x14f   :  { %6625 = vmatpush3.bf16.msra.mxu0 %v7141_v2 }
 0x150   :  { %6626 = vmatprep.subr.bf16.mxu0 %v7142_v4 }
 0x153   :  { %6627 = vmatpush3.bf16.msra.mxu0 %v7142_v4 }
 0x156   :  { %6629 = vmatmul.mubr.msk.bf16.vlgmr.msra.gmra.mrb[0].mxu0 %vm419_vm0, %v7144_v5 }
 0x157   :  { %6632 = vmatprep.mubr.msk.bf16.mxu0 %vm419_vm0, %v7145_v6 }
 0x15e   :  { %6633 = vmatmul.mubr.msk.bf16.gmra.mrb[4].mxu0 %vm419_vm0, %v7146_v7 }
 0x15f   :  { %6636 = vmatprep.mubr.msk.bf16.mxu0 %vm419_vm0, %v7147_v8 }
 0x166   :  { %6637 = vmatmul.mubr.msk.bf16.gmra.mrb[8].mxu0 %vm419_vm0, %v7148_v9 }
 0x167   :  { %6640 = vmatprep.mubr.msk.bf16.mxu0 %vm419_vm0, %v7149_v10 }
 0x16e   :  { %6641 = vmatmul.mubr.msk.bf16.gmra.mrb[12].mxu0 %vm419_vm0, %v7150_v11 }
 0x16f   :  { %6644 = vmatprep.mubr.msk.bf16.mxu0 %vm419_vm0, %v7151_v12 }
 0x176   :  { %6645 = vmatmul.mubr.msk.bf16.gmra.mrb[16].mxu0 %vm419_vm0, %v7152_v13 }
 0x177   :  { %6648 = vmatprep.mubr.msk.bf16.mxu0 %vm419_vm0, %v7153_v14 }
 0x17e   :  { %6649 = vmatmul.mubr.msk.bf16.gmra.mrb[20].mxu0 %vm419_vm0, %v7154_v15 }
 0x229   :  { %v6630_v17 = vpop.f32.mrb[0].mxu0 }
 0x22a   :  { %v8556_v18 = vadd.f32 %v6630_v17, %v8553_v16  ;;  %v490_v19 = vpop.f32.mrb[1].mxu0 }
 0x22b   :  { %v8559_v20 = vadd.f32 %v8553_v16, %v490_v19  ;;  %v6631_v21 = vpop.f32.mrb[2].mxu0  ;;  %v7155_v19 = vld [vmem:[#allocation10] sm:$0xff]  }
 0x22c   :  { %11184 = vst [vmem:[#allocation39_spill] sm:$0xff] %v8556_v18  ;;  %v8562_v22 = vadd.f32 %v6631_v21, %v8553_v16  ;;  %v493_v23 = vpop.f32.mrb[3].mxu0  ;;  %v593_v24 = vsel %vm419_vm0, %v8556_v18, 0.0  ;;  %v686_v26 = vmul.f32 %v8556_v18, %v8556_v18  ;;  %v7156_v21 = vld [vmem:[#allocation13] sm:$0xff]   ;;  %6652 = vmatprep.subr.bf16.mxu1 %v7155_v19 }
 0x22d   :  { %11185 = vst [vmem:[#allocation40_spill] sm:$0xff] %v8559_v20  ;;  %594 = vadd.xlane.f32.xlu1 %v593_v24  ;;  %v587_v25 = vsel %vm419_vm0, %v8559_v20, 0.0  ;;  %v8571_v27 = vadd.f32 %v8553_v16, %v493_v23  ;;  %v684_v38 = vmul.f32 %v8559_v20, %v8559_v20  ;;  %6684 = vmatprep.subr.bf16.mxu0 %v7156_v21 }
 0x22e   :  { %11186 = vst [vmem:[#allocation41_spill] sm:$0xff] %v8562_v22  ;;  %588 = vadd.xlane.f32.xlu0 %v587_v25  ;;  %v596_v28 = vsel %vm419_vm0, %v8562_v22, 0.0  ;;  %v687_v29 = vmul.f32 %v8562_v22, %v8562_v22  ;;  %v714_v30 = vsel %vm419_vm0, %v686_v26, 0.0  ;;  %6653 = vmatpush3.bf16.msra.mxu1 %v7155_v19 }
 0x22f   :  { %11187 = vst [vmem:[#allocation42_spill] sm:$0xff] %v8571_v27  ;;  %v685_v36 = vmul.f32 %v8571_v27, %v8571_v27  ;;  %v590_v37 = vsel %vm419_vm0, %v8571_v27, 0.0  ;;  %v708_v42 = vsel %vm419_vm0, %v684_v38, 0.0  ;;  %6685 = vmatpush3.bf16.msra.mxu0 %v7156_v21 }
 0x230   :  { %v717_v34 = vsel %vm419_vm0, %v687_v29, 0.0 }
 0x231   :  { %597 = vadd.xlane.f32.xlu1 %v596_v28  ;;  %v6634_v31 = vpop.f32.mrb[4].mxu0  ;;  %v711_v40 = vsel %vm419_vm0, %v685_v36, 0.0  ;;  %v7158_v36 = vld [vmem:[#allocation13 + $0x8] sm:$0xff]  }
 0x232   :  { %715 = vadd.xlane.f32.xlu0 %v714_v30  ;;  %v506_v32 = vpop.f32.mrb[5].mxu0  ;;  %v8590_v41 = vadd.f32 %v6634_v31, %v8553_v16  ;;  %6686 = vmatprep.subr.bf16.mxu0 %v7158_v36 }
 0x233   :  { %v6635_v33 = vpop.f32.mrb[6].mxu0  ;;  %v8599_v49 = vadd.f32 %v8553_v16, %v506_v32  ;;  %6687 = vmatpush3.bf16.msra.mxu0 %v7158_v36 }
 0x234   :  { %v509_v35 = vpop.f32.mrb[7].mxu0  ;;  %v8586_v39 = vadd.f32 %v6635_v33, %v8553_v16  ;;  %11189 = vst [vmem:[#allocation44_spill] sm:$0xff] %v8590_v41  ;;  %v605_v50 = vsel %vm419_vm0, %v8590_v41, 0.0  ;;  %v690_v54 = vmul.f32 %v8590_v41, %v8590_v41 }
 0x235   :  { %718 = vadd.xlane.f32.xlu1 %v717_v34  ;;  %v8596_v47 = vadd.f32 %v8553_v16, %v509_v35  ;;  %11191 = vst [vmem:[#allocation46_spill] sm:$0xff] %v8599_v49  ;;  %v599_v53 = vsel %vm419_vm0, %v8599_v49, 0.0  ;;  %v688_v62 = vmul.f32 %v8599_v49, %v8599_v49  ;;  %v7157_v35 = vld [vmem:[#allocation10 + $0x8] sm:$0xff]  }
 0x236   :  { %591 = vadd.xlane.f32.xlu0 %v590_v37  ;;  %11188 = vst [vmem:[#allocation43_spill] sm:$0xff] %v8586_v39  ;;  %v608_v44 = vsel %vm419_vm0, %v8586_v39, 0.0  ;;  %v691_v52 = vmul.f32 %v8586_v39, %v8586_v39  ;;  %v726_v61 = vsel %vm419_vm0, %v690_v54, 0.0  ;;  %6654 = vmatprep.subr.bf16.mxu1 %v7157_v35 }
 0x237   :  { %11190 = vst [vmem:[#allocation45_spill] sm:$0xff] %v8596_v47  ;;  %v602_v51 = vsel %vm419_vm0, %v8596_v47, 0.0  ;;  %v689_v59 = vmul.f32 %v8596_v47, %v8596_v47  ;;  %v720_v2 = vsel %vm419_vm0, %v688_v62, 0.0  ;;  %6655 = vmatpush3.bf16.msra.mxu1 %v7157_v35 }
 0x238   :  { %v729_v58 = vsel %vm419_vm0, %v691_v52, 0.0  ;;  %v7161_v52 = vld [vmem:[#allocation10 + $0x18] sm:$0xff]  }
 0x239   :  { %712 = vadd.xlane.f32.xlu1 %v711_v40  ;;  %v6638_v43 = vpop.f32.mrb[8].mxu0  ;;  %v723_v0 = vsel %vm419_vm0, %v689_v59, 0.0 }
 0x23a   :  { %709 = vadd.xlane.f32.xlu0 %v708_v42  ;;  %v522_v45 = vpop.f32.mrb[9].mxu0  ;;  %v8628_v1 = vadd.f32 %v6638_v43, %v8553_v16 }
 0x23b   :  { %v6639_v46 = vpop.f32.mrb[10].mxu0  ;;  %v8646_v12 = vadd.f32 %v8553_v16, %v522_v45  ;;  %v7160_v45 = vld [vmem:[#allocation13 + $0x10] sm:$0xff]  }
 0x23c   :  { %v525_v48 = vpop.f32.mrb[11].mxu0  ;;  %v8624_v63 = vadd.f32 %v6639_v46, %v8553_v16  ;;  %11193 = vst [vmem:[#allocation48_spill] sm:$0xff] %v8628_v1  ;;  %v617_v13 = vsel %vm419_vm0, %v8628_v1, 0.0  ;;  %v694_v24 = vmul.f32 %v8628_v1, %v8628_v1  ;;  %6688 = vmatprep.subr.bf16.mxu0 %v7160_v45 }
 0x23d   :  { %609 = vadd.xlane.f32.xlu1 %v608_v44  ;;  %v8640_v9 = vadd.f32 %v8553_v16, %v525_v48  ;;  %11198 = vst [vmem:[#allocation53_spill] sm:$0xff] %v8646_v12  ;;  %v611_v23 = vsel %vm419_vm0, %v8646_v12, 0.0  ;;  %v692_v38 = vmul.f32 %v8646_v12, %v8646_v12  ;;  %v7159_v44 = vld [vmem:[#allocation10 + $0x10] sm:$0xff]   ;;  %6689 = vmatpush3.bf16.msra.mxu0 %v7160_v45  ;;  %v8759_v45 = vld [vmem:[%s11208_s26] sm:$0xff]  }
 0x23e   :  { %606 = vadd.xlane.f32.xlu0 %v605_v50  ;;  %11192 = vst [vmem:[#allocation47_spill] sm:$0xff] %v8624_v63  ;;  %v620_v4 = vsel %vm419_vm0, %v8624_v63, 0.0  ;;  %v695_v17 = vmul.f32 %v8624_v63, %v8624_v63  ;;  %v738_v37 = vsel %vm419_vm0, %v694_v24, 0.0  ;;  %6656 = vmatprep.subr.bf16.mxu1 %v7159_v44 }
 0x23f   :  { %11196 = vst [vmem:[#allocation51_spill] sm:$0xff] %v8640_v9  ;;  %v614_v15 = vsel %vm419_vm0, %v8640_v9, 0.0  ;;  %v693_v32 = vmul.f32 %v8640_v9, %v8640_v9  ;;  %v732_v48 = vsel %vm419_vm0, %v692_v38, 0.0  ;;  %6657 = vmatpush3.bf16.msra.mxu1 %v7159_v44 }
 0x240   :  { %v741_v31 = vsel %vm419_vm0, %v695_v17, 0.0  ;;  %6658 = vmatprep.subr.bf16.mxu1 %v7161_v52 }
 0x241   :  { %603 = vadd.xlane.f32.xlu1 %v602_v51  ;;  %v8611_v55 = vpop.f32.mrb[12].mxu0  ;;  %v735_v43 = vsel %vm419_vm0, %v693_v32, 0.0 }
 0x242   :  { %600 = vadd.xlane.f32.xlu0 %v599_v53  ;;  %v8613_v56 = vpop.f32.mrb[13].mxu0  ;;  %v8685_v46 = vadd.f32 %v8611_v55, %v8553_v16  ;;  %v7162_v53 = vld [vmem:[#allocation13 + $0x18] sm:$0xff]  }
 0x243   :  { %v6643_v57 = vpop.f32.mrb[14].mxu0  ;;  %v8696_v54 = vadd.f32 %v8553_v16, %v8613_v56  ;;  %6690 = vmatprep.subr.bf16.mxu0 %v7162_v53  ;;  %6659 = vmatpush3.bf16.msra.mxu1 %v7161_v52 }
 0x244   :  { %v8618_v60 = vpop.f32.mrb[15].mxu0  ;;  %v8680_v42 = vadd.f32 %v6643_v57, %v8553_v16  ;;  %11205 = vst [vmem:[#allocation60_spill] sm:$0xff] %v8685_v46  ;;  %v629_v55 = vsel %vm419_vm0, %v8685_v46, 0.0  ;;  %6691 = vmatpush3.bf16.msra.mxu0 %v7162_v53  ;;  %v698_v56 = vmul.f32 %v8685_v46, %v8685_v46  ;;  %6716 = vmatprep.subr.bf16.mxu1 %v8759_v45 }
 0x245   :  { %730 = vadd.xlane.f32.xlu1 %v729_v58  ;;  %v8692_v51 = vadd.f32 %v8553_v16, %v8618_v60  ;;  %11207 = vst [vmem:[#allocation62_spill] sm:$0xff] %v8696_v54  ;;  %v696_v62 = vmul.f32 %v8696_v54, %v8696_v54 }
 0x246   :  { %727 = vadd.xlane.f32.xlu0 %v726_v61  ;;  %11204 = vst [vmem:[#allocation59_spill] sm:$0xff] %v8680_v42  ;;  %v632_v50 = vsel %vm419_vm0, %v8680_v42, 0.0  ;;  %v699_v58 = vmul.f32 %v8680_v42, %v8680_v42  ;;  %v750_v61 = vsel %vm419_vm0, %v698_v56, 0.0 }
 0x247   :  { %11206 = vst [vmem:[#allocation61_spill] sm:$0xff] %v8692_v51  ;;  %v626_v57 = vsel %vm419_vm0, %v8692_v51, 0.0  ;;  %v697_v60 = vmul.f32 %v8692_v51, %v8692_v51 }
 0x248   :  { %v753_v59 = vsel %vm419_vm0, %v699_v58, 0.0 }
 0x249   :  { %724 = vadd.xlane.f32.xlu1 %v723_v0  ;;  %v6646_v3 = vpop.f32.mrb[16].mxu0  ;;  %v747_v0 = vsel %vm419_vm0, %v697_v60, 0.0 }
 0x24a   :  { %721 = vadd.xlane.f32.xlu0 %v720_v2  ;;  %v8634_v5 = vadd.f32 %v6646_v3, %v8553_v16  ;;  %v554_v6 = vpop.f32.mrb[17].mxu0  ;;  %v744_v2 = vsel %vm419_vm0, %v696_v62, 0.0 }
 0x24b   :  { %v8637_v7 = vadd.f32 %v8553_v16, %v554_v6  ;;  %v6647_v8 = vpop.f32.mrb[18].mxu0 }
 0x24c   :  { %11194 = vst [vmem:[#allocation49_spill] sm:$0xff] %v8634_v5  ;;  %v8643_v10 = vadd.f32 %v6647_v8, %v8553_v16  ;;  %v557_v11 = vpop.f32.mrb[19].mxu0 }
 0x24d   :  { %11195 = vst [vmem:[#allocation50_spill] sm:$0xff] %v8637_v7  ;;  %621 = vadd.xlane.f32.xlu1 %v620_v4  ;;  %v8651_v14 = vadd.f32 %v8553_v16, %v557_v11  ;;  %v641_v4 = vsel %vm419_vm0, %v8634_v5, 0.0  ;;  %v635_v11 = vsel %vm419_vm0, %v8637_v7, 0.0  ;;  %v700_v21 = vmul.f32 %v8637_v7, %v8637_v7 }
 0x24e   :  { %11197 = vst [vmem:[#allocation52_spill] sm:$0xff] %v8643_v10  ;;  %618 = vadd.xlane.f32.xlu0 %v617_v13  ;;  %v644_v3 = vsel %vm419_vm0, %v8643_v10, 0.0  ;;  %v703_v8 = vmul.f32 %v8643_v10, %v8643_v10  ;;  %v702_v13 = vmul.f32 %v8634_v5, %v8634_v5 }
 0x24f   :  { %11199 = vst [vmem:[#allocation54_spill] sm:$0xff] %v8651_v14  ;;  %v638_v6 = vsel %vm419_vm0, %v8651_v14, 0.0  ;;  %v701_v17 = vmul.f32 %v8651_v14, %v8651_v14  ;;  %v756_v24 = vsel %vm419_vm0, %v700_v21, 0.0 }
 0x250   :  { %v762_v19 = vsel %vm419_vm0, %v702_v13, 0.0 }
 0x251   :  { %615 = vadd.xlane.f32.xlu1 %v614_v15  ;;  %v6650_v25 = vpop.f32.mrb[20].mxu0  ;;  %v765_v15 = vsel %vm419_vm0, %v703_v8, 0.0 }
 0x252   :  { %612 = vadd.xlane.f32.xlu0 %v611_v23  ;;  %v8662_v26 = vadd.f32 %v6650_v25, %v8553_v16  ;;  %v570_v28 = vpop.f32.mrb[21].mxu0  ;;  %v759_v23 = vsel %vm419_vm0, %v701_v17, 0.0 }
 0x253   :  { %v8665_v29 = vadd.f32 %v8553_v16, %v570_v28  ;;  %v6651_v30 = vpop.f32.mrb[22].mxu0 }
 0x254   :  { %11200 = vst [vmem:[#allocation55_spill] sm:$0xff] %v8662_v26  ;;  %v8671_v33 = vadd.f32 %v6651_v30, %v8553_v16  ;;  %v573_v34 = vpop.f32.mrb[23].mxu0  ;;  %v653_v28 = vsel %vm419_vm0, %v8662_v26, 0.0  ;;  %v706_v38 = vmul.f32 %v8662_v26, %v8662_v26 }
 0x255   :  { %11201 = vst [vmem:[#allocation56_spill] sm:$0xff] %v8665_v29  ;;  %742 = vadd.xlane.f32.xlu1 %v741_v31  ;;  %v8677_v40 = vadd.f32 %v8553_v16, %v573_v34  ;;  %v623_v16 = vsel %vm419_vm0, %v8696_v54, 0.0  ;;  %v647_v32 = vsel %vm419_vm0, %v8665_v29, 0.0  ;;  %v704_v34 = vmul.f32 %v8665_v29, %v8665_v29 }
 0x256   :  { %11202 = vst [vmem:[#allocation57_spill] sm:$0xff] %v8671_v33  ;;  %739 = vadd.xlane.f32.xlu0 %v738_v37  ;;  %v656_v25 = vsel %vm419_vm0, %v8671_v33, 0.0  ;;  %v707_v36 = vmul.f32 %v8671_v33, %v8671_v33  ;;  %v774_v44 = vsel %vm419_vm0, %v706_v38, 0.0 }
 0x257   :  { %11203 = vst [vmem:[#allocation58_spill] sm:$0xff] %v8677_v40  ;;  %v650_v30 = vsel %vm419_vm0, %v8677_v40, 0.0  ;;  %v705_v31 = vmul.f32 %v8677_v40, %v8677_v40  ;;  %v768_v37 = vsel %vm419_vm0, %v704_v34, 0.0 }
 0x259   :  { %736 = vadd.xlane.f32.xlu1 %v735_v43  ;;  %v771_v35 = vsel %vm419_vm0, %v705_v31, 0.0  ;;  %v777_v43 = vsel %vm419_vm0, %v707_v36, 0.0 }
 0x25a   :  { %733 = vadd.xlane.f32.xlu0 %v732_v48 }
 0x25d   :  { %633 = vadd.xlane.f32.xlu1 %v632_v50 }
 0x25e   :  { %630 = vadd.xlane.f32.xlu0 %v629_v55 }
 0x261   :  { %627 = vadd.xlane.f32.xlu1 %v626_v57 }
 0x262   :  { %624 = vadd.xlane.f32.xlu0 %v623_v16 }
 0x265   :  { %754 = vadd.xlane.f32.xlu1 %v753_v59 }
 0x266   :  { %751 = vadd.xlane.f32.xlu0 %v750_v61 }
 0x269   :  { %748 = vadd.xlane.f32.xlu1 %v747_v0 }
 0x26a   :  { %745 = vadd.xlane.f32.xlu0 %v744_v2 }
 0x26d   :  { %645 = vadd.xlane.f32.xlu1 %v644_v3 }
 0x26e   :  { %642 = vadd.xlane.f32.xlu0 %v641_v4 }
 0x271   :  { %639 = vadd.xlane.f32.xlu1 %v638_v6 }
 0x272   :  { %636 = vadd.xlane.f32.xlu0 %v635_v11 }
 0x275   :  { %766 = vadd.xlane.f32.xlu1 %v765_v15 }
 0x276   :  { %763 = vadd.xlane.f32.xlu0 %v762_v19 }
 0x279   :  { %760 = vadd.xlane.f32.xlu1 %v759_v23 }
 0x27a   :  { %757 = vadd.xlane.f32.xlu0 %v756_v24 }
 0x27d   :  { %657 = vadd.xlane.f32.xlu1 %v656_v25 }
 0x27e   :  { %654 = vadd.xlane.f32.xlu0 %v653_v28 }
 0x281   :  { %651 = vadd.xlane.f32.xlu1 %v650_v30 }
 0x282   :  { %648 = vadd.xlane.f32.xlu0 %v647_v32 }
 0x285   :  { %772 = vadd.xlane.f32.xlu1 %v771_v35 }
 0x286   :  { %769 = vadd.xlane.f32.xlu0 %v768_v37 }
 0x289   :  { %778 = vadd.xlane.f32.xlu1 %v777_v43 }
 0x28a   :  { %775 = vadd.xlane.f32.xlu0 %v774_v44 }
 0x2ba   :  { %v595_v48 = vpop.xlane.xlu1 %594 }
 0x2bb   :  { %v589_v50 = vpop.xlane.xlu0 %588  ;;  %v662_v52 = vmul.f32 0.015625, %v595_v48 }
 0x2bc   :  { %v660_v0 = vmul.f32 0.015625, %v589_v50 }
 0x2bd   :  { %v806_v58 = vmul.f32 %v662_v52, %v662_v52 }
 0x2be   :  { %v598_v53 = vpop.xlane.xlu1 %597  ;;  %v804_v17 = vmul.f32 %v660_v0, %v660_v0 }
 0x2bf   :  { %v663_v55 = vmul.f32 0.015625, %v598_v53  ;;  %v716_v57 = vpop.xlane.xlu0 %715 }
 0x2c0   :  { %v782_v16 = vmul.f32 0.015625, %v716_v57 }
 0x2c1   :  { %v807_v60 = vmul.f32 %v663_v55, %v663_v55  ;;  %v855_v37 = vsub.f32 %v8562_v22, %v663_v55  ;;  %v852_v55 = vsub.f32 %v8559_v20, %v660_v0 }
 0x2c2   :  { %v830_v56 = vsub.f32 %v782_v16, %v806_v58  ;;  %v719_v59 = vpop.xlane.xlu1 %718  ;;  %v854_v58 = vsub.f32 %v8556_v18, %v662_v52 }
 0x2c3   :  { %v783_v61 = vmul.f32 0.015625, %v719_v59  ;;  %v592_v62 = vpop.xlane.xlu0 %591 }
 0x2c4   :  { %v878_v2 = vadd.f32 1e-05, %v830_v56  ;;  %v661_v3 = vmul.f32 0.015625, %v592_v62 }
 0x2c5   :  { %v831_v4 = vsub.f32 %v783_v61, %v807_v60 }
 0x2c6   :  { %v805_v6 = vmul.f32 %v661_v3, %v661_v3  ;;  %v713_v8 = vpop.xlane.xlu1 %712  ;;  %7219 = vrsqrt.f32 %v878_v2  ;;  %v853_v61 = vsub.f32 %v8571_v27, %v661_v3 }
 0x2c7   :  { %v879_v11 = vadd.f32 1e-05, %v831_v4  ;;  %v781_v13 = vmul.f32 0.015625, %v713_v8  ;;  %v710_v15 = vpop.xlane.xlu0 %709 }
 0x2c8   :  { %v780_v19 = vmul.f32 0.015625, %v710_v15 }
 0x2c9   :  { %7221 = vrsqrt.f32 %v879_v11  ;;  %v829_v21 = vsub.f32 %v781_v13, %v805_v6 }
 0x2ca   :  { %v828_v23 = vsub.f32 %v780_v19, %v804_v17  ;;  %v610_v24 = vpop.xlane.xlu1 %609  ;;  %v8782_v17 = vld [vmem:[#allocation5] ss:$0 sm:$0xff] }
 0x2cb   :  { %v877_v25 = vadd.f32 1e-05, %v829_v21  ;;  %v607_v28 = vpop.xlane.xlu0 %606  ;;  %v8762_v32 = vmul.f32 0.015625, %v610_v24 }
 0x2cc   :  { %v876_v30 = vadd.f32 1e-05, %v828_v23  ;;  %v8764_v35 = vmul.f32 0.015625, %v607_v28 }
 0x2cd   :  { %7223 = vrsqrt.f32 %v877_v25  ;;  %v811_v44 = vmul.f32 %v8762_v32, %v8762_v32 }
 0x2ce   :  { %7225 = vrsqrt.f32 %v876_v30  ;;  %v604_v31 = vpop.xlane.xlu1 %603  ;;  %v810_v16 = vmul.f32 %v8764_v35, %v8764_v35 }
 0x2cf   :  { %v601_v34 = vpop.xlane.xlu0 %600  ;;  %v8769_v48 = vmul.f32 0.015625, %v604_v31 }
 0x2d0   :  { %v7220_v36 = vpop.eup %7219  ;;  %v8771_v50 = vmul.f32 0.015625, %v601_v34 }
 0x2d1   :  { %v926_v4 = vmul.f32 %v7220_v36, %v854_v58  ;;  %v809_v8 = vmul.f32 %v8769_v48, %v8769_v48 }
 0x2d2   :  { %v731_v38 = vpop.xlane.xlu1 %730  ;;  %v808_v52 = vmul.f32 %v8771_v50, %v8771_v50 }
 0x2d3   :  { %v7222_v43 = vpop.eup %7221  ;;  %v787_v53 = vmul.f32 0.015625, %v731_v38  ;;  %v728_v57 = vpop.xlane.xlu0 %727  ;;  %v956_v34 = vmul.f32 %v8782_v17, %v926_v4  ;;  %v8787_v38 = vld [vmem:[#allocation7] ss:$0 sm:$0xff]  ;;  %v859_v4 = vsub.f32 %v8586_v39, %v8762_v32 }
 0x2d4   :  { %v786_v56 = vmul.f32 0.015625, %v728_v57  ;;  %v927_v59 = vmul.f32 %v7222_v43, %v855_v37 }
 0x2d5   :  { %v835_v60 = vsub.f32 %v787_v53, %v811_v44 }
 0x2d6   :  { %v834_v62 = vsub.f32 %v786_v56, %v810_v16  ;;  %v725_v2 = vpop.xlane.xlu1 %724  ;;  %v957_v3 = vmul.f32 %v8782_v17, %v927_v59  ;;  %v986_v56 = vadd.f32 %v8787_v38, %v956_v34 }
 0x2d7   :  { %v7224_v6 = vpop.eup %7223  ;;  %v883_v11 = vadd.f32 1e-05, %v835_v60  ;;  %v785_v13 = vmul.f32 0.015625, %v725_v2  ;;  %v722_v15 = vpop.xlane.xlu0 %721  ;;  %v7164_v2 = vld [vmem:[%s11208_s26 + $0x8] sm:$0xff]  }
 0x2d8   :  { %v7226_v19 = vpop.eup %7225  ;;  %v882_v21 = vadd.f32 1e-05, %v834_v62  ;;  %v784_v0 = vmul.f32 0.015625, %v722_v15  ;;  %v925_v23 = vmul.f32 %v7224_v6, %v853_v61  ;;  %v987_v57 = vadd.f32 %v8787_v38, %v957_v3 }
 0x2d9   :  { %7227 = vrsqrt.f32 %v883_v11  ;;  %v833_v24 = vsub.f32 %v785_v13, %v809_v8  ;;  %v924_v25 = vmul.f32 %v7226_v19, %v852_v55  ;;  %v858_v11 = vsub.f32 %v8590_v41, %v8764_v35  ;;  %v7165_v35 = vld [vmem:[%s11208_s26 + $0x10] sm:$0xff]  }
 0x2da   :  { %7229 = vrsqrt.f32 %v882_v21  ;;  %v832_v28 = vsub.f32 %v784_v0, %v808_v52  ;;  %v622_v30 = vpop.xlane.xlu1 %621  ;;  %v955_v31 = vmul.f32 %v8782_v17, %v925_v23  ;;  %v8800_v62 = vpack.c.bf16 %v987_v57, %v986_v56 }
 0x2db   :  { %v881_v36 = vadd.f32 1e-05, %v833_v24  ;;  %v619_v37 = vpop.xlane.xlu0 %618  ;;  %v954_v43 = vmul.f32 %v8782_v17, %v924_v25  ;;  %v8794_v59 = vmul.f32 0.015625, %v622_v30  ;;  %v856_v30 = vsub.f32 %v8599_v49, %v8771_v50 }
 0x2dc   :  { %v880_v44 = vadd.f32 1e-05, %v832_v28  ;;  %v985_v53 = vadd.f32 %v8787_v38, %v955_v31  ;;  %v8798_v61 = vmul.f32 0.015625, %v619_v37  ;;  %v857_v28 = vsub.f32 %v8596_v47, %v8769_v48 }
 0x2dd   :  { %7231 = vrsqrt.f32 %v881_v36  ;;  %v984_v58 = vadd.f32 %v8787_v38, %v954_v43  ;;  %v815_v13 = vmul.f32 %v8794_v59, %v8794_v59 }
 0x2de   :  { %7233 = vrsqrt.f32 %v880_v44  ;;  %v616_v16 = vpop.xlane.xlu1 %615  ;;  %v814_v0 = vmul.f32 %v8798_v61, %v8798_v61 }
 0x2df   :  { %v613_v60 = vpop.xlane.xlu0 %612  ;;  %v8796_v55 = vpack.c.bf16 %v985_v53, %v984_v58  ;;  %v8811_v6 = vmul.f32 0.015625, %v616_v16 }
 0x2e0   :  { %v8821_v15 = vmul.f32 0.015625, %v613_v60  ;;  %v7166_v60 = vld [vmem:[%s11208_s26 + $0x18] sm:$0xff]  }
 0x2e1   :  { %6660 = vmatprep.mubr.msk.bf16.mxu1 %vm419_vm0, %v8796_v55  ;;  %6692 = vmatprep.mubr.msk.bf16.mxu0 %vm419_vm0, %v8796_v55 }
 0x2e2   :  { %v743_v8 = vpop.xlane.xlu1 %742  ;;  %6661 = vmatmul.mubr.msk.bf16.vlgmr.msra.gmra.mrb[0].mxu1 %vm419_vm0, %v8800_v62  ;;  %6693 = vmatmul.mubr.msk.bf16.vlgmr.msra.gmra.mrb[24].mxu0 %vm419_vm0, %v8800_v62  ;;  %v812_v37 = vmul.f32 %v8821_v15, %v8821_v15 }
 0x2e3   :  { %v7228_v52 = vpop.eup %7227  ;;  %v791_v19 = vmul.f32 0.015625, %v743_v8  ;;  %v740_v32 = vpop.xlane.xlu0 %739  ;;  %6717 = vmatpush3.bf16.msra.mxu1 %v8759_v45  ;;  %v813_v45 = vmul.f32 %v8811_v6, %v8811_v6 }
 0x2e4   :  { %v7230_v21 = vpop.eup %7229  ;;  %v790_v23 = vmul.f32 0.015625, %v740_v32  ;;  %v931_v3 = vmul.f32 %v7228_v52, %v859_v4  ;;  %6718 = vmatprep.subr.bf16.mxu1 %v7164_v2 }
 0x2e5   :  { %v839_v24 = vsub.f32 %v791_v19, %v815_v13  ;;  %v930_v25 = vmul.f32 %v7230_v21, %v858_v11 }
 0x2e6   :  { %v838_v31 = vsub.f32 %v790_v23, %v814_v0  ;;  %v737_v34 = vpop.xlane.xlu1 %736  ;;  %v961_v57 = vmul.f32 %v8782_v17, %v931_v3 }
 0x2e7   :  { %v7232_v36 = vpop.eup %7231  ;;  %v887_v43 = vadd.f32 1e-05, %v839_v24  ;;  %v789_v44 = vmul.f32 0.015625, %v737_v34  ;;  %v734_v53 = vpop.xlane.xlu0 %733  ;;  %6719 = vmatpush3.bf16.msra.mxu1 %v7164_v2  ;;  %v960_v50 = vmul.f32 %v8782_v17, %v930_v25  ;;  %v863_v34 = vsub.f32 %v8624_v63, %v8794_v59 }
 0x2e8   :  { %v7234_v58 = vpop.eup %7233  ;;  %v886_v48 = vadd.f32 1e-05, %v838_v31  ;;  %v788_v16 = vmul.f32 0.015625, %v734_v53  ;;  %v929_v56 = vmul.f32 %v7232_v36, %v857_v28  ;;  %6720 = vmatprep.subr.bf16.mxu1 %v7165_v35  ;;  %v991_v3 = vadd.f32 %v8787_v38, %v961_v57 }
 0x2e9   :  { %7235 = vrsqrt.f32 %v887_v43  ;;  %v837_v4 = vsub.f32 %v789_v44, %v813_v45  ;;  %v928_v8 = vmul.f32 %v7234_v58, %v856_v30  ;;  %v990_v23 = vadd.f32 %v8787_v38, %v960_v50 }
 0x2ea   :  { %7237 = vrsqrt.f32 %v886_v48  ;;  %v836_v52 = vsub.f32 %v788_v16, %v812_v37  ;;  %v634_v11 = vpop.xlane.xlu1 %633  ;;  %v959_v13 = vmul.f32 %v8782_v17, %v929_v56  ;;  %v862_v44 = vsub.f32 %v8628_v1, %v8798_v61 }
 0x2eb   :  { %v885_v2 = vadd.f32 1e-05, %v837_v4  ;;  %v631_v19 = vpop.xlane.xlu0 %630  ;;  %v958_v32 = vmul.f32 %v8782_v17, %v928_v8  ;;  %6721 = vmatpush3.bf16.msra.mxu1 %v7165_v35  ;;  %v8848_v28 = vmul.f32 0.015625, %v634_v11  ;;  %v8854_v31 = vpack.c.bf16 %v991_v3, %v990_v23 }
 0x2ec   :  { %v884_v21 = vadd.f32 1e-05, %v836_v52  ;;  %v989_v0 = vadd.f32 %v8787_v38, %v959_v13  ;;  %6722 = vmatprep.subr.bf16.mxu1 %v7166_v60  ;;  %v8852_v35 = vmul.f32 0.015625, %v631_v19  ;;  %v861_v8 = vsub.f32 %v8640_v9, %v8811_v6 }
 0x2ed   :  { %7239 = vrsqrt.f32 %v885_v2  ;;  %v988_v24 = vadd.f32 %v8787_v38, %v958_v32  ;;  %v819_v53 = vmul.f32 %v8848_v28, %v8848_v28  ;;  %v860_v61 = vsub.f32 %v8646_v12, %v8821_v15 }
 0x2ee   :  { %7241 = vrsqrt.f32 %v884_v21  ;;  %v628_v25 = vpop.xlane.xlu1 %627  ;;  %v818_v16 = vmul.f32 %v8852_v35, %v8852_v35 }
 0x2ef   :  { %v625_v30 = vpop.xlane.xlu0 %624  ;;  %v8850_v45 = vpack.c.bf16 %v989_v0, %v988_v24  ;;  %6723 = vmatpush3.bf16.msra.mxu1 %v7166_v60  ;;  %v8862_v36 = vmul.f32 0.015625, %v628_v25 }
 0x2f0   :  { %v8872_v57 = vmul.f32 0.015625, %v625_v30 }
 0x2f1   :  { %6664 = vmatprep.mubr.msk.bf16.mxu1 %vm419_vm0, %v8850_v45  ;;  %6696 = vmatprep.mubr.msk.bf16.mxu0 %vm419_vm0, %v8850_v45  ;;  %v817_v52 = vmul.f32 %v8862_v36, %v8862_v36 }
 0x2f2   :  { %v755_v37 = vpop.xlane.xlu1 %754  ;;  %6665 = vmatmul.mubr.msk.bf16.gmra.mrb[4].mxu1 %vm419_vm0, %v8854_v31  ;;  %6697 = vmatmul.mubr.msk.bf16.gmra.mrb[28].mxu0 %vm419_vm0, %v8854_v31  ;;  %v816_v19 = vmul.f32 %v8872_v57, %v8872_v57 }
 0x2f3   :  { %v7236_v43 = vpop.eup %7235  ;;  %v795_v58 = vmul.f32 0.015625, %v755_v37  ;;  %v752_v59 = vpop.xlane.xlu0 %751 }
 0x2f4   :  { %v7238_v48 = vpop.eup %7237  ;;  %v794_v56 = vmul.f32 0.015625, %v752_v59  ;;  %v935_v50 = vmul.f32 %v7236_v43, %v863_v34 }
 0x2f5   :  { %v843_v60 = vsub.f32 %v795_v58, %v819_v53  ;;  %v934_v4 = vmul.f32 %v7238_v48, %v862_v44 }
 0x2f6   :  { %v842_v11 = vsub.f32 %v794_v56, %v818_v16  ;;  %v749_v13 = vpop.xlane.xlu1 %748  ;;  %v965_v23 = vmul.f32 %v8782_v17, %v935_v50 }
 0x2f7   :  { %v7240_v2 = vpop.eup %7239  ;;  %v891_v32 = vadd.f32 1e-05, %v843_v60  ;;  %v793_v21 = vmul.f32 0.015625, %v749_v13  ;;  %v746_v0 = vpop.xlane.xlu0 %745  ;;  %v964_v15 = vmul.f32 %v8782_v17, %v934_v4 }
 0x2f8   :  { %v7242_v3 = vpop.eup %7241  ;;  %v890_v24 = vadd.f32 1e-05, %v842_v11  ;;  %v792_v6 = vmul.f32 0.015625, %v746_v0  ;;  %v933_v25 = vmul.f32 %v7240_v2, %v861_v8  ;;  %v995_v50 = vadd.f32 %v8787_v38, %v965_v23 }
 0x2f9   :  { %7243 = vrsqrt.f32 %v891_v32  ;;  %v841_v30 = vsub.f32 %v793_v21, %v817_v52  ;;  %v932_v34 = vmul.f32 %v7242_v3, %v860_v61  ;;  %v994_v56 = vadd.f32 %v8787_v38, %v964_v15 }
 0x2fa   :  { %7245 = vrsqrt.f32 %v890_v24  ;;  %v840_v37 = vsub.f32 %v792_v6, %v816_v19  ;;  %v646_v43 = vpop.xlane.xlu1 %645  ;;  %v963_v44 = vmul.f32 %v8782_v17, %v933_v25  ;;  %v867_v2 = vsub.f32 %v8680_v42, %v8848_v28  ;;  %v9082_v42 = vld [vmem:[#allocation8] ss:$0 sm:$0xff] }
 0x2fb   :  { %v889_v53 = vadd.f32 1e-05, %v841_v30  ;;  %v643_v58 = vpop.xlane.xlu0 %642  ;;  %v962_v59 = vmul.f32 %v8782_v17, %v932_v34  ;;  %v8892_v8 = vmul.f32 0.015625, %v646_v43  ;;  %v8898_v13 = vpack.c.bf16 %v995_v50, %v994_v56 }
 0x2fc   :  { %v888_v48 = vadd.f32 1e-05, %v840_v37  ;;  %v993_v16 = vadd.f32 %v8787_v38, %v963_v44  ;;  %v8896_v11 = vmul.f32 0.015625, %v643_v58  ;;  %v866_v0 = vsub.f32 %v8685_v46, %v8852_v35 }
 0x2fd   :  { %7247 = vrsqrt.f32 %v889_v53  ;;  %v992_v60 = vadd.f32 %v8787_v38, %v962_v59  ;;  %v823_v23 = vmul.f32 %v8892_v8, %v8892_v8  ;;  %v865_v43 = vsub.f32 %v8692_v51, %v8862_v36  ;;  %v9080_v51 = vld [vmem:[#allocation11] ss:$0 sm:$0xff] }
 0x2fe   :  { %7249 = vrsqrt.f32 %v888_v48  ;;  %v640_v4 = vpop.xlane.xlu1 %639  ;;  %v822_v25 = vmul.f32 %v8896_v11, %v8896_v11  ;;  %v864_v35 = vsub.f32 %v8696_v54, %v8872_v57 }
 0x2ff   :  { %v637_v61 = vpop.xlane.xlu0 %636  ;;  %v8894_v52 = vpack.c.bf16 %v993_v16, %v992_v60  ;;  %v8906_v19 = vmul.f32 0.015625, %v640_v4 }
 0x300   :  { %v8916_v3 = vmul.f32 0.015625, %v637_v61 }
 0x301   :  { %6668 = vmatprep.mubr.msk.bf16.mxu1 %vm419_vm0, %v8894_v52  ;;  %6700 = vmatprep.mubr.msk.bf16.mxu0 %vm419_vm0, %v8894_v52  ;;  %v821_v44 = vmul.f32 %v8906_v19, %v8906_v19 }
 0x302   :  { %v767_v32 = vpop.xlane.xlu1 %766  ;;  %6669 = vmatmul.mubr.msk.bf16.gmra.mrb[8].mxu1 %vm419_vm0, %v8898_v13  ;;  %6701 = vmatmul.mubr.msk.bf16.gmra.mrb[32].mxu0 %vm419_vm0, %v8898_v13  ;;  %v820_v48 = vmul.f32 %v8916_v3, %v8916_v3 }
 0x303   :  { %v7244_v21 = vpop.eup %7243  ;;  %v799_v24 = vmul.f32 0.015625, %v767_v32  ;;  %v764_v28 = vpop.xlane.xlu0 %763 }
 0x304   :  { %v7246_v6 = vpop.eup %7245  ;;  %v798_v15 = vmul.f32 0.015625, %v764_v28  ;;  %v939_v30 = vmul.f32 %v7244_v21, %v867_v2 }
 0x305   :  { %v847_v34 = vsub.f32 %v799_v24, %v823_v23  ;;  %v938_v37 = vmul.f32 %v7246_v6, %v866_v0 }
 0x306   :  { %v846_v53 = vsub.f32 %v798_v15, %v822_v25  ;;  %v761_v58 = vpop.xlane.xlu1 %760  ;;  %v969_v60 = vmul.f32 %v8782_v17, %v939_v30 }
 0x307   :  { %v7248_v59 = vpop.eup %7247  ;;  %v895_v16 = vadd.f32 1e-05, %v847_v34  ;;  %v797_v56 = vmul.f32 0.015625, %v761_v58  ;;  %v758_v50 = vpop.xlane.xlu0 %757  ;;  %v968_v57 = vmul.f32 %v8782_v17, %v938_v37 }
 0x308   :  { %v7250_v4 = vpop.eup %7249  ;;  %v894_v61 = vadd.f32 1e-05, %v846_v53  ;;  %v796_v36 = vmul.f32 0.015625, %v758_v50  ;;  %v937_v2 = vmul.f32 %v7248_v59, %v865_v43  ;;  %v999_v43 = vadd.f32 %v8787_v38, %v969_v60 }
 0x309   :  { %7251 = vrsqrt.f32 %v895_v16  ;;  %v845_v32 = vsub.f32 %v797_v56, %v821_v44  ;;  %v936_v21 = vmul.f32 %v7250_v4, %v864_v35  ;;  %v998_v34 = vadd.f32 %v8787_v38, %v968_v57 }
 0x30a   :  { %7253 = vrsqrt.f32 %v894_v61  ;;  %v844_v0 = vsub.f32 %v796_v36, %v820_v48  ;;  %v658_v23 = vpop.xlane.xlu1 %657  ;;  %v967_v24 = vmul.f32 %v8782_v17, %v937_v2  ;;  %v871_v16 = vsub.f32 %v8643_v10, %v8892_v8 }
 0x30b   :  { %v893_v28 = vadd.f32 1e-05, %v845_v32  ;;  %v655_v6 = vpop.xlane.xlu0 %654  ;;  %v966_v25 = vmul.f32 %v8782_v17, %v936_v21  ;;  %v8942_v48 = vpack.c.bf16 %v999_v43, %v998_v34  ;;  %v8950_v56 = vmul.f32 0.015625, %v658_v23 }
 0x30c   :  { %v892_v15 = vadd.f32 1e-05, %v844_v0  ;;  %v997_v30 = vadd.f32 %v8787_v38, %v967_v24  ;;  %v870_v4 = vsub.f32 %v8634_v5, %v8896_v11  ;;  %v8958_v61 = vmul.f32 0.015625, %v655_v6 }
 0x30d   :  { %7255 = vrsqrt.f32 %v893_v28  ;;  %v996_v37 = vadd.f32 %v8787_v38, %v966_v25  ;;  %v869_v28 = vsub.f32 %v8651_v14, %v8906_v19  ;;  %v868_v11 = vsub.f32 %v8637_v7, %v8916_v3 }
 0x30e   :  { %7257 = vrsqrt.f32 %v892_v15  ;;  %v652_v35 = vpop.xlane.xlu1 %651  ;;  %v827_v6 = vmul.f32 %v8950_v56, %v8950_v56  ;;  %v826_v34 = vmul.f32 %v8958_v61, %v8958_v61 }
 0x30f   :  { %v8936_v44 = vmul.f32 0.015625, %v652_v35  ;;  %v649_v53 = vpop.xlane.xlu0 %648  ;;  %v8938_v58 = vpack.c.bf16 %v997_v30, %v996_v37 }
 0x310   :  { %v8940_v59 = vmul.f32 0.015625, %v649_v53 }
 0x311   :  { %6672 = vmatprep.mubr.msk.bf16.mxu1 %vm419_vm0, %v8938_v58  ;;  %6704 = vmatprep.mubr.msk.bf16.mxu0 %vm419_vm0, %v8938_v58  ;;  %v825_v36 = vmul.f32 %v8936_v44, %v8936_v44 }
 0x312   :  { %v773_v50 = vpop.xlane.xlu1 %772  ;;  %6673 = vmatmul.mubr.msk.bf16.gmra.mrb[12].mxu1 %vm419_vm0, %v8942_v48  ;;  %6705 = vmatmul.mubr.msk.bf16.gmra.mrb[36].mxu0 %vm419_vm0, %v8942_v48  ;;  %v824_v32 = vmul.f32 %v8940_v59, %v8940_v59 }
 0x313   :  { %v7252_v60 = vpop.eup %7251  ;;  %v801_v2 = vmul.f32 0.015625, %v773_v50  ;;  %v770_v8 = vpop.xlane.xlu0 %769 }
 0x314   :  { %v7254_v57 = vpop.eup %7253  ;;  %v800_v21 = vmul.f32 0.015625, %v770_v8  ;;  %v943_v0 = vmul.f32 %v7252_v60, %v871_v16 }
 0x315   :  { %v849_v23 = vsub.f32 %v801_v2, %v825_v36  ;;  %v942_v24 = vmul.f32 %v7254_v57, %v870_v4 }
 0x316   :  { %v848_v25 = vsub.f32 %v800_v21, %v824_v32  ;;  %v779_v15 = vpop.xlane.xlu1 %778  ;;  %v973_v53 = vmul.f32 %v8782_v17, %v943_v0 }
 0x317   :  { %v7256_v30 = vpop.eup %7255  ;;  %v897_v43 = vadd.f32 1e-05, %v849_v23  ;;  %v803_v37 = vmul.f32 0.015625, %v779_v15  ;;  %v776_v35 = vpop.xlane.xlu0 %775  ;;  %v972_v3 = vmul.f32 %v8782_v17, %v942_v24 }
 0x318   :  { %v7258_v16 = vpop.eup %7257  ;;  %v896_v50 = vadd.f32 1e-05, %v848_v25  ;;  %v802_v19 = vmul.f32 0.015625, %v776_v35  ;;  %v941_v60 = vmul.f32 %v7256_v30, %v869_v28  ;;  %v1003_v25 = vadd.f32 %v8787_v38, %v973_v53 }
 0x319   :  { %7259 = vrsqrt.f32 %v897_v43  ;;  %v851_v4 = vsub.f32 %v803_v37, %v827_v6  ;;  %v940_v36 = vmul.f32 %v7258_v16, %v868_v11  ;;  %v1002_v0 = vadd.f32 %v8787_v38, %v972_v3 }
 0x31a   :  { %7261 = vrsqrt.f32 %v896_v50  ;;  %v850_v2 = vsub.f32 %v802_v19, %v826_v34  ;;  %v971_v8 = vmul.f32 %v8782_v17, %v941_v60  ;;  %v873_v6 = vsub.f32 %v8677_v40, %v8936_v44 }
 0x31b   :  { %v899_v57 = vadd.f32 1e-05, %v851_v4  ;;  %v970_v32 = vmul.f32 %v8782_v17, %v940_v36  ;;  %v1017_v11 = vpack.c.bf16 %v1003_v25, %v1002_v0  ;;  %v872_v30 = vsub.f32 %v8665_v29, %v8940_v59 }
 0x31c   :  { %v898_v21 = vadd.f32 1e-05, %v850_v2  ;;  %v1001_v23 = vadd.f32 %v8787_v38, %v971_v8  ;;  %v875_v35 = vsub.f32 %v8671_v33, %v8950_v56  ;;  %v874_v44 = vsub.f32 %v8662_v26, %v8958_v61 }
 0x31d   :  { %7263 = vrsqrt.f32 %v899_v57  ;;  %v1000_v24 = vadd.f32 %v8787_v38, %v970_v32 }
 0x31e   :  { %7265 = vrsqrt.f32 %v898_v21 }
 0x31f   :  { %v1016_v28 = vpack.c.bf16 %v1001_v23, %v1000_v24 }
 0x321   :  { %6676 = vmatprep.mubr.msk.bf16.mxu1 %vm419_vm0, %v1016_v28  ;;  %6708 = vmatprep.mubr.msk.bf16.mxu0 %vm419_vm0, %v1016_v28 }
 0x322   :  { %6677 = vmatmul.mubr.msk.bf16.gmra.mrb[16].mxu1 %vm419_vm0, %v1017_v11  ;;  %6709 = vmatmul.mubr.msk.bf16.gmra.mrb[40].mxu0 %vm419_vm0, %v1017_v11 }
 0x323   :  { %v7260_v15 = vpop.eup %7259 }
 0x324   :  { %v7262_v34 = vpop.eup %7261  ;;  %v945_v43 = vmul.f32 %v7260_v15, %v873_v6 }
 0x325   :  { %v944_v37 = vmul.f32 %v7262_v34, %v872_v30 }
 0x326   :  { %v975_v53 = vmul.f32 %v8782_v17, %v945_v43 }
 0x327   :  { %v7264_v16 = vpop.eup %7263  ;;  %v974_v50 = vmul.f32 %v8782_v17, %v944_v37 }
 0x328   :  { %v7266_v19 = vpop.eup %7265  ;;  %v1005_v60 = vadd.f32 %v8787_v38, %v975_v53  ;;  %v947_v3 = vmul.f32 %v7264_v16, %v875_v35 }
 0x329   :  { %v1004_v59 = vadd.f32 %v8787_v38, %v974_v50  ;;  %v946_v4 = vmul.f32 %v7266_v19, %v874_v44 }
 0x32a   :  { %v977_v36 = vmul.f32 %v8782_v17, %v947_v3 }
 0x32b   :  { %v1018_v2 = vpack.c.bf16 %v1005_v60, %v1004_v59  ;;  %v976_v56 = vmul.f32 %v8782_v17, %v946_v4  ;;  %v7167_v17 = vld [vmem:[#allocation26] sm:$0xff]  }
 0x32c   :  { %v1007_v8 = vadd.f32 %v8787_v38, %v977_v36  ;;  %6748 = vmatprep.subr.bf16.mxu0 %v7167_v17 }
 0x32d   :  { %6680 = vmatprep.mubr.msk.bf16.mxu1 %vm419_vm0, %v1018_v2  ;;  %6712 = vmatprep.mubr.msk.bf16.mxu0 %vm419_vm0, %v1018_v2  ;;  %v1006_v61 = vadd.f32 %v8787_v38, %v976_v56  ;;  %v7168_v38 = vld [vmem:[#allocation26 + $0x8] sm:$0xff]  }
 0x32e   :  { %6749 = vmatpush3.bf16.msra.mxu0 %v7167_v17 }
 0x32f   :  { %v1019_v57 = vpack.c.bf16 %v1007_v8, %v1006_v61  ;;  %6750 = vmatprep.subr.bf16.mxu0 %v7168_v38 }
 0x331   :  { %6681 = vmatmul.mubr.msk.bf16.gmra.mrb[20].mxu1 %vm419_vm0, %v1019_v57  ;;  %6713 = vmatmul.mubr.msk.bf16.gmra.mrb[44].mxu0 %vm419_vm0, %v1019_v57 }
 0x332   :  { %6724 = vmatprep.mubr.msk.bf16.mxu1 %vm419_vm0, %v8796_v55  ;;  %6751 = vmatpush3.bf16.msra.mxu0 %v7168_v38  ;;  %v7169_v55 = vld [vmem:[#allocation26 + $0x10] sm:$0xff]  }
 0x333   :  { %6752 = vmatprep.subr.bf16.mxu0 %v7169_v55 }
 0x336   :  { %6753 = vmatpush3.bf16.msra.mxu0 %v7169_v55 }
 0x339   :  { %6725 = vmatmul.mubr.msk.bf16.vlgmr.msra.gmra.mrb[24].mxu1 %vm419_vm0, %v8800_v62  ;;  %v7170_v62 = vld [vmem:[#allocation26 + $0x18] sm:$0xff]  }
 0x33a   :  { %6728 = vmatprep.mubr.msk.bf16.mxu1 %vm419_vm0, %v8850_v45  ;;  %6754 = vmatprep.subr.bf16.mxu0 %v7170_v62 }
 0x33b   :  { %6755 = vmatpush3.bf16.msra.mxu0 %v7170_v62 }
 0x341   :  { %6729 = vmatmul.mubr.msk.bf16.gmra.mrb[28].mxu1 %vm419_vm0, %v8854_v31 }
 0x342   :  { %6732 = vmatprep.mubr.msk.bf16.mxu1 %vm419_vm0, %v8894_v52 }
 0x349   :  { %6733 = vmatmul.mubr.msk.bf16.gmra.mrb[32].mxu1 %vm419_vm0, %v8898_v13 }
 0x34a   :  { %6736 = vmatprep.mubr.msk.bf16.mxu1 %vm419_vm0, %v8938_v58 }
 0x351   :  { %6737 = vmatmul.mubr.msk.bf16.gmra.mrb[36].mxu1 %vm419_vm0, %v8942_v48 }
 0x352   :  { %6740 = vmatprep.mubr.msk.bf16.mxu1 %vm419_vm0, %v1016_v28 }
 0x359   :  { %6741 = vmatmul.mubr.msk.bf16.gmra.mrb[40].mxu1 %vm419_vm0, %v1017_v11 }
 0x35a   :  { %6744 = vmatprep.mubr.msk.bf16.mxu1 %vm419_vm0, %v1018_v2 }
 0x361   :  { %6745 = vmatmul.mubr.msk.bf16.gmra.mrb[44].mxu1 %vm419_vm0, %v1019_v57 }
 0x3b5   :  { %v6662_v45 = vpop.f32.mrb[0].mxu1  ;;  %v9024_v31 = vpop.f32.mrb[24].mxu0 }
 0x3b6   :  { %11209 = vst [vmem:[#allocation63_spill] sm:$0xff] %v9024_v31  ;;  %v1129_v52 = vpop.f32.mrb[1].mxu1  ;;  %v9026_v13 = vpop.f32.mrb[25].mxu0  ;;  %v9085_v54 = vadd.f32 %v6662_v45, %v9080_v51 }
 0x3b7   :  { %11210 = vst [vmem:[#allocation64_spill] sm:$0xff] %v9026_v13  ;;  %v6663_v58 = vpop.f32.mrb[2].mxu1  ;;  %v9028_v48 = vpop.f32.mrb[26].mxu0  ;;  %v9088_v46 = vadd.f32 %v9080_v51, %v1129_v52 }
 0x3b8   :  { %11211 = vst [vmem:[#allocation65_spill] sm:$0xff] %v9028_v48  ;;  %v1132_v32 = vpop.f32.mrb[3].mxu1  ;;  %v9030_v21 = vpop.f32.mrb[27].mxu0  ;;  %v9091_v9 = vadd.f32 %v6663_v58, %v9080_v51 }
 0x3b9   :  { %11212 = vst [vmem:[#allocation66_spill] sm:$0xff] %v9030_v21  ;;  %v9094_v63 = vadd.f32 %v9080_v51, %v1132_v32 }
 0x3c5   :  { %v6666_v23 = vpop.f32.mrb[4].mxu1  ;;  %v9032_v0 = vpop.f32.mrb[28].mxu0 }
 0x3c6   :  { %11213 = vst [vmem:[#allocation67_spill] sm:$0xff] %v9032_v0  ;;  %v1145_v25 = vpop.f32.mrb[5].mxu1  ;;  %v9034_v24 = vpop.f32.mrb[29].mxu0  ;;  %v9097_v12 = vadd.f32 %v6666_v23, %v9080_v51 }
 0x3c7   :  { %11214 = vst [vmem:[#allocation68_spill] sm:$0xff] %v9034_v24  ;;  %v6667_v28 = vpop.f32.mrb[6].mxu1  ;;  %v9036_v11 = vpop.f32.mrb[30].mxu0  ;;  %v9100_v1 = vadd.f32 %v9080_v51, %v1145_v25 }
 0x3c8   :  { %11215 = vst [vmem:[#allocation69_spill] sm:$0xff] %v9036_v11  ;;  %v1148_v6 = vpop.f32.mrb[7].mxu1  ;;  %v9038_v15 = vpop.f32.mrb[31].mxu0  ;;  %v9103_v47 = vadd.f32 %v6667_v28, %v9080_v51 }
 0x3c9   :  { %11216 = vst [vmem:[#allocation70_spill] sm:$0xff] %v9038_v15  ;;  %v9106_v45 = vadd.f32 %v9080_v51, %v1148_v6 }
 0x3d5   :  { %v6670_v30 = vpop.f32.mrb[8].mxu1  ;;  %v9040_v34 = vpop.f32.mrb[32].mxu0 }
 0x3d6   :  { %11217 = vst [vmem:[#allocation71_spill] sm:$0xff] %v9040_v34  ;;  %v1161_v43 = vpop.f32.mrb[9].mxu1  ;;  %v9042_v37 = vpop.f32.mrb[33].mxu0  ;;  %v9109_v39 = vadd.f32 %v6670_v30, %v9080_v51 }
 0x3d7   :  { %11218 = vst [vmem:[#allocation72_spill] sm:$0xff] %v9042_v37  ;;  %v6671_v35 = vpop.f32.mrb[10].mxu1  ;;  %v9044_v53 = vpop.f32.mrb[34].mxu0  ;;  %v9112_v58 = vadd.f32 %v9080_v51, %v1161_v43 }
 0x3d8   :  { %11219 = vst [vmem:[#allocation73_spill] sm:$0xff] %v9044_v53  ;;  %v1164_v16 = vpop.f32.mrb[11].mxu1  ;;  %v9046_v44 = vpop.f32.mrb[35].mxu0  ;;  %v9115_v32 = vadd.f32 %v6671_v35, %v9080_v51 }
 0x3d9   :  { %11220 = vst [vmem:[#allocation74_spill] sm:$0xff] %v9046_v44  ;;  %v9119_v49 = vadd.f32 %v9080_v51, %v1164_v16 }
 0x3e5   :  { %v6674_v50 = vpop.f32.mrb[12].mxu1  ;;  %v9048_v19 = vpop.f32.mrb[36].mxu0 }
 0x3e6   :  { %11221 = vst [vmem:[#allocation75_spill] sm:$0xff] %v9048_v19  ;;  %v1177_v60 = vpop.f32.mrb[13].mxu1  ;;  %v9050_v3 = vpop.f32.mrb[37].mxu0  ;;  %v9122_v28 = vadd.f32 %v6674_v50, %v9080_v51 }
 0x3e7   :  { %11222 = vst [vmem:[#allocation76_spill] sm:$0xff] %v9050_v3  ;;  %v6675_v59 = vpop.f32.mrb[14].mxu1  ;;  %v9052_v4 = vpop.f32.mrb[38].mxu0  ;;  %v9125_v6 = vadd.f32 %v9080_v51, %v1177_v60 }
 0x3e8   :  { %11223 = vst [vmem:[#allocation77_spill] sm:$0xff] %v9052_v4  ;;  %v1180_v36 = vpop.f32.mrb[15].mxu1  ;;  %v9054_v2 = vpop.f32.mrb[39].mxu0 }
 0x3e9   :  { %11224 = vst [vmem:[#allocation78_spill] sm:$0xff] %v9054_v2 }
 0x3f5   :  { %v6678_v56 = vpop.f32.mrb[16].mxu1  ;;  %v9056_v8 = vpop.f32.mrb[40].mxu0 }
 0x3f6   :  { %11225 = vst [vmem:[#allocation79_spill] sm:$0xff] %v9056_v8  ;;  %v1193_v61 = vpop.f32.mrb[17].mxu1  ;;  %v9058_v57 = vpop.f32.mrb[41].mxu0  ;;  %v9129_v43 = vadd.f32 %v6678_v56, %v9080_v51 }
 0x3f7   :  { %11226 = vst [vmem:[#allocation80_spill] sm:$0xff] %v9058_v57  ;;  %v6679_v17 = vpop.f32.mrb[18].mxu1  ;;  %v9060_v38 = vpop.f32.mrb[42].mxu0  ;;  %v9132_v35 = vadd.f32 %v9080_v51, %v1193_v61 }
 0x3f8   :  { %11227 = vst [vmem:[#allocation81_spill] sm:$0xff] %v9060_v38  ;;  %v1196_v55 = vpop.f32.mrb[19].mxu1  ;;  %v9062_v62 = vpop.f32.mrb[43].mxu0  ;;  %v9136_v22 = vadd.f32 %v6679_v17, %v9080_v51 }
 0x3f9   :  { %11228 = vst [vmem:[#allocation82_spill] sm:$0xff] %v9062_v62  ;;  %v9139_v50 = vadd.f32 %v9080_v51, %v1196_v55 }
 0x404   :  { %v9064_v40 = vpop.f32.mrb[20].mxu1  ;;  %v9066_v33 = vpop.f32.mrb[44].mxu0 }
 0x405   :  { %11229 = vst [vmem:[#allocation83_spill] sm:$0xff] %v9066_v33  ;;  %v9068_v29 = vpop.f32.mrb[21].mxu1  ;;  %v9070_v26 = vpop.f32.mrb[45].mxu0 }
 0x406   :  { %11230 = vst [vmem:[#allocation84_spill] sm:$0xff] %v9070_v26  ;;  %v9072_v14 = vpop.f32.mrb[22].mxu1  ;;  %v9074_v10 = vpop.f32.mrb[46].mxu0 }
 0x407   :  { %11231 = vst [vmem:[#allocation85_spill] sm:$0xff] %v9074_v10  ;;  %v9076_v7 = vpop.f32.mrb[23].mxu1  ;;  %v9078_v5 = vpop.f32.mrb[47].mxu0 }
 0x408   :  { %11232 = vst [vmem:[#allocation86_spill] sm:$0xff] %v9078_v5 }
 0x40c   :  { %v6726_v52 = vpop.f32.mrb[24].mxu1 }
 0x40d   :  { %v1474_v23 = vadd.f32 %v6726_v52, %v9082_v42  ;;  %v1465_v25 = vpop.f32.mrb[25].mxu1 }
 0x40e   :  { %v1466_v30 = vadd.f32 %v9082_v42, %v1465_v25  ;;  %v6727_v41 = vpop.f32.mrb[26].mxu1 }
 0x40f   :  { %v1562_v52 = vmul.f32 0.35355338, %v1474_v23  ;;  %v1477_v27 = vadd.f32 %v6727_v41, %v9082_v42  ;;  %v1468_v16 = vpop.f32.mrb[27].mxu1 }
 0x410   :  { %v1560_v60 = vmul.f32 0.35355338, %v1466_v30  ;;  %v1469_v25 = vadd.f32 %v9082_v42, %v1468_v16  ;;  %v9157_v16 = vadd.f32 %v6675_v59, %v9080_v51 }
 0x411   :  { %v1586_v20 = vmul.f32 %v1562_v52, %v9085_v54  ;;  %v9144_v56 = vmul.f32 %v1562_v52, %v9109_v39  ;;  %v9147_v61 = vmul.f32 %v1562_v52, %v9129_v43  ;;  %v1563_v23 = vmul.f32 0.35355338, %v1477_v27 }
 0x412   :  { %v1584_v41 = vmul.f32 %v1560_v60, %v9088_v46  ;;  %v9151_v17 = vmul.f32 %v1560_v60, %v9112_v58  ;;  %v9154_v55 = vmul.f32 %v1560_v60, %v9132_v35  ;;  %v1561_v30 = vmul.f32 0.35355338, %v1469_v25 }
 0x413   :  { %v1587_v18 = vmul.f32 %v1563_v23, %v9091_v9  ;;  %v9161_v5 = vmul.f32 %v1563_v23, %v9115_v32  ;;  %v9164_v52 = vmul.f32 %v1563_v23, %v9136_v22  ;;  %v9167_v27 = vadd.f32 %v9080_v51, %v1180_v36 }
 0x414   :  { %v1585_v2 = vmul.f32 %v1561_v30, %v9094_v63  ;;  %v9171_v60 = vmul.f32 %v1561_v30, %v9119_v49  ;;  %v9174_v25 = vmul.f32 %v1561_v30, %v9139_v50  ;;  %v6730_v59 = vpop.f32.mrb[28].mxu1 }
 0x415   :  { %v1657_v15 = vpack.c.bf16 %v1587_v18, %v1586_v20  ;;  %v1490_v10 = vadd.f32 %v6730_v59, %v9082_v42  ;;  %v1481_v4 = vpop.f32.mrb[29].mxu1  ;;  %v9188_v18 = vadd.f32 %v9064_v40, %v9080_v51  ;;  %v9192_v20 = vadd.f32 %v9080_v51, %v9068_v29 }
 0x416   :  { %v1482_v11 = vadd.f32 %v9082_v42, %v1481_v4  ;;  %v6731_v26 = vpop.f32.mrb[30].mxu1  ;;  %v1656_v3 = vpack.c.bf16 %v1585_v2, %v1584_v41  ;;  %v1660_v33 = vpack.c.bf16 %v9171_v60, %v9151_v17  ;;  %v9197_v2 = vadd.f32 %v9072_v14, %v9080_v51 }
 0x417   :  { %v1566_v59 = vmul.f32 0.35355338, %v1490_v10  ;;  %v1493_v36 = vadd.f32 %v6731_v26, %v9082_v42  ;;  %v1484_v4 = vpop.f32.mrb[31].mxu1  ;;  %v9201_v41 = vadd.f32 %v9080_v51, %v9076_v7 }
 0x418   :  { %v1564_v17 = vmul.f32 0.35355338, %v1482_v11  ;;  %v1485_v40 = vadd.f32 %v9082_v42, %v1484_v4  ;;  %6756 = vmatprep.mubr.msk.bf16.mxu0 %vm419_vm0, %v1656_v3 }
 0x419   :  { %v1590_v29 = vmul.f32 %v1566_v59, %v9097_v12  ;;  %v9207_v10 = vmul.f32 %v1566_v59, %v9122_v28  ;;  %v9210_v26 = vmul.f32 %v1566_v59, %v9188_v18  ;;  %v1567_v60 = vmul.f32 0.35355338, %v1493_v36  ;;  %6757 = vmatmul.mubr.msk.bf16.vlgmr.msra.gmra.mrb[48].mxu0 %vm419_vm0, %v1657_v15 }
 0x41a   :  { %v1588_v14 = vmul.f32 %v1564_v17, %v9100_v1  ;;  %v9215_v7 = vmul.f32 %v1564_v17, %v9125_v6  ;;  %v9218_v51 = vmul.f32 %v1564_v17, %v9192_v20  ;;  %v1565_v11 = vmul.f32 0.35355338, %v1485_v40 }
 0x41b   :  { %v1591_v3 = vmul.f32 %v1567_v60, %v9103_v47  ;;  %v9222_v4 = vmul.f32 %v1567_v60, %v9157_v16  ;;  %v9225_v59 = vmul.f32 %v1567_v60, %v9197_v2 }
 0x41c   :  { %v1589_v36 = vmul.f32 %v1565_v11, %v9106_v45  ;;  %v1597_v15 = vmul.f32 %v1565_v11, %v9167_v27  ;;  %v9230_v30 = vmul.f32 %v1565_v11, %v9201_v41  ;;  %v6734_v23 = vpop.f32.mrb[32].mxu1 }
 0x41d   :  { %v1506_v17 = vadd.f32 %v6734_v23, %v9082_v42  ;;  %v1497_v62 = vpop.f32.mrb[33].mxu1  ;;  %v1659_v40 = vpack.c.bf16 %v1591_v3, %v1590_v29 }
 0x41e   :  { %v1498_v60 = vadd.f32 %v9082_v42, %v1497_v62  ;;  %v6735_v8 = vpop.f32.mrb[34].mxu1  ;;  %v1658_v19 = vpack.c.bf16 %v1589_v36, %v1588_v14  ;;  %v1662_v44 = vpack.c.bf16 %v1597_v15, %v9215_v7 }
 0x41f   :  { %v1570_v53 = vmul.f32 0.35355338, %v1506_v17  ;;  %v1509_v23 = vadd.f32 %v6735_v8, %v9082_v42  ;;  %v1500_v37 = vpop.f32.mrb[35].mxu1 }
 0x420   :  { %v1568_v29 = vmul.f32 0.35355338, %v1498_v60  ;;  %v1501_v3 = vadd.f32 %v9082_v42, %v1500_v37  ;;  %6760 = vmatprep.mubr.msk.bf16.mxu0 %vm419_vm0, %v1658_v19 }
 0x421   :  { %v9245_v57 = vmul.f32 %v1570_v53, %v9085_v54  ;;  %v9248_v62 = vmul.f32 %v1570_v53, %v9109_v39  ;;  %v9251_v14 = vmul.f32 %v1570_v53, %v9129_v43  ;;  %v1571_v7 = vmul.f32 0.35355338, %v1509_v23  ;;  %6761 = vmatmul.mubr.msk.bf16.gmra.mrb[52].mxu0 %vm419_vm0, %v1659_v40 }
 0x422   :  { %v9255_v8 = vmul.f32 %v1568_v29, %v9088_v46  ;;  %v9258_v36 = vmul.f32 %v1568_v29, %v9112_v58  ;;  %v9261_v37 = vmul.f32 %v1568_v29, %v9132_v35  ;;  %v1569_v19 = vmul.f32 0.35355338, %v1501_v3  ;;  %6764 = vmatprep.mubr.msk.bf16.mxu0 %vm419_vm0, %v1660_v33 }
 0x423   :  { %11233 = vst [vmem:[#allocation87_spill] sm:$0xff] %v9248_v62  ;;  %11234 = vst [vmem:[#allocation88_spill] sm:$0xff] %v9251_v14  ;;  %v9265_v15 = vmul.f32 %v1571_v7, %v9091_v9  ;;  %v9268_v53 = vmul.f32 %v1571_v7, %v9115_v32  ;;  %v9271_v17 = vmul.f32 %v1571_v7, %v9136_v22 }
 0x424   :  { %11235 = vst [vmem:[#allocation89_spill] sm:$0xff] %v9258_v36  ;;  %11236 = vst [vmem:[#allocation90_spill] sm:$0xff] %v9261_v37  ;;  %v9274_v40 = vmul.f32 %v1569_v19, %v9094_v63  ;;  %v9277_v60 = vmul.f32 %v1569_v19, %v9119_v49  ;;  %v9280_v23 = vmul.f32 %v1569_v19, %v9139_v50  ;;  %v6738_v29 = vpop.f32.mrb[36].mxu1 }
 0x425   :  { %11237 = vst [vmem:[#allocation91_spill] sm:$0xff] %v9268_v53  ;;  %11238 = vst [vmem:[#allocation92_spill] sm:$0xff] %v9271_v17  ;;  %v1522_v33 = vadd.f32 %v6738_v29, %v9082_v42  ;;  %v1513_v3 = vpop.f32.mrb[37].mxu1  ;;  %v11241_v29 = vpack.c.bf16 %v9161_v5, %v9144_v56 }
 0x426   :  { %11239 = vst [vmem:[#allocation93_spill] sm:$0xff] %v9280_v23  ;;  %v1514_v34 = vadd.f32 %v9082_v42, %v1513_v3  ;;  %v6739_v24 = vpop.f32.mrb[38].mxu1 }
 0x427   :  { %v1574_v21 = vmul.f32 0.35355338, %v1522_v33  ;;  %v1525_v11 = vadd.f32 %v6739_v24, %v9082_v42  ;;  %v1516_v48 = vpop.f32.mrb[39].mxu1 }
 0x428   :  { %v1572_v7 = vmul.f32 0.35355338, %v1514_v34  ;;  %v1517_v13 = vadd.f32 %v9082_v42, %v1516_v48 }
 0x429   :  { %v9299_v38 = vmul.f32 %v1574_v21, %v9097_v12  ;;  %v9302_v3 = vmul.f32 %v1574_v21, %v9122_v28  ;;  %v9305_v19 = vmul.f32 %v1574_v21, %v9188_v18  ;;  %v1575_v0 = vmul.f32 0.35355338, %v1525_v11  ;;  %6765 = vmatmul.mubr.msk.bf16.gmra.mrb[56].mxu0 %vm419_vm0, %v11241_v29 }
 0x42a   :  { %v9312_v24 = vmul.f32 %v1572_v7, %v9100_v1  ;;  %v9315_v48 = vmul.f32 %v1572_v7, %v9125_v6  ;;  %v9318_v34 = vmul.f32 %v1572_v7, %v9192_v20  ;;  %v1573_v33 = vmul.f32 0.35355338, %v1517_v13  ;;  %6768 = vmatprep.mubr.msk.bf16.mxu0 %vm419_vm0, %v1662_v44 }
 0x42b   :  { %11240 = vst [vmem:[#allocation94_spill] sm:$0xff] %v9302_v3  ;;  %v9322_v21 = vmul.f32 %v1575_v0, %v9103_v47  ;;  %v9325_v11 = vmul.f32 %v1575_v0, %v9157_v16  ;;  %v9328_v5 = vmul.f32 %v1575_v0, %v9197_v2 }
 0x42c   :  { %v9331_v56 = vmul.f32 %v1573_v33, %v9106_v45  ;;  %v9334_v29 = vmul.f32 %v1573_v33, %v9167_v27  ;;  %v9337_v7 = vmul.f32 %v1573_v33, %v9201_v41  ;;  %v6742_v13 = vpop.f32.mrb[40].mxu1 }
 0x42d   :  { %v1538_v44 = vadd.f32 %v6742_v13, %v9082_v42  ;;  %v1529_v31 = vpop.f32.mrb[41].mxu1  ;;  %v11242_v13 = vpack.c.bf16 %v9222_v4, %v9207_v10 }
 0x42e   :  { %v1530_v37 = vadd.f32 %v9082_v42, %v1529_v31  ;;  %v6743_v23 = vpop.f32.mrb[42].mxu1 }
 0x42f   :  { %v1578_v53 = vmul.f32 0.35355338, %v1538_v44  ;;  %v1541_v14 = vadd.f32 %v6743_v23, %v9082_v42  ;;  %v1532_v36 = vpop.f32.mrb[43].mxu1 }
 0x430   :  { %v1576_v0 = vmul.f32 0.35355338, %v1530_v37  ;;  %v1533_v3 = vadd.f32 %v9082_v42, %v1532_v36 }
 0x431   :  { %v9356_v17 = vmul.f32 %v1578_v53, %v9085_v54  ;;  %v9359_v31 = vmul.f32 %v1578_v53, %v9109_v39  ;;  %v9362_v33 = vmul.f32 %v1578_v53, %v9129_v43  ;;  %v1579_v62 = vmul.f32 0.35355338, %v1541_v14  ;;  %6769 = vmatmul.mubr.msk.bf16.gmra.mrb[60].mxu0 %vm419_vm0, %v11242_v13 }
 0x432   :  { %v9369_v23 = vmul.f32 %v1576_v0, %v9088_v46  ;;  %v9372_v36 = vmul.f32 %v1576_v0, %v9112_v58  ;;  %v9375_v54 = vmul.f32 %v1576_v0, %v9132_v35  ;;  %v1577_v39 = vmul.f32 0.35355338, %v1533_v3 }
 0x433   :  { %v11243_v43 = vpack.c.bf16 %v9174_v25, %v9154_v55  ;;  %v1635_v14 = vmul.f32 %v1579_v62, %v9091_v9  ;;  %v1643_v10 = vmul.f32 %v1579_v62, %v9115_v32  ;;  %v9384_v4 = vmul.f32 %v1579_v62, %v9136_v22 }
 0x434   :  { %v1633_v46 = vmul.f32 %v1577_v39, %v9094_v63  ;;  %v1641_v58 = vmul.f32 %v1577_v39, %v9119_v49  ;;  %v1649_v35 = vmul.f32 %v1577_v39, %v9139_v50  ;;  %v6746_v37 = vpop.f32.mrb[44].mxu1 }
 0x435   :  { %6772 = vmatprep.mubr.msk.bf16.mxu0 %vm419_vm0, %v11243_v43  ;;  %v1554_v53 = vadd.f32 %v6746_v37, %v9082_v42  ;;  %v1545_v3 = vpop.f32.mrb[45].mxu1  ;;  %v1681_v55 = vpack.c.bf16 %v1635_v14, %v9356_v17  ;;  %v1685_v25 = vpack.c.bf16 %v1643_v10, %v9359_v31  ;;  %v1689_v9 = vpack.c.bf16 %v9384_v4, %v9362_v33 }
 0x436   :  { %v1546_v22 = vadd.f32 %v9082_v42, %v1545_v3  ;;  %v6747_v32 = vpop.f32.mrb[46].mxu1  ;;  %v1680_v63 = vpack.c.bf16 %v1633_v46, %v9369_v23  ;;  %v1684_v49 = vpack.c.bf16 %v1641_v58, %v9372_v36  ;;  %v1688_v50 = vpack.c.bf16 %v1649_v35, %v9375_v54 }
 0x437   :  { %v1582_v62 = vmul.f32 0.35355338, %v1554_v53  ;;  %v1557_v44 = vadd.f32 %v6747_v32, %v9082_v42  ;;  %v1548_v0 = vpop.f32.mrb[47].mxu1  ;;  %v11244_v23 = vpack.c.bf16 %v9164_v52, %v9147_v61 }
 0x438   :  { %v1580_v13 = vmul.f32 0.35355338, %v1546_v22  ;;  %v1549_v17 = vadd.f32 %v9082_v42, %v1548_v0 }
 0x439   :  { %v1638_v31 = vmul.f32 %v1582_v62, %v9097_v12  ;;  %v1646_v33 = vmul.f32 %v1582_v62, %v9122_v28  ;;  %v1654_v39 = vmul.f32 %v1582_v62, %v9188_v18  ;;  %v1583_v43 = vmul.f32 0.35355338, %v1557_v44  ;;  %6773 = vmatmul.mubr.msk.bf16.gmra.mrb[64].mxu0 %vm419_vm0, %v11244_v23 }
 0x43a   :  { %v1636_v36 = vmul.f32 %v1580_v13, %v9100_v1  ;;  %v1644_v54 = vmul.f32 %v1580_v13, %v9125_v6  ;;  %v1652_v14 = vmul.f32 %v1580_v13, %v9192_v20  ;;  %v1581_v10 = vmul.f32 0.35355338, %v1549_v17 }
 0x43b   :  { %v11245_v12 = vpack.c.bf16 %v9230_v30, %v9218_v51  ;;  %v1639_v42 = vmul.f32 %v1583_v43, %v9103_v47  ;;  %v1647_v28 = vmul.f32 %v1583_v43, %v9157_v16  ;;  %v1655_v61 = vmul.f32 %v1583_v43, %v9197_v2  ;;  %v11251_v2 = vld [vmem:[#allocation89_spill] sm:$0xff] }
 0x43c   :  { %v1637_v52 = vmul.f32 %v1581_v10, %v9106_v45  ;;  %v1645_v1 = vmul.f32 %v1581_v10, %v9167_v27  ;;  %v1653_v6 = vmul.f32 %v1581_v10, %v9201_v41  ;;  %v11246_v51 = vpack.c.bf16 %v9225_v59, %v9210_v26  ;;  %v11253_v26 = vld [vmem:[#allocation91_spill] sm:$0xff] }
 0x43d   :  { %6776 = vmatprep.mubr.msk.bf16.mxu0 %vm419_vm0, %v11245_v12  ;;  %v1683_v18 = vpack.c.bf16 %v1639_v42, %v1638_v31  ;;  %v1687_v20 = vpack.c.bf16 %v1647_v28, %v1646_v33  ;;  %v1691_v4 = vpack.c.bf16 %v1655_v61, %v1654_v39  ;;  %v11247_v47 = vpack.c.bf16 %v9274_v40, %v9255_v8  ;;  %v11254_v59 = vld [vmem:[#allocation87_spill] sm:$0xff]  ;;  %v11259_v40 = vld [vmem:[#allocation93_spill] sm:$0xff]  ;;  %v11268_v42 = vld [vmem:[#allocation64_spill] sm:$0xff] }
 0x43e   :  { %v1682_v46 = vpack.c.bf16 %v1637_v52, %v1636_v36  ;;  %v1686_v58 = vpack.c.bf16 %v1645_v1, %v1644_v54  ;;  %v1690_v30 = vpack.c.bf16 %v1653_v6, %v1652_v14  ;;  %v11248_v45 = vpack.c.bf16 %v9265_v15, %v9245_v57  ;;  %v11257_v15 = vld [vmem:[#allocation94_spill] sm:$0xff]  ;;  %v9517_v14 = vld [vmem:[#allocation14] ss:$0 sm:$0xff]  ;;  %v11267_v10 = vld [vmem:[#allocation63_spill] sm:$0xff] }
 0x43f   :  { %v11249_v16 = vpack.c.bf16 %v9331_v56, %v9312_v24  ;;  %v11250_v27 = vpack.c.bf16 %v9322_v21, %v9299_v38  ;;  %v11252_v41 = vpack.c.bf16 %v9277_v60, %v11251_v2  ;;  %v11255_v57 = vpack.c.bf16 %v11253_v26, %v11254_v59  ;;  %v11260_v24 = vld [vmem:[#allocation90_spill] sm:$0xff]  ;;  %v11262_v21 = vld [vmem:[#allocation92_spill] sm:$0xff]  ;;  %v11269_v61 = vld [vmem:[#allocation65_spill] sm:$0xff] }
 0x440   :  { %v11256_v8 = vpack.c.bf16 %v9334_v29, %v9315_v48  ;;  %v11258_v38 = vpack.c.bf16 %v9325_v11, %v11257_v15  ;;  %v11261_v60 = vpack.c.bf16 %v11259_v40, %v11260_v24  ;;  %v11263_v56 = vld [vmem:[#allocation88_spill] sm:$0xff]  ;;  %v11265_v48 = vpack.c.bf16 %v9337_v7, %v9318_v34  ;;  %v7172_v34 = vld [vmem:[#allocation16 + $0x8] sm:$0xff]   ;;  %v7174_v29 = vld [vmem:[#allocation16 + $0x18] sm:$0xff]  }
 0x441   :  { %6777 = vmatmul.mubr.msk.bf16.gmra.mrb[68].mxu0 %vm419_vm0, %v11246_v51  ;;  %v11264_v35 = vpack.c.bf16 %v11262_v21, %v11263_v56  ;;  %v11266_v11 = vpack.c.bf16 %v9328_v5, %v9305_v19  ;;  %v7171_v19 = vld [vmem:[#allocation16] sm:$0xff]   ;;  %v7173_v5 = vld [vmem:[#allocation16 + $0x10] sm:$0xff]   ;;  %v9521_v12 = vadd.f32 %v11267_v10, %v9517_v14  ;;  %v9525_v28 = vadd.f32 %v9517_v14, %v11268_v42  ;;  %v11275_v2 = vld [vmem:[#allocation73_spill] sm:$0xff] }
 0x442   :  { %6780 = vmatprep.mubr.msk.bf16.mxu0 %vm419_vm0, %v11247_v47  ;;  %6828 = vmatprep.subr.bf16.mxu1 %v7171_v19  ;;  %v9529_v52 = vadd.f32 %v11269_v61, %v9517_v14  ;;  %v11270_v1 = vld [vmem:[#allocation66_spill] sm:$0xff] }
 0x443   :  { %6829 = vmatpush3.bf16.msra.mxu1 %v7171_v19  ;;  %v9533_v6 = vadd.f32 %v9517_v14, %v11270_v1  ;;  %v11276_v26 = vld [vmem:[#allocation74_spill] sm:$0xff] }
 0x444   :  { %6830 = vmatprep.subr.bf16.mxu1 %v7172_v34  ;;  %v9557_v59 = vadd.f32 %v9517_v14, %v11276_v26 }
 0x447   :  { %6831 = vmatpush3.bf16.msra.mxu1 %v7172_v34 }
 0x448   :  { %6832 = vmatprep.subr.bf16.mxu1 %v7173_v5 }
 0x449   :  { %6781 = vmatmul.mubr.msk.bf16.gmra.mrb[72].mxu0 %vm419_vm0, %v11248_v45 }
 0x44a   :  { %6784 = vmatprep.mubr.msk.bf16.mxu0 %vm419_vm0, %v11249_v16  ;;  %v11274_v16 = vld [vmem:[#allocation72_spill] sm:$0xff] }
 0x44b   :  { %6833 = vmatpush3.bf16.msra.mxu1 %v7173_v5 }
 0x44c   :  { %6834 = vmatprep.subr.bf16.mxu1 %v7174_v29 }
 0x44f   :  { %6835 = vmatpush3.bf16.msra.mxu1 %v7174_v29  ;;  %v11277_v29 = vld [vmem:[#allocation75_spill] sm:$0xff] }
 0x451   :  { %6785 = vmatmul.mubr.msk.bf16.gmra.mrb[76].mxu0 %vm419_vm0, %v11250_v27  ;;  %v9549_v27 = vadd.f32 %v9517_v14, %v11274_v16 }
 0x452   :  { %6788 = vmatprep.mubr.msk.bf16.mxu0 %vm419_vm0, %v11252_v41  ;;  %v9553_v41 = vadd.f32 %v11275_v2, %v9517_v14 }
 0x459   :  { %6789 = vmatmul.mubr.msk.bf16.gmra.mrb[80].mxu0 %vm419_vm0, %v11255_v57 }
 0x45a   :  { %6792 = vmatprep.mubr.msk.bf16.mxu0 %vm419_vm0, %v11256_v8 }
 0x461   :  { %6793 = vmatmul.mubr.msk.bf16.gmra.mrb[84].mxu0 %vm419_vm0, %v11258_v38 }
 0x462   :  { %6796 = vmatprep.mubr.msk.bf16.mxu0 %vm419_vm0, %v11261_v60 }
 0x469   :  { %6797 = vmatmul.mubr.msk.bf16.gmra.mrb[88].mxu0 %vm419_vm0, %v11264_v35 }
 0x46a   :  { %6800 = vmatprep.mubr.msk.bf16.mxu0 %vm419_vm0, %v11265_v48 }
 0x471   :  { %6801 = vmatmul.mubr.msk.bf16.gmra.mrb[92].mxu0 %vm419_vm0, %v11266_v11 }
 0x472   :  { %6804 = vmatprep.mubr.msk.bf16.mxu0 %vm419_vm0, %v1680_v63 }
 0x479   :  { %6805 = vmatmul.mubr.msk.bf16.gmra.mrb[96].mxu0 %vm419_vm0, %v1681_v55 }
 0x47a   :  { %6808 = vmatprep.mubr.msk.bf16.mxu0 %vm419_vm0, %v1682_v46  ;;  %v11272_v46 = vld [vmem:[#allocation68_spill] sm:$0xff] }
 0x481   :  { %6809 = vmatmul.mubr.msk.bf16.gmra.mrb[100].mxu0 %vm419_vm0, %v1683_v18 }
 0x482   :  { %6812 = vmatprep.mubr.msk.bf16.mxu0 %vm419_vm0, %v1684_v49 }
 0x489   :  { %6813 = vmatmul.mubr.msk.bf16.gmra.mrb[104].mxu0 %vm419_vm0, %v1685_v25 }
 0x48a   :  { %6816 = vmatprep.mubr.msk.bf16.mxu0 %vm419_vm0, %v1686_v58  ;;  %v9541_v58 = vadd.f32 %v9517_v14, %v11272_v46 }
 0x491   :  { %6817 = vmatmul.mubr.msk.bf16.gmra.mrb[108].mxu0 %vm419_vm0, %v1687_v20  ;;  %v11271_v20 = vld [vmem:[#allocation67_spill] sm:$0xff] }
 0x492   :  { %6820 = vmatprep.mubr.msk.bf16.mxu0 %vm419_vm0, %v1688_v50 }
 0x499   :  { %6821 = vmatmul.mubr.msk.bf16.gmra.mrb[112].mxu0 %vm419_vm0, %v1689_v9 }
 0x49a   :  { %6824 = vmatprep.mubr.msk.bf16.mxu0 %vm419_vm0, %v1690_v30  ;;  %v11273_v30 = vld [vmem:[#allocation71_spill] sm:$0xff] }
 0x49b   :  { %v9545_v51 = vadd.f32 %v11273_v30, %v9517_v14 }
 0x4a1   :  { %6825 = vmatmul.mubr.msk.bf16.gmra.mrb[116].mxu0 %vm419_vm0, %v1691_v4  ;;  %v9537_v4 = vadd.f32 %v11271_v20, %v9517_v14 }
 0x4ec   :  { %v6758_v7 = vpop.f32.mrb[48].mxu0 }
 0x4ed   :  { %v1858_v37 = vpop.f32.mrb[49].mxu0 }
 0x4ee   :  { %v9484_v53 = vpop.f32.mrb[50].mxu0 }
 0x4ef   :  { %v9486_v3 = vpop.f32.mrb[51].mxu0 }
 0x4f4   :  { %v9488_v55 = vpop.f32.mrb[52].mxu0 }
 0x4f5   :  { %v9490_v25 = vpop.f32.mrb[53].mxu0 }
 0x4f6   :  { %v9492_v9 = vpop.f32.mrb[54].mxu0 }
 0x4f7   :  { %v9494_v22 = vpop.f32.mrb[55].mxu0 }
 0x4fc   :  { %v6766_v32 = vpop.f32.mrb[56].mxu0 }
 0x4fd   :  { %v2147_v63 = vmax.f32 %v6758_v7, %v6766_v32  ;;  %v1890_v49 = vpop.f32.mrb[57].mxu0 }
 0x4fe   :  { %v2145_v50 = vmax.f32 %v1858_v37, %v1890_v49  ;;  %v6767_v62 = vpop.f32.mrb[58].mxu0 }
 0x4ff   :  { %v2148_v44 = vmax.f32 %v9484_v53, %v6767_v62  ;;  %v9497_v0 = vpop.f32.mrb[59].mxu0 }
 0x500   :  { %v2146_v13 = vmax.f32 %v9486_v3, %v9497_v0 }
 0x504   :  { %v9501_v17 = vpop.f32.mrb[60].mxu0 }
 0x505   :  { %v2151_v31 = vmax.f32 %v9488_v55, %v9501_v17  ;;  %v9505_v33 = vpop.f32.mrb[61].mxu0 }
 0x506   :  { %v2149_v39 = vmax.f32 %v9490_v25, %v9505_v33  ;;  %v9509_v43 = vpop.f32.mrb[62].mxu0 }
 0x507   :  { %v2152_v23 = vmax.f32 %v9492_v9, %v9509_v43  ;;  %v9513_v36 = vpop.f32.mrb[63].mxu0 }
 0x508   :  { %v2150_v54 = vmax.f32 %v9494_v22, %v9513_v36 }
 0x50c   :  { %v6774_v18 = vpop.f32.mrb[64].mxu0 }
 0x50d   :  { %v2171_v47 = vmax.f32 %v2147_v63, %v6774_v18  ;;  %v1922_v45 = vpop.f32.mrb[65].mxu0  ;;  %v9562_v63 = vadd.f32 %v11277_v29, %v9517_v14 }
 0x50e   :  { %v2169_v57 = vmax.f32 %v2145_v50, %v1922_v45  ;;  %v6775_v8 = vpop.f32.mrb[66].mxu0  ;;  %v11278_v50 = vld [vmem:[#allocation79_spill] sm:$0xff] }
 0x50f   :  { %v2195_v15 = vsub.f32 %v6758_v7, %v2171_v47  ;;  %v2291_v38 = vsub.f32 %v6766_v32, %v2171_v47  ;;  %v2435_v40 = vsub.f32 %v6774_v18, %v2171_v47  ;;  %v2172_v24 = vmax.f32 %v2148_v44, %v6775_v8  ;;  %v1925_v60 = vpop.f32.mrb[67].mxu0 }
 0x510   :  { %v2193_v21 = vsub.f32 %v1858_v37, %v2169_v57  ;;  %v2289_v56 = vsub.f32 %v1890_v49, %v2169_v57  ;;  %v2433_v35 = vsub.f32 %v1922_v45, %v2169_v57  ;;  %v2170_v48 = vmax.f32 %v2146_v13, %v1925_v60 }
 0x511   :  { %v2221_v11 = vmul.f32 1.442695, %v2195_v15  ;;  %v2317_v19 = vmul.f32 1.442695, %v2291_v38  ;;  %v2461_v34 = vmul.f32 1.442695, %v2435_v40  ;;  %v2196_v5 = vsub.f32 %v9484_v53, %v2172_v24 }
 0x512   :  { %v9566_v7 = vadd.f32 %v11278_v50, %v9517_v14  ;;  %v2217_v32 = vmul.f32 1.442695, %v2193_v21  ;;  %v2292_v44 = vsub.f32 %v6767_v62, %v2172_v24  ;;  %v2313_v37 = vmul.f32 1.442695, %v2289_v56  ;;  %v11282_v56 = vld [vmem:[#allocation83_spill] sm:$0xff] }
 0x513   :  { %7267 = vpow2.f32 %v2221_v11  ;;  %v2436_v49 = vsub.f32 %v6775_v8, %v2172_v24  ;;  %v2194_v13 = vsub.f32 %v9486_v3, %v2170_v48  ;;  %v2457_v10 = vmul.f32 1.442695, %v2433_v35  ;;  %v11279_v8 = vld [vmem:[#allocation80_spill] sm:$0xff] }
 0x514   :  { %7269 = vpow2.f32 %v2317_v19  ;;  %v2290_v42 = vsub.f32 %v9497_v0, %v2170_v48  ;;  %v2434_v53 = vsub.f32 %v1925_v60, %v2170_v48  ;;  %v6778_v61 = vpop.f32.mrb[68].mxu0  ;;  %v2223_v1 = vmul.f32 1.442695, %v2196_v5 }
 0x515   :  { %7271 = vpow2.f32 %v2461_v34  ;;  %v2319_v18 = vmul.f32 1.442695, %v2292_v44  ;;  %v2175_v20 = vmax.f32 %v2151_v31, %v6778_v61  ;;  %v1938_v46 = vpop.f32.mrb[69].mxu0  ;;  %v2463_v30 = vmul.f32 1.442695, %v2436_v49 }
 0x516   :  { %7273 = vpow2.f32 %v2217_v32  ;;  %v2219_v47 = vmul.f32 1.442695, %v2194_v13  ;;  %v2173_v62 = vmax.f32 %v2149_v39, %v1938_v46  ;;  %v6779_v45 = vpop.f32.mrb[70].mxu0  ;;  %v9578_v15 = vadd.f32 %v9517_v14, %v11279_v8  ;;  %v11280_v39 = vld [vmem:[#allocation81_spill] sm:$0xff] }
 0x517   :  { %7275 = vpow2.f32 %v2313_v37  ;;  %v2199_v16 = vsub.f32 %v9488_v55, %v2175_v20  ;;  %v2295_v3 = vsub.f32 %v9501_v17, %v2175_v20  ;;  %v2439_v2 = vsub.f32 %v6778_v61, %v2175_v20  ;;  %v9572_v26 = vpop.f32.mrb[71].mxu0  ;;  %v11281_v17 = vld [vmem:[#allocation82_spill] sm:$0xff] }
 0x518   :  { %7277 = vpow2.f32 %v2457_v10  ;;  %v2197_v0 = vsub.f32 %v9490_v25, %v2173_v62  ;;  %v2293_v57 = vsub.f32 %v9505_v33, %v2173_v62  ;;  %v2437_v31 = vsub.f32 %v1938_v46, %v2173_v62 }
 0x519   :  { %v9582_v38 = vadd.f32 %v11280_v39, %v9517_v14  ;;  %7279 = vpow2.f32 %v2223_v1  ;;  %v2315_v55 = vmul.f32 1.442695, %v2290_v42  ;;  %v9586_v40 = vadd.f32 %v9517_v14, %v11281_v17 }
 0x51a   :  { %7281 = vpow2.f32 %v2319_v18  ;;  %v2459_v24 = vmul.f32 1.442695, %v2434_v53  ;;  %v2229_v25 = vmul.f32 1.442695, %v2199_v16  ;;  %v2325_v33 = vmul.f32 1.442695, %v2295_v3 }
 0x51b   :  { %7283 = vpow2.f32 %v2463_v30  ;;  %v2176_v60 = vmax.f32 %v2152_v23, %v6779_v45  ;;  %v9595_v21 = vmax.f32 %v2150_v54, %v9572_v26  ;;  %v9599_v35 = vadd.f32 %v11282_v56, %v9517_v14 }
 0x51c   :  { %7285 = vpow2.f32 %v2219_v47  ;;  %v2469_v48 = vmul.f32 1.442695, %v2439_v2  ;;  %v2225_v11 = vmul.f32 1.442695, %v2197_v0  ;;  %v9601_v19 = vpop.f32.mrb[72].mxu0 }
 0x51d   :  { %v7268_v34 = vpop.eup %7267  ;;  %7287 = vpow2.f32 %v2315_v55  ;;  %v2200_v5 = vsub.f32 %v9492_v9, %v2176_v60  ;;  %v2296_v23 = vsub.f32 %v9509_v43, %v2176_v60  ;;  %v2440_v29 = vsub.f32 %v6779_v45, %v2176_v60  ;;  %v9605_v50 = vpop.f32.mrb[73].mxu0 }
 0x51e   :  { %v7270_v54 = vpop.eup %7269  ;;  %v2267_v32 = vmul.f32 %v7268_v34, %v9521_v12  ;;  %7289 = vpow2.f32 %v2459_v24  ;;  %v2198_v44 = vsub.f32 %v9494_v22, %v9595_v21  ;;  %v2294_v37 = vsub.f32 %v9513_v36, %v9595_v21  ;;  %v9612_v49 = vpop.f32.mrb[74].mxu0 }
 0x51f   :  { %v7272_v13 = vpop.eup %7271  ;;  %v2363_v10 = vadd.f32 %v7270_v54, %v7268_v34  ;;  %v2387_v9 = vmul.f32 %v7270_v54, %v9545_v51  ;;  %7291 = vpow2.f32 %v2229_v25  ;;  %v2321_v43 = vmul.f32 1.442695, %v2293_v57  ;;  %v9615_v42 = vpop.f32.mrb[75].mxu0 }
 0x520   :  { %v7274_v53 = vpop.eup %7273  ;;  %v2531_v61 = vmul.f32 %v7272_v13, %v9566_v7  ;;  %7293 = vpow2.f32 %v2325_v33  ;;  %v2465_v1 = vmul.f32 1.442695, %v2437_v31  ;;  %v2231_v18 = vmul.f32 1.442695, %v2200_v5 }
 0x521   :  { %v7276_v22 = vpop.eup %7275  ;;  %v2411_v20 = vadd.f32 %v2387_v9, %v2267_v32  ;;  %v2507_v46 = vadd.f32 %v7272_v13, %v2363_v10  ;;  %7295 = vpow2.f32 %v2469_v48  ;;  %v2327_v36 = vmul.f32 1.442695, %v2296_v23 }
 0x522   :  { %v7278_v30 = vpop.eup %7277  ;;  %v2361_v47 = vadd.f32 %v7276_v22, %v7274_v53  ;;  %7297 = vpow2.f32 %v2225_v11  ;;  %v2471_v62 = vmul.f32 1.442695, %v2440_v29  ;;  %v2438_v45 = vsub.f32 %v9572_v26, %v9595_v21 }
 0x523   :  { %v7280_v16 = vpop.eup %7279  ;;  %v2555_v3 = vadd.f32 %v2531_v61, %v2411_v20  ;;  %7299 = vrcp.f32 %v2507_v46  ;;  %v2265_v2 = vmul.f32 %v7274_v53, %v9525_v28  ;;  %v2385_v0 = vmul.f32 %v7276_v22, %v9549_v27  ;;  %v11283_v46 = vld [vmem:[#allocation76_spill] sm:$0xff] }
 0x524   :  { %v7282_v57 = vpop.eup %7281  ;;  %v2505_v31 = vadd.f32 %v7278_v30, %v2361_v47  ;;  %v2268_v8 = vmul.f32 %v7280_v16, %v9529_v52  ;;  %7301 = vpow2.f32 %v2321_v43  ;;  %v2227_v39 = vmul.f32 1.442695, %v2198_v44  ;;  %v9623_v55 = vpop.f32.mrb[76].mxu0 }
 0x525   :  { %v7284_v17 = vpop.eup %7283  ;;  %v2364_v24 = vadd.f32 %v7282_v57, %v7280_v16  ;;  %v2388_v25 = vmul.f32 %v7282_v57, %v9553_v41  ;;  %7303 = vpow2.f32 %v2465_v1  ;;  %v9626_v26 = vpop.f32.mrb[77].mxu0  ;;  %v2409_v33 = vadd.f32 %v2385_v0, %v2265_v2  ;;  %v11284_v2 = vld [vmem:[#allocation84_spill] sm:$0xff] }
 0x526   :  { %v7286_v60 = vpop.eup %7285  ;;  %7305 = vrcp.f32 %v2505_v31  ;;  %v2532_v21 = vmul.f32 %v7284_v17, %v9582_v38  ;;  %v2323_v56 = vmul.f32 1.442695, %v2294_v37  ;;  %v9629_v48 = vpop.f32.mrb[78].mxu0  ;;  %v2529_v11 = vmul.f32 %v7278_v30, %v9578_v15 }
 0x527   :  { %v7288_v34 = vpop.eup %7287  ;;  %v2412_v5 = vadd.f32 %v2388_v25, %v2268_v8  ;;  %v2508_v23 = vadd.f32 %v7284_v17, %v2364_v24  ;;  %7307 = vpow2.f32 %v2231_v18  ;;  %v9632_v29 = vpop.f32.mrb[79].mxu0  ;;  %v2266_v54 = vmul.f32 %v7286_v60, %v9533_v6 }
 0x528   :  { %v7290_v32 = vpop.eup %7289  ;;  %v2362_v44 = vadd.f32 %v7288_v34, %v7286_v60  ;;  %7309 = vpow2.f32 %v2327_v36  ;;  %v2386_v13 = vmul.f32 %v7288_v34, %v9557_v59  ;;  %v2553_v10 = vadd.f32 %v2529_v11, %v2409_v33 }
 0x529   :  { %v7292_v9 = vpop.eup %7291  ;;  %v2556_v37 = vadd.f32 %v2532_v21, %v2412_v5  ;;  %7311 = vrcp.f32 %v2508_v23  ;;  %v2467_v43 = vmul.f32 1.442695, %v2438_v45  ;;  %v2530_v53 = vmul.f32 %v7290_v32, %v9586_v40 }
 0x52a   :  { %v7294_v61 = vpop.eup %7293  ;;  %v2506_v1 = vadd.f32 %v7290_v32, %v2362_v44  ;;  %7313 = vpow2.f32 %v2471_v62  ;;  %v2410_v18 = vadd.f32 %v2386_v13, %v2266_v54  ;;  %v2271_v22 = vmul.f32 %v7292_v9, %v9537_v4  ;;  %v11286_v13 = vld [vmem:[#allocation77_spill] sm:$0xff] }
 0x52b   :  { %v7296_v20 = vpop.eup %7295  ;;  %v9640_v30 = vadd.f32 %v9517_v14, %v11283_v46  ;;  %v2367_v36 = vadd.f32 %v7294_v61, %v7292_v9  ;;  %7315 = vpow2.f32 %v2227_v39  ;;  %v2391_v47 = vmul.f32 %v7294_v61, %v9562_v63 }
 0x52c   :  { %v7298_v16 = vpop.eup %7297  ;;  %v9645_v45 = vadd.f32 %v9517_v14, %v11284_v2  ;;  %7317 = vrcp.f32 %v2506_v1  ;;  %v9647_v0 = vpop.f32.mrb[80].mxu0  ;;  %v2554_v62 = vadd.f32 %v2530_v53, %v2410_v18  ;;  %v2535_v57 = vmul.f32 %v7296_v20, %v9599_v35 }
 0x52d   :  { %v7300_v31 = vpop.eup %7299  ;;  %v2511_v8 = vadd.f32 %v7296_v20, %v2367_v36  ;;  %7319 = vpow2.f32 %v2323_v56  ;;  %v2155_v17 = vmax.f32 %v9601_v19, %v9647_v0  ;;  %v9652_v39 = vpop.f32.mrb[81].mxu0  ;;  %v2269_v24 = vmul.f32 %v7298_v16, %v9541_v58  ;;  %v11287_v36 = vld [vmem:[#allocation85_spill] sm:$0xff] }
 0x52e   :  { %v7302_v25 = vpop.eup %7301  ;;  %v9655_v33 = vmul.f32 %v7300_v31, %v2555_v3  ;;  %7321 = vpow2.f32 %v2467_v43  ;;  %v9659_v21 = vpop.f32.mrb[82].mxu0  ;;  %v2415_v11 = vadd.f32 %v2391_v47, %v2271_v22  ;;  %v11285_v3 = vld [vmem:[#allocation69_spill] sm:$0xff]  ;;  %v9672_v9 = vadd.f32 %v11286_v13, %v9517_v14 }
 0x52f   :  { %v7304_v34 = vpop.eup %7303  ;;  %7323 = vrcp.f32 %v2511_v8  ;;  %v2365_v56 = vadd.f32 %v7302_v25, %v7298_v16  ;;  %v9663_v23 = vpop.f32.mrb[83].mxu0  ;;  %v2389_v54 = vmul.f32 %v7302_v25, %v9640_v30  ;;  %v9668_v44 = vadd.f32 %v11285_v3, %v9517_v14 }
 0x530   :  { %v7306_v32 = vpop.eup %7305  ;;  %v2559_v53 = vadd.f32 %v2535_v57, %v2415_v11  ;;  %v2533_v20 = vmul.f32 %v7304_v34, %v9645_v45  ;;  %v9679_v47 = vadd.f32 %v11287_v36, %v9517_v14  ;;  %v11288_v11 = vld [vmem:[#allocation70_spill] sm:$0xff] }
 0x531   :  { %v7308_v61 = vpop.eup %7307  ;;  %v2509_v1 = vadd.f32 %v7304_v34, %v2365_v56  ;;  %v2601_v18 = vmul.f32 %v7306_v32, %v2553_v10  ;;  %v2413_v22 = vadd.f32 %v2389_v54, %v2269_v24  ;;  %v9685_v10 = vadd.f32 %v9517_v14, %v11288_v11  ;;  %v11290_v32 = vld [vmem:[#allocation86_spill] sm:$0xff] }
 0x532   :  { %v7310_v46 = vpop.eup %7309  ;;  %v2272_v16 = vmul.f32 %v7308_v61, %v9668_v44  ;;  %v9710_v43 = vadd.f32 %v9517_v14, %v11290_v32 }
 0x533   :  { %v7312_v2 = vpop.eup %7311  ;;  %7325 = vrcp.f32 %v2509_v1  ;;  %v2368_v31 = vadd.f32 %v7310_v46, %v7308_v61  ;;  %v2557_v8 = vadd.f32 %v2533_v20, %v2413_v22  ;;  %v2392_v25 = vmul.f32 %v7310_v46, %v9672_v9  ;;  %v11289_v22 = vld [vmem:[#allocation78_spill] sm:$0xff] }
 0x534   :  { %v7314_v57 = vpop.eup %7313  ;;  %v2604_v24 = vmul.f32 %v7312_v2, %v2556_v37  ;;  %v9687_v34 = vpop.f32.mrb[84].mxu0  ;;  %v9696_v20 = vadd.f32 %v9517_v14, %v11289_v22  ;;  %11291 = vst [vmem:[#allocation89_spill] sm:$0xff] %v9710_v43 }
 0x535   :  { %v7316_v56 = vpop.eup %7315  ;;  %v2512_v54 = vadd.f32 %v7314_v57, %v2368_v31  ;;  %v9691_v3 = vpop.f32.mrb[85].mxu0  ;;  %v2416_v13 = vadd.f32 %v2392_v25, %v2272_v16  ;;  %v2536_v61 = vmul.f32 %v7314_v57, %v9679_v47 }
 0x536   :  { %v7318_v1 = vpop.eup %7317  ;;  %v2626_v46 = vpack.c.bf16 %v2604_v24, %v9655_v33  ;;  %v9701_v36 = vpop.f32.mrb[86].mxu0  ;;  %v2270_v2 = vmul.f32 %v7316_v56, %v9685_v10 }
 0x537   :  { %v7320_v31 = vpop.eup %7319  ;;  %7327 = vrcp.f32 %v2512_v54  ;;  %v2602_v11 = vmul.f32 %v7318_v1, %v2554_v62  ;;  %v9706_v25 = vpop.f32.mrb[87].mxu0  ;;  %v2560_v57 = vadd.f32 %v2536_v61, %v2416_v13 }
 0x538   :  { %v7322_v22 = vpop.eup %7321  ;;  %v2366_v37 = vadd.f32 %v7320_v31, %v7316_v56  ;;  %v2390_v24 = vmul.f32 %v7320_v31, %v9696_v20 }
 0x539   :  { %v7324_v5 = vpop.eup %7323  ;;  %v2625_v54 = vpack.c.bf16 %v2602_v11, %v2601_v18  ;;  %v2534_v16 = vmul.f32 %v7322_v22, %v9710_v43 }
 0x53a   :  { %v2510_v62 = vadd.f32 %v7322_v22, %v2366_v37  ;;  %v2414_v1 = vadd.f32 %v2390_v24, %v2270_v2  ;;  %v9716_v60 = vmul.f32 %v7324_v5, %v2559_v53  ;;  %v11292_v37 = vmax.f32 %v9605_v50, %v9652_v39 }
 0x53b   :  { %6836 = vmatprep.mubr.msk.bf16.mxu1 %vm419_vm0, %v2625_v54  ;;  %v11294_v54 = vmax.f32 %v9615_v42, %v9663_v23 }
 0x53c   :  { %7329 = vrcp.f32 %v2510_v62  ;;  %6837 = vmatmul.mubr.msk.bf16.vlgmr.msra.gmra.mrb[48].mxu1 %vm419_vm0, %v2626_v46  ;;  %v6798_v14 = vpop.f32.mrb[88].mxu0  ;;  %v2558_v56 = vadd.f32 %v2534_v16, %v2414_v1  ;;  %v11293_v46 = vmax.f32 %v9612_v49, %v9659_v21 }
 0x53d   :  { %v7326_v32 = vpop.eup %7325  ;;  %v2179_v13 = vmax.f32 %v2155_v17, %v6798_v14  ;;  %v2018_v61 = vpop.f32.mrb[89].mxu0 }
 0x53e   :  { %v2605_v18 = vmul.f32 %v7326_v32, %v2557_v8  ;;  %v2177_v2 = vmax.f32 %v11292_v37, %v2018_v61  ;;  %v6799_v5 = vpop.f32.mrb[90].mxu0 }
 0x53f   :  { %v2203_v53 = vsub.f32 %v9601_v19, %v2179_v13  ;;  %v2299_v31 = vsub.f32 %v9647_v0, %v2179_v13  ;;  %v2443_v11 = vsub.f32 %v6798_v14, %v2179_v13  ;;  %v2180_v16 = vmax.f32 %v11293_v46, %v6799_v5  ;;  %v2021_v22 = vpop.f32.mrb[91].mxu0 }
 0x540   :  { %v2201_v24 = vsub.f32 %v9605_v50, %v2177_v2  ;;  %v2297_v17 = vsub.f32 %v9652_v39, %v2177_v2  ;;  %v2441_v8 = vsub.f32 %v2018_v61, %v2177_v2  ;;  %v2178_v62 = vmax.f32 %v11294_v54, %v2021_v22 }
 0x541   :  { %v7328_v1 = vpop.eup %7327  ;;  %v2237_v32 = vmul.f32 1.442695, %v2203_v53  ;;  %v2333_v19 = vmul.f32 1.442695, %v2299_v31  ;;  %v2477_v37 = vmul.f32 1.442695, %v2443_v11  ;;  %v2204_v0 = vsub.f32 %v9612_v49, %v2180_v16 }
 0x542   :  { %v2233_v14 = vmul.f32 1.442695, %v2201_v24  ;;  %v2329_v13 = vmul.f32 1.442695, %v2297_v17  ;;  %v2608_v33 = vmul.f32 %v7328_v1, %v2560_v57  ;;  %v2473_v46 = vmul.f32 1.442695, %v2441_v8 }
 0x543   :  { %7331 = vpow2.f32 %v2237_v32  ;;  %v2300_v50 = vsub.f32 %v9659_v21, %v2180_v16  ;;  %v2444_v43 = vsub.f32 %v6799_v5, %v2180_v16  ;;  %v2202_v61 = vsub.f32 %v9615_v42, %v2178_v62 }
 0x544   :  { %7333 = vpow2.f32 %v2333_v19  ;;  %v2628_v39 = vpack.c.bf16 %v2608_v33, %v9716_v60  ;;  %v2298_v2 = vsub.f32 %v9663_v23, %v2178_v62  ;;  %v6802_v53 = vpop.f32.mrb[92].mxu0  ;;  %v2239_v31 = vmul.f32 1.442695, %v2204_v0 }
 0x545   :  { %7335 = vpow2.f32 %v2477_v37  ;;  %v2335_v11 = vmul.f32 1.442695, %v2300_v50  ;;  %v2442_v49 = vsub.f32 %v2021_v22, %v2178_v62  ;;  %v2034_v24 = vpop.f32.mrb[93].mxu0  ;;  %v2479_v57 = vmul.f32 1.442695, %v2444_v43 }
 0x546   :  { %v7330_v17 = vpop.eup %7329  ;;  %7337 = vpow2.f32 %v2233_v14  ;;  %v2235_v8 = vmul.f32 1.442695, %v2202_v61  ;;  %v11295_v21 = vmax.f32 %v9623_v55, %v9687_v34  ;;  %v6803_v16 = vpop.f32.mrb[94].mxu0  ;;  %v2331_v42 = vmul.f32 1.442695, %v2298_v2 }
 0x547   :  { %v2606_v60 = vmul.f32 %v7330_v17, %v2558_v56  ;;  %7339 = vpow2.f32 %v2329_v13  ;;  %v11296_v23 = vmax.f32 %v9626_v26, %v9691_v3  ;;  %v9747_v54 = vpop.f32.mrb[95].mxu0  ;;  %v2475_v19 = vmul.f32 1.442695, %v2442_v49 }
 0x548   :  { %v2183_v5 = vmax.f32 %v11295_v21, %v6802_v53  ;;  %7341 = vpow2.f32 %v2473_v46 }
 0x549   :  { %v2181_v33 = vmax.f32 %v11296_v23, %v2034_v24  ;;  %v2627_v1 = vpack.c.bf16 %v2606_v60, %v2605_v18  ;;  %7343 = vpow2.f32 %v2239_v31 }
 0x54a   :  { %v2207_v22 = vsub.f32 %v9623_v55, %v2183_v5  ;;  %v2303_v43 = vsub.f32 %v9687_v34, %v2183_v5  ;;  %v2447_v62 = vsub.f32 %v6802_v53, %v2183_v5  ;;  %7345 = vpow2.f32 %v2335_v11 }
 0x54b   :  { %v2205_v32 = vsub.f32 %v9626_v26, %v2181_v33  ;;  %v2301_v56 = vsub.f32 %v9691_v3, %v2181_v33  ;;  %6840 = vmatprep.mubr.msk.bf16.mxu1 %vm419_vm0, %v2627_v1  ;;  %7347 = vpow2.f32 %v2479_v57  ;;  %v2445_v14 = vsub.f32 %v2034_v24, %v2181_v33 }
 0x54c   :  { %v2245_v37 = vmul.f32 1.442695, %v2207_v22  ;;  %v2341_v0 = vmul.f32 1.442695, %v2303_v43  ;;  %6841 = vmatmul.mubr.msk.bf16.gmra.mrb[52].mxu1 %vm419_vm0, %v2628_v39  ;;  %7349 = vpow2.f32 %v2235_v8  ;;  %v2485_v55 = vmul.f32 1.442695, %v2447_v62 }
 0x54d   :  { %v11297_v34 = vmax.f32 %v9629_v48, %v9701_v36  ;;  %v11298_v26 = vmax.f32 %v9632_v29, %v9706_v25  ;;  %v9762_v13 = vpop.f32.mrb[96].mxu0  ;;  %v7332_v46 = vpop.eup %7331  ;;  %7351 = vpow2.f32 %v2331_v42  ;;  %v2241_v50 = vmul.f32 1.442695, %v2205_v32 }
 0x54e   :  { %v2337_v61 = vmul.f32 1.442695, %v2301_v56  ;;  %v9764_v2 = vpop.f32.mrb[97].mxu0  ;;  %v7334_v39 = vpop.eup %7333  ;;  %7353 = vpow2.f32 %v2475_v19  ;;  %v2481_v60 = vmul.f32 1.442695, %v2445_v14  ;;  %v2275_v14 = vmul.f32 %v7332_v46, %v9521_v12 }
 0x54f   :  { %v2184_v18 = vmax.f32 %v11297_v34, %v6803_v16  ;;  %v2182_v3 = vmax.f32 %v11298_v26, %v9747_v54  ;;  %v9768_v49 = vpop.f32.mrb[98].mxu0  ;;  %v7336_v24 = vpop.eup %7335  ;;  %v2371_v17 = vadd.f32 %v7334_v39, %v7332_v46  ;;  %7355 = vpow2.f32 %v2245_v37 }
 0x550   :  { %v9772_v21 = vpop.f32.mrb[99].mxu0  ;;  %v7338_v5 = vpop.eup %7337  ;;  %7357 = vpow2.f32 %v2341_v0 }
 0x551   :  { %v2208_v53 = vsub.f32 %v9629_v48, %v2184_v18  ;;  %v2304_v31 = vsub.f32 %v9701_v36, %v2184_v18  ;;  %v2448_v11 = vsub.f32 %v6803_v16, %v2184_v18  ;;  %v2206_v57 = vsub.f32 %v9632_v29, %v2182_v3  ;;  %v7340_v48 = vpop.eup %7339 }
 0x552   :  { %v2302_v8 = vsub.f32 %v9706_v25, %v2182_v3  ;;  %v2515_v33 = vadd.f32 %v7336_v24, %v2371_v17  ;;  %7359 = vpow2.f32 %v2485_v55  ;;  %v7342_v22 = vpop.eup %7341  ;;  %v2369_v43 = vadd.f32 %v7340_v48, %v7338_v5 }
 0x553   :  { %v2247_v42 = vmul.f32 1.442695, %v2208_v53  ;;  %v2343_v23 = vmul.f32 1.442695, %v2304_v31  ;;  %v2487_v36 = vmul.f32 1.442695, %v2448_v11  ;;  %7361 = vpow2.f32 %v2241_v50  ;;  %v7344_v25 = vpop.eup %7343 }
 0x554   :  { %v2243_v16 = vmul.f32 1.442695, %v2206_v57  ;;  %v2446_v62 = vsub.f32 %v9747_v54, %v2182_v3  ;;  %v2273_v29 = vmul.f32 %v7338_v5, %v9525_v28  ;;  %7363 = vrcp.f32 %v2515_v33  ;;  %v7346_v19 = vpop.eup %7345  ;;  %v9778_v0 = vpop.f32.mrb[100].mxu0 }
 0x555   :  { %v2339_v1 = vmul.f32 1.442695, %v2302_v8  ;;  %v2393_v32 = vmul.f32 %v7340_v48, %v9549_v27  ;;  %v2537_v56 = vmul.f32 %v7342_v22, %v9578_v15  ;;  %v2513_v37 = vadd.f32 %v7342_v22, %v2369_v43  ;;  %v7348_v34 = vpop.eup %7347  ;;  %v9782_v18 = vpop.f32.mrb[101].mxu0 }
 0x556   :  { %7365 = vpow2.f32 %v2337_v61  ;;  %v2276_v55 = vmul.f32 %v7344_v25, %v9529_v52  ;;  %v2372_v54 = vadd.f32 %v7346_v19, %v7344_v25  ;;  %v2395_v3 = vmul.f32 %v7334_v39, %v9545_v51  ;;  %v7350_v50 = vpop.eup %7349  ;;  %v9785_v31 = vpop.f32.mrb[102].mxu0 }
 0x557   :  { %7367 = vpow2.f32 %v2481_v60  ;;  %v2417_v26 = vadd.f32 %v2393_v32, %v2273_v29  ;;  %v2483_v53 = vmul.f32 1.442695, %v2446_v62  ;;  %v2396_v61 = vmul.f32 %v7346_v19, %v9553_v41  ;;  %v7352_v46 = vpop.eup %7351  ;;  %v9789_v57 = vpop.f32.mrb[103].mxu0 }
 0x558   :  { %7369 = vrcp.f32 %v2513_v37  ;;  %v2539_v11 = vmul.f32 %v7336_v24, %v9566_v7  ;;  %v2516_v17 = vadd.f32 %v7348_v34, %v2372_v54  ;;  %v2274_v8 = vmul.f32 %v7350_v50, %v9533_v6  ;;  %v7354_v60 = vpop.eup %7353 }
 0x559   :  { %7371 = vpow2.f32 %v2247_v42  ;;  %v2561_v5 = vadd.f32 %v2537_v56, %v2417_v26  ;;  %v2370_v48 = vadd.f32 %v7352_v46, %v7350_v50  ;;  %v2394_v39 = vmul.f32 %v7352_v46, %v9557_v59  ;;  %v7356_v22 = vpop.eup %7355 }
 0x55a   :  { %7373 = vpow2.f32 %v2343_v23  ;;  %v2419_v33 = vadd.f32 %v2395_v3, %v2275_v14  ;;  %v2538_v43 = vmul.f32 %v7354_v60, %v9586_v40  ;;  %v2420_v62 = vadd.f32 %v2396_v61, %v2276_v55  ;;  %v7358_v29 = vpop.eup %7357 }
 0x55b   :  { %7375 = vrcp.f32 %v2516_v17  ;;  %v2540_v24 = vmul.f32 %v7348_v34, %v9582_v38  ;;  %v2514_v42 = vadd.f32 %v7354_v60, %v2370_v48  ;;  %v2418_v25 = vadd.f32 %v2394_v39, %v2274_v8 }
 0x55c   :  { %7377 = vpow2.f32 %v2487_v36  ;;  %v2563_v32 = vadd.f32 %v2539_v11, %v2419_v33  ;;  %v7360_v19 = vpop.eup %7359  ;;  %v2375_v56 = vadd.f32 %v7358_v29, %v7356_v22  ;;  %v2279_v23 = vmul.f32 %v7356_v22, %v9537_v4  ;;  %v9796_v14 = vpop.f32.mrb[104].mxu0  ;;  %v11299_v36 = vld [vmem:[#allocation89_spill] sm:$0xff] }
 0x55d   :  { %7379 = vpow2.f32 %v2243_v16  ;;  %v2564_v37 = vadd.f32 %v2540_v24, %v2420_v62  ;;  %v7362_v54 = vpop.eup %7361  ;;  %v2562_v26 = vadd.f32 %v2538_v43, %v2418_v25  ;;  %v2399_v55 = vmul.f32 %v7358_v29, %v9562_v63  ;;  %v9802_v61 = vpop.f32.mrb[105].mxu0 }
 0x55e   :  { %7381 = vrcp.f32 %v2514_v42  ;;  %v2543_v34 = vmul.f32 %v7360_v19, %v9599_v35  ;;  %v7364_v3 = vpop.eup %7363  ;;  %v2519_v50 = vadd.f32 %v7360_v19, %v2375_v56  ;;  %v2277_v16 = vmul.f32 %v7362_v54, %v9541_v58  ;;  %v9807_v17 = vpop.f32.mrb[106].mxu0 }
 0x55f   :  { %7383 = vpow2.f32 %v2339_v1  ;;  %v2611_v8 = vmul.f32 %v7364_v3, %v2563_v32  ;;  %v2423_v60 = vadd.f32 %v2399_v55, %v2279_v23  ;;  %v2164_v1 = vmax.f32 %v9768_v49, %v9807_v17  ;;  %v9811_v33 = vpop.f32.mrb[107].mxu0 }
 0x560   :  { %v7366_v11 = vpop.eup %7365  ;;  %7385 = vpow2.f32 %v2483_v53 }
 0x561   :  { %v7368_v48 = vpop.eup %7367  ;;  %7387 = vrcp.f32 %v2519_v50  ;;  %v2373_v39 = vadd.f32 %v7366_v11, %v7362_v54  ;;  %v2397_v22 = vmul.f32 %v7366_v11, %v9640_v30  ;;  %v2567_v62 = vadd.f32 %v2543_v34, %v2423_v60 }
 0x562   :  { %v7370_v43 = vpop.eup %7369  ;;  %v2541_v32 = vmul.f32 %v7368_v48, %v9645_v45 }
 0x563   :  { %v7372_v24 = vpop.eup %7371  ;;  %v2517_v29 = vadd.f32 %v7368_v48, %v2373_v39  ;;  %v2609_v42 = vmul.f32 %v7370_v43, %v2561_v5  ;;  %v2421_v25 = vadd.f32 %v2397_v22, %v2277_v16 }
 0x564   :  { %v7374_v19 = vpop.eup %7373  ;;  %v2280_v56 = vmul.f32 %v7372_v24, %v9668_v44  ;;  %v9819_v11 = vpop.f32.mrb[108].mxu0 }
 0x565   :  { %v7376_v23 = vpop.eup %7375  ;;  %7389 = vrcp.f32 %v2517_v29  ;;  %v2376_v54 = vadd.f32 %v7374_v19, %v7372_v24  ;;  %v2565_v55 = vadd.f32 %v2541_v32, %v2421_v25  ;;  %v2400_v3 = vmul.f32 %v7374_v19, %v9672_v9  ;;  %v9823_v16 = vpop.f32.mrb[109].mxu0 }
 0x566   :  { %v7378_v50 = vpop.eup %7377  ;;  %v2612_v53 = vmul.f32 %v7376_v23, %v2564_v37  ;;  %v9828_v29 = vpop.f32.mrb[110].mxu0 }
 0x567   :  { %v7380_v34 = vpop.eup %7379  ;;  %v2520_v60 = vadd.f32 %v7378_v50, %v2376_v54  ;;  %v2424_v48 = vadd.f32 %v2400_v3, %v2280_v56  ;;  %v2544_v39 = vmul.f32 %v7378_v50, %v9679_v47  ;;  %v9833_v23 = vpop.f32.mrb[111].mxu0 }
 0x568   :  { %v7382_v22 = vpop.eup %7381  ;;  %v2630_v24 = vpack.c.bf16 %v2612_v53, %v2611_v8  ;;  %v2278_v25 = vmul.f32 %v7380_v34, %v9685_v10 }
 0x569   :  { %v7384_v37 = vpop.eup %7383  ;;  %7391 = vrcp.f32 %v2520_v60  ;;  %v2610_v32 = vmul.f32 %v7382_v22, %v2562_v26  ;;  %v2568_v56 = vadd.f32 %v2544_v39, %v2424_v48  ;;  %v11300_v22 = vmax.f32 %v9762_v13, %v9796_v14 }
 0x56a   :  { %v7386_v54 = vpop.eup %7385  ;;  %v2374_v3 = vadd.f32 %v7384_v37, %v7380_v34  ;;  %v2398_v8 = vmul.f32 %v7384_v37, %v9696_v20 }
 0x56b   :  { %v7388_v53 = vpop.eup %7387  ;;  %v2629_v43 = vpack.c.bf16 %v2610_v32, %v2609_v42  ;;  %v2542_v60 = vmul.f32 %v7386_v54, %v11299_v36 }
 0x56c   :  { %v2518_v5 = vadd.f32 %v7386_v54, %v2374_v3  ;;  %v2422_v46 = vadd.f32 %v2398_v8, %v2278_v25  ;;  %v9839_v26 = vmul.f32 %v7388_v53, %v2567_v62  ;;  %v6822_v48 = vpop.f32.mrb[112].mxu0  ;;  %v11301_v25 = vmax.f32 %v9764_v2, %v9802_v61 }
 0x56d   :  { %6844 = vmatprep.mubr.msk.bf16.mxu1 %vm419_vm0, %v2629_v43  ;;  %v2187_v37 = vmax.f32 %v11300_v22, %v6822_v48  ;;  %v2114_v50 = vpop.f32.mrb[113].mxu0 }
 0x56e   :  { %7393 = vrcp.f32 %v2518_v5  ;;  %6845 = vmatmul.mubr.msk.bf16.gmra.mrb[56].mxu1 %vm419_vm0, %v2630_v24  ;;  %v2566_v34 = vadd.f32 %v2542_v60, %v2422_v46  ;;  %v2185_v32 = vmax.f32 %v11301_v25, %v2114_v50  ;;  %v6823_v62 = vpop.f32.mrb[114].mxu0 }
 0x56f   :  { %v7390_v39 = vpop.eup %7389  ;;  %v2211_v54 = vsub.f32 %v9762_v13, %v2187_v37  ;;  %v2307_v5 = vsub.f32 %v9796_v14, %v2187_v37  ;;  %v2451_v43 = vsub.f32 %v6822_v48, %v2187_v37  ;;  %v2188_v24 = vmax.f32 %v2164_v1, %v6823_v62  ;;  %v2117_v3 = vpop.f32.mrb[115].mxu0 }
 0x570   :  { %v2613_v42 = vmul.f32 %v7390_v39, %v2565_v55  ;;  %v2209_v46 = vsub.f32 %v9764_v2, %v2185_v32  ;;  %v2305_v8 = vsub.f32 %v9802_v61, %v2185_v32  ;;  %v2449_v53 = vsub.f32 %v2114_v50, %v2185_v32 }
 0x571   :  { %v11302_v55 = vmax.f32 %v9772_v21, %v9811_v33  ;;  %v2253_v22 = vmul.f32 1.442695, %v2211_v54  ;;  %v2349_v25 = vmul.f32 1.442695, %v2307_v5  ;;  %v2493_v19 = vmul.f32 1.442695, %v2451_v43 }
 0x572   :  { %v2212_v13 = vsub.f32 %v9768_v49, %v2188_v24  ;;  %v2249_v36 = vmul.f32 1.442695, %v2209_v46  ;;  %v2345_v14 = vmul.f32 1.442695, %v2305_v8  ;;  %v2489_v1 = vmul.f32 1.442695, %v2449_v53 }
 0x573   :  { %v2186_v60 = vmax.f32 %v11302_v55, %v2117_v3  ;;  %v7392_v39 = vpop.eup %7391  ;;  %7395 = vpow2.f32 %v2253_v22  ;;  %v2308_v2 = vsub.f32 %v9807_v17, %v2188_v24  ;;  %v2452_v37 = vsub.f32 %v6823_v62, %v2188_v24 }
 0x574   :  { %v2616_v48 = vmul.f32 %v7392_v39, %v2568_v56  ;;  %7397 = vpow2.f32 %v2349_v25  ;;  %v6826_v54 = vpop.f32.mrb[116].mxu0  ;;  %v2255_v5 = vmul.f32 1.442695, %v2212_v13  ;;  %v11303_v17 = vmax.f32 %v9778_v0, %v9819_v11 }
 0x575   :  { %v2210_v50 = vsub.f32 %v9772_v21, %v2186_v60  ;;  %v2306_v32 = vsub.f32 %v9811_v33, %v2186_v60  ;;  %7399 = vpow2.f32 %v2493_v19  ;;  %v2351_v43 = vmul.f32 1.442695, %v2308_v2  ;;  %v2130_v46 = vpop.f32.mrb[117].mxu0 }
 0x576   :  { %v2632_v61 = vpack.c.bf16 %v2616_v48, %v9839_v26  ;;  %v2450_v49 = vsub.f32 %v2117_v3, %v2186_v60  ;;  %7401 = vpow2.f32 %v2249_v36  ;;  %v2495_v56 = vmul.f32 1.442695, %v2452_v37  ;;  %v6827_v24 = vpop.f32.mrb[118].mxu0 }
 0x577   :  { %v2251_v53 = vmul.f32 1.442695, %v2210_v50  ;;  %v2191_v62 = vmax.f32 %v11303_v17, %v6826_v54  ;;  %7403 = vpow2.f32 %v2345_v14  ;;  %v2347_v21 = vmul.f32 1.442695, %v2306_v32  ;;  %v9867_v55 = vpop.f32.mrb[119].mxu0 }
 0x578   :  { %v7394_v8 = vpop.eup %7393  ;;  %v11304_v33 = vmax.f32 %v9782_v18, %v9823_v16  ;;  %7405 = vpow2.f32 %v2489_v1  ;;  %v2491_v25 = vmul.f32 1.442695, %v2450_v49 }
 0x579   :  { %v2614_v26 = vmul.f32 %v7394_v8, %v2566_v34  ;;  %v2215_v3 = vsub.f32 %v9778_v0, %v2191_v62  ;;  %v2311_v36 = vsub.f32 %v9819_v11, %v2191_v62  ;;  %v2455_v60 = vsub.f32 %v6826_v54, %v2191_v62 }
 0x57a   :  { %v2189_v19 = vmax.f32 %v11304_v33, %v2130_v46  ;;  %7407 = vpow2.f32 %v2255_v5  ;;  %v11305_v11 = vmax.f32 %v9785_v31, %v9828_v29 }
 0x57b   :  { %v2631_v39 = vpack.c.bf16 %v2614_v26, %v2613_v42  ;;  %7409 = vpow2.f32 %v2351_v43  ;;  %v2261_v13 = vmul.f32 1.442695, %v2215_v3  ;;  %v2357_v0 = vmul.f32 1.442695, %v2311_v36 }
 0x57c   :  { %v2213_v22 = vsub.f32 %v9782_v18, %v2189_v19  ;;  %v2309_v34 = vsub.f32 %v9823_v16, %v2189_v19  ;;  %7411 = vpow2.f32 %v2495_v56  ;;  %v2453_v14 = vsub.f32 %v2130_v46, %v2189_v19 }
 0x57d   :  { %6848 = vmatprep.mubr.msk.bf16.mxu1 %vm419_vm0, %v2631_v39  ;;  %7413 = vpow2.f32 %v2251_v53  ;;  %v2192_v42 = vmax.f32 %v11305_v11, %v6827_v24  ;;  %v11306_v18 = vmax.f32 %v9789_v57, %v9833_v23  ;;  %v7396_v48 = vpop.eup %7395  ;;  %v2501_v1 = vmul.f32 1.442695, %v2455_v60 }
 0x57e   :  { %6849 = vmatmul.mubr.msk.bf16.gmra.mrb[60].mxu1 %vm419_vm0, %v2632_v61  ;;  %7415 = vpow2.f32 %v2347_v21  ;;  %v2257_v2 = vmul.f32 1.442695, %v2213_v22  ;;  %v2353_v37 = vmul.f32 1.442695, %v2309_v34  ;;  %v7398_v50 = vpop.eup %7397  ;;  %v2497_v56 = vmul.f32 1.442695, %v2453_v14 }
 0x57f   :  { %v2190_v16 = vmax.f32 %v11306_v18, %v9867_v55  ;;  %7417 = vpow2.f32 %v2491_v25  ;;  %v2216_v61 = vsub.f32 %v9785_v31, %v2192_v42  ;;  %v2312_v32 = vsub.f32 %v9828_v29, %v2192_v42  ;;  %v7400_v5 = vpop.eup %7399 }
 0x580   :  { %v2456_v54 = vsub.f32 %v6827_v24, %v2192_v42  ;;  %v2379_v43 = vadd.f32 %v7398_v50, %v7396_v48  ;;  %7419 = vpow2.f32 %v2261_v13  ;;  %v7402_v8 = vpop.eup %7401  ;;  %v2283_v22 = vmul.f32 %v7396_v48, %v9521_v12 }
 0x581   :  { %v2214_v49 = vsub.f32 %v9789_v57, %v2190_v16  ;;  %v2310_v46 = vsub.f32 %v9833_v23, %v2190_v16  ;;  %7421 = vpow2.f32 %v2357_v0  ;;  %v2263_v53 = vmul.f32 1.442695, %v2216_v61  ;;  %v7404_v62 = vpop.eup %7403 }
 0x582   :  { %v2359_v17 = vmul.f32 1.442695, %v2312_v32  ;;  %v2523_v26 = vadd.f32 %v7400_v5, %v2379_v43  ;;  %7423 = vpow2.f32 %v2501_v1  ;;  %v2503_v21 = vmul.f32 1.442695, %v2456_v54  ;;  %v7406_v33 = vpop.eup %7405 }
 0x583   :  { %v2259_v31 = vmul.f32 1.442695, %v2214_v49  ;;  %v2377_v29 = vadd.f32 %v7404_v62, %v7402_v8  ;;  %7425 = vpow2.f32 %v2257_v2  ;;  %v2454_v24 = vsub.f32 %v9867_v55, %v2190_v16 }
 0x584   :  { %v2281_v19 = vmul.f32 %v7402_v8, %v9525_v28  ;;  %v7408_v57 = vpop.eup %7407  ;;  %7427 = vrcp.f32 %v2523_v26  ;;  %v2355_v23 = vmul.f32 1.442695, %v2310_v46  ;;  %v2401_v3 = vmul.f32 %v7404_v62, %v9549_v27 }
 0x585   :  { %v2545_v36 = vmul.f32 %v7406_v33, %v9578_v15  ;;  %v7410_v60 = vpop.eup %7409  ;;  %v2521_v39 = vadd.f32 %v7406_v33, %v2377_v29  ;;  %7429 = vpow2.f32 %v2353_v37  ;;  %v2284_v34 = vmul.f32 %v7408_v57, %v9529_v52 }
 0x586   :  { %v7412_v25 = vpop.eup %7411  ;;  %v2380_v13 = vadd.f32 %v7410_v60, %v7408_v57  ;;  %7431 = vpow2.f32 %v2497_v56  ;;  %v2425_v55 = vadd.f32 %v2401_v3, %v2281_v19  ;;  %v2403_v28 = vmul.f32 %v7398_v50, %v9545_v51 }
 0x587   :  { %v7414_v14 = vpop.eup %7413  ;;  %7433 = vrcp.f32 %v2521_v39  ;;  %v2499_v0 = vmul.f32 1.442695, %v2454_v24  ;;  %v2404_v27 = vmul.f32 %v7410_v60, %v9553_v41  ;;  %v2547_v15 = vmul.f32 %v7400_v5, %v9566_v7 }
 0x588   :  { %v7416_v11 = vpop.eup %7415  ;;  %v2524_v42 = vadd.f32 %v7412_v25, %v2380_v13  ;;  %7435 = vpow2.f32 %v2263_v53  ;;  %v2282_v12 = vmul.f32 %v7414_v14, %v9533_v6  ;;  %v2569_v18 = vadd.f32 %v2545_v36, %v2425_v55 }
 0x589   :  { %v7418_v52 = vpop.eup %7417  ;;  %v2378_v16 = vadd.f32 %v7416_v11, %v7414_v14  ;;  %7437 = vpow2.f32 %v2359_v17  ;;  %v2402_v48 = vmul.f32 %v7416_v11, %v9557_v59  ;;  %v2427_v1 = vadd.f32 %v2403_v28, %v2283_v22 }
 0x58a   :  { %v7420_v51 = vpop.eup %7419  ;;  %7439 = vrcp.f32 %v2524_v42  ;;  %v2546_v2 = vmul.f32 %v7418_v52, %v9586_v40  ;;  %v2428_v37 = vadd.f32 %v2404_v27, %v2284_v34  ;;  %v2548_v41 = vmul.f32 %v7412_v25, %v9582_v38 }
 0x58b   :  { %v7422_v7 = vpop.eup %7421  ;;  %v2522_v50 = vadd.f32 %v7418_v52, %v2378_v16  ;;  %7441 = vpow2.f32 %v2503_v21  ;;  %v2426_v61 = vadd.f32 %v2402_v48, %v2282_v12  ;;  %v2571_v32 = vadd.f32 %v2547_v15, %v2427_v1  ;;  %v11307_v52 = vld [vmem:[#allocation89_spill] sm:$0xff] }
 0x58c   :  { %v7424_v6 = vpop.eup %7423  ;;  %v2383_v54 = vadd.f32 %v7422_v7, %v7420_v51  ;;  %7443 = vpow2.f32 %v2259_v31  ;;  %v2572_v5 = vadd.f32 %v2548_v41, %v2428_v37  ;;  %v2287_v43 = vmul.f32 %v7420_v51, %v9537_v4 }
 0x58d   :  { %v7426_v59 = vpop.eup %7425  ;;  %7445 = vrcp.f32 %v2522_v50  ;;  %v2570_v49 = vadd.f32 %v2546_v2, %v2426_v61  ;;  %v2407_v46 = vmul.f32 %v7422_v7, %v9562_v63  ;;  %v2551_v62 = vmul.f32 %v7424_v6, %v9599_v35  ;;  %v9915_v61 = vld [vmem:[#allocation17] ss:$0 sm:$0xff] }
 0x58e   :  { %v7428_v40 = vpop.eup %7427  ;;  %v2527_v8 = vadd.f32 %v7424_v6, %v2383_v54  ;;  %7447 = vpow2.f32 %v2355_v23  ;;  %v2285_v38 = vmul.f32 %v7426_v59, %v9541_v58 }
 0x58f   :  { %v7430_v56 = vpop.eup %7429  ;;  %7449 = vpow2.f32 %v2499_v0  ;;  %v2619_v53 = vmul.f32 %v7428_v40, %v2571_v32  ;;  %v2431_v17 = vadd.f32 %v2407_v46, %v2287_v43  ;;  %v11308_v32 = vld [vmem:[#allocation39_spill] sm:$0xff]  ;;  %v11310_v46 = vld [vmem:[#allocation41_spill] sm:$0xff] }
 0x590   :  { %v7432_v26 = vpop.eup %7431  ;;  %7451 = vrcp.f32 %v2527_v8  ;;  %v2381_v21 = vadd.f32 %v7430_v56, %v7426_v59  ;;  %v2405_v4 = vmul.f32 %v7430_v56, %v9640_v30 }
 0x591   :  { %v7434_v31 = vpop.eup %7433  ;;  %v2575_v33 = vadd.f32 %v2551_v62, %v2431_v17  ;;  %v2549_v57 = vmul.f32 %v7432_v26, %v9645_v45 }
 0x592   :  { %v7436_v29 = vpop.eup %7435  ;;  %v2525_v63 = vadd.f32 %v7432_v26, %v2381_v21  ;;  %v2617_v24 = vmul.f32 %v7434_v31, %v2569_v18  ;;  %v2429_v19 = vadd.f32 %v2405_v4, %v2285_v38  ;;  %v11311_v38 = vld [vmem:[#allocation42_spill] sm:$0xff] }
 0x593   :  { %v7438_v58 = vpop.eup %7437  ;;  %v2288_v23 = vmul.f32 %v7436_v29, %v9668_v44 }
 0x594   :  { %v7440_v3 = vpop.eup %7439  ;;  %7453 = vrcp.f32 %v2525_v63  ;;  %v2384_v36 = vadd.f32 %v7438_v58, %v7436_v29  ;;  %v2573_v35 = vadd.f32 %v2549_v57, %v2429_v19  ;;  %v2408_v60 = vmul.f32 %v7438_v58, %v9672_v9 }
 0x595   :  { %v7442_v39 = vpop.eup %7441  ;;  %v2620_v22 = vmul.f32 %v7440_v3, %v2572_v5  ;;  %v11309_v5 = vld [vmem:[#allocation40_spill] sm:$0xff] }
 0x596   :  { %v7444_v30 = vpop.eup %7443  ;;  %v2528_v34 = vadd.f32 %v7442_v39, %v2384_v36  ;;  %v2432_v25 = vadd.f32 %v2408_v60, %v2288_v23  ;;  %v2552_v13 = vmul.f32 %v7442_v39, %v9679_v47  ;;  %v11312_v23 = vld [vmem:[#allocation44_spill] sm:$0xff]  ;;  %v11313_v60 = vld [vmem:[#allocation46_spill] sm:$0xff] }
 0x597   :  { %v7446_v55 = vpop.eup %7445  ;;  %v2634_v28 = vpack.c.bf16 %v2620_v22, %v2619_v53  ;;  %v2286_v45 = vmul.f32 %v7444_v30, %v9685_v10 }
 0x598   :  { %v7448_v14 = vpop.eup %7447  ;;  %7455 = vrcp.f32 %v2528_v34  ;;  %v2618_v44 = vmul.f32 %v7446_v55, %v2570_v49  ;;  %v2576_v0 = vadd.f32 %v2552_v13, %v2432_v25  ;;  %v11314_v34 = vld [vmem:[#allocation43_spill] sm:$0xff] }
 0x599   :  { %v7450_v27 = vpop.eup %7449  ;;  %v2382_v15 = vadd.f32 %v7448_v14, %v7444_v30  ;;  %v2406_v11 = vmul.f32 %v7448_v14, %v9696_v20 }
 0x59a   :  { %v7452_v9 = vpop.eup %7451  ;;  %v2633_v42 = vpack.c.bf16 %v2618_v44, %v2617_v24  ;;  %v2550_v16 = vmul.f32 %v7450_v27, %v11307_v52 }
 0x59b   :  { %v2526_v12 = vadd.f32 %v7450_v27, %v2382_v15  ;;  %v2430_v18 = vadd.f32 %v2406_v11, %v2286_v45  ;;  %v2623_v48 = vmul.f32 %v7452_v9, %v2575_v33 }
 0x59c   :  { %6852 = vmatprep.mubr.msk.bf16.mxu1 %vm419_vm0, %v2633_v42 }
 0x59d   :  { %7457 = vrcp.f32 %v2526_v12  ;;  %6853 = vmatmul.mubr.msk.bf16.gmra.mrb[64].mxu1 %vm419_vm0, %v2634_v28  ;;  %v2574_v47 = vadd.f32 %v2550_v16, %v2430_v18  ;;  %v11315_v28 = vld [vmem:[#allocation45_spill] sm:$0xff] }
 0x59e   :  { %v7454_v10 = vpop.eup %7453 }
 0x59f   :  { %v2621_v1 = vmul.f32 %v7454_v10, %v2573_v35 }
 0x5a2   :  { %v7456_v51 = vpop.eup %7455 }
 0x5a3   :  { %v2624_v2 = vmul.f32 %v7456_v51, %v2576_v0  ;;  %v11316_v51 = vld [vmem:[#allocation48_spill] sm:$0xff] }
 0x5a5   :  { %v2636_v37 = vpack.c.bf16 %v2624_v2, %v2623_v48 }
 0x5a7   :  { %v7458_v41 = vpop.eup %7457 }
 0x5a8   :  { %v2622_v20 = vmul.f32 %v7458_v41, %v2574_v47  ;;  %v7175_v41 = vld [vmem:[#allocation22] sm:$0xff]  }
 0x5a9   :  { %6860 = vmatprep.subr.bf16.mxu1 %v7175_v41 }
 0x5aa   :  { %v2635_v7 = vpack.c.bf16 %v2622_v20, %v2621_v1  ;;  %v11317_v20 = vld [vmem:[#allocation53_spill] sm:$0xff]  ;;  %6861 = vmatpush3.bf16.msra.mxu1 %v7175_v41 }
 0x5ac   :  { %6856 = vmatprep.mubr.msk.bf16.mxu1 %vm419_vm0, %v2635_v7 }
 0x5ad   :  { %6857 = vmatmul.mubr.msk.bf16.gmra.mrb[68].mxu1 %vm419_vm0, %v2636_v37 }
 0x60f   :  { %v6838_v50 = vpop.f32.mrb[48].mxu1 }
 0x610   :  { %v2836_v6 = vadd.f32 %v6838_v50, %v11308_v32  ;;  %v2739_v54 = vpop.f32.mrb[49].mxu1 }
 0x611   :  { %v2834_v43 = vadd.f32 %v2739_v54, %v11309_v5  ;;  %v6839_v59 = vpop.f32.mrb[50].mxu1 }
 0x612   :  { %v9920_v49 = vadd.f32 %v9915_v61, %v2836_v6  ;;  %v2837_v40 = vadd.f32 %v6839_v59, %v11310_v46  ;;  %v2742_v8 = vpop.f32.mrb[51].mxu1  ;;  %v11318_v6 = vld [vmem:[#allocation47_spill] sm:$0xff] }
 0x613   :  { %v2835_v56 = vadd.f32 %v2742_v8, %v11311_v38  ;;  %v9925_v53 = vadd.f32 %v9915_v61, %v2834_v43  ;;  %v11319_v43 = vld [vmem:[#allocation51_spill] sm:$0xff] }
 0x614   :  { %v9928_v17 = vadd.f32 %v9915_v61, %v2837_v40  ;;  %v2897_v62 = vsel %vm419_vm0, %v9920_v49, 0.0  ;;  %v2989_v31 = vmul.f32 %v9920_v49, %v9920_v49  ;;  %v7176_v38 = vld [vmem:[#allocation22 + $0x8] sm:$0xff]  }
 0x615   :  { %2898 = vadd.xlane.f32.xlu0 %v2897_v62  ;;  %v9933_v26 = vadd.f32 %v9915_v61, %v2835_v56  ;;  %v2891_v4 = vsel %vm419_vm0, %v9925_v53, 0.0  ;;  %v2987_v24 = vmul.f32 %v9925_v53, %v9925_v53  ;;  %6862 = vmatprep.subr.bf16.mxu1 %v7176_v38 }
 0x616   :  { %v2900_v21 = vsel %vm419_vm0, %v9928_v17, 0.0  ;;  %v2990_v29 = vmul.f32 %v9928_v17, %v9928_v17  ;;  %v3017_v63 = vsel %vm419_vm0, %v2989_v31, 0.0  ;;  %6863 = vmatpush3.bf16.msra.mxu1 %v7176_v38 }
 0x617   :  { %2901 = vadd.xlane.f32.xlu1 %v2900_v21  ;;  %v2894_v33 = vsel %vm419_vm0, %v9933_v26, 0.0  ;;  %v2988_v57 = vmul.f32 %v9933_v26, %v9933_v26  ;;  %v3011_v35 = vsel %vm419_vm0, %v2987_v24, 0.0  ;;  %v7177_v21 = vld [vmem:[#allocation22 + $0x10] sm:$0xff]  }
 0x618   :  { %v3020_v19 = vsel %vm419_vm0, %v2990_v29, 0.0  ;;  %6864 = vmatprep.subr.bf16.mxu1 %v7177_v21 }
 0x619   :  { %2892 = vadd.xlane.f32.xlu0 %v2891_v4  ;;  %v3014_v55 = vsel %vm419_vm0, %v2988_v57, 0.0 }
 0x61a   :  { %6865 = vmatpush3.bf16.msra.mxu1 %v7177_v21  ;;  %v11327_v21 = vld [vmem:[#allocation54_spill] sm:$0xff] }
 0x61b   :  { %2895 = vadd.xlane.f32.xlu1 %v2894_v33  ;;  %v7178_v33 = vld [vmem:[#allocation22 + $0x18] sm:$0xff]  }
 0x61c   :  { %6866 = vmatprep.subr.bf16.mxu1 %v7178_v33 }
 0x61d   :  { %3018 = vadd.xlane.f32.xlu0 %v3017_v63 }
 0x61e   :  { %6867 = vmatpush3.bf16.msra.mxu1 %v7178_v33 }
 0x61f   :  { %v6842_v58 = vpop.f32.mrb[52].mxu1  ;;  %3021 = vadd.xlane.f32.xlu1 %v3020_v19 }
 0x620   :  { %v2840_v3 = vadd.f32 %v6842_v58, %v11312_v23  ;;  %v2755_v36 = vpop.f32.mrb[53].mxu1 }
 0x621   :  { %v2838_v39 = vadd.f32 %v2755_v36, %v11313_v60  ;;  %v6843_v22 = vpop.f32.mrb[54].mxu1  ;;  %3012 = vadd.xlane.f32.xlu0 %v3011_v35 }
 0x622   :  { %v9955_v30 = vadd.f32 %v9915_v61, %v2840_v3  ;;  %v2841_v25 = vadd.f32 %v6843_v22, %v11314_v34  ;;  %v2758_v13 = vpop.f32.mrb[55].mxu1  ;;  %v11320_v3 = vld [vmem:[#allocation60_spill] sm:$0xff] }
 0x623   :  { %v2839_v45 = vadd.f32 %v2758_v13, %v11315_v28  ;;  %3015 = vadd.xlane.f32.xlu1 %v3014_v55  ;;  %v9961_v14 = vadd.f32 %v9915_v61, %v2838_v39  ;;  %v11321_v39 = vld [vmem:[#allocation62_spill] sm:$0xff]  ;;  %v11322_v13 = vld [vmem:[#allocation59_spill] sm:$0xff] }
 0x624   :  { %v9964_v44 = vadd.f32 %v9915_v61, %v2841_v25  ;;  %v2909_v0 = vsel %vm419_vm0, %v9955_v30, 0.0  ;;  %v2993_v9 = vmul.f32 %v9955_v30, %v9955_v30 }
 0x625   :  { %2910 = vadd.xlane.f32.xlu0 %v2909_v0  ;;  %v9969_v27 = vadd.f32 %v9915_v61, %v2839_v45  ;;  %v2903_v11 = vsel %vm419_vm0, %v9961_v14, 0.0  ;;  %v2991_v52 = vmul.f32 %v9961_v14, %v9961_v14  ;;  %v11323_v0 = vld [vmem:[#allocation61_spill] sm:$0xff] }
 0x626   :  { %v2912_v15 = vsel %vm419_vm0, %v9964_v44, 0.0  ;;  %v2994_v12 = vmul.f32 %v9964_v44, %v9964_v44  ;;  %v3029_v18 = vsel %vm419_vm0, %v2993_v9, 0.0 }
 0x627   :  { %2913 = vadd.xlane.f32.xlu1 %v2912_v15  ;;  %v2906_v42 = vsel %vm419_vm0, %v9969_v27, 0.0  ;;  %v2992_v48 = vmul.f32 %v9969_v27, %v9969_v27  ;;  %v3023_v47 = vsel %vm419_vm0, %v2991_v52, 0.0 }
 0x628   :  { %v3032_v16 = vsel %vm419_vm0, %v2994_v12, 0.0 }
 0x629   :  { %2904 = vadd.xlane.f32.xlu0 %v2903_v11  ;;  %v3026_v10 = vsel %vm419_vm0, %v2992_v48, 0.0 }
 0x62b   :  { %2907 = vadd.xlane.f32.xlu1 %v2906_v42 }
 0x62d   :  { %3030 = vadd.xlane.f32.xlu0 %v3029_v18 }
 0x62f   :  { %3033 = vadd.xlane.f32.xlu1 %v3032_v16 }
 0x631   :  { %3024 = vadd.xlane.f32.xlu0 %v3023_v47 }
 0x633   :  { %3027 = vadd.xlane.f32.xlu1 %v3026_v10 }
 0x641   :  { %v6846_v1 = vpop.f32.mrb[56].mxu1 }
 0x642   :  { %v2844_v2 = vadd.f32 %v6846_v1, %v11316_v51  ;;  %v2771_v37 = vpop.f32.mrb[57].mxu1 }
 0x643   :  { %v2842_v7 = vadd.f32 %v2771_v37, %v11317_v20  ;;  %v6847_v50 = vpop.f32.mrb[58].mxu1 }
 0x644   :  { %v9992_v32 = vadd.f32 %v9915_v61, %v2844_v2  ;;  %v2845_v54 = vadd.f32 %v6847_v50, %v11318_v6  ;;  %v2774_v5 = vpop.f32.mrb[59].mxu1 }
 0x645   :  { %v2843_v59 = vadd.f32 %v2774_v5, %v11319_v43  ;;  %v9997_v46 = vadd.f32 %v9915_v61, %v2842_v7  ;;  %v11324_v7 = vld [vmem:[#allocation49_spill] sm:$0xff] }
 0x646   :  { %v10000_v40 = vadd.f32 %v9915_v61, %v2845_v54  ;;  %v2921_v8 = vsel %vm419_vm0, %v9992_v32, 0.0  ;;  %v2997_v31 = vmul.f32 %v9992_v32, %v9992_v32  ;;  %v11325_v54 = vld [vmem:[#allocation50_spill] sm:$0xff] }
 0x647   :  { %2922 = vadd.xlane.f32.xlu0 %v2921_v8  ;;  %v10005_v56 = vadd.f32 %v9915_v61, %v2843_v59  ;;  %v2915_v4 = vsel %vm419_vm0, %v9997_v46, 0.0  ;;  %v2995_v19 = vmul.f32 %v9997_v46, %v9997_v46  ;;  %v11326_v8 = vld [vmem:[#allocation52_spill] sm:$0xff] }
 0x648   :  { %v2924_v62 = vsel %vm419_vm0, %v10000_v40, 0.0  ;;  %v2998_v63 = vmul.f32 %v10000_v40, %v10000_v40  ;;  %v3041_v24 = vsel %vm419_vm0, %v2997_v31, 0.0 }
 0x649   :  { %2925 = vadd.xlane.f32.xlu1 %v2924_v62  ;;  %v2918_v29 = vsel %vm419_vm0, %v10005_v56, 0.0  ;;  %v2996_v58 = vmul.f32 %v10005_v56, %v10005_v56  ;;  %v3035_v60 = vsel %vm419_vm0, %v2995_v19, 0.0 }
 0x64a   :  { %v3044_v57 = vsel %vm419_vm0, %v2998_v63, 0.0 }
 0x64b   :  { %2916 = vadd.xlane.f32.xlu0 %v2915_v4  ;;  %v3038_v45 = vsel %vm419_vm0, %v2996_v58, 0.0 }
 0x64d   :  { %2919 = vadd.xlane.f32.xlu1 %v2918_v29 }
 0x64f   :  { %3042 = vadd.xlane.f32.xlu0 %v3041_v24 }
 0x651   :  { %v6850_v23 = vpop.f32.mrb[60].mxu1  ;;  %3045 = vadd.xlane.f32.xlu1 %v3044_v57 }
 0x652   :  { %v2848_v36 = vadd.f32 %v6850_v23, %v11320_v3  ;;  %v2787_v35 = vpop.f32.mrb[61].mxu1 }
 0x653   :  { %v2846_v22 = vadd.f32 %v2787_v35, %v11321_v39  ;;  %v6851_v34 = vpop.f32.mrb[62].mxu1  ;;  %3036 = vadd.xlane.f32.xlu0 %v3035_v60 }
 0x654   :  { %v10027_v25 = vadd.f32 %v9915_v61, %v2848_v36  ;;  %v2849_v55 = vadd.f32 %v6851_v34, %v11322_v13  ;;  %v2790_v28 = vpop.f32.mrb[63].mxu1 }
 0x655   :  { %v2847_v15 = vadd.f32 %v2790_v28, %v11323_v0  ;;  %3039 = vadd.xlane.f32.xlu1 %v3038_v45  ;;  %v10033_v11 = vadd.f32 %v9915_v61, %v2846_v22  ;;  %v11328_v22 = vld [vmem:[#allocation55_spill] sm:$0xff]  ;;  %v11329_v28 = vld [vmem:[#allocation56_spill] sm:$0xff] }
 0x656   :  { %v10036_v9 = vadd.f32 %v9915_v61, %v2849_v55  ;;  %v2933_v42 = vsel %vm419_vm0, %v10027_v25, 0.0  ;;  %v3001_v16 = vmul.f32 %v10027_v25, %v10027_v25 }
 0x657   :  { %2934 = vadd.xlane.f32.xlu0 %v2933_v42  ;;  %v10041_v12 = vadd.f32 %v9915_v61, %v2847_v15  ;;  %v2927_v52 = vsel %vm419_vm0, %v10033_v11, 0.0  ;;  %v2999_v1 = vmul.f32 %v10033_v11, %v10033_v11  ;;  %v11330_v42 = vld [vmem:[#allocation57_spill] sm:$0xff] }
 0x658   :  { %v2936_v18 = vsel %vm419_vm0, %v10036_v9, 0.0  ;;  %v3002_v47 = vmul.f32 %v10036_v9, %v10036_v9  ;;  %v3053_v10 = vsel %vm419_vm0, %v3001_v16, 0.0 }
 0x659   :  { %2937 = vadd.xlane.f32.xlu1 %v2936_v18  ;;  %v2930_v48 = vsel %vm419_vm0, %v10041_v12, 0.0  ;;  %v3000_v2 = vmul.f32 %v10041_v12, %v10041_v12  ;;  %v3047_v37 = vsel %vm419_vm0, %v2999_v1, 0.0 }
 0x65a   :  { %v3056_v51 = vsel %vm419_vm0, %v3002_v47, 0.0 }
 0x65b   :  { %2928 = vadd.xlane.f32.xlu0 %v2927_v52  ;;  %v3050_v41 = vsel %vm419_vm0, %v3000_v2, 0.0 }
 0x65d   :  { %2931 = vadd.xlane.f32.xlu1 %v2930_v48  ;;  %v11331_v48 = vld [vmem:[#allocation58_spill] sm:$0xff] }
 0x65f   :  { %3054 = vadd.xlane.f32.xlu0 %v3053_v10 }
 0x661   :  { %3057 = vadd.xlane.f32.xlu1 %v3056_v51 }
 0x663   :  { %3048 = vadd.xlane.f32.xlu0 %v3047_v37 }
 0x665   :  { %3051 = vadd.xlane.f32.xlu1 %v3050_v41 }
 0x670   :  { %v6854_v20 = vpop.f32.mrb[64].mxu1 }
 0x671   :  { %v2852_v50 = vadd.f32 %v6854_v20, %v11324_v7  ;;  %v2803_v6 = vpop.f32.mrb[65].mxu1 }
 0x672   :  { %v2850_v5 = vadd.f32 %v2803_v6, %v11325_v54  ;;  %v6855_v43 = vpop.f32.mrb[66].mxu1 }
 0x673   :  { %v10064_v59 = vadd.f32 %v9915_v61, %v2852_v50  ;;  %v2853_v38 = vadd.f32 %v6855_v43, %v11326_v8  ;;  %v2806_v62 = vpop.f32.mrb[67].mxu1 }
 0x674   :  { %v2851_v4 = vadd.f32 %v2806_v62, %v11327_v21  ;;  %v10069_v31 = vadd.f32 %v9915_v61, %v2850_v5 }
 0x675   :  { %v10072_v33 = vadd.f32 %v9915_v61, %v2853_v38  ;;  %v2945_v29 = vsel %vm419_vm0, %v10064_v59, 0.0  ;;  %v3005_v57 = vmul.f32 %v10064_v59, %v10064_v59 }
 0x676   :  { %2946 = vadd.xlane.f32.xlu0 %v2945_v29  ;;  %v10077_v63 = vadd.f32 %v9915_v61, %v2851_v4  ;;  %v2939_v19 = vsel %vm419_vm0, %v10069_v31, 0.0  ;;  %v3003_v36 = vmul.f32 %v10069_v31, %v10069_v31 }
 0x677   :  { %v2948_v24 = vsel %vm419_vm0, %v10072_v33, 0.0  ;;  %v3006_v23 = vmul.f32 %v10072_v33, %v10072_v33  ;;  %v3065_v3 = vsel %vm419_vm0, %v3005_v57, 0.0 }
 0x678   :  { %2949 = vadd.xlane.f32.xlu1 %v2948_v24  ;;  %v2942_v58 = vsel %vm419_vm0, %v10077_v63, 0.0  ;;  %v3004_v60 = vmul.f32 %v10077_v63, %v10077_v63  ;;  %v3059_v55 = vsel %vm419_vm0, %v3003_v36, 0.0 }
 0x679   :  { %v3068_v35 = vsel %vm419_vm0, %v3006_v23, 0.0 }
 0x67a   :  { %2940 = vadd.xlane.f32.xlu0 %v2939_v19  ;;  %v3062_v16 = vsel %vm419_vm0, %v3004_v60, 0.0 }
 0x67c   :  { %2943 = vadd.xlane.f32.xlu1 %v2942_v58 }
 0x67e   :  { %3066 = vadd.xlane.f32.xlu0 %v3065_v3 }
 0x680   :  { %v6858_v39 = vpop.f32.mrb[68].mxu1  ;;  %3069 = vadd.xlane.f32.xlu1 %v3068_v35 }
 0x681   :  { %v2856_v34 = vadd.f32 %v6858_v39, %v11328_v22  ;;  %v2819_v13 = vpop.f32.mrb[69].mxu1 }
 0x682   :  { %v2854_v45 = vadd.f32 %v2819_v13, %v11329_v28  ;;  %v6859_v0 = vpop.f32.mrb[70].mxu1  ;;  %3060 = vadd.xlane.f32.xlu0 %v3059_v55 }
 0x683   :  { %v10099_v15 = vadd.f32 %v9915_v61, %v2856_v34  ;;  %v2857_v18 = vadd.f32 %v6859_v0, %v11330_v42  ;;  %v2822_v52 = vpop.f32.mrb[71].mxu1 }
 0x684   :  { %v2855_v47 = vadd.f32 %v2822_v52, %v11331_v48  ;;  %3063 = vadd.xlane.f32.xlu1 %v3062_v16  ;;  %v10105_v10 = vadd.f32 %v9915_v61, %v2854_v45 }
 0x685   :  { %v10108_v1 = vadd.f32 %v9915_v61, %v2857_v18  ;;  %v2957_v51 = vsel %vm419_vm0, %v10099_v15, 0.0  ;;  %v3009_v6 = vmul.f32 %v10099_v15, %v10099_v15 }
 0x686   :  { %2958 = vadd.xlane.f32.xlu0 %v2957_v51  ;;  %v10113_v2 = vadd.f32 %v9915_v61, %v2855_v47  ;;  %v2951_v41 = vsel %vm419_vm0, %v10105_v10, 0.0  ;;  %v3007_v20 = vmul.f32 %v10105_v10, %v10105_v10 }
 0x687   :  { %v2960_v37 = vsel %vm419_vm0, %v10108_v1, 0.0  ;;  %v3010_v5 = vmul.f32 %v10108_v1, %v10108_v1  ;;  %v3077_v43 = vsel %vm419_vm0, %v3009_v6, 0.0 }
 0x688   :  { %2961 = vadd.xlane.f32.xlu1 %v2960_v37  ;;  %v2954_v7 = vsel %vm419_vm0, %v10113_v2, 0.0  ;;  %v3008_v50 = vmul.f32 %v10113_v2, %v10113_v2  ;;  %v3071_v61 = vsel %vm419_vm0, %v3007_v20, 0.0 }
 0x689   :  { %v3080_v8 = vsel %vm419_vm0, %v3010_v5, 0.0 }
 0x68a   :  { %2952 = vadd.xlane.f32.xlu0 %v2951_v41  ;;  %v3074_v54 = vsel %vm419_vm0, %v3008_v50, 0.0 }
 0x68c   :  { %2955 = vadd.xlane.f32.xlu1 %v2954_v7 }
 0x68e   :  { %3072 = vadd.xlane.f32.xlu0 %v3071_v61 }
 0x690   :  { %3075 = vadd.xlane.f32.xlu1 %v3074_v54 }
 0x692   :  { %3078 = vadd.xlane.f32.xlu0 %v3077_v43 }
 0x694   :  { %3081 = vadd.xlane.f32.xlu1 %v3080_v8 }
 0x6a2   :  { %v2899_v38 = vpop.xlane.xlu0 %2898 }
 0x6a3   :  { %v2965_v4 = vmul.f32 0.015625, %v2899_v38 }
 0x6a4   :  { %v2902_v62 = vpop.xlane.xlu1 %2901 }
 0x6a5   :  { %v2966_v24 = vmul.f32 0.015625, %v2902_v62  ;;  %v3109_v57 = vmul.f32 %v2965_v4, %v2965_v4 }
 0x6a6   :  { %v2893_v21 = vpop.xlane.xlu0 %2892 }
 0x6a7   :  { %v2963_v58 = vmul.f32 0.015625, %v2893_v21  ;;  %v3110_v36 = vmul.f32 %v2966_v24, %v2966_v24  ;;  %v3158_v8 = vsub.f32 %v9928_v17, %v2966_v24 }
 0x6a8   :  { %v2896_v29 = vpop.xlane.xlu1 %2895 }
 0x6a9   :  { %v2964_v35 = vmul.f32 0.015625, %v2896_v29  ;;  %v3107_v34 = vmul.f32 %v2963_v58, %v2963_v58  ;;  %v3157_v29 = vsub.f32 %v9920_v49, %v2965_v4 }
 0x6aa   :  { %v3019_v19 = vpop.xlane.xlu0 %3018 }
 0x6ab   :  { %v3085_v23 = vmul.f32 0.015625, %v3019_v19  ;;  %v3108_v0 = vmul.f32 %v2964_v35, %v2964_v35  ;;  %v3156_v24 = vsub.f32 %v9933_v26, %v2964_v35 }
 0x6ac   :  { %v3022_v3 = vpop.xlane.xlu1 %3021 }
 0x6ad   :  { %v3133_v60 = vsub.f32 %v3085_v23, %v3109_v57  ;;  %v3086_v39 = vmul.f32 0.015625, %v3022_v3  ;;  %v3155_v3 = vsub.f32 %v9925_v53, %v2963_v58 }
 0x6ae   :  { %v3013_v22 = vpop.xlane.xlu0 %3012 }
 0x6af   :  { %v3181_v13 = vadd.f32 1e-05, %v3133_v60  ;;  %v3134_v55 = vsub.f32 %v3086_v39, %v3110_v36  ;;  %v3083_v28 = vmul.f32 0.015625, %v3013_v22 }
 0x6b0   :  { %v3016_v45 = vpop.xlane.xlu1 %3015 }
 0x6b1   :  { %v3182_v42 = vadd.f32 1e-05, %v3134_v55  ;;  %v3131_v18 = vsub.f32 %v3083_v28, %v3107_v34  ;;  %v3084_v52 = vmul.f32 0.015625, %v3016_v45  ;;  %7459 = vrsqrt.f32 %v3181_v13  ;;  %v10141_v45 = vld [vmem:[#allocation19] ss:$0 sm:$0xff] }
 0x6b2   :  { %v2911_v16 = vpop.xlane.xlu0 %2910 }
 0x6b3   :  { %7461 = vrsqrt.f32 %v3182_v42  ;;  %v3179_v48 = vadd.f32 1e-05, %v3131_v18  ;;  %v3132_v47 = vsub.f32 %v3084_v52, %v3108_v0  ;;  %v10133_v20 = vmul.f32 0.015625, %v2911_v16 }
 0x6b4   :  { %v2914_v51 = vpop.xlane.xlu1 %2913 }
 0x6b5   :  { %7463 = vrsqrt.f32 %v3179_v48  ;;  %v3180_v37 = vadd.f32 1e-05, %v3132_v47  ;;  %v2970_v50 = vmul.f32 0.015625, %v2914_v51  ;;  %v3113_v54 = vmul.f32 %v10133_v20, %v10133_v20 }
 0x6b6   :  { %v2905_v41 = vpop.xlane.xlu0 %2904 }
 0x6b7   :  { %7465 = vrsqrt.f32 %v3180_v37  ;;  %v2967_v61 = vmul.f32 0.015625, %v2905_v41  ;;  %v3114_v19 = vmul.f32 %v2970_v50, %v2970_v50 }
 0x6b8   :  { %v2908_v7 = vpop.xlane.xlu1 %2907 }
 0x6b9   :  { %v2968_v38 = vmul.f32 0.015625, %v2908_v7  ;;  %v3111_v60 = vmul.f32 %v2967_v61, %v2967_v61  ;;  %v10146_v7 = vld [vmem:[#allocation20] ss:$0 sm:$0xff] }
 0x6ba   :  { %v3031_v6 = vpop.xlane.xlu0 %3030 }
 0x6bb   :  { %v3089_v5 = vmul.f32 0.015625, %v3031_v6  ;;  %v7460_v43 = vpop.eup %7459  ;;  %v3112_v0 = vmul.f32 %v2968_v38, %v2968_v38 }
 0x6bc   :  { %v3034_v62 = vpop.xlane.xlu1 %3033  ;;  %v3229_v34 = vmul.f32 %v7460_v43, %v3157_v29 }
 0x6bd   :  { %v7462_v21 = vpop.eup %7461  ;;  %v3137_v57 = vsub.f32 %v3089_v5, %v3113_v54  ;;  %v3090_v23 = vmul.f32 0.015625, %v3034_v62 }
 0x6be   :  { %v3230_v36 = vmul.f32 %v7462_v21, %v3158_v8  ;;  %v3025_v39 = vpop.xlane.xlu0 %3024  ;;  %v3259_v37 = vmul.f32 %v10141_v45, %v3229_v34  ;;  %v3160_v34 = vsub.f32 %v9969_v27, %v2968_v38 }
 0x6bf   :  { %v7464_v22 = vpop.eup %7463  ;;  %v3185_v13 = vadd.f32 1e-05, %v3137_v57  ;;  %v3138_v55 = vsub.f32 %v3090_v23, %v3114_v19  ;;  %v3087_v28 = vmul.f32 0.015625, %v3025_v39  ;;  %v3162_v57 = vsub.f32 %v9964_v44, %v2970_v50 }
 0x6c0   :  { %v3028_v42 = vpop.xlane.xlu1 %3027  ;;  %v3227_v4 = vmul.f32 %v7464_v22, %v3155_v3  ;;  %v3260_v52 = vmul.f32 %v10141_v45, %v3230_v36  ;;  %v3289_v62 = vadd.f32 %v10146_v7, %v3259_v37  ;;  %v3161_v3 = vsub.f32 %v9955_v30, %v10133_v20 }
 0x6c1   :  { %v7466_v18 = vpop.eup %7465  ;;  %v3186_v16 = vadd.f32 1e-05, %v3138_v55  ;;  %v3135_v58 = vsub.f32 %v3087_v28, %v3111_v60  ;;  %v3088_v48 = vmul.f32 0.015625, %v3028_v42  ;;  %7467 = vrsqrt.f32 %v3185_v13 }
 0x6c2   :  { %v3228_v47 = vmul.f32 %v7466_v18, %v3156_v24  ;;  %v3257_v51 = vmul.f32 %v10141_v45, %v3227_v4  ;;  %v3290_v5 = vadd.f32 %v10146_v7, %v3260_v52  ;;  %v3159_v36 = vsub.f32 %v9961_v14, %v2967_v61 }
 0x6c3   :  { %7469 = vrsqrt.f32 %v3186_v16  ;;  %v3183_v41 = vadd.f32 1e-05, %v3135_v58  ;;  %v3136_v35 = vsub.f32 %v3088_v48, %v3112_v0 }
 0x6c4   :  { %v3258_v6 = vmul.f32 %v10141_v45, %v3228_v47  ;;  %v3287_v43 = vadd.f32 %v10146_v7, %v3257_v51  ;;  %v3312_v29 = vpack.c.bf16 %v3290_v5, %v3289_v62 }
 0x6c5   :  { %7471 = vrsqrt.f32 %v3183_v41  ;;  %v3184_v54 = vadd.f32 1e-05, %v3136_v35 }
 0x6c6   :  { %v3288_v8 = vadd.f32 %v10146_v7, %v3258_v6 }
 0x6c7   :  { %7473 = vrsqrt.f32 %v3184_v54 }
 0x6c8   :  { %v3311_v21 = vpack.c.bf16 %v3288_v8, %v3287_v43 }
 0x6ca   :  { %6868 = vmatprep.mubr.msk.bf16.mxu1 %vm419_vm0, %v3311_v21 }
 0x6cb   :  { %6869 = vmatmul.mubr.msk.bf16.vlgmr.msra.gmra.mrb[72].mxu1 %vm419_vm0, %v3312_v29  ;;  %v7468_v19 = vpop.eup %7467 }
 0x6cc   :  { %v3233_v22 = vmul.f32 %v7468_v19, %v3161_v3 }
 0x6cd   :  { %v7470_v23 = vpop.eup %7469 }
 0x6ce   :  { %v3234_v60 = vmul.f32 %v7470_v23, %v3162_v57  ;;  %v3263_v50 = vmul.f32 %v10141_v45, %v3233_v22 }
 0x6cf   :  { %v7472_v39 = vpop.eup %7471 }
 0x6d0   :  { %v3231_v13 = vmul.f32 %v7472_v39, %v3159_v36  ;;  %v3264_v28 = vmul.f32 %v10141_v45, %v3234_v60  ;;  %v3293_v58 = vadd.f32 %v10146_v7, %v3263_v50 }
 0x6d1   :  { %v7474_v55 = vpop.eup %7473 }
 0x6d2   :  { %v3232_v0 = vmul.f32 %v7474_v55, %v3160_v34  ;;  %v3261_v42 = vmul.f32 %v10141_v45, %v3231_v13  ;;  %v3294_v61 = vadd.f32 %v10146_v7, %v3264_v28 }
 0x6d4   :  { %v2923_v24 = vpop.xlane.xlu0 %2922  ;;  %v3262_v20 = vmul.f32 %v10141_v45, %v3232_v0  ;;  %v3291_v52 = vadd.f32 %v10146_v7, %v3261_v42  ;;  %v3314_v37 = vpack.c.bf16 %v3294_v61, %v3293_v58 }
 0x6d5   :  { %v2973_v16 = vmul.f32 0.015625, %v2923_v24 }
 0x6d6   :  { %v2926_v4 = vpop.xlane.xlu1 %2925  ;;  %v3292_v38 = vadd.f32 %v10146_v7, %v3262_v20 }
 0x6d7   :  { %v2974_v51 = vmul.f32 0.015625, %v2926_v4  ;;  %v3117_v35 = vmul.f32 %v2973_v16, %v2973_v16 }
 0x6d8   :  { %v2917_v18 = vpop.xlane.xlu0 %2916  ;;  %v3313_v47 = vpack.c.bf16 %v3292_v38, %v3291_v52 }
 0x6d9   :  { %v2971_v6 = vmul.f32 0.015625, %v2917_v18  ;;  %v3118_v43 = vmul.f32 %v2974_v51, %v2974_v51 }
 0x6da   :  { %v2920_v48 = vpop.xlane.xlu1 %2919  ;;  %6872 = vmatprep.mubr.msk.bf16.mxu1 %vm419_vm0, %v3313_v47 }
 0x6db   :  { %6873 = vmatmul.mubr.msk.bf16.gmra.mrb[76].mxu1 %vm419_vm0, %v3314_v37  ;;  %v2972_v8 = vmul.f32 0.015625, %v2920_v48  ;;  %v3115_v19 = vmul.f32 %v2971_v6, %v2971_v6  ;;  %v3166_v48 = vsub.f32 %v10000_v40, %v2974_v51 }
 0x6dc   :  { %v3043_v41 = vpop.xlane.xlu0 %3042 }
 0x6dd   :  { %v3093_v54 = vmul.f32 0.015625, %v3043_v41  ;;  %v3116_v60 = vmul.f32 %v2972_v8, %v2972_v8  ;;  %v3164_v51 = vsub.f32 %v10005_v56, %v2972_v8 }
 0x6de   :  { %v3046_v5 = vpop.xlane.xlu1 %3045 }
 0x6df   :  { %v3141_v62 = vsub.f32 %v3093_v54, %v3117_v35  ;;  %v3094_v21 = vmul.f32 0.015625, %v3046_v5  ;;  %v3165_v35 = vsub.f32 %v9992_v32, %v2973_v16 }
 0x6e0   :  { %v3037_v29 = vpop.xlane.xlu0 %3036 }
 0x6e1   :  { %v3189_v57 = vadd.f32 1e-05, %v3141_v62  ;;  %v3142_v23 = vsub.f32 %v3094_v21, %v3118_v43  ;;  %v3091_v3 = vmul.f32 0.015625, %v3037_v29  ;;  %v3163_v62 = vsub.f32 %v9997_v46, %v2971_v6 }
 0x6e2   :  { %v3040_v36 = vpop.xlane.xlu1 %3039 }
 0x6e3   :  { %v3190_v39 = vadd.f32 1e-05, %v3142_v23  ;;  %v3139_v22 = vsub.f32 %v3091_v3, %v3115_v19  ;;  %v3092_v34 = vmul.f32 0.015625, %v3040_v36  ;;  %7475 = vrsqrt.f32 %v3189_v57 }
 0x6e4   :  { %v2935_v13 = vpop.xlane.xlu0 %2934 }
 0x6e5   :  { %7477 = vrsqrt.f32 %v3190_v39  ;;  %v3187_v55 = vadd.f32 1e-05, %v3139_v22  ;;  %v3140_v28 = vsub.f32 %v3092_v34, %v3116_v60  ;;  %v2977_v50 = vmul.f32 0.015625, %v2935_v13 }
 0x6e6   :  { %v2938_v24 = vpop.xlane.xlu1 %2937 }
 0x6e7   :  { %7479 = vrsqrt.f32 %v3187_v55  ;;  %v3188_v0 = vadd.f32 1e-05, %v3140_v28  ;;  %v2978_v20 = vmul.f32 0.015625, %v2938_v24  ;;  %v3121_v52 = vmul.f32 %v2977_v50, %v2977_v50 }
 0x6e8   :  { %v2929_v42 = vpop.xlane.xlu0 %2928 }
 0x6e9   :  { %7481 = vrsqrt.f32 %v3188_v0  ;;  %v2975_v61 = vmul.f32 0.015625, %v2929_v42  ;;  %v3122_v54 = vmul.f32 %v2978_v20, %v2978_v20 }
 0x6ea   :  { %v2932_v4 = vpop.xlane.xlu1 %2931 }
 0x6eb   :  { %v2976_v47 = vmul.f32 0.015625, %v2932_v4  ;;  %v3119_v21 = vmul.f32 %v2975_v61, %v2975_v61 }
 0x6ec   :  { %v3055_v18 = vpop.xlane.xlu0 %3054 }
 0x6ed   :  { %v3097_v38 = vmul.f32 0.015625, %v3055_v18  ;;  %v7476_v58 = vpop.eup %7475  ;;  %v3120_v39 = vmul.f32 %v2976_v47, %v2976_v47 }
 0x6ee   :  { %v3058_v37 = vpop.xlane.xlu1 %3057  ;;  %v3237_v60 = vmul.f32 %v7476_v58, %v3165_v35 }
 0x6ef   :  { %v7478_v41 = vpop.eup %7477  ;;  %v3145_v5 = vsub.f32 %v3097_v38, %v3121_v52  ;;  %v3098_v43 = vmul.f32 0.015625, %v3058_v37 }
 0x6f0   :  { %v3049_v29 = vpop.xlane.xlu0 %3048  ;;  %v3238_v19 = vmul.f32 %v7478_v41, %v3166_v48  ;;  %v3267_v18 = vmul.f32 %v10141_v45, %v3237_v60 }
 0x6f1   :  { %v7480_v57 = vpop.eup %7479  ;;  %v3193_v23 = vadd.f32 1e-05, %v3145_v5  ;;  %v3146_v3 = vsub.f32 %v3098_v43, %v3122_v54  ;;  %v3095_v36 = vmul.f32 0.015625, %v3049_v29  ;;  %v3170_v5 = vsub.f32 %v10036_v9, %v2978_v20 }
 0x6f2   :  { %v3052_v22 = vpop.xlane.xlu1 %3051  ;;  %v3235_v34 = vmul.f32 %v7480_v57, %v3163_v62  ;;  %v3268_v24 = vmul.f32 %v10141_v45, %v3238_v19  ;;  %v3297_v37 = vadd.f32 %v10146_v7, %v3267_v18  ;;  %v3169_v62 = vsub.f32 %v10027_v25, %v2977_v50 }
 0x6f3   :  { %v7482_v13 = vpop.eup %7481  ;;  %v3194_v16 = vadd.f32 1e-05, %v3146_v3  ;;  %v3143_v55 = vsub.f32 %v3095_v36, %v3119_v21  ;;  %v3096_v28 = vmul.f32 0.015625, %v3052_v22  ;;  %7483 = vrsqrt.f32 %v3193_v23 }
 0x6f4   :  { %v3236_v6 = vmul.f32 %v7482_v13, %v3164_v51  ;;  %v3265_v0 = vmul.f32 %v10141_v45, %v3235_v34  ;;  %v3298_v38 = vadd.f32 %v10146_v7, %v3268_v24  ;;  %v3167_v21 = vsub.f32 %v10033_v11, %v2975_v61 }
 0x6f5   :  { %7485 = vrsqrt.f32 %v3194_v16  ;;  %v3191_v42 = vadd.f32 1e-05, %v3143_v55  ;;  %v3144_v4 = vsub.f32 %v3096_v28, %v3120_v39  ;;  %v3168_v23 = vsub.f32 %v10041_v12, %v2976_v47 }
 0x6f6   :  { %v3266_v8 = vmul.f32 %v10141_v45, %v3236_v6  ;;  %v3295_v58 = vadd.f32 %v10146_v7, %v3265_v0  ;;  %v3316_v35 = vpack.c.bf16 %v3298_v38, %v3297_v37 }
 0x6f7   :  { %7487 = vrsqrt.f32 %v3191_v42  ;;  %v3192_v52 = vadd.f32 1e-05, %v3144_v4 }
 0x6f8   :  { %v3296_v48 = vadd.f32 %v10146_v7, %v3266_v8 }
 0x6f9   :  { %7489 = vrsqrt.f32 %v3192_v52 }
 0x6fa   :  { %v3315_v41 = vpack.c.bf16 %v3296_v48, %v3295_v58 }
 0x6fc   :  { %6876 = vmatprep.mubr.msk.bf16.mxu1 %vm419_vm0, %v3315_v41 }
 0x6fd   :  { %6877 = vmatmul.mubr.msk.bf16.gmra.mrb[80].mxu1 %vm419_vm0, %v3316_v35  ;;  %v7484_v54 = vpop.eup %7483 }
 0x6fe   :  { %v3241_v57 = vmul.f32 %v7484_v54, %v3169_v62 }
 0x6ff   :  { %v7486_v43 = vpop.eup %7485 }
 0x700   :  { %v3242_v29 = vmul.f32 %v7486_v43, %v3170_v5  ;;  %v3271_v20 = vmul.f32 %v10141_v45, %v3241_v57 }
 0x701   :  { %v7488_v19 = vpop.eup %7487 }
 0x702   :  { %v3239_v3 = vmul.f32 %v7488_v19, %v3167_v21  ;;  %v3272_v60 = vmul.f32 %v10141_v45, %v3242_v29  ;;  %v3301_v28 = vadd.f32 %v10146_v7, %v3271_v20 }
 0x703   :  { %v7490_v36 = vpop.eup %7489  ;;  %v2947_v51 = vpop.xlane.xlu0 %2946 }
 0x704   :  { %v3240_v39 = vmul.f32 %v7490_v36, %v3168_v23  ;;  %v3269_v22 = vmul.f32 %v10141_v45, %v3239_v3  ;;  %v3302_v61 = vadd.f32 %v10146_v7, %v3272_v60  ;;  %v2981_v55 = vmul.f32 0.015625, %v2947_v51 }
 0x705   :  { %v2950_v34 = vpop.xlane.xlu1 %2949 }
 0x706   :  { %v3270_v50 = vmul.f32 %v10141_v45, %v3240_v39  ;;  %v3299_v16 = vadd.f32 %v10146_v7, %v3269_v22  ;;  %v2982_v0 = vmul.f32 0.015625, %v2950_v34  ;;  %v3318_v42 = vpack.c.bf16 %v3302_v61, %v3301_v28 }
 0x707   :  { %v2941_v13 = vpop.xlane.xlu0 %2940  ;;  %v3125_v18 = vmul.f32 %v2981_v55, %v2981_v55 }
 0x708   :  { %v3300_v47 = vadd.f32 %v10146_v7, %v3270_v50  ;;  %v2979_v8 = vmul.f32 0.015625, %v2941_v13  ;;  %v3126_v58 = vmul.f32 %v2982_v0, %v2982_v0 }
 0x709   :  { %v2944_v24 = vpop.xlane.xlu1 %2943 }
 0x70a   :  { %v3317_v6 = vpack.c.bf16 %v3300_v47, %v3299_v16  ;;  %v2980_v48 = vmul.f32 0.015625, %v2944_v24  ;;  %v3123_v54 = vmul.f32 %v2979_v8, %v2979_v8  ;;  %v3174_v24 = vsub.f32 %v10072_v33, %v2982_v0 }
 0x70b   :  { %v3067_v4 = vpop.xlane.xlu0 %3066 }
 0x70c   :  { %6880 = vmatprep.mubr.msk.bf16.mxu1 %vm419_vm0, %v3317_v6  ;;  %v3101_v52 = vmul.f32 0.015625, %v3067_v4  ;;  %v3124_v29 = vmul.f32 %v2980_v48, %v2980_v48 }
 0x70d   :  { %6881 = vmatmul.mubr.msk.bf16.gmra.mrb[84].mxu1 %vm419_vm0, %v3318_v42  ;;  %v3070_v38 = vpop.xlane.xlu1 %3069 }
 0x70e   :  { %v3149_v37 = vsub.f32 %v3101_v52, %v3125_v18  ;;  %v3102_v41 = vmul.f32 0.015625, %v3070_v38  ;;  %v3173_v18 = vsub.f32 %v10064_v59, %v2981_v55 }
 0x70f   :  { %v3061_v35 = vpop.xlane.xlu0 %3060 }
 0x710   :  { %v3197_v5 = vadd.f32 1e-05, %v3149_v37  ;;  %v3150_v43 = vsub.f32 %v3102_v41, %v3126_v58  ;;  %v3099_v62 = vmul.f32 0.015625, %v3061_v35  ;;  %v3171_v37 = vsub.f32 %v10069_v31, %v2979_v8 }
 0x711   :  { %v3064_v21 = vpop.xlane.xlu1 %3063 }
 0x712   :  { %v3198_v19 = vadd.f32 1e-05, %v3150_v43  ;;  %v3147_v57 = vsub.f32 %v3099_v62, %v3123_v54  ;;  %v3100_v23 = vmul.f32 0.015625, %v3064_v21  ;;  %7491 = vrsqrt.f32 %v3197_v5 }
 0x713   :  { %v2959_v3 = vpop.xlane.xlu0 %2958 }
 0x714   :  { %7493 = vrsqrt.f32 %v3198_v19  ;;  %v3195_v36 = vadd.f32 1e-05, %v3147_v57  ;;  %v3148_v60 = vsub.f32 %v3100_v23, %v3124_v29  ;;  %v10200_v61 = vmul.f32 0.015625, %v2959_v3 }
 0x715   :  { %v2962_v51 = vpop.xlane.xlu1 %2961  ;;  %v3172_v29 = vsub.f32 %v10077_v63, %v2980_v48 }
 0x716   :  { %7495 = vrsqrt.f32 %v3195_v36  ;;  %v3196_v39 = vadd.f32 1e-05, %v3148_v60  ;;  %v10203_v6 = vmul.f32 0.015625, %v2962_v51  ;;  %v3129_v41 = vmul.f32 %v10200_v61, %v10200_v61 }
 0x717   :  { %v2953_v22 = vpop.xlane.xlu0 %2952 }
 0x718   :  { %7497 = vrsqrt.f32 %v3196_v39  ;;  %v2983_v20 = vmul.f32 0.015625, %v2953_v22  ;;  %v3130_v55 = vmul.f32 %v10203_v6, %v10203_v6 }
 0x719   :  { %v2956_v34 = vpop.xlane.xlu1 %2955 }
 0x71a   :  { %v10198_v50 = vmul.f32 0.015625, %v2956_v34  ;;  %v3127_v16 = vmul.f32 %v2983_v20, %v2983_v20 }
 0x71b   :  { %v3073_v13 = vpop.xlane.xlu0 %3072 }
 0x71c   :  { %v3103_v47 = vmul.f32 0.015625, %v3073_v13  ;;  %v7492_v28 = vpop.eup %7491  ;;  %v3128_v52 = vmul.f32 %v10198_v50, %v10198_v50 }
 0x71d   :  { %v3076_v42 = vpop.xlane.xlu1 %3075  ;;  %v3245_v21 = vmul.f32 %v7492_v28, %v3173_v18 }
 0x71e   :  { %v7494_v4 = vpop.eup %7493  ;;  %v3151_v38 = vsub.f32 %v3103_v47, %v3127_v16  ;;  %v3104_v58 = vmul.f32 0.015625, %v3076_v42 }
 0x71f   :  { %v3079_v35 = vpop.xlane.xlu0 %3078  ;;  %v3246_v54 = vmul.f32 %v7494_v4, %v3174_v24  ;;  %v3275_v48 = vmul.f32 %v10141_v45, %v3245_v21  ;;  %v7179_v4 = vld [vmem:[%s11111_s17] sm:$0xff]   ;;  %v3178_v21 = vsub.f32 %v10108_v1, %v10203_v6 }
 0x720   :  { %v7496_v5 = vpop.eup %7495  ;;  %v3199_v0 = vadd.f32 1e-05, %v3151_v38  ;;  %v3152_v43 = vsub.f32 %v3104_v58, %v3128_v52  ;;  %v3105_v62 = vmul.f32 0.015625, %v3079_v35  ;;  %6892 = vmatprep.subr.bf16.mxu1 %v7179_v4  ;;  %v3175_v38 = vsub.f32 %v10105_v10, %v2983_v20  ;;  %v7181_v20 = vld [vmem:[%s11111_s17 + $0x10] sm:$0xff]  }
 0x721   :  { %v3082_v19 = vpop.xlane.xlu1 %3081  ;;  %v3243_v57 = vmul.f32 %v7496_v5, %v3171_v37  ;;  %v3276_v23 = vmul.f32 %v10141_v45, %v3246_v54  ;;  %v3305_v42 = vadd.f32 %v10146_v7, %v3275_v48  ;;  %6893 = vmatpush3.bf16.msra.mxu1 %v7179_v4  ;;  %v7180_v37 = vld [vmem:[%s11111_s17 + $0x8] sm:$0xff]   ;;  %v3177_v5 = vsub.f32 %v10099_v15, %v10200_v61 }
 0x722   :  { %v7498_v8 = vpop.eup %7497  ;;  %7499 = vrsqrt.f32 %v3199_v0  ;;  %v3200_v3 = vadd.f32 1e-05, %v3152_v43  ;;  %v3153_v36 = vsub.f32 %v3105_v62, %v3129_v41  ;;  %v3106_v60 = vmul.f32 0.015625, %v3082_v19  ;;  %6894 = vmatprep.subr.bf16.mxu1 %v7180_v37 }
 0x723   :  { %v3244_v51 = vmul.f32 %v7498_v8, %v3172_v29  ;;  %v3273_v39 = vmul.f32 %v10141_v45, %v3243_v57  ;;  %v3306_v47 = vadd.f32 %v10146_v7, %v3276_v23  ;;  %v3176_v41 = vsub.f32 %v10113_v2, %v10198_v50  ;;  %v7182_v50 = vld [vmem:[%s11111_s17 + $0x18] sm:$0xff]  }
 0x724   :  { %7501 = vrsqrt.f32 %v3200_v3  ;;  %v3201_v22 = vadd.f32 1e-05, %v3153_v36  ;;  %v3154_v34 = vsub.f32 %v3106_v60, %v3130_v55 }
 0x725   :  { %v3274_v13 = vmul.f32 %v10141_v45, %v3244_v51  ;;  %v3303_v28 = vadd.f32 %v10146_v7, %v3273_v39  ;;  %v3320_v52 = vpack.c.bf16 %v3306_v47, %v3305_v42  ;;  %6895 = vmatpush3.bf16.msra.mxu1 %v7180_v37  ;;  %v7183_v51 = vld [vmem:[%s11111_s17 + $0x20] sm:$0xff]  }
 0x726   :  { %7503 = vrsqrt.f32 %v3201_v22  ;;  %v3202_v16 = vadd.f32 1e-05, %v3154_v34  ;;  %6896 = vmatprep.subr.bf16.mxu1 %v7181_v20  ;;  %v7184_v22 = vld [vmem:[%s11111_s17 + $0x28] sm:$0xff]   ;;  %v10265_v34 = vld [vmem:[#allocation23] ss:$0 sm:$0xff] }
 0x727   :  { %v3304_v24 = vadd.f32 %v10146_v7, %v3274_v13 }
 0x728   :  { %7505 = vrsqrt.f32 %v3202_v16 }
 0x729   :  { %v3319_v18 = vpack.c.bf16 %v3304_v24, %v3303_v28  ;;  %6897 = vmatpush3.bf16.msra.mxu1 %v7181_v20 }
 0x72a   :  { %6898 = vmatprep.subr.bf16.mxu1 %v7182_v50 }
 0x72b   :  { %6884 = vmatprep.mubr.msk.bf16.mxu1 %vm419_vm0, %v3319_v18 }
 0x72c   :  { %v7500_v58 = vpop.eup %7499  ;;  %6885 = vmatmul.mubr.msk.bf16.gmra.mrb[88].mxu1 %vm419_vm0, %v3320_v52 }
 0x72d   :  { %v3247_v35 = vmul.f32 %v7500_v58, %v3175_v38  ;;  %6899 = vmatpush3.bf16.msra.mxu1 %v7182_v50 }
 0x72e   :  { %v7502_v54 = vpop.eup %7501  ;;  %6900 = vmatprep.subr.bf16.mxu1 %v7183_v51 }
 0x72f   :  { %v3248_v0 = vmul.f32 %v7502_v54, %v3176_v41  ;;  %v3277_v43 = vmul.f32 %v10141_v45, %v3247_v35 }
 0x730   :  { %v7504_v62 = vpop.eup %7503 }
 0x731   :  { %v3278_v29 = vmul.f32 %v10141_v45, %v3248_v0  ;;  %v3249_v55 = vmul.f32 %v7504_v62, %v3177_v5  ;;  %v3307_v57 = vadd.f32 %v10146_v7, %v3277_v43  ;;  %6901 = vmatpush3.bf16.msra.mxu1 %v7183_v51 }
 0x732   :  { %v7506_v19 = vpop.eup %7505  ;;  %6902 = vmatprep.subr.bf16.mxu1 %v7184_v22 }
 0x733   :  { %v3308_v61 = vadd.f32 %v10146_v7, %v3278_v29  ;;  %v3250_v23 = vmul.f32 %v7506_v19, %v3178_v21  ;;  %v3279_v8 = vmul.f32 %v10141_v45, %v3249_v55 }
 0x735   :  { %v3321_v3 = vpack.c.bf16 %v3308_v61, %v3307_v57  ;;  %v3280_v36 = vmul.f32 %v10141_v45, %v3250_v23  ;;  %v3309_v6 = vadd.f32 %v10146_v7, %v3279_v8  ;;  %v7185_v45 = vld [vmem:[%s11111_s17 + $0x30] sm:$0xff]   ;;  %6903 = vmatpush3.bf16.msra.mxu1 %v7184_v22 }
 0x736   :  { %6904 = vmatprep.subr.bf16.mxu1 %v7185_v45 }
 0x737   :  { %6888 = vmatprep.mubr.msk.bf16.mxu1 %vm419_vm0, %v3321_v3  ;;  %v3310_v60 = vadd.f32 %v10146_v7, %v3280_v36  ;;  %v7186_v7 = vld [vmem:[%s11111_s17 + $0x38] sm:$0xff]  }
 0x739   :  { %v3322_v39 = vpack.c.bf16 %v3310_v60, %v3309_v6  ;;  %6905 = vmatpush3.bf16.msra.mxu1 %v7185_v45 }
 0x73a   :  { %6906 = vmatprep.subr.bf16.mxu1 %v7186_v7 }
 0x73b   :  { %6889 = vmatmul.mubr.msk.bf16.gmra.mrb[92].mxu1 %vm419_vm0, %v3322_v39 }
 0x73d   :  { %6907 = vmatpush3.bf16.msra.mxu1 %v7186_v7 }
 0x79e   :  { %v6870_v48 = vpop.f32.mrb[72].mxu1 }
 0x79f   :  { %v3441_v13 = vadd.f32 %v6870_v48, %v10265_v34  ;;  %v3432_v16 = vpop.f32.mrb[73].mxu1 }
 0x7a0   :  { %v3433_v47 = vadd.f32 %v10265_v34, %v3432_v16  ;;  %v6871_v28 = vpop.f32.mrb[74].mxu1 }
 0x7a1   :  { %v3553_v24 = vmul.f32 0.044715, %v3441_v13  ;;  %v3444_v42 = vadd.f32 %v6871_v28, %v10265_v34  ;;  %v3435_v4 = vpop.f32.mrb[75].mxu1 }
 0x7a2   :  { %v3551_v18 = vmul.f32 0.044715, %v3433_v47  ;;  %v3436_v52 = vadd.f32 %v10265_v34, %v3435_v4 }
 0x7a3   :  { %v3577_v38 = vmul.f32 %v3553_v24, %v3441_v13  ;;  %v3554_v58 = vmul.f32 0.044715, %v3444_v42 }
 0x7a4   :  { %v3575_v37 = vmul.f32 %v3551_v18, %v3433_v47  ;;  %v3552_v41 = vmul.f32 0.044715, %v3436_v52 }
 0x7a5   :  { %v3601_v35 = vmul.f32 %v3577_v38, %v3441_v13  ;;  %v3578_v54 = vmul.f32 %v3554_v58, %v3444_v42  ;;  %v3529_v58 = vmul.f32 0.5, %v3441_v13 }
 0x7a6   :  { %v3599_v20 = vmul.f32 %v3575_v37, %v3433_v47  ;;  %v3576_v5 = vmul.f32 %v3552_v41, %v3436_v52 }
 0x7a7   :  { %v3625_v0 = vadd.f32 %v3601_v35, %v3441_v13  ;;  %v3602_v43 = vmul.f32 %v3578_v54, %v3444_v42 }
 0x7a8   :  { %v3600_v62 = vmul.f32 %v3576_v5, %v3436_v52  ;;  %v3623_v50 = vadd.f32 %v3599_v20, %v3433_v47  ;;  %v3527_v5 = vmul.f32 0.5, %v3433_v47 }
 0x7a9   :  { %v3649_v21 = vmul.f32 0.7978846, %v3625_v0  ;;  %v3626_v29 = vadd.f32 %v3602_v43, %v3444_v42 }
 0x7aa   :  { %v3624_v55 = vadd.f32 %v3600_v62, %v3436_v52  ;;  %v3647_v19 = vmul.f32 0.7978846, %v3623_v50  ;;  %v3530_v50 = vmul.f32 0.5, %v3444_v42 }
 0x7ab   :  { %7507 = vtanh.f32 %v3649_v21  ;;  %v3650_v57 = vmul.f32 0.7978846, %v3626_v29 }
 0x7ac   :  { %v3648_v61 = vmul.f32 0.7978846, %v3624_v55  ;;  %7509 = vtanh.f32 %v3647_v19  ;;  %v3528_v19 = vmul.f32 0.5, %v3436_v52 }
 0x7ad   :  { %7511 = vtanh.f32 %v3650_v57 }
 0x7ae   :  { %v6874_v23 = vpop.f32.mrb[76].mxu1  ;;  %7513 = vtanh.f32 %v3648_v61 }
 0x7af   :  { %v3457_v8 = vadd.f32 %v6874_v23, %v10265_v34  ;;  %v3448_v3 = vpop.f32.mrb[77].mxu1 }
 0x7b0   :  { %v3449_v36 = vadd.f32 %v10265_v34, %v3448_v3  ;;  %v6875_v6 = vpop.f32.mrb[78].mxu1 }
 0x7b1   :  { %v3557_v60 = vmul.f32 0.044715, %v3457_v8  ;;  %v3460_v51 = vadd.f32 %v6875_v6, %v10265_v34  ;;  %v3451_v39 = vpop.f32.mrb[79].mxu1 }
 0x7b2   :  { %v3555_v22 = vmul.f32 0.044715, %v3449_v36  ;;  %v3452_v45 = vadd.f32 %v10265_v34, %v3451_v39 }
 0x7b3   :  { %v3581_v7 = vmul.f32 %v3557_v60, %v3457_v8  ;;  %v3558_v48 = vmul.f32 0.044715, %v3460_v51 }
 0x7b4   :  { %v3579_v16 = vmul.f32 %v3555_v22, %v3449_v36  ;;  %v3556_v28 = vmul.f32 0.044715, %v3452_v45 }
 0x7b5   :  { %v7508_v24 = vpop.eup %7507  ;;  %v3605_v4 = vmul.f32 %v3581_v7, %v3457_v8  ;;  %v3582_v18 = vmul.f32 %v3558_v48, %v3460_v51 }
 0x7b6   :  { %v7510_v38 = vpop.eup %7509  ;;  %v3603_v37 = vmul.f32 %v3579_v16, %v3449_v36  ;;  %v3580_v41 = vmul.f32 %v3556_v28, %v3452_v45  ;;  %v3697_v35 = vadd.f32 1.0, %v7508_v24 }
 0x7b7   :  { %v7512_v54 = vpop.eup %7511  ;;  %v3606_v20 = vmul.f32 %v3582_v18, %v3460_v51  ;;  %v3695_v0 = vadd.f32 1.0, %v7510_v38  ;;  %v3629_v43 = vadd.f32 %v3605_v4, %v3457_v8  ;;  %v3533_v38 = vmul.f32 0.5, %v3457_v8 }
 0x7b8   :  { %v7514_v62 = vpop.eup %7513  ;;  %v3604_v21 = vmul.f32 %v3580_v41, %v3452_v45  ;;  %v3698_v29 = vadd.f32 1.0, %v7512_v54  ;;  %v3627_v55 = vadd.f32 %v3603_v37, %v3449_v36  ;;  %v3721_v3 = vmul.f32 %v3697_v35, %v3529_v58 }
 0x7b9   :  { %v3696_v57 = vadd.f32 1.0, %v7514_v62  ;;  %v3630_v61 = vadd.f32 %v3606_v20, %v3460_v51  ;;  %v3653_v23 = vmul.f32 0.7978846, %v3629_v43  ;;  %v3719_v39 = vmul.f32 %v3695_v0, %v3527_v5 }
 0x7ba   :  { %v3722_v6 = vmul.f32 %v3698_v29, %v3530_v50  ;;  %v3628_v13 = vadd.f32 %v3604_v21, %v3452_v45  ;;  %v3651_v60 = vmul.f32 0.7978846, %v3627_v55  ;;  %v3534_v58 = vmul.f32 0.5, %v3460_v51 }
 0x7bb   :  { %v3720_v22 = vmul.f32 %v3696_v57, %v3528_v19  ;;  %v3654_v7 = vmul.f32 0.7978846, %v3630_v61  ;;  %7515 = vtanh.f32 %v3653_v23  ;;  %v3531_v41 = vmul.f32 0.5, %v3449_v36 }
 0x7bc   :  { %v3744_v47 = vpack.c.bf16 %v3722_v6, %v3721_v3  ;;  %v3652_v48 = vmul.f32 0.7978846, %v3628_v13  ;;  %7517 = vtanh.f32 %v3651_v60  ;;  %v3532_v35 = vmul.f32 0.5, %v3452_v45 }
 0x7bd   :  { %v3743_v16 = vpack.c.bf16 %v3720_v22, %v3719_v39  ;;  %7519 = vtanh.f32 %v3654_v7 }
 0x7be   :  { %7521 = vtanh.f32 %v3652_v48 }
 0x7bf   :  { %6908 = vmatprep.mubr.bf16.mxu1 %v3743_v16 }
 0x7c0   :  { %6909 = vmatmul.mubr.bf16.vlgmr.msra.gmra.mrb[96].mxu1 %v3744_v47 }
 0x7c5   :  { %v7516_v42 = vpop.eup %7515 }
 0x7c6   :  { %v7518_v52 = vpop.eup %7517  ;;  %v3701_v28 = vadd.f32 1.0, %v7516_v42 }
 0x7c7   :  { %v7520_v24 = vpop.eup %7519  ;;  %v3699_v4 = vadd.f32 1.0, %v7518_v52 }
 0x7c8   :  { %v7522_v18 = vpop.eup %7521  ;;  %v3702_v37 = vadd.f32 1.0, %v7520_v24  ;;  %v3725_v20 = vmul.f32 %v3701_v28, %v3533_v38 }
 0x7c9   :  { %v3700_v54 = vadd.f32 1.0, %v7522_v18  ;;  %v3723_v0 = vmul.f32 %v3699_v4, %v3531_v41 }
 0x7ca   :  { %v3726_v5 = vmul.f32 %v3702_v37, %v3534_v58 }
 0x7cb   :  { %v3724_v43 = vmul.f32 %v3700_v54, %v3532_v35 }
 0x7cc   :  { %v3746_v62 = vpack.c.bf16 %v3726_v5, %v3725_v20 }
 0x7cd   :  { %v3745_v50 = vpack.c.bf16 %v3724_v43, %v3723_v0 }
 0x7cf   :  { %6912 = vmatprep.mubr.bf16.mxu1 %v3745_v50 }
 0x7d0   :  { %v6878_v21 = vpop.f32.mrb[80].mxu1  ;;  %6913 = vmatmul.mubr.bf16.gmra.mrb[100].mxu1 %v3746_v62 }
 0x7d1   :  { %v3473_v29 = vadd.f32 %v6878_v21, %v10265_v34  ;;  %v3464_v55 = vpop.f32.mrb[81].mxu1 }
 0x7d2   :  { %v3465_v19 = vadd.f32 %v10265_v34, %v3464_v55  ;;  %v6879_v57 = vpop.f32.mrb[82].mxu1 }
 0x7d3   :  { %v3561_v8 = vmul.f32 0.044715, %v3473_v29  ;;  %v3476_v36 = vadd.f32 %v6879_v57, %v10265_v34  ;;  %v3467_v51 = vpop.f32.mrb[83].mxu1 }
 0x7d4   :  { %v3559_v45 = vmul.f32 0.044715, %v3465_v19  ;;  %v3468_v61 = vadd.f32 %v10265_v34, %v3467_v51 }
 0x7d5   :  { %v3585_v23 = vmul.f32 %v3561_v8, %v3473_v29  ;;  %v3562_v3 = vmul.f32 0.044715, %v3476_v36 }
 0x7d6   :  { %v3583_v6 = vmul.f32 %v3559_v45, %v3465_v19  ;;  %v3560_v13 = vmul.f32 0.044715, %v3468_v61 }
 0x7d7   :  { %v3609_v60 = vmul.f32 %v3585_v23, %v3473_v29  ;;  %v3586_v39 = vmul.f32 %v3562_v3, %v3476_v36 }
 0x7d8   :  { %v3607_v22 = vmul.f32 %v3583_v6, %v3465_v19  ;;  %v3584_v7 = vmul.f32 %v3560_v13, %v3468_v61  ;;  %v3537_v13 = vmul.f32 0.5, %v3473_v29 }
 0x7d9   :  { %v3610_v47 = vmul.f32 %v3586_v39, %v3476_v36  ;;  %v3633_v48 = vadd.f32 %v3609_v60, %v3473_v29 }
 0x7da   :  { %v3608_v16 = vmul.f32 %v3584_v7, %v3468_v61  ;;  %v3631_v42 = vadd.f32 %v3607_v22, %v3465_v19  ;;  %v3535_v7 = vmul.f32 0.5, %v3465_v19 }
 0x7db   :  { %v3634_v52 = vadd.f32 %v3610_v47, %v3476_v36  ;;  %v3657_v28 = vmul.f32 0.7978846, %v3633_v48 }
 0x7dc   :  { %v3632_v24 = vadd.f32 %v3608_v16, %v3468_v61  ;;  %v3655_v4 = vmul.f32 0.7978846, %v3631_v42 }
 0x7dd   :  { %v3658_v18 = vmul.f32 0.7978846, %v3634_v52  ;;  %7523 = vtanh.f32 %v3657_v28  ;;  %v3538_v52 = vmul.f32 0.5, %v3476_v36 }
 0x7de   :  { %v3656_v38 = vmul.f32 0.7978846, %v3632_v24  ;;  %7525 = vtanh.f32 %v3655_v4  ;;  %v3536_v4 = vmul.f32 0.5, %v3468_v61 }
 0x7df   :  { %7527 = vtanh.f32 %v3658_v18 }
 0x7e0   :  { %v6882_v58 = vpop.f32.mrb[84].mxu1  ;;  %7529 = vtanh.f32 %v3656_v38 }
 0x7e1   :  { %v3489_v37 = vadd.f32 %v6882_v58, %v10265_v34  ;;  %v3480_v41 = vpop.f32.mrb[85].mxu1 }
 0x7e2   :  { %v3481_v35 = vadd.f32 %v10265_v34, %v3480_v41  ;;  %v6883_v54 = vpop.f32.mrb[86].mxu1 }
 0x7e3   :  { %v3565_v20 = vmul.f32 0.044715, %v3489_v37  ;;  %v3492_v5 = vadd.f32 %v6883_v54, %v10265_v34  ;;  %v3483_v0 = vpop.f32.mrb[87].mxu1 }
 0x7e4   :  { %v3563_v43 = vmul.f32 0.044715, %v3481_v35  ;;  %v3484_v62 = vadd.f32 %v10265_v34, %v3483_v0 }
 0x7e5   :  { %v3589_v50 = vmul.f32 %v3565_v20, %v3489_v37  ;;  %v3566_v21 = vmul.f32 0.044715, %v3492_v5 }
 0x7e6   :  { %v3587_v55 = vmul.f32 %v3563_v43, %v3481_v35  ;;  %v3564_v57 = vmul.f32 0.044715, %v3484_v62 }
 0x7e7   :  { %v7524_v8 = vpop.eup %7523  ;;  %v3613_v51 = vmul.f32 %v3589_v50, %v3489_v37  ;;  %v3590_v45 = vmul.f32 %v3566_v21, %v3492_v5 }
 0x7e8   :  { %v7526_v23 = vpop.eup %7525  ;;  %v3611_v3 = vmul.f32 %v3587_v55, %v3481_v35  ;;  %v3588_v6 = vmul.f32 %v3564_v57, %v3484_v62  ;;  %v3705_v60 = vadd.f32 1.0, %v7524_v8 }
 0x7e9   :  { %v7528_v39 = vpop.eup %7527  ;;  %v3614_v22 = vmul.f32 %v3590_v45, %v3492_v5  ;;  %v3703_v47 = vadd.f32 1.0, %v7526_v23  ;;  %v3637_v48 = vadd.f32 %v3613_v51, %v3489_v37  ;;  %v3541_v23 = vmul.f32 0.5, %v3489_v37 }
 0x7ea   :  { %v7530_v16 = vpop.eup %7529  ;;  %v3612_v42 = vmul.f32 %v3588_v6, %v3484_v62  ;;  %v3706_v28 = vadd.f32 1.0, %v7528_v39  ;;  %v3635_v24 = vadd.f32 %v3611_v3, %v3481_v35  ;;  %v3729_v41 = vmul.f32 %v3705_v60, %v3537_v13 }
 0x7eb   :  { %v3704_v18 = vadd.f32 1.0, %v7530_v16  ;;  %v3638_v38 = vadd.f32 %v3614_v22, %v3492_v5  ;;  %v3661_v58 = vmul.f32 0.7978846, %v3637_v48  ;;  %v3727_v29 = vmul.f32 %v3703_v47, %v3535_v7 }
 0x7ec   :  { %v3730_v54 = vmul.f32 %v3706_v28, %v3538_v52  ;;  %v3636_v20 = vadd.f32 %v3612_v42, %v3484_v62  ;;  %v3659_v0 = vmul.f32 0.7978846, %v3635_v24  ;;  %v3542_v3 = vmul.f32 0.5, %v3492_v5 }
 0x7ed   :  { %v3728_v43 = vmul.f32 %v3704_v18, %v3536_v4  ;;  %v3662_v50 = vmul.f32 0.7978846, %v3638_v38  ;;  %7531 = vtanh.f32 %v3661_v58  ;;  %v3539_v13 = vmul.f32 0.5, %v3481_v35 }
 0x7ee   :  { %v3748_v19 = vpack.c.bf16 %v3730_v54, %v3729_v41  ;;  %v3660_v21 = vmul.f32 0.7978846, %v3636_v20  ;;  %7533 = vtanh.f32 %v3659_v0  ;;  %v3540_v60 = vmul.f32 0.5, %v3484_v62 }
 0x7ef   :  { %v3747_v55 = vpack.c.bf16 %v3728_v43, %v3727_v29  ;;  %7535 = vtanh.f32 %v3662_v50 }
 0x7f0   :  { %7537 = vtanh.f32 %v3660_v21 }
 0x7f1   :  { %6916 = vmatprep.mubr.bf16.mxu1 %v3747_v55 }
 0x7f2   :  { %6917 = vmatmul.mubr.bf16.gmra.mrb[104].mxu1 %v3748_v19 }
 0x7f7   :  { %v7532_v36 = vpop.eup %7531 }
 0x7f8   :  { %v7534_v61 = vpop.eup %7533  ;;  %v3709_v57 = vadd.f32 1.0, %v7532_v36 }
 0x7f9   :  { %v7536_v8 = vpop.eup %7535  ;;  %v3707_v51 = vadd.f32 1.0, %v7534_v61 }
 0x7fa   :  { %v7538_v45 = vpop.eup %7537  ;;  %v3710_v6 = vadd.f32 1.0, %v7536_v8  ;;  %v3733_v22 = vmul.f32 %v3709_v57, %v3541_v23 }
 0x7fb   :  { %v3708_v39 = vadd.f32 1.0, %v7538_v45  ;;  %v3731_v47 = vmul.f32 %v3707_v51, %v3539_v13 }
 0x7fc   :  { %v3734_v7 = vmul.f32 %v3710_v6, %v3542_v3 }
 0x7fd   :  { %v3732_v48 = vmul.f32 %v3708_v39, %v3540_v60 }
 0x7fe   :  { %v3750_v16 = vpack.c.bf16 %v3734_v7, %v3733_v22 }
 0x7ff   :  { %v3749_v42 = vpack.c.bf16 %v3732_v48, %v3731_v47  ;;  %v6886_v52 = vpop.f32.mrb[88].mxu1 }
 0x800   :  { %v3505_v28 = vadd.f32 %v6886_v52, %v10265_v34  ;;  %v3496_v24 = vpop.f32.mrb[89].mxu1 }
 0x801   :  { %6920 = vmatprep.mubr.bf16.mxu1 %v3749_v42  ;;  %v3497_v4 = vadd.f32 %v10265_v34, %v3496_v24  ;;  %v6887_v18 = vpop.f32.mrb[90].mxu1 }
 0x802   :  { %6921 = vmatmul.mubr.bf16.gmra.mrb[108].mxu1 %v3750_v16  ;;  %v3569_v37 = vmul.f32 0.044715, %v3505_v28  ;;  %v3508_v35 = vadd.f32 %v6887_v18, %v10265_v34  ;;  %v3499_v5 = vpop.f32.mrb[91].mxu1 }
 0x803   :  { %v3567_v62 = vmul.f32 0.044715, %v3497_v4  ;;  %v3500_v38 = vadd.f32 %v10265_v34, %v3499_v5 }
 0x804   :  { %v3593_v58 = vmul.f32 %v3569_v37, %v3505_v28  ;;  %v3570_v41 = vmul.f32 0.044715, %v3508_v35 }
 0x805   :  { %v3591_v54 = vmul.f32 %v3567_v62, %v3497_v4  ;;  %v3568_v20 = vmul.f32 0.044715, %v3500_v38 }
 0x806   :  { %v3617_v0 = vmul.f32 %v3593_v58, %v3505_v28  ;;  %v3594_v29 = vmul.f32 %v3570_v41, %v3508_v35 }
 0x807   :  { %v3615_v43 = vmul.f32 %v3591_v54, %v3497_v4  ;;  %v3592_v50 = vmul.f32 %v3568_v20, %v3500_v38 }
 0x808   :  { %v3618_v19 = vmul.f32 %v3594_v29, %v3508_v35  ;;  %v3641_v21 = vadd.f32 %v3617_v0, %v3505_v28  ;;  %v3545_v0 = vmul.f32 0.5, %v3505_v28 }
 0x809   :  { %v3616_v55 = vmul.f32 %v3592_v50, %v3500_v38  ;;  %v3639_v36 = vadd.f32 %v3615_v43, %v3497_v4 }
 0x80a   :  { %v3642_v61 = vadd.f32 %v3618_v19, %v3508_v35  ;;  %v3665_v57 = vmul.f32 0.7978846, %v3641_v21  ;;  %v3543_v21 = vmul.f32 0.5, %v3497_v4 }
 0x80b   :  { %v3640_v8 = vadd.f32 %v3616_v55, %v3500_v38  ;;  %v3663_v51 = vmul.f32 0.7978846, %v3639_v36 }
 0x80c   :  { %v3666_v45 = vmul.f32 0.7978846, %v3642_v61  ;;  %7539 = vtanh.f32 %v3665_v57  ;;  %v3546_v61 = vmul.f32 0.5, %v3508_v35 }
 0x80d   :  { %v3664_v23 = vmul.f32 0.7978846, %v3640_v8  ;;  %7541 = vtanh.f32 %v3663_v51 }
 0x80e   :  { %v6890_v3 = vpop.f32.mrb[92].mxu1  ;;  %7543 = vtanh.f32 %v3666_v45  ;;  %v3544_v45 = vmul.f32 0.5, %v3500_v38 }
 0x80f   :  { %v3521_v6 = vadd.f32 %v6890_v3, %v10265_v34  ;;  %v3512_v13 = vpop.f32.mrb[93].mxu1  ;;  %7545 = vtanh.f32 %v3664_v23 }
 0x810   :  { %v3513_v60 = vadd.f32 %v10265_v34, %v3512_v13  ;;  %v6891_v39 = vpop.f32.mrb[94].mxu1 }
 0x811   :  { %v3573_v22 = vmul.f32 0.044715, %v3521_v6  ;;  %v3524_v7 = vadd.f32 %v6891_v39, %v10265_v34  ;;  %v3515_v47 = vpop.f32.mrb[95].mxu1 }
 0x812   :  { %v3571_v48 = vmul.f32 0.044715, %v3513_v60  ;;  %v3516_v16 = vadd.f32 %v10265_v34, %v3515_v47 }
 0x813   :  { %v3597_v42 = vmul.f32 %v3573_v22, %v3521_v6  ;;  %v3574_v52 = vmul.f32 0.044715, %v3524_v7 }
 0x814   :  { %v3595_v24 = vmul.f32 %v3571_v48, %v3513_v60  ;;  %v3572_v18 = vmul.f32 0.044715, %v3516_v16 }
 0x815   :  { %v3621_v37 = vmul.f32 %v3597_v42, %v3521_v6  ;;  %v3598_v5 = vmul.f32 %v3574_v52, %v3524_v7 }
 0x816   :  { %v7540_v62 = vpop.eup %7539  ;;  %v3619_v58 = vmul.f32 %v3595_v24, %v3513_v60  ;;  %v3596_v41 = vmul.f32 %v3572_v18, %v3516_v16 }
 0x817   :  { %v7542_v54 = vpop.eup %7541  ;;  %v3622_v20 = vmul.f32 %v3598_v5, %v3524_v7  ;;  %v3713_v29 = vadd.f32 1.0, %v7540_v62  ;;  %v3645_v43 = vadd.f32 %v3621_v37, %v3521_v6  ;;  %v3549_v62 = vmul.f32 0.5, %v3521_v6  ;;  %v10294_v6 = vld [vmem:[%s11332_s21] ss:$0 sm:$0xff] }
 0x818   :  { %v7544_v50 = vpop.eup %7543  ;;  %v3620_v19 = vmul.f32 %v3596_v41, %v3516_v16  ;;  %v3711_v55 = vadd.f32 1.0, %v7542_v54  ;;  %v3643_v36 = vadd.f32 %v3619_v58, %v3513_v60  ;;  %v3550_v58 = vmul.f32 0.5, %v3524_v7 }
 0x819   :  { %v7546_v34 = vpop.eup %7545  ;;  %v3714_v57 = vadd.f32 1.0, %v7544_v50  ;;  %v3646_v8 = vadd.f32 %v3622_v20, %v3524_v7  ;;  %v3669_v51 = vmul.f32 0.7978846, %v3645_v43  ;;  %v3737_v39 = vmul.f32 %v3713_v29, %v3545_v0 }
 0x81a   :  { %v3712_v23 = vadd.f32 1.0, %v7546_v34  ;;  %v3644_v3 = vadd.f32 %v3620_v19, %v3516_v16  ;;  %v3667_v13 = vmul.f32 0.7978846, %v3643_v36  ;;  %v3735_v28 = vmul.f32 %v3711_v55, %v3543_v21  ;;  %v7187_v36 = vld [vmem:[#allocation10 + $0x20] sm:$0xff]  }
 0x81b   :  { %v3738_v22 = vmul.f32 %v3714_v57, %v3546_v61  ;;  %v3670_v47 = vmul.f32 0.7978846, %v3646_v8  ;;  %7547 = vtanh.f32 %v3669_v51  ;;  %v3547_v54 = vmul.f32 0.5, %v3513_v60  ;;  %6932 = vmatprep.subr.bf16.mxu0 %v7187_v36 }
 0x81c   :  { %v3736_v48 = vmul.f32 %v3712_v23, %v3544_v45  ;;  %v3668_v42 = vmul.f32 0.7978846, %v3644_v3  ;;  %7549 = vtanh.f32 %v3667_v13  ;;  %v3548_v20 = vmul.f32 0.5, %v3516_v16  ;;  %6933 = vmatpush3.bf16.msra.mxu0 %v7187_v36 }
 0x81d   :  { %v3752_v4 = vpack.c.bf16 %v3738_v22, %v3737_v39  ;;  %7551 = vtanh.f32 %v3670_v47 }
 0x81e   :  { %v3751_v52 = vpack.c.bf16 %v3736_v48, %v3735_v28  ;;  %7553 = vtanh.f32 %v3668_v42 }
 0x820   :  { %6924 = vmatprep.mubr.bf16.mxu1 %v3751_v52 }
 0x821   :  { %6925 = vmatmul.mubr.bf16.gmra.mrb[112].mxu1 %v3752_v4 }
 0x825   :  { %v7548_v35 = vpop.eup %7547 }
 0x826   :  { %v7550_v24 = vpop.eup %7549  ;;  %v3717_v38 = vadd.f32 1.0, %v7548_v35 }
 0x827   :  { %v7552_v18 = vpop.eup %7551  ;;  %v3715_v37 = vadd.f32 1.0, %v7550_v24 }
 0x828   :  { %v7554_v5 = vpop.eup %7553  ;;  %v3718_v41 = vadd.f32 1.0, %v7552_v18  ;;  %v3741_v29 = vmul.f32 %v3717_v38, %v3549_v62 }
 0x829   :  { %v3716_v0 = vadd.f32 1.0, %v7554_v5  ;;  %v3739_v50 = vmul.f32 %v3715_v37, %v3547_v54 }
 0x82a   :  { %v3742_v43 = vmul.f32 %v3718_v41, %v3550_v58 }
 0x82b   :  { %v3740_v19 = vmul.f32 %v3716_v0, %v3548_v20  ;;  %v7188_v0 = vld [vmem:[#allocation10 + $0x28] sm:$0xff]  }
 0x82c   :  { %v3754_v21 = vpack.c.bf16 %v3742_v43, %v3741_v29  ;;  %6934 = vmatprep.subr.bf16.mxu0 %v7188_v0 }
 0x82d   :  { %v3753_v55 = vpack.c.bf16 %v3740_v19, %v3739_v50  ;;  %6935 = vmatpush3.bf16.msra.mxu0 %v7188_v0 }
 0x82f   :  { %6928 = vmatprep.mubr.bf16.mxu1 %v3753_v55 }
 0x830   :  { %6929 = vmatmul.mubr.bf16.gmra.mrb[116].mxu1 %v3754_v21 }
 0x893   :  { %v6910_v34 = vpop.f32.mrb[96].mxu1 }
 0x894   :  { %v3950_v60 = vadd.f32 %v6910_v34, %v9920_v49  ;;  %v3853_v7 = vpop.f32.mrb[97].mxu1 }
 0x895   :  { %v3948_v16 = vadd.f32 %v3853_v7, %v9925_v53  ;;  %v6911_v61 = vpop.f32.mrb[98].mxu1 }
 0x896   :  { %v10299_v57 = vadd.f32 %v10294_v6, %v3950_v60  ;;  %v3951_v8 = vadd.f32 %v6911_v61, %v9928_v17  ;;  %v3856_v51 = vpop.f32.mrb[99].mxu1 }
 0x897   :  { %v3949_v45 = vadd.f32 %v3856_v51, %v9933_v26  ;;  %v10304_v23 = vadd.f32 %v10294_v6, %v3948_v16 }
 0x898   :  { %v10307_v3 = vadd.f32 %v10294_v6, %v3951_v8  ;;  %v4013_v49 = vsel %vm419_vm0, %v10299_v57, 0.0  ;;  %v4105_v26 = vmul.f32 %v10299_v57, %v10299_v57 }
 0x899   :  { %4014 = vadd.xlane.f32.xlu0 %v4013_v49  ;;  %v10312_v53 = vadd.f32 %v10294_v6, %v3949_v45  ;;  %v4007_v17 = vsel %vm419_vm0, %v10304_v23, 0.0  ;;  %v4103_v28 = vmul.f32 %v10304_v23, %v10304_v23 }
 0x89a   :  { %v4016_v13 = vsel %vm419_vm0, %v10307_v3, 0.0  ;;  %v4106_v22 = vmul.f32 %v10307_v3, %v10307_v3  ;;  %v4133_v47 = vsel %vm419_vm0, %v4105_v26, 0.0 }
 0x89b   :  { %4017 = vadd.xlane.f32.xlu1 %v4016_v13  ;;  %v4010_v39 = vsel %vm419_vm0, %v10312_v53, 0.0  ;;  %v4104_v42 = vmul.f32 %v10312_v53, %v10312_v53  ;;  %v4127_v24 = vsel %vm419_vm0, %v4103_v28, 0.0  ;;  %v7192_v28 = vld [vmem:[#allocation13 + $0x30] sm:$0xff]  }
 0x89c   :  { %v4136_v48 = vsel %vm419_vm0, %v4106_v22, 0.0 }
 0x89d   :  { %4008 = vadd.xlane.f32.xlu0 %v4007_v17  ;;  %v4130_v58 = vsel %vm419_vm0, %v4104_v42, 0.0  ;;  %v7189_v17 = vld [vmem:[#allocation13 + $0x20] sm:$0xff]  }
 0x89e   :  { %6964 = vmatprep.subr.bf16.mxu1 %v7189_v17 }
 0x89f   :  { %4011 = vadd.xlane.f32.xlu1 %v4010_v39  ;;  %6965 = vmatpush3.bf16.msra.mxu1 %v7189_v17 }
 0x8a1   :  { %4134 = vadd.xlane.f32.xlu0 %v4133_v47 }
 0x8a3   :  { %4137 = vadd.xlane.f32.xlu1 %v4136_v48  ;;  %v6914_v4 = vpop.f32.mrb[100].mxu1 }
 0x8a4   :  { %v3954_v52 = vadd.f32 %v6914_v4, %v9955_v30  ;;  %v3869_v35 = vpop.f32.mrb[101].mxu1  ;;  %v7193_v4 = vld [vmem:[#allocation10 + $0x38] sm:$0xff]  }
 0x8a5   :  { %v3952_v38 = vadd.f32 %v3869_v35, %v9961_v14  ;;  %4128 = vadd.xlane.f32.xlu0 %v4127_v24  ;;  %v6915_v18 = vpop.f32.mrb[102].mxu1  ;;  %v7194_v24 = vld [vmem:[#allocation13 + $0x38] sm:$0xff]  }
 0x8a6   :  { %v10334_v37 = vadd.f32 %v10294_v6, %v3954_v52  ;;  %v3955_v5 = vadd.f32 %v6915_v18, %v9964_v44  ;;  %v3872_v62 = vpop.f32.mrb[103].mxu1 }
 0x8a7   :  { %v3953_v41 = vadd.f32 %v3872_v62, %v9969_v27  ;;  %4131 = vadd.xlane.f32.xlu1 %v4130_v58  ;;  %v10340_v30 = vadd.f32 %v10294_v6, %v3952_v38 }
 0x8a8   :  { %v10343_v54 = vadd.f32 %v10294_v6, %v3955_v5  ;;  %v4025_v14 = vsel %vm419_vm0, %v10334_v37, 0.0  ;;  %v4109_v29 = vmul.f32 %v10334_v37, %v10334_v37 }
 0x8a9   :  { %4026 = vadd.xlane.f32.xlu0 %v4025_v14  ;;  %v10348_v20 = vadd.f32 %v10294_v6, %v3953_v41  ;;  %v4019_v27 = vsel %vm419_vm0, %v10340_v30, 0.0  ;;  %v4107_v21 = vmul.f32 %v10340_v30, %v10340_v30 }
 0x8aa   :  { %v4028_v44 = vsel %vm419_vm0, %v10343_v54, 0.0  ;;  %v4110_v50 = vmul.f32 %v10343_v54, %v10343_v54  ;;  %v4145_v19 = vsel %vm419_vm0, %v4109_v29, 0.0 }
 0x8ab   :  { %4029 = vadd.xlane.f32.xlu1 %v4028_v44  ;;  %v4022_v43 = vsel %vm419_vm0, %v10348_v20, 0.0  ;;  %v4108_v36 = vmul.f32 %v10348_v20, %v10348_v20  ;;  %v4139_v34 = vsel %vm419_vm0, %v4107_v21, 0.0  ;;  %v10410_v21 = vld [vmem:[#allocation26] sm:$0xff]  }
 0x8ac   :  { %v4148_v55 = vsel %vm419_vm0, %v4110_v50, 0.0 }
 0x8ad   :  { %4020 = vadd.xlane.f32.xlu0 %v4019_v27  ;;  %v4142_v60 = vsel %vm419_vm0, %v4108_v36, 0.0 }
 0x8af   :  { %4023 = vadd.xlane.f32.xlu1 %v4022_v43 }
 0x8b1   :  { %4146 = vadd.xlane.f32.xlu0 %v4145_v19 }
 0x8b3   :  { %4149 = vadd.xlane.f32.xlu1 %v4148_v55 }
 0x8b5   :  { %4140 = vadd.xlane.f32.xlu0 %v4139_v34 }
 0x8b7   :  { %4143 = vadd.xlane.f32.xlu1 %v4142_v60 }
 0x8c5   :  { %v6918_v7 = vpop.f32.mrb[104].mxu1 }
 0x8c6   :  { %v3958_v16 = vadd.f32 %v6918_v7, %v9992_v32  ;;  %v3885_v61 = vpop.f32.mrb[105].mxu1 }
 0x8c7   :  { %v3956_v8 = vadd.f32 %v3885_v61, %v9997_v46  ;;  %v6919_v51 = vpop.f32.mrb[106].mxu1  ;;  %v7190_v46 = vld [vmem:[#allocation13 + $0x28] sm:$0xff]  }
 0x8c8   :  { %v10371_v45 = vadd.f32 %v10294_v6, %v3958_v16  ;;  %v3959_v49 = vadd.f32 %v6919_v51, %v10000_v40  ;;  %v3888_v13 = vpop.f32.mrb[107].mxu1  ;;  %6966 = vmatprep.subr.bf16.mxu1 %v7190_v46 }
 0x8c9   :  { %v3957_v26 = vadd.f32 %v3888_v13, %v10005_v56  ;;  %v10376_v39 = vadd.f32 %v10294_v6, %v3956_v8  ;;  %v7191_v56 = vld [vmem:[#allocation10 + $0x30] sm:$0xff]   ;;  %6967 = vmatpush3.bf16.msra.mxu1 %v7190_v46 }
 0x8ca   :  { %v10379_v22 = vadd.f32 %v10294_v6, %v3959_v49  ;;  %v4037_v32 = vsel %vm419_vm0, %v10371_v45, 0.0  ;;  %v4113_v42 = vmul.f32 %v10371_v45, %v10371_v45  ;;  %6936 = vmatprep.subr.bf16.mxu0 %v7191_v56  ;;  %6968 = vmatprep.subr.bf16.mxu1 %v7192_v28 }
 0x8cb   :  { %4038 = vadd.xlane.f32.xlu0 %v4037_v32  ;;  %v10384_v47 = vadd.f32 %v10294_v6, %v3957_v26  ;;  %v4031_v48 = vsel %vm419_vm0, %v10376_v39, 0.0  ;;  %6937 = vmatpush3.bf16.msra.mxu0 %v7191_v56  ;;  %v4111_v18 = vmul.f32 %v10376_v39, %v10376_v39 }
 0x8cc   :  { %v4040_v40 = vsel %vm419_vm0, %v10379_v22, 0.0  ;;  %v4114_v35 = vmul.f32 %v10379_v22, %v10379_v22  ;;  %v4157_v38 = vsel %vm419_vm0, %v4113_v42, 0.0  ;;  %6938 = vmatprep.subr.bf16.mxu0 %v7193_v4 }
 0x8cd   :  { %4041 = vadd.xlane.f32.xlu1 %v4040_v40  ;;  %v4034_v52 = vsel %vm419_vm0, %v10384_v47, 0.0  ;;  %6969 = vmatpush3.bf16.msra.mxu1 %v7192_v28  ;;  %v4112_v62 = vmul.f32 %v10384_v47, %v10384_v47  ;;  %v4151_v44 = vsel %vm419_vm0, %v4111_v18, 0.0 }
 0x8ce   :  { %v4160_v5 = vsel %vm419_vm0, %v4114_v35, 0.0  ;;  %6970 = vmatprep.subr.bf16.mxu1 %v7194_v24 }
 0x8cf   :  { %4032 = vadd.xlane.f32.xlu0 %v4031_v48  ;;  %6939 = vmatpush3.bf16.msra.mxu0 %v7193_v4  ;;  %v4154_v19 = vsel %vm419_vm0, %v4112_v62, 0.0 }
 0x8d1   :  { %4035 = vadd.xlane.f32.xlu1 %v4034_v52  ;;  %6971 = vmatpush3.bf16.msra.mxu1 %v7194_v24 }
 0x8d2   :  { %7012 = vmatprep.subr.bf16.mxu1 %v10410_v21 }
 0x8d3   :  { %4158 = vadd.xlane.f32.xlu0 %v4157_v38 }
 0x8d5   :  { %4161 = vadd.xlane.f32.xlu1 %v4160_v5  ;;  %v6922_v58 = vpop.f32.mrb[108].mxu1 }
 0x8d6   :  { %v3962_v41 = vadd.f32 %v6922_v58, %v10027_v25  ;;  %v3901_v14 = vpop.f32.mrb[109].mxu1 }
 0x8d7   :  { %v3960_v0 = vadd.f32 %v3901_v14, %v10033_v11  ;;  %4152 = vadd.xlane.f32.xlu0 %v4151_v44  ;;  %v6923_v27 = vpop.f32.mrb[110].mxu1 }
 0x8d8   :  { %v10406_v29 = vadd.f32 %v10294_v6, %v3962_v41  ;;  %v3963_v43 = vadd.f32 %v6923_v27, %v10036_v9  ;;  %v3904_v50 = vpop.f32.mrb[111].mxu1 }
 0x8d9   :  { %v3961_v25 = vadd.f32 %v3904_v50, %v10041_v12  ;;  %4155 = vadd.xlane.f32.xlu1 %v4154_v19  ;;  %v10415_v11 = vadd.f32 %v10294_v6, %v3960_v0 }
 0x8da   :  { %v10418_v55 = vadd.f32 %v10294_v6, %v3963_v43  ;;  %v4049_v36 = vsel %vm419_vm0, %v10406_v29, 0.0  ;;  %v4117_v60 = vmul.f32 %v10406_v29, %v10406_v29 }
 0x8db   :  { %4050 = vadd.xlane.f32.xlu0 %v4049_v36  ;;  %v10423_v9 = vadd.f32 %v10294_v6, %v3961_v25  ;;  %v4043_v12 = vsel %vm419_vm0, %v10415_v11, 0.0  ;;  %v4115_v8 = vmul.f32 %v10415_v11, %v10415_v11 }
 0x8dc   :  { %v4052_v34 = vsel %vm419_vm0, %v10418_v55, 0.0  ;;  %v4118_v16 = vmul.f32 %v10418_v55, %v10418_v55  ;;  %v4169_v61 = vsel %vm419_vm0, %v4117_v60, 0.0 }
 0x8dd   :  { %4053 = vadd.xlane.f32.xlu1 %v4052_v34  ;;  %v4046_v7 = vsel %vm419_vm0, %v10423_v9, 0.0  ;;  %v4116_v49 = vmul.f32 %v10423_v9, %v10423_v9  ;;  %v4163_v13 = vsel %vm419_vm0, %v4115_v8, 0.0 }
 0x8de   :  { %v4172_v51 = vsel %vm419_vm0, %v4118_v16, 0.0 }
 0x8df   :  { %4044 = vadd.xlane.f32.xlu0 %v4043_v12  ;;  %v4166_v17 = vsel %vm419_vm0, %v4116_v49, 0.0 }
 0x8e1   :  { %4047 = vadd.xlane.f32.xlu1 %v4046_v7 }
 0x8e3   :  { %4170 = vadd.xlane.f32.xlu0 %v4169_v61 }
 0x8e5   :  { %4173 = vadd.xlane.f32.xlu1 %v4172_v51 }
 0x8e7   :  { %4164 = vadd.xlane.f32.xlu0 %v4163_v13 }
 0x8e9   :  { %4167 = vadd.xlane.f32.xlu1 %v4166_v17 }
 0x8f4   :  { %v6926_v26 = vpop.f32.mrb[112].mxu1 }
 0x8f5   :  { %v3966_v32 = vadd.f32 %v6926_v26, %v10064_v59  ;;  %v3917_v46 = vpop.f32.mrb[113].mxu1 }
 0x8f6   :  { %v3964_v40 = vadd.f32 %v3917_v46, %v10069_v31  ;;  %v6927_v56 = vpop.f32.mrb[114].mxu1 }
 0x8f7   :  { %v10446_v28 = vadd.f32 %v10294_v6, %v3966_v32  ;;  %v3967_v48 = vadd.f32 %v6927_v56, %v10072_v33  ;;  %v3920_v42 = vpop.f32.mrb[115].mxu1  ;;  %v10518_v32 = vld [vmem:[%s11208_s26 + $0x20] sm:$0xff]  }
 0x8f8   :  { %v3965_v4 = vadd.f32 %v3920_v42, %v10077_v63  ;;  %v10451_v52 = vadd.f32 %v10294_v6, %v3964_v40  ;;  %6996 = vmatprep.subr.bf16.mxu0 %v10518_v32 }
 0x8f9   :  { %11333 = vst [vmem:[#allocation91_spill] sm:$0xff] %v10446_v28  ;;  %v10454_v35 = vadd.f32 %v10294_v6, %v3967_v48  ;;  %v4061_v59 = vsel %vm419_vm0, %v10446_v28, 0.0  ;;  %v4121_v63 = vmul.f32 %v10446_v28, %v10446_v28 }
 0x8fa   :  { %11334 = vst [vmem:[#allocation87_spill] sm:$0xff] %v10451_v52  ;;  %4062 = vadd.xlane.f32.xlu0 %v4061_v59  ;;  %v10459_v31 = vadd.f32 %v10294_v6, %v3965_v4  ;;  %v4055_v33 = vsel %vm419_vm0, %v10451_v52, 0.0  ;;  %v4119_v62 = vmul.f32 %v10451_v52, %v10451_v52 }
 0x8fb   :  { %11335 = vst [vmem:[#allocation94_spill] sm:$0xff] %v10454_v35  ;;  %v4064_v24 = vsel %vm419_vm0, %v10454_v35, 0.0  ;;  %v4122_v18 = vmul.f32 %v10454_v35, %v10454_v35  ;;  %v4181_v5 = vsel %vm419_vm0, %v4121_v63, 0.0 }
 0x8fc   :  { %11336 = vst [vmem:[#allocation93_spill] sm:$0xff] %v10459_v31  ;;  %4065 = vadd.xlane.f32.xlu1 %v4064_v24  ;;  %v4058_v38 = vsel %vm419_vm0, %v10459_v31, 0.0  ;;  %v4120_v14 = vmul.f32 %v10459_v31, %v10459_v31  ;;  %v4175_v50 = vsel %vm419_vm0, %v4119_v62, 0.0 }
 0x8fd   :  { %v4184_v41 = vsel %vm419_vm0, %v4122_v18, 0.0 }
 0x8fe   :  { %4056 = vadd.xlane.f32.xlu0 %v4055_v33  ;;  %v4178_v12 = vsel %vm419_vm0, %v4120_v14, 0.0 }
 0x900   :  { %4059 = vadd.xlane.f32.xlu1 %v4058_v38 }
 0x902   :  { %4182 = vadd.xlane.f32.xlu0 %v4181_v5 }
 0x903   :  { %v6930_v58 = vpop.f32.mrb[116].mxu1 }
 0x904   :  { %v3970_v44 = vadd.f32 %v6930_v58, %v10099_v15  ;;  %4185 = vadd.xlane.f32.xlu1 %v4184_v41  ;;  %v3933_v0 = vpop.f32.mrb[117].mxu1 }
 0x905   :  { %v3968_v27 = vadd.f32 %v3933_v0, %v10105_v10  ;;  %v6931_v43 = vpop.f32.mrb[118].mxu1 }
 0x906   :  { %v10481_v19 = vadd.f32 %v10294_v6, %v3970_v44  ;;  %v3971_v25 = vadd.f32 %v6931_v43, %v10108_v1  ;;  %4176 = vadd.xlane.f32.xlu0 %v4175_v50  ;;  %v3936_v36 = vpop.f32.mrb[119].mxu1 }
 0x907   :  { %v3969_v34 = vadd.f32 %v3936_v36, %v10113_v2  ;;  %v10492_v60 = vadd.f32 %v10294_v6, %v3968_v27 }
 0x908   :  { %11337 = vst [vmem:[#allocation90_spill] sm:$0xff] %v10481_v19  ;;  %v10487_v15 = vadd.f32 %v10294_v6, %v3971_v25  ;;  %4179 = vadd.xlane.f32.xlu1 %v4178_v12  ;;  %v4073_v10 = vsel %vm419_vm0, %v10481_v19, 0.0 }
 0x909   :  { %11339 = vst [vmem:[#allocation88_spill] sm:$0xff] %v10492_v60  ;;  %v10497_v7 = vadd.f32 %v10294_v6, %v3969_v34  ;;  %v4067_v2 = vsel %vm419_vm0, %v10492_v60, 0.0  ;;  %v4123_v16 = vmul.f32 %v10492_v60, %v10492_v60  ;;  %v4125_v6 = vmul.f32 %v10481_v19, %v10481_v19 }
 0x90a   :  { %11338 = vst [vmem:[#allocation92_spill] sm:$0xff] %v10487_v15  ;;  %4074 = vadd.xlane.f32.xlu0 %v4073_v10  ;;  %v4076_v1 = vsel %vm419_vm0, %v10487_v15, 0.0  ;;  %v4126_v13 = vmul.f32 %v10487_v15, %v10487_v15 }
 0x90b   :  { %11340 = vst [vmem:[#allocation63_spill] sm:$0xff] %v10497_v7  ;;  %v4070_v61 = vsel %vm419_vm0, %v10497_v7, 0.0  ;;  %v4124_v8 = vmul.f32 %v10497_v7, %v10497_v7  ;;  %v4187_v51 = vsel %vm419_vm0, %v4123_v16, 0.0  ;;  %v4193_v17 = vsel %vm419_vm0, %v4125_v6, 0.0 }
 0x90c   :  { %4077 = vadd.xlane.f32.xlu1 %v4076_v1  ;;  %v4196_v26 = vsel %vm419_vm0, %v4126_v13, 0.0 }
 0x90d   :  { %v4190_v49 = vsel %vm419_vm0, %v4124_v8, 0.0 }
 0x90e   :  { %4068 = vadd.xlane.f32.xlu0 %v4067_v2 }
 0x910   :  { %4071 = vadd.xlane.f32.xlu1 %v4070_v61 }
 0x912   :  { %4188 = vadd.xlane.f32.xlu0 %v4187_v51 }
 0x914   :  { %4191 = vadd.xlane.f32.xlu1 %v4190_v49 }
 0x916   :  { %4194 = vadd.xlane.f32.xlu0 %v4193_v17 }
 0x918   :  { %4197 = vadd.xlane.f32.xlu1 %v4196_v26 }
 0x926   :  { %v4015_v46 = vpop.xlane.xlu0 %4014 }
 0x927   :  { %v4081_v48 = vmul.f32 0.015625, %v4015_v46 }
 0x928   :  { %v4018_v40 = vpop.xlane.xlu1 %4017 }
 0x929   :  { %v4082_v4 = vmul.f32 0.015625, %v4018_v40  ;;  %v4225_v24 = vmul.f32 %v4081_v48, %v4081_v48 }
 0x92a   :  { %v4009_v56 = vpop.xlane.xlu0 %4008 }
 0x92b   :  { %v4079_v33 = vmul.f32 0.015625, %v4009_v56  ;;  %v4226_v18 = vmul.f32 %v4082_v4, %v4082_v4  ;;  %v4274_v40 = vsub.f32 %v10307_v3, %v4082_v4 }
 0x92c   :  { %v4012_v42 = vpop.xlane.xlu1 %4011 }
 0x92d   :  { %v4080_v5 = vmul.f32 0.015625, %v4012_v42  ;;  %v4223_v14 = vmul.f32 %v4079_v33, %v4079_v33 }
 0x92e   :  { %v4135_v59 = vpop.xlane.xlu0 %4134 }
 0x92f   :  { %v4201_v63 = vmul.f32 0.015625, %v4135_v59  ;;  %v4224_v50 = vmul.f32 %v4080_v5, %v4080_v5 }
 0x930   :  { %v4138_v38 = vpop.xlane.xlu1 %4137 }
 0x931   :  { %v4249_v62 = vsub.f32 %v4201_v63, %v4225_v24  ;;  %v4202_v58 = vmul.f32 0.015625, %v4138_v38  ;;  %v4273_v24 = vsub.f32 %v10299_v57, %v4081_v48  ;;  %v10539_v57 = vld [vmem:[#allocation5 + $0x1] ss:$0 sm:$0xff] }
 0x932   :  { %v4129_v41 = vpop.xlane.xlu0 %4128 }
 0x933   :  { %v4297_v44 = vadd.f32 1e-05, %v4249_v62  ;;  %v4250_v0 = vsub.f32 %v4202_v58, %v4226_v18  ;;  %v4199_v27 = vmul.f32 0.015625, %v4129_v41  ;;  %v4271_v62 = vsub.f32 %v10304_v23, %v4079_v33 }
 0x934   :  { %v4132_v43 = vpop.xlane.xlu1 %4131 }
 0x935   :  { %v4298_v25 = vadd.f32 1e-05, %v4250_v0  ;;  %v4247_v36 = vsub.f32 %v4199_v27, %v4223_v14  ;;  %v4200_v34 = vmul.f32 0.015625, %v4132_v43  ;;  %7555 = vrsqrt.f32 %v4297_v44 }
 0x936   :  { %v4027_v12 = vpop.xlane.xlu0 %4026  ;;  %v4272_v43 = vsub.f32 %v10312_v53, %v4080_v5 }
 0x937   :  { %7557 = vrsqrt.f32 %v4298_v25  ;;  %v4295_v10 = vadd.f32 1e-05, %v4247_v36  ;;  %v4248_v1 = vsub.f32 %v4200_v34, %v4224_v50  ;;  %v10521_v8 = vmul.f32 0.015625, %v4027_v12 }
 0x938   :  { %v4030_v2 = vpop.xlane.xlu1 %4029 }
 0x939   :  { %7559 = vrsqrt.f32 %v4295_v10  ;;  %v4296_v16 = vadd.f32 1e-05, %v4248_v1  ;;  %v10523_v6 = vmul.f32 0.015625, %v4030_v2  ;;  %v4229_v17 = vmul.f32 %v10521_v8, %v10521_v8 }
 0x93a   :  { %v4021_v61 = vpop.xlane.xlu0 %4020 }
 0x93b   :  { %7561 = vrsqrt.f32 %v4296_v16  ;;  %v10525_v49 = vmul.f32 0.015625, %v4021_v61  ;;  %v4230_v63 = vmul.f32 %v10523_v6, %v10523_v6  ;;  %v10546_v16 = vld [vmem:[#allocation7 + $0x1] ss:$0 sm:$0xff] }
 0x93c   :  { %v4024_v51 = vpop.xlane.xlu1 %4023 }
 0x93d   :  { %v10530_v56 = vmul.f32 0.015625, %v4024_v51  ;;  %v4227_v41 = vmul.f32 %v10525_v49, %v10525_v49 }
 0x93e   :  { %v4147_v13 = vpop.xlane.xlu0 %4146 }
 0x93f   :  { %v4205_v26 = vmul.f32 0.015625, %v4147_v13  ;;  %v7556_v46 = vpop.eup %7555  ;;  %v4228_v48 = vmul.f32 %v10530_v56, %v10530_v56 }
 0x940   :  { %v4150_v42 = vpop.xlane.xlu1 %4149  ;;  %v4345_v3 = vmul.f32 %v7556_v46, %v4273_v24 }
 0x941   :  { %v7558_v59 = vpop.eup %7557  ;;  %v4253_v38 = vsub.f32 %v4205_v26, %v4229_v17  ;;  %v4206_v18 = vmul.f32 0.015625, %v4150_v42 }
 0x942   :  { %v4346_v58 = vmul.f32 %v7558_v59, %v4274_v40  ;;  %v4141_v14 = vpop.xlane.xlu0 %4140  ;;  %v4375_v2 = vmul.f32 %v10539_v57, %v4345_v3  ;;  %v7196_v59 = vld [vmem:[%s11208_s26 + $0x28] sm:$0xff]  }
 0x943   :  { %v7560_v44 = vpop.eup %7559  ;;  %v4301_v4 = vadd.f32 1e-05, %v4253_v38  ;;  %v4254_v0 = vsub.f32 %v4206_v18, %v4230_v63  ;;  %v4203_v27 = vmul.f32 0.015625, %v4141_v14  ;;  %v4278_v63 = vsub.f32 %v10343_v54, %v10523_v6  ;;  %v7701_v3 = vld [vmem:[#allocation26 + $0x10] sm:$0xff]  }
 0x944   :  { %v4144_v50 = vpop.xlane.xlu1 %4143  ;;  %v4343_v25 = vmul.f32 %v7560_v44, %v4271_v62  ;;  %v4376_v33 = vmul.f32 %v10539_v57, %v4346_v58  ;;  %v4405_v46 = vadd.f32 %v10546_v16, %v4375_v2  ;;  %v4277_v18 = vsub.f32 %v10334_v37, %v10521_v8  ;;  %v7197_v62 = vld [vmem:[%s11208_s26 + $0x30] sm:$0xff]   ;;  %v7700_v58 = vld [vmem:[#allocation26 + $0x8] sm:$0xff]  }
 0x945   :  { %v7562_v23 = vpop.eup %7561  ;;  %v4302_v36 = vadd.f32 1e-05, %v4254_v0  ;;  %v4251_v34 = vsub.f32 %v4203_v27, %v4227_v41  ;;  %v4204_v12 = vmul.f32 0.015625, %v4144_v50  ;;  %7563 = vrsqrt.f32 %v4301_v4  ;;  %v7198_v44 = vld [vmem:[%s11208_s26 + $0x38] sm:$0xff]  }
 0x946   :  { %v4344_v10 = vmul.f32 %v7562_v23, %v4272_v43  ;;  %v4373_v1 = vmul.f32 %v10539_v57, %v4343_v25  ;;  %v4406_v51 = vadd.f32 %v10546_v16, %v4376_v33  ;;  %v4275_v41 = vsub.f32 %v10340_v30, %v10525_v49  ;;  %v7702_v43 = vld [vmem:[#allocation26 + $0x18] sm:$0xff]  }
 0x947   :  { %7565 = vrsqrt.f32 %v4302_v36  ;;  %v4299_v53 = vadd.f32 1e-05, %v4251_v34  ;;  %v4252_v5 = vsub.f32 %v4204_v12, %v4228_v48 }
 0x948   :  { %v4374_v61 = vmul.f32 %v10539_v57, %v4344_v10  ;;  %v4403_v17 = vadd.f32 %v10546_v16, %v4373_v1  ;;  %v4428_v42 = vpack.c.bf16 %v4406_v51, %v4405_v46 }
 0x949   :  { %7567 = vrsqrt.f32 %v4299_v53  ;;  %v4300_v13 = vadd.f32 1e-05, %v4252_v5 }
 0x94a   :  { %v4404_v26 = vadd.f32 %v10546_v16, %v4374_v61 }
 0x94b   :  { %7569 = vrsqrt.f32 %v4300_v13 }
 0x94c   :  { %v4427_v40 = vpack.c.bf16 %v4404_v26, %v4403_v17 }
 0x94e   :  { %6940 = vmatprep.mubr.msk.bf16.mxu0 %vm419_vm0, %v4427_v40  ;;  %6972 = vmatprep.mubr.msk.bf16.mxu1 %vm419_vm0, %v4427_v40 }
 0x94f   :  { %6941 = vmatmul.mubr.msk.bf16.vlgmr.msra.gmra.mrb[120].mxu0 %vm419_vm0, %v4428_v42  ;;  %6973 = vmatmul.mubr.msk.bf16.vlgmr.msra.gmra.mrb[120].mxu1 %vm419_vm0, %v4428_v42  ;;  %v7564_v24 = vpop.eup %7563 }
 0x950   :  { %6997 = vmatpush3.bf16.msra.mxu0 %v10518_v32  ;;  %7013 = vmatpush3.bf16.msra.mxu1 %v10410_v21  ;;  %v4349_v6 = vmul.f32 %v7564_v24, %v4277_v18  ;;  %v4276_v21 = vsub.f32 %v10348_v20, %v10530_v56 }
 0x951   :  { %v7566_v38 = vpop.eup %7565  ;;  %6998 = vmatprep.subr.bf16.mxu0 %v7196_v59  ;;  %7014 = vmatprep.subr.bf16.mxu1 %v7700_v58 }
 0x952   :  { %v4350_v14 = vmul.f32 %v7566_v38, %v4278_v63  ;;  %v4379_v0 = vmul.f32 %v10539_v57, %v4349_v6 }
 0x953   :  { %v7568_v54 = vpop.eup %7567 }
 0x954   :  { %v4347_v32 = vmul.f32 %v7568_v54, %v4275_v41  ;;  %6999 = vmatpush3.bf16.msra.mxu0 %v7196_v59  ;;  %7015 = vmatpush3.bf16.msra.mxu1 %v7700_v58  ;;  %v4380_v8 = vmul.f32 %v10539_v57, %v4350_v14  ;;  %v4409_v33 = vadd.f32 %v10546_v16, %v4379_v0 }
 0x955   :  { %v7570_v37 = vpop.eup %7569  ;;  %7000 = vmatprep.subr.bf16.mxu0 %v7197_v62  ;;  %7016 = vmatprep.subr.bf16.mxu1 %v7701_v3 }
 0x956   :  { %v4348_v49 = vmul.f32 %v7570_v37, %v4276_v21  ;;  %v4377_v4 = vmul.f32 %v10539_v57, %v4347_v32  ;;  %v4410_v27 = vadd.f32 %v10546_v16, %v4380_v8 }
 0x958   :  { %v4039_v30 = vpop.xlane.xlu0 %4038  ;;  %v4378_v56 = vmul.f32 %v10539_v57, %v4348_v49  ;;  %7001 = vmatpush3.bf16.msra.mxu0 %v7197_v62  ;;  %7017 = vmatpush3.bf16.msra.mxu1 %v7701_v3  ;;  %v4407_v50 = vadd.f32 %v10546_v16, %v4377_v4  ;;  %v4430_v10 = vpack.c.bf16 %v4410_v27, %v4409_v33 }
 0x959   :  { %7002 = vmatprep.subr.bf16.mxu0 %v7198_v44  ;;  %7018 = vmatprep.subr.bf16.mxu1 %v7702_v43  ;;  %v10583_v23 = vmul.f32 0.015625, %v4039_v30 }
 0x95a   :  { %v4042_v20 = vpop.xlane.xlu1 %4041  ;;  %v4408_v25 = vadd.f32 %v10546_v16, %v4378_v56 }
 0x95b   :  { %v4090_v12 = vmul.f32 0.015625, %v4042_v20  ;;  %v4233_v2 = vmul.f32 %v10583_v23, %v10583_v23 }
 0x95c   :  { %v4033_v48 = vpop.xlane.xlu0 %4032  ;;  %v4429_v34 = vpack.c.bf16 %v4408_v25, %v4407_v50  ;;  %7003 = vmatpush3.bf16.msra.mxu0 %v7198_v44  ;;  %7019 = vmatpush3.bf16.msra.mxu1 %v7702_v43 }
 0x95d   :  { %v4087_v53 = vmul.f32 0.015625, %v4033_v48  ;;  %v4234_v51 = vmul.f32 %v4090_v12, %v4090_v12  ;;  %v4282_v20 = vsub.f32 %v10379_v22, %v4090_v12  ;;  %v4281_v48 = vsub.f32 %v10371_v45, %v10583_v23 }
 0x95e   :  { %v4036_v36 = vpop.xlane.xlu1 %4035  ;;  %6944 = vmatprep.mubr.msk.bf16.mxu0 %vm419_vm0, %v4429_v34  ;;  %6976 = vmatprep.mubr.msk.bf16.mxu1 %vm419_vm0, %v4429_v34 }
 0x95f   :  { %6945 = vmatmul.mubr.msk.bf16.gmra.mrb[124].mxu0 %vm419_vm0, %v4430_v10  ;;  %6977 = vmatmul.mubr.msk.bf16.gmra.mrb[124].mxu1 %vm419_vm0, %v4430_v10  ;;  %v4088_v13 = vmul.f32 0.015625, %v4036_v36  ;;  %v4231_v40 = vmul.f32 %v4087_v53, %v4087_v53  ;;  %v4279_v36 = vsub.f32 %v10376_v39, %v4087_v53 }
 0x960   :  { %v4159_v1 = vpop.xlane.xlu0 %4158 }
 0x961   :  { %v4209_v5 = vmul.f32 0.015625, %v4159_v1  ;;  %v4232_v38 = vmul.f32 %v4088_v13, %v4088_v13  ;;  %v4280_v22 = vsub.f32 %v10384_v47, %v4088_v13 }
 0x962   :  { %v4162_v61 = vpop.xlane.xlu1 %4161 }
 0x963   :  { %v4257_v17 = vsub.f32 %v4209_v5, %v4233_v2  ;;  %v4210_v26 = vmul.f32 0.015625, %v4162_v61 }
 0x964   :  { %v4153_v46 = vpop.xlane.xlu0 %4152 }
 0x965   :  { %v4305_v42 = vadd.f32 1e-05, %v4257_v17  ;;  %v4258_v59 = vsub.f32 %v4210_v26, %v4234_v51  ;;  %v4207_v24 = vmul.f32 0.015625, %v4153_v46 }
 0x966   :  { %v4156_v63 = vpop.xlane.xlu1 %4155 }
 0x967   :  { %v4306_v18 = vadd.f32 1e-05, %v4258_v59  ;;  %v4255_v62 = vsub.f32 %v4207_v24, %v4231_v40  ;;  %v4208_v58 = vmul.f32 0.015625, %v4156_v63  ;;  %7571 = vrsqrt.f32 %v4305_v42 }
 0x968   :  { %v4051_v41 = vpop.xlane.xlu0 %4050 }
 0x969   :  { %7573 = vrsqrt.f32 %v4306_v18  ;;  %v4303_v14 = vadd.f32 1e-05, %v4255_v62  ;;  %v4256_v54 = vsub.f32 %v4208_v58, %v4232_v38  ;;  %v10592_v37 = vmul.f32 0.015625, %v4051_v41 }
 0x96a   :  { %v4054_v6 = vpop.xlane.xlu1 %4053 }
 0x96b   :  { %7575 = vrsqrt.f32 %v4303_v14  ;;  %v4304_v21 = vadd.f32 1e-05, %v4256_v54  ;;  %v4094_v44 = vmul.f32 0.015625, %v4054_v6  ;;  %v4237_v49 = vmul.f32 %v10592_v37, %v10592_v37 }
 0x96c   :  { %v4045_v32 = vpop.xlane.xlu0 %4044 }
 0x96d   :  { %7577 = vrsqrt.f32 %v4304_v21  ;;  %v4091_v3 = vmul.f32 0.015625, %v4045_v32  ;;  %v4238_v50 = vmul.f32 %v4094_v44, %v4094_v44  ;;  %v4286_v21 = vsub.f32 %v10418_v55, %v4094_v44 }
 0x96e   :  { %v4048_v8 = vpop.xlane.xlu1 %4047 }
 0x96f   :  { %v4092_v56 = vmul.f32 0.015625, %v4048_v8  ;;  %v4235_v34 = vmul.f32 %v4091_v3, %v4091_v3  ;;  %v4285_v8 = vsub.f32 %v10406_v29, %v10592_v37 }
 0x970   :  { %v4171_v30 = vpop.xlane.xlu0 %4170 }
 0x971   :  { %v4213_v4 = vmul.f32 0.015625, %v4171_v30  ;;  %v7572_v0 = vpop.eup %7571  ;;  %v4236_v12 = vmul.f32 %v4092_v56, %v4092_v56  ;;  %v4283_v30 = vsub.f32 %v10415_v11, %v4091_v3 }
 0x972   :  { %v4174_v27 = vpop.xlane.xlu1 %4173  ;;  %v4353_v17 = vmul.f32 %v7572_v0, %v4281_v48 }
 0x973   :  { %v7574_v43 = vpop.eup %7573  ;;  %v4261_v25 = vsub.f32 %v4213_v4, %v4237_v49  ;;  %v4214_v33 = vmul.f32 0.015625, %v4174_v27 }
 0x974   :  { %v4165_v10 = vpop.xlane.xlu0 %4164  ;;  %v4354_v1 = vmul.f32 %v7574_v43, %v4282_v20  ;;  %v4383_v38 = vmul.f32 %v10539_v57, %v4353_v17  ;;  %v4284_v20 = vsub.f32 %v10423_v9, %v4092_v56 }
 0x975   :  { %v7576_v2 = vpop.eup %7575  ;;  %v4309_v5 = vadd.f32 1e-05, %v4261_v25  ;;  %v4262_v61 = vsub.f32 %v4214_v33, %v4238_v50  ;;  %v4211_v51 = vmul.f32 0.015625, %v4165_v10 }
 0x976   :  { %v4168_v26 = vpop.xlane.xlu1 %4167  ;;  %v4351_v46 = vmul.f32 %v7576_v2, %v4279_v36  ;;  %v4384_v59 = vmul.f32 %v10539_v57, %v4354_v1  ;;  %v4413_v41 = vadd.f32 %v10546_v16, %v4383_v38 }
 0x977   :  { %v7578_v40 = vpop.eup %7577  ;;  %v4310_v45 = vadd.f32 1e-05, %v4262_v61  ;;  %v4259_v23 = vsub.f32 %v4211_v51, %v4235_v34  ;;  %v4212_v42 = vmul.f32 0.015625, %v4168_v26  ;;  %7579 = vrsqrt.f32 %v4309_v5 }
 0x978   :  { %v4352_v39 = vmul.f32 %v7578_v40, %v4280_v22  ;;  %v4381_v53 = vmul.f32 %v10539_v57, %v4351_v46  ;;  %v4414_v18 = vadd.f32 %v10546_v16, %v4384_v59 }
 0x979   :  { %7581 = vrsqrt.f32 %v4310_v45  ;;  %v4307_v24 = vadd.f32 1e-05, %v4259_v23  ;;  %v4260_v63 = vsub.f32 %v4212_v42, %v4236_v12 }
 0x97a   :  { %v4382_v47 = vmul.f32 %v10539_v57, %v4352_v39  ;;  %v4411_v62 = vadd.f32 %v10546_v16, %v4381_v53  ;;  %v4432_v54 = vpack.c.bf16 %v4414_v18, %v4413_v41 }
 0x97b   :  { %7583 = vrsqrt.f32 %v4307_v24  ;;  %v4308_v13 = vadd.f32 1e-05, %v4260_v63 }
 0x97c   :  { %v4412_v58 = vadd.f32 %v10546_v16, %v4382_v47 }
 0x97d   :  { %7585 = vrsqrt.f32 %v4308_v13 }
 0x97e   :  { %v4431_v14 = vpack.c.bf16 %v4412_v58, %v4411_v62 }
 0x980   :  { %6948 = vmatprep.mubr.msk.bf16.mxu0 %vm419_vm0, %v4431_v14  ;;  %6980 = vmatprep.mubr.msk.bf16.mxu1 %vm419_vm0, %v4431_v14 }
 0x981   :  { %6949 = vmatmul.mubr.msk.bf16.gmra.mrb[128].mxu0 %vm419_vm0, %v4432_v54  ;;  %6981 = vmatmul.mubr.msk.bf16.gmra.mrb[128].mxu1 %vm419_vm0, %v4432_v54  ;;  %v7580_v6 = vpop.eup %7579 }
 0x982   :  { %v4357_v0 = vmul.f32 %v7580_v6, %v4285_v8 }
 0x983   :  { %v7582_v32 = vpop.eup %7581 }
 0x984   :  { %v4358_v49 = vmul.f32 %v7582_v32, %v4286_v21  ;;  %v4387_v55 = vmul.f32 %v10539_v57, %v4357_v0 }
 0x985   :  { %v7584_v4 = vpop.eup %7583 }
 0x986   :  { %v4355_v27 = vmul.f32 %v7584_v4, %v4283_v30  ;;  %v4388_v48 = vmul.f32 %v10539_v57, %v4358_v49  ;;  %v4417_v36 = vadd.f32 %v10546_v16, %v4387_v55 }
 0x987   :  { %v7586_v43 = vpop.eup %7585  ;;  %v4063_v50 = vpop.xlane.xlu0 %4062 }
 0x988   :  { %v4356_v25 = vmul.f32 %v7586_v43, %v4284_v20  ;;  %v4385_v33 = vmul.f32 %v10539_v57, %v4355_v27  ;;  %v4418_v11 = vadd.f32 %v10546_v16, %v4388_v48  ;;  %v10625_v56 = vmul.f32 0.015625, %v4063_v50 }
 0x989   :  { %v4066_v44 = vpop.xlane.xlu1 %4065 }
 0x98a   :  { %v4386_v29 = vmul.f32 %v10539_v57, %v4356_v25  ;;  %v4415_v3 = vadd.f32 %v10546_v16, %v4385_v33  ;;  %v4098_v1 = vmul.f32 0.015625, %v4066_v44  ;;  %v4434_v2 = vpack.c.bf16 %v4418_v11, %v4417_v36 }
 0x98b   :  { %v4057_v37 = vpop.xlane.xlu0 %4056  ;;  %v4241_v61 = vmul.f32 %v10625_v56, %v10625_v56  ;;  %v4289_v48 = vsub.f32 %v10446_v28, %v10625_v56 }
 0x98c   :  { %v4416_v9 = vadd.f32 %v10546_v16, %v4386_v29  ;;  %v4095_v51 = vmul.f32 0.015625, %v4057_v37  ;;  %v4242_v12 = vmul.f32 %v4098_v1, %v4098_v1  ;;  %v4290_v0 = vsub.f32 %v10454_v35, %v4098_v1 }
 0x98d   :  { %v4060_v34 = vpop.xlane.xlu1 %4059 }
 0x98e   :  { %v4433_v10 = vpack.c.bf16 %v4416_v9, %v4415_v3  ;;  %v4096_v26 = vmul.f32 0.015625, %v4060_v34  ;;  %v4239_v23 = vmul.f32 %v4095_v51, %v4095_v51  ;;  %v4287_v55 = vsub.f32 %v10451_v52, %v4095_v51 }
 0x98f   :  { %v4183_v5 = vpop.xlane.xlu0 %4182 }
 0x990   :  { %6952 = vmatprep.mubr.msk.bf16.mxu0 %vm419_vm0, %v4433_v10  ;;  %6984 = vmatprep.mubr.msk.bf16.mxu1 %vm419_vm0, %v4433_v10  ;;  %v4217_v17 = vmul.f32 0.015625, %v4183_v5  ;;  %v4240_v24 = vmul.f32 %v4096_v26, %v4096_v26  ;;  %v4288_v10 = vsub.f32 %v10459_v31, %v4096_v26 }
 0x991   :  { %6953 = vmatmul.mubr.msk.bf16.gmra.mrb[132].mxu0 %vm419_vm0, %v4434_v2  ;;  %6985 = vmatmul.mubr.msk.bf16.gmra.mrb[132].mxu1 %vm419_vm0, %v4434_v2  ;;  %v4186_v22 = vpop.xlane.xlu1 %4185 }
 0x992   :  { %v4265_v46 = vsub.f32 %v4217_v17, %v4241_v61  ;;  %v4218_v40 = vmul.f32 0.015625, %v4186_v22 }
 0x993   :  { %v4177_v45 = vpop.xlane.xlu0 %4176 }
 0x994   :  { %v4313_v42 = vadd.f32 1e-05, %v4265_v46  ;;  %v4266_v59 = vsub.f32 %v4218_v40, %v4242_v12  ;;  %v4215_v39 = vmul.f32 0.015625, %v4177_v45 }
 0x995   :  { %v4180_v53 = vpop.xlane.xlu1 %4179 }
 0x996   :  { %v4314_v63 = vadd.f32 1e-05, %v4266_v59  ;;  %v4263_v38 = vsub.f32 %v4215_v39, %v4239_v23  ;;  %v4216_v47 = vmul.f32 0.015625, %v4180_v53  ;;  %7587 = vrsqrt.f32 %v4313_v42 }
 0x997   :  { %v4075_v13 = vpop.xlane.xlu0 %4074 }
 0x998   :  { %7589 = vrsqrt.f32 %v4314_v63  ;;  %v4311_v18 = vadd.f32 1e-05, %v4263_v38  ;;  %v4264_v62 = vsub.f32 %v4216_v47, %v4240_v24  ;;  %v10634_v32 = vmul.f32 0.015625, %v4075_v13 }
 0x999   :  { %v4078_v58 = vpop.xlane.xlu1 %4077 }
 0x99a   :  { %7591 = vrsqrt.f32 %v4311_v18  ;;  %v4312_v41 = vadd.f32 1e-05, %v4264_v62  ;;  %v4102_v20 = vmul.f32 0.015625, %v4078_v58  ;;  %v4245_v44 = vmul.f32 %v10634_v32, %v10634_v32 }
 0x99b   :  { %v4069_v14 = vpop.xlane.xlu0 %4068 }
 0x99c   :  { %7593 = vrsqrt.f32 %v4312_v41  ;;  %v4099_v54 = vmul.f32 0.015625, %v4069_v14  ;;  %v4246_v1 = vmul.f32 %v4102_v20, %v4102_v20  ;;  %v4293_v41 = vsub.f32 %v10481_v19, %v10634_v32 }
 0x99d   :  { %v4072_v6 = vpop.xlane.xlu1 %4071 }
 0x99e   :  { %v4100_v21 = vmul.f32 0.015625, %v4072_v6  ;;  %v4243_v30 = vmul.f32 %v4099_v54, %v4099_v54  ;;  %v4291_v47 = vsub.f32 %v10492_v60, %v4099_v54 }
 0x99f   :  { %v4189_v8 = vpop.xlane.xlu0 %4188 }
 0x9a0   :  { %v4219_v49 = vmul.f32 0.015625, %v4189_v8  ;;  %v7588_v4 = vpop.eup %7587  ;;  %v4244_v50 = vmul.f32 %v4100_v21, %v4100_v21  ;;  %v4292_v18 = vsub.f32 %v10497_v7, %v4100_v21  ;;  %v4294_v8 = vsub.f32 %v10487_v15, %v4102_v20 }
 0x9a1   :  { %v4192_v27 = vpop.xlane.xlu1 %4191  ;;  %v4361_v34 = vmul.f32 %v7588_v4, %v4289_v48 }
 0x9a2   :  { %v7590_v43 = vpop.eup %7589  ;;  %v4267_v25 = vsub.f32 %v4219_v49, %v4243_v30  ;;  %v4220_v33 = vmul.f32 0.015625, %v4192_v27 }
 0x9a3   :  { %v4195_v29 = vpop.xlane.xlu0 %4194  ;;  %v4362_v11 = vmul.f32 %v7590_v43, %v4290_v0  ;;  %v4391_v23 = vmul.f32 %v10539_v57, %v4361_v34 }
 0x9a4   :  { %v7592_v37 = vpop.eup %7591  ;;  %v4315_v3 = vadd.f32 1e-05, %v4267_v25  ;;  %v4268_v9 = vsub.f32 %v4220_v33, %v4244_v50  ;;  %v4221_v36 = vmul.f32 0.015625, %v4195_v29 }
 0x9a5   :  { %v4198_v2 = vpop.xlane.xlu1 %4197  ;;  %v4359_v56 = vmul.f32 %v7592_v37, %v4287_v55  ;;  %v4392_v5 = vmul.f32 %v10539_v57, %v4362_v11  ;;  %v4421_v24 = vadd.f32 %v10546_v16, %v4391_v23 }
 0x9a6   :  { %v7594_v61 = vpop.eup %7593  ;;  %7595 = vrsqrt.f32 %v4315_v3  ;;  %v4316_v51 = vadd.f32 1e-05, %v4268_v9  ;;  %v4269_v17 = vsub.f32 %v4221_v36, %v4245_v44  ;;  %v4222_v22 = vmul.f32 0.015625, %v4198_v2 }
 0x9a7   :  { %v4360_v12 = vmul.f32 %v7594_v61, %v4288_v10  ;;  %v4389_v46 = vmul.f32 %v10539_v57, %v4359_v56  ;;  %v4422_v59 = vadd.f32 %v10546_v16, %v4392_v5 }
 0x9a8   :  { %7597 = vrsqrt.f32 %v4316_v51  ;;  %v4317_v40 = vadd.f32 1e-05, %v4269_v17  ;;  %v4270_v45 = vsub.f32 %v4222_v22, %v4246_v1 }
 0x9a9   :  { %v4390_v26 = vmul.f32 %v10539_v57, %v4360_v12  ;;  %v4419_v39 = vadd.f32 %v10546_v16, %v4389_v46  ;;  %v4436_v38 = vpack.c.bf16 %v4422_v59, %v4421_v24 }
 0x9aa   :  { %7599 = vrsqrt.f32 %v4317_v40  ;;  %v4318_v42 = vadd.f32 1e-05, %v4270_v45 }
 0x9ab   :  { %v4420_v53 = vadd.f32 %v10546_v16, %v4390_v26 }
 0x9ac   :  { %7601 = vrsqrt.f32 %v4318_v42 }
 0x9ad   :  { %v4435_v63 = vpack.c.bf16 %v4420_v53, %v4419_v39 }
 0x9af   :  { %6956 = vmatprep.mubr.msk.bf16.mxu0 %vm419_vm0, %v4435_v63  ;;  %6988 = vmatprep.mubr.msk.bf16.mxu1 %vm419_vm0, %v4435_v63 }
 0x9b0   :  { %v7596_v13 = vpop.eup %7595  ;;  %6957 = vmatmul.mubr.msk.bf16.gmra.mrb[136].mxu0 %vm419_vm0, %v4436_v38  ;;  %6989 = vmatmul.mubr.msk.bf16.gmra.mrb[136].mxu1 %vm419_vm0, %v4436_v38 }
 0x9b1   :  { %v4363_v62 = vmul.f32 %v7596_v13, %v4291_v47 }
 0x9b2   :  { %v7598_v58 = vpop.eup %7597 }
 0x9b3   :  { %v4364_v14 = vmul.f32 %v7598_v58, %v4292_v18  ;;  %v4393_v6 = vmul.f32 %v10539_v57, %v4363_v62 }
 0x9b4   :  { %v7600_v54 = vpop.eup %7599 }
 0x9b5   :  { %v4394_v30 = vmul.f32 %v10539_v57, %v4364_v14  ;;  %v4365_v49 = vmul.f32 %v7600_v54, %v4293_v41  ;;  %v4423_v0 = vadd.f32 %v10546_v16, %v4393_v6 }
 0x9b6   :  { %v7602_v4 = vpop.eup %7601 }
 0x9b7   :  { %v4424_v27 = vadd.f32 %v10546_v16, %v4394_v30  ;;  %v4366_v21 = vmul.f32 %v7602_v4, %v4294_v8  ;;  %v4395_v43 = vmul.f32 %v10539_v57, %v4365_v49 }
 0x9b9   :  { %v4437_v48 = vpack.c.bf16 %v4424_v27, %v4423_v0  ;;  %v4396_v32 = vmul.f32 %v10539_v57, %v4366_v21  ;;  %v4425_v20 = vadd.f32 %v10546_v16, %v4395_v43  ;;  %v10732_v27 = vld [vmem:[#allocation11 + $0x1] ss:$0 sm:$0xff]  ;;  %v10734_v21 = vld [vmem:[#allocation8 + $0x1] ss:$0 sm:$0xff] }
 0x9bb   :  { %6960 = vmatprep.mubr.msk.bf16.mxu0 %vm419_vm0, %v4437_v48  ;;  %6992 = vmatprep.mubr.msk.bf16.mxu1 %vm419_vm0, %v4437_v48  ;;  %v4426_v50 = vadd.f32 %v10546_v16, %v4396_v32 }
 0x9bd   :  { %v4438_v25 = vpack.c.bf16 %v4426_v50, %v4425_v20 }
 0x9bf   :  { %6961 = vmatmul.mubr.msk.bf16.gmra.mrb[140].mxu0 %vm419_vm0, %v4438_v25  ;;  %6993 = vmatmul.mubr.msk.bf16.gmra.mrb[140].mxu1 %vm419_vm0, %v4438_v25 }
 0x9c0   :  { %7004 = vmatprep.mubr.msk.bf16.mxu0 %vm419_vm0, %v4435_v63 }
 0x9c7   :  { %7005 = vmatmul.mubr.msk.bf16.vlgmr.msra.gmra.mrb[144].mxu0 %vm419_vm0, %v4436_v38 }
 0x9c8   :  { %7008 = vmatprep.mubr.msk.bf16.mxu0 %vm419_vm0, %v4437_v48 }
 0x9cf   :  { %7009 = vmatmul.mubr.msk.bf16.gmra.mrb[148].mxu0 %vm419_vm0, %v4438_v25 }
 0xa22   :  { %v6942_v57 = vpop.f32.mrb[120].mxu0  ;;  %v10676_v33 = vpop.f32.mrb[120].mxu1 }
 0xa23   :  { %v4550_v55 = vpop.f32.mrb[121].mxu0  ;;  %v10678_v44 = vpop.f32.mrb[121].mxu1  ;;  %v4559_v43 = vadd.f32 %v6942_v57, %v10732_v27 }
 0xa24   :  { %v6943_v16 = vpop.f32.mrb[122].mxu0  ;;  %v10680_v29 = vpop.f32.mrb[122].mxu1  ;;  %v4551_v48 = vadd.f32 %v10732_v27, %v4550_v55 }
 0xa25   :  { %v4553_v11 = vpop.f32.mrb[123].mxu0  ;;  %v10682_v37 = vpop.f32.mrb[123].mxu1  ;;  %v4562_v32 = vadd.f32 %v6943_v16, %v10732_v27 }
 0xa26   :  { %v4554_v20 = vadd.f32 %v10732_v27, %v4553_v11 }
 0xa32   :  { %v6946_v3 = vpop.f32.mrb[124].mxu0  ;;  %v10684_v9 = vpop.f32.mrb[124].mxu1 }
 0xa33   :  { %v4566_v36 = vpop.f32.mrb[125].mxu0  ;;  %v10686_v34 = vpop.f32.mrb[125].mxu1  ;;  %v4575_v50 = vadd.f32 %v6946_v3, %v10732_v27 }
 0xa34   :  { %v6947_v10 = vpop.f32.mrb[126].mxu0  ;;  %v10688_v1 = vpop.f32.mrb[126].mxu1  ;;  %v10742_v25 = vadd.f32 %v10732_v27, %v4566_v36 }
 0xa35   :  { %11341 = vst [vmem:[#allocation64_spill] sm:$0xff] %v10688_v1  ;;  %v4569_v2 = vpop.f32.mrb[127].mxu0  ;;  %v10690_v56 = vpop.f32.mrb[127].mxu1  ;;  %v10745_v7 = vadd.f32 %v6947_v10, %v10732_v27 }
 0xa36   :  { %11342 = vst [vmem:[#allocation65_spill] sm:$0xff] %v10690_v56  ;;  %v10748_v15 = vadd.f32 %v10732_v27, %v4569_v2 }
 0xa54   :  { %v6950_v5 = vpop.f32.mrb[128].mxu0  ;;  %v10692_v61 = vpop.f32.mrb[128].mxu1 }
 0xa55   :  { %v4582_v51 = vpop.f32.mrb[129].mxu0  ;;  %v10694_v17 = vpop.f32.mrb[129].mxu1  ;;  %v4591_v57 = vadd.f32 %v6950_v5, %v10732_v27 }
 0xa56   :  { %v6951_v22 = vpop.f32.mrb[130].mxu0  ;;  %v10696_v12 = vpop.f32.mrb[130].mxu1  ;;  %v4583_v55 = vadd.f32 %v10732_v27, %v4582_v51 }
 0xa57   :  { %v4585_v46 = vpop.f32.mrb[131].mxu0  ;;  %v10698_v40 = vpop.f32.mrb[131].mxu1  ;;  %v4594_v16 = vadd.f32 %v6951_v22, %v10732_v27 }
 0xa58   :  { %v4586_v3 = vadd.f32 %v10732_v27, %v4585_v46 }
 0xa64   :  { %v6954_v45 = vpop.f32.mrb[132].mxu0  ;;  %v10700_v23 = vpop.f32.mrb[132].mxu1 }
 0xa65   :  { %v4598_v26 = vpop.f32.mrb[133].mxu0  ;;  %v10702_v42 = vpop.f32.mrb[133].mxu1  ;;  %v4607_v36 = vadd.f32 %v6954_v45, %v10732_v27 }
 0xa66   :  { %v6955_v59 = vpop.f32.mrb[134].mxu0  ;;  %v10704_v39 = vpop.f32.mrb[134].mxu1  ;;  %v4599_v10 = vadd.f32 %v10732_v27, %v4598_v26 }
 0xa67   :  { %11343 = vst [vmem:[#allocation66_spill] sm:$0xff] %v10704_v39  ;;  %v4601_v53 = vpop.f32.mrb[135].mxu0  ;;  %v10706_v24 = vpop.f32.mrb[135].mxu1 }
 0xa68   :  { %11344 = vst [vmem:[#allocation67_spill] sm:$0xff] %v10706_v24 }
 0xa83   :  { %v6958_v63 = vpop.f32.mrb[136].mxu0  ;;  %v10708_v38 = vpop.f32.mrb[136].mxu1 }
 0xa84   :  { %v4614_v47 = vpop.f32.mrb[137].mxu0  ;;  %v10710_v13 = vpop.f32.mrb[137].mxu1  ;;  %v4623_v35 = vadd.f32 %v6958_v63, %v10732_v27 }
 0xa85   :  { %v6959_v18 = vpop.f32.mrb[138].mxu0  ;;  %v10712_v62 = vpop.f32.mrb[138].mxu1  ;;  %v4615_v5 = vadd.f32 %v10732_v27, %v4614_v47 }
 0xa86   :  { %v4617_v58 = vpop.f32.mrb[139].mxu0  ;;  %v10714_v41 = vpop.f32.mrb[139].mxu1 }
 0xa87   :  { %v4618_v28 = vadd.f32 %v10732_v27, %v4617_v58 }
 0xa92   :  { %v10716_v14 = vpop.f32.mrb[140].mxu0  ;;  %v10718_v6 = vpop.f32.mrb[140].mxu1 }
 0xa93   :  { %v10720_v54 = vpop.f32.mrb[141].mxu0  ;;  %v10722_v8 = vpop.f32.mrb[141].mxu1 }
 0xa94   :  { %11345 = vst [vmem:[#allocation68_spill] sm:$0xff] %v10722_v8  ;;  %v10724_v30 = vpop.f32.mrb[142].mxu0  ;;  %v10726_v49 = vpop.f32.mrb[142].mxu1 }
 0xa95   :  { %11346 = vst [vmem:[#allocation71_spill] sm:$0xff] %v10726_v49  ;;  %v10728_v4 = vpop.f32.mrb[143].mxu0  ;;  %v10730_v0 = vpop.f32.mrb[143].mxu1 }
 0xa96   :  { %11347 = vst [vmem:[#allocation72_spill] sm:$0xff] %v10730_v0 }
 0xa9a   :  { %v7006_v60 = vpop.f32.mrb[144].mxu0 }
 0xa9b   :  { %v4899_v11 = vadd.f32 %v7006_v60, %v10734_v21  ;;  %v4890_v19 = vpop.f32.mrb[145].mxu0  ;;  %v4626_v60 = vadd.f32 %v6959_v18, %v10732_v27  ;;  %v4602_v18 = vadd.f32 %v10732_v27, %v4601_v53  ;;  %v4639_v53 = vadd.f32 %v10716_v14, %v10732_v27 }
 0xa9c   :  { %v4891_v31 = vadd.f32 %v10734_v21, %v4890_v19  ;;  %v7007_v2 = vpop.f32.mrb[146].mxu0 }
 0xa9d   :  { %v4923_v52 = vmul.f32 0.35355338, %v4899_v11  ;;  %v4902_v51 = vadd.f32 %v7007_v2, %v10734_v21  ;;  %v4893_v22 = vpop.f32.mrb[147].mxu0  ;;  %v4610_v11 = vadd.f32 %v6955_v59, %v10732_v27 }
 0xa9e   :  { %v4921_v46 = vmul.f32 0.35355338, %v4891_v31  ;;  %v4894_v45 = vadd.f32 %v10734_v21, %v4893_v22 }
 0xa9f   :  { %v4931_v0 = vmul.f32 %v4923_v52, %v4559_v43  ;;  %v4939_v26 = vmul.f32 %v4923_v52, %v4591_v57  ;;  %v10764_v24 = vmul.f32 %v4923_v52, %v4623_v35  ;;  %v4924_v19 = vmul.f32 0.35355338, %v4902_v51 }
 0xaa0   :  { %v4929_v56 = vmul.f32 %v4921_v46, %v4551_v48  ;;  %v4937_v63 = vmul.f32 %v4921_v46, %v4583_v55  ;;  %v4945_v49 = vmul.f32 %v4921_v46, %v4615_v5  ;;  %v4922_v47 = vmul.f32 0.35355338, %v4894_v45 }
 0xaa1   :  { %v4932_v2 = vmul.f32 %v4924_v19, %v4562_v32  ;;  %v4940_v39 = vmul.f32 %v4924_v19, %v4594_v16  ;;  %v4948_v1 = vmul.f32 %v4924_v19, %v4626_v60 }
 0xaa2   :  { %v4930_v58 = vmul.f32 %v4922_v47, %v4554_v20  ;;  %v4938_v31 = vmul.f32 %v4922_v47, %v4586_v3  ;;  %v4946_v8 = vmul.f32 %v4922_v47, %v4618_v28  ;;  %v7010_v22 = vpop.f32.mrb[148].mxu0  ;;  %v4631_v28 = vadd.f32 %v10732_v27, %v10720_v54 }
 0xaa3   :  { %v4954_v43 = vpack.c.bf16 %v4932_v2, %v4931_v0  ;;  %v4915_v52 = vadd.f32 %v7010_v22, %v10734_v21  ;;  %v4906_v35 = vpop.f32.mrb[149].mxu0  ;;  %v4958_v57 = vpack.c.bf16 %v4940_v39, %v4939_v26  ;;  %v4962_v48 = vpack.c.bf16 %v4948_v1, %v10764_v24 }
 0xaa4   :  { %v4907_v55 = vadd.f32 %v10734_v21, %v4906_v35  ;;  %v7011_v5 = vpop.f32.mrb[150].mxu0  ;;  %v4953_v59 = vpack.c.bf16 %v4930_v58, %v4929_v56  ;;  %v4957_v32 = vpack.c.bf16 %v4938_v31, %v4937_v63  ;;  %v4961_v16 = vpack.c.bf16 %v4946_v8, %v4945_v49 }
 0xaa5   :  { %v4927_v20 = vmul.f32 0.35355338, %v4915_v52  ;;  %v4918_v0 = vadd.f32 %v7011_v5, %v10734_v21  ;;  %v4909_v3 = vpop.f32.mrb[151].mxu0  ;;  %v4642_v39 = vadd.f32 %v10724_v30, %v10732_v27  ;;  %v4634_v1 = vadd.f32 %v10732_v27, %v10728_v4 }
 0xaa6   :  { %v4925_v24 = vmul.f32 0.35355338, %v4907_v55  ;;  %v4910_v56 = vadd.f32 %v10734_v21, %v4909_v3  ;;  %7020 = vmatprep.mubr.msk.bf16.mxu1 %vm419_vm0, %v4953_v59 }
 0xaa7   :  { %v4935_v8 = vmul.f32 %v4927_v20, %v4575_v50  ;;  %v4943_v14 = vmul.f32 %v4927_v20, %v4607_v36  ;;  %v4951_v49 = vmul.f32 %v4927_v20, %v4639_v53  ;;  %v4928_v51 = vmul.f32 0.35355338, %v4918_v0  ;;  %7021 = vmatmul.mubr.msk.bf16.vlgmr.msra.gmra.mrb[144].mxu1 %vm419_vm0, %v4954_v43 }
 0xaa8   :  { %v4933_v54 = vmul.f32 %v4925_v24, %v10742_v25  ;;  %v4941_v60 = vmul.f32 %v4925_v24, %v4599_v10  ;;  %v4949_v46 = vmul.f32 %v4925_v24, %v4631_v28  ;;  %v4926_v45 = vmul.f32 0.35355338, %v4910_v56  ;;  %v7201_v25 = vld [vmem:[#allocation16 + $0x30] sm:$0xff]   ;;  %v7202_v10 = vld [vmem:[#allocation16 + $0x38] sm:$0xff]  }
 0xaa9   :  { %v4936_v30 = vmul.f32 %v4928_v51, %v10745_v7  ;;  %v4944_v26 = vmul.f32 %v4928_v51, %v4610_v11  ;;  %v4952_v4 = vmul.f32 %v4928_v51, %v4642_v39  ;;  %v7200_v7 = vld [vmem:[#allocation16 + $0x28] sm:$0xff]  }
 0xaaa   :  { %v4934_v27 = vmul.f32 %v4926_v45, %v10748_v15  ;;  %v4942_v21 = vmul.f32 %v4926_v45, %v4602_v18  ;;  %v4950_v19 = vmul.f32 %v4926_v45, %v4634_v1  ;;  %v7199_v15 = vld [vmem:[#allocation16 + $0x20] sm:$0xff]  }
 0xaab   :  { %v4956_v63 = vpack.c.bf16 %v4936_v30, %v4935_v8  ;;  %v4960_v50 = vpack.c.bf16 %v4944_v26, %v4943_v14  ;;  %v4964_v36 = vpack.c.bf16 %v4952_v4, %v4951_v49  ;;  %7044 = vmatprep.subr.bf16.mxu0 %v7199_v15  ;;  %v10829_v14 = vld [vmem:[#allocation14 + $0x1] ss:$0 sm:$0xff] }
 0xaac   :  { %v4955_v47 = vpack.c.bf16 %v4934_v27, %v4933_v54  ;;  %v4959_v2 = vpack.c.bf16 %v4942_v21, %v4941_v60  ;;  %v4963_v58 = vpack.c.bf16 %v4950_v19, %v4949_v46  ;;  %7045 = vmatpush3.bf16.msra.mxu0 %v7199_v15  ;;  %v10833_v49 = vadd.f32 %v10676_v33, %v10829_v14 }
 0xaad   :  { %7046 = vmatprep.subr.bf16.mxu0 %v7200_v7  ;;  %v10837_v51 = vadd.f32 %v10829_v14, %v10678_v44  ;;  %v10841_v54 = vadd.f32 %v10680_v29, %v10829_v14  ;;  %v10845_v46 = vadd.f32 %v10829_v14, %v10682_v37  ;;  %v10849_v45 = vadd.f32 %v10684_v9, %v10829_v14 }
 0xaae   :  { %7024 = vmatprep.mubr.msk.bf16.mxu1 %vm419_vm0, %v4955_v47  ;;  %v10853_v33 = vadd.f32 %v10692_v61, %v10829_v14  ;;  %v10857_v26 = vadd.f32 %v10829_v14, %v10694_v17  ;;  %v10861_v29 = vadd.f32 %v10696_v12, %v10829_v14  ;;  %v10865_v37 = vadd.f32 %v10829_v14, %v10698_v40 }
 0xaaf   :  { %7025 = vmatmul.mubr.msk.bf16.gmra.mrb[148].mxu1 %vm419_vm0, %v4956_v63  ;;  %v10870_v40 = vadd.f32 %v10700_v23, %v10829_v14 }
 0xab0   :  { %7028 = vmatprep.mubr.msk.bf16.mxu1 %vm419_vm0, %v4957_v32  ;;  %7047 = vmatpush3.bf16.msra.mxu0 %v7200_v7  ;;  %v10874_v7 = vadd.f32 %v10708_v38, %v10829_v14 }
 0xab1   :  { %7048 = vmatprep.subr.bf16.mxu0 %v7201_v25 }
 0xab4   :  { %7049 = vmatpush3.bf16.msra.mxu0 %v7201_v25 }
 0xab5   :  { %7050 = vmatprep.subr.bf16.mxu0 %v7202_v10 }
 0xab7   :  { %7029 = vmatmul.mubr.msk.bf16.gmra.mrb[152].mxu1 %vm419_vm0, %v4958_v57 }
 0xab8   :  { %7032 = vmatprep.mubr.msk.bf16.mxu1 %vm419_vm0, %v4959_v2  ;;  %7051 = vmatpush3.bf16.msra.mxu0 %v7202_v10 }
 0xabf   :  { %7033 = vmatmul.mubr.msk.bf16.gmra.mrb[156].mxu1 %vm419_vm0, %v4960_v50 }
 0xac0   :  { %7036 = vmatprep.mubr.msk.bf16.mxu1 %vm419_vm0, %v4961_v16 }
 0xac7   :  { %7037 = vmatmul.mubr.msk.bf16.gmra.mrb[160].mxu1 %vm419_vm0, %v4962_v48 }
 0xac8   :  { %7040 = vmatprep.mubr.msk.bf16.mxu1 %vm419_vm0, %v4963_v58 }
 0xacf   :  { %7041 = vmatmul.mubr.msk.bf16.gmra.mrb[164].mxu1 %vm419_vm0, %v4964_v36 }
 0xb7a   :  { %v7022_v11 = vpop.f32.mrb[144].mxu1 }
 0xb7b   :  { %v5035_v18 = vpop.f32.mrb[145].mxu1 }
 0xb7c   :  { %v10796_v31 = vpop.f32.mrb[146].mxu1 }
 0xb7d   :  { %v10798_v22 = vpop.f32.mrb[147].mxu1 }
 0xb82   :  { %v10800_v43 = vpop.f32.mrb[148].mxu1 }
 0xb83   :  { %v10802_v52 = vpop.f32.mrb[149].mxu1 }
 0xb84   :  { %v10804_v35 = vpop.f32.mrb[150].mxu1 }
 0xb85   :  { %v10806_v57 = vpop.f32.mrb[151].mxu1 }
 0xb8a   :  { %v7030_v48 = vpop.f32.mrb[152].mxu1 }
 0xb8b   :  { %v5132_v55 = vmax.f32 %v7022_v11, %v7030_v48  ;;  %v5067_v5 = vpop.f32.mrb[153].mxu1 }
 0xb8c   :  { %v5130_v59 = vmax.f32 %v5035_v18, %v5067_v5  ;;  %v7031_v32 = vpop.f32.mrb[154].mxu1 }
 0xb8d   :  { %v5133_v16 = vmax.f32 %v10796_v31, %v7031_v32  ;;  %v10809_v53 = vpop.f32.mrb[155].mxu1 }
 0xb8e   :  { %v5131_v28 = vmax.f32 %v10798_v22, %v10809_v53 }
 0xb92   :  { %v10813_v20 = vpop.f32.mrb[156].mxu1 }
 0xb93   :  { %v5136_v0 = vmax.f32 %v10800_v43, %v10813_v20  ;;  %v10817_v3 = vpop.f32.mrb[157].mxu1 }
 0xb94   :  { %v5134_v39 = vmax.f32 %v10802_v52, %v10817_v3  ;;  %v10821_v1 = vpop.f32.mrb[158].mxu1 }
 0xb95   :  { %v5137_v24 = vmax.f32 %v10804_v35, %v10821_v1  ;;  %v10825_v56 = vpop.f32.mrb[159].mxu1 }
 0xb96   :  { %v5135_v8 = vmax.f32 %v10806_v57, %v10825_v56 }
 0xb9a   :  { %v7038_v60 = vpop.f32.mrb[160].mxu1 }
 0xb9b   :  { %v5140_v30 = vmax.f32 %v5132_v55, %v7038_v60  ;;  %v5099_v44 = vpop.f32.mrb[161].mxu1 }
 0xb9c   :  { %v5138_v9 = vmax.f32 %v5130_v59, %v5099_v44  ;;  %v7039_v4 = vpop.f32.mrb[162].mxu1 }
 0xb9d   :  { %v5148_v27 = vsub.f32 %v7022_v11, %v5140_v30  ;;  %v5180_v21 = vsub.f32 %v7030_v48, %v5140_v30  ;;  %v5228_v61 = vsub.f32 %v7038_v60, %v5140_v30  ;;  %v5141_v19 = vmax.f32 %v5133_v16, %v7039_v4  ;;  %v5102_v63 = vpop.f32.mrb[163].mxu1 }
 0xb9e   :  { %v5146_v50 = vsub.f32 %v5035_v18, %v5138_v9  ;;  %v5178_v36 = vsub.f32 %v5067_v5, %v5138_v9  ;;  %v5226_v47 = vsub.f32 %v5099_v44, %v5138_v9  ;;  %v5139_v17 = vmax.f32 %v5131_v28, %v5102_v63 }
 0xb9f   :  { %v5158_v2 = vmul.f32 1.442695, %v5148_v27  ;;  %v5190_v58 = vmul.f32 1.442695, %v5180_v21  ;;  %v5238_v15 = vmul.f32 1.442695, %v5228_v61  ;;  %v5149_v12 = vsub.f32 %v10796_v31, %v5141_v19 }
 0xba0   :  { %v5154_v25 = vmul.f32 1.442695, %v5146_v50  ;;  %v5181_v10 = vsub.f32 %v7031_v32, %v5141_v19  ;;  %v5186_v11 = vmul.f32 1.442695, %v5178_v36  ;;  %v5229_v18 = vsub.f32 %v7039_v4, %v5141_v19 }
 0xba1   :  { %7603 = vpow2.f32 %v5158_v2  ;;  %v5147_v48 = vsub.f32 %v10798_v22, %v5139_v17  ;;  %v5234_v55 = vmul.f32 1.442695, %v5226_v47  ;;  %v5179_v5 = vsub.f32 %v10809_v53, %v5139_v17 }
 0xba2   :  { %7605 = vpow2.f32 %v5190_v58  ;;  %v5227_v31 = vsub.f32 %v5102_v63, %v5139_v17  ;;  %v7042_v59 = vpop.f32.mrb[164].mxu1  ;;  %v5160_v23 = vmul.f32 1.442695, %v5149_v12  ;;  %v5192_v16 = vmul.f32 1.442695, %v5181_v10 }
 0xba3   :  { %7607 = vpow2.f32 %v5238_v15  ;;  %v5144_v28 = vmax.f32 %v5136_v0, %v7042_v59  ;;  %v5115_v60 = vpop.f32.mrb[165].mxu1  ;;  %v5240_v38 = vmul.f32 1.442695, %v5229_v18  ;;  %v5156_v30 = vmul.f32 1.442695, %v5147_v48 }
 0xba4   :  { %7609 = vpow2.f32 %v5154_v25  ;;  %v5142_v32 = vmax.f32 %v5134_v39, %v5115_v60  ;;  %v7043_v44 = vpop.f32.mrb[166].mxu1  ;;  %v10886_v61 = vadd.f32 %v10829_v14, %v10710_v13  ;;  %v4796_v39 = vadd.f32 %v10712_v62, %v10829_v14 }
 0xba5   :  { %7611 = vpow2.f32 %v5186_v11  ;;  %v5152_v9 = vsub.f32 %v10800_v43, %v5144_v28  ;;  %v5184_v22 = vsub.f32 %v10813_v20, %v5144_v28  ;;  %v5232_v4 = vsub.f32 %v7042_v59, %v5144_v28  ;;  %v10880_v27 = vpop.f32.mrb[167].mxu1 }
 0xba6   :  { %7613 = vpow2.f32 %v5234_v55  ;;  %v5150_v53 = vsub.f32 %v10802_v52, %v5142_v32  ;;  %v5182_v21 = vsub.f32 %v10817_v3, %v5142_v32  ;;  %v5230_v0 = vsub.f32 %v5115_v60, %v5142_v32 }
 0xba7   :  { %7615 = vpow2.f32 %v5160_v23  ;;  %v5188_v43 = vmul.f32 1.442695, %v5179_v5  ;;  %v10892_v20 = vadd.f32 %v10829_v14, %v10714_v41  ;;  %v10896_v19 = vadd.f32 %v10718_v6, %v10829_v14 }
 0xba8   :  { %7617 = vpow2.f32 %v5192_v16  ;;  %v5236_v52 = vmul.f32 1.442695, %v5227_v31  ;;  %v5166_v3 = vmul.f32 1.442695, %v5152_v9  ;;  %v5145_v13 = vmax.f32 %v5137_v24, %v7043_v44 }
 0xba9   :  { %7619 = vpow2.f32 %v5240_v38  ;;  %v10905_v62 = vmax.f32 %v5135_v8, %v10880_v27  ;;  %v5198_v41 = vmul.f32 1.442695, %v5184_v22  ;;  %v5246_v63 = vmul.f32 1.442695, %v5232_v4 }
 0xbaa   :  { %7621 = vpow2.f32 %v5156_v30  ;;  %v5162_v50 = vmul.f32 1.442695, %v5150_v53  ;;  %v5153_v36 = vsub.f32 %v10804_v35, %v5145_v13  ;;  %v5185_v47 = vsub.f32 %v10821_v1, %v5145_v13 }
 0xbab   :  { %v7604_v6 = vpop.eup %7603  ;;  %7623 = vpow2.f32 %v5188_v43  ;;  %v5233_v17 = vsub.f32 %v7043_v44, %v5145_v13  ;;  %v5151_v58 = vsub.f32 %v10806_v57, %v10905_v62  ;;  %v5183_v8 = vsub.f32 %v10825_v56, %v10905_v62 }
 0xbac   :  { %v7606_v2 = vpop.eup %7605  ;;  %v5172_v24 = vmul.f32 %v7604_v6, %v10833_v49  ;;  %7625 = vpow2.f32 %v5236_v52  ;;  %v5194_v10 = vmul.f32 1.442695, %v5182_v21  ;;  %v5242_v11 = vmul.f32 1.442695, %v5230_v0 }
 0xbad   :  { %v7608_v15 = vpop.eup %7607  ;;  %v5204_v12 = vadd.f32 %v7606_v2, %v7604_v6  ;;  %v5212_v25 = vmul.f32 %v7606_v2, %v10853_v33  ;;  %7627 = vpow2.f32 %v5166_v3  ;;  %v5168_v18 = vmul.f32 1.442695, %v5153_v36 }
 0xbae   :  { %v7610_v35 = vpop.eup %7609  ;;  %v5260_v1 = vmul.f32 %v7608_v15, %v10874_v7  ;;  %7629 = vpow2.f32 %v5198_v41  ;;  %v5200_v57 = vmul.f32 1.442695, %v5185_v47  ;;  %v5248_v56 = vmul.f32 1.442695, %v5233_v17 }
 0xbaf   :  { %v7612_v49 = vpop.eup %7611  ;;  %v5220_v48 = vadd.f32 %v5212_v25, %v5172_v24  ;;  %v5252_v55 = vadd.f32 %v7608_v15, %v5204_v12  ;;  %7631 = vpow2.f32 %v5246_v63  ;;  %v5231_v33 = vsub.f32 %v10880_v27, %v10905_v62  ;;  %v11348_v25 = vld [vmem:[#allocation68_spill] sm:$0xff] }
 0xbb0   :  { %v7614_v5 = vpop.eup %7613  ;;  %v5202_v31 = vadd.f32 %v7612_v49, %v7610_v35  ;;  %7633 = vpow2.f32 %v5162_v50  ;;  %v5170_v7 = vmul.f32 %v7610_v35, %v10837_v51  ;;  %v5210_v16 = vmul.f32 %v7612_v49, %v10857_v26 }
 0xbb1   :  { %v7616_v59 = vpop.eup %7615  ;;  %v5268_v23 = vadd.f32 %v5260_v1, %v5220_v48  ;;  %7635 = vrcp.f32 %v5252_v55  ;;  %v5164_v30 = vmul.f32 1.442695, %v5151_v58  ;;  %v5196_v53 = vmul.f32 1.442695, %v5183_v8  ;;  %v11350_v55 = vld [vmem:[#allocation66_spill] sm:$0xff] }
 0xbb2   :  { %v7618_v28 = vpop.eup %7617  ;;  %v5250_v60 = vadd.f32 %v7614_v5, %v5202_v31  ;;  %v5173_v38 = vmul.f32 %v7616_v59, %v10841_v54  ;;  %7637 = vpow2.f32 %v5194_v10  ;;  %v5218_v22 = vadd.f32 %v5210_v16, %v5170_v7 }
 0xbb3   :  { %v7620_v32 = vpop.eup %7619  ;;  %v5205_v44 = vadd.f32 %v7618_v28, %v7616_v59  ;;  %v5213_v9 = vmul.f32 %v7618_v28, %v10861_v29  ;;  %7639 = vpow2.f32 %v5242_v11  ;;  %v5258_v51 = vmul.f32 %v7614_v5, %v10886_v61  ;;  %v11351_v59 = vld [vmem:[#allocation71_spill] sm:$0xff] }
 0xbb4   :  { %v7622_v4 = vpop.eup %7621  ;;  %7641 = vrcp.f32 %v5250_v60  ;;  %v5261_v27 = vmul.f32 %v7620_v32, %v4796_v39  ;;  %v5244_v41 = vmul.f32 1.442695, %v5231_v33  ;;  %v4769_v2 = vadd.f32 %v10829_v14, %v10702_v42 }
 0xbb5   :  { %v7624_v21 = vpop.eup %7623  ;;  %v5221_v26 = vadd.f32 %v5213_v9, %v5173_v38  ;;  %v5253_v0 = vadd.f32 %v7620_v32, %v5205_v44  ;;  %7643 = vpow2.f32 %v5168_v18  ;;  %v5171_v54 = vmul.f32 %v7622_v4, %v10845_v46  ;;  %v11349_v18 = vld [vmem:[#allocation64_spill] sm:$0xff]  ;;  %v11352_v32 = vld [vmem:[#allocation65_spill] sm:$0xff] }
 0xbb6   :  { %v7626_v43 = vpop.eup %7625  ;;  %v5203_v52 = vadd.f32 %v7624_v21, %v7622_v4  ;;  %7645 = vpow2.f32 %v5200_v57  ;;  %v5211_v3 = vmul.f32 %v7624_v21, %v10865_v37  ;;  %v5266_v29 = vadd.f32 %v5258_v51, %v5218_v22  ;;  %v11353_v21 = vld [vmem:[#allocation67_spill] sm:$0xff] }
 0xbb7   :  { %v7628_v13 = vpop.eup %7627  ;;  %v5269_v62 = vadd.f32 %v5261_v27, %v5221_v26  ;;  %7647 = vrcp.f32 %v5253_v0  ;;  %v5259_v39 = vmul.f32 %v7626_v43, %v10892_v20  ;;  %v4737_v46 = vadd.f32 %v10829_v14, %v10686_v34 }
 0xbb8   :  { %v7630_v63 = vpop.eup %7629  ;;  %v5251_v61 = vadd.f32 %v7626_v43, %v5203_v52  ;;  %7649 = vpow2.f32 %v5248_v56  ;;  %v5219_v50 = vadd.f32 %v5211_v3, %v5171_v54  ;;  %v5176_v6 = vmul.f32 %v7628_v13, %v10849_v45  ;;  %v11354_v52 = vld [vmem:[#allocation72_spill] sm:$0xff] }
 0xbb9   :  { %v7632_v36 = vpop.eup %7631  ;;  %v5208_v47 = vadd.f32 %v7630_v63, %v7628_v13  ;;  %7651 = vpow2.f32 %v5164_v30  ;;  %v5216_v37 = vmul.f32 %v7630_v63, %v10870_v40  ;;  %v4801_v34 = vadd.f32 %v10829_v14, %v11348_v25 }
 0xbba   :  { %v7634_v17 = vpop.eup %7633  ;;  %7653 = vrcp.f32 %v5251_v61  ;;  %v5267_v20 = vadd.f32 %v5259_v39, %v5219_v50  ;;  %v5264_v24 = vmul.f32 %v7632_v36, %v10896_v19  ;;  %v4748_v19 = vadd.f32 %v11349_v18, %v10829_v14 }
 0xbbb   :  { %v7636_v58 = vpop.eup %7635  ;;  %v5256_v8 = vadd.f32 %v7632_v36, %v5208_v47  ;;  %7655 = vpow2.f32 %v5196_v53  ;;  %v5174_v45 = vmul.f32 %v7634_v17, %v4737_v46  ;;  %v5224_v15 = vadd.f32 %v5216_v37, %v5176_v6 }
 0xbbc   :  { %v7638_v12 = vpop.eup %7637  ;;  %v5284_v10 = vmul.f32 %v7636_v58, %v5268_v23  ;;  %7657 = vpow2.f32 %v5244_v41  ;;  %v4780_v57 = vadd.f32 %v11350_v55, %v10829_v14  ;;  %v4812_v23 = vadd.f32 %v11351_v59, %v10829_v14 }
 0xbbd   :  { %v7640_v40 = vpop.eup %7639  ;;  %7659 = vrcp.f32 %v5256_v8  ;;  %v5206_v35 = vadd.f32 %v7638_v12, %v7634_v17  ;;  %v5214_v1 = vmul.f32 %v7638_v12, %v4769_v2  ;;  %v5272_v42 = vadd.f32 %v5264_v24, %v5224_v15  ;;  %v6325_v15 = vld [vmem:[#allocation17 + $0x1] ss:$0 sm:$0xff]  ;;  %v11355_v12 = vld [vmem:[#allocation91_spill] sm:$0xff] }
 0xbbe   :  { %v7642_v11 = vpop.eup %7641  ;;  %v5262_v49 = vmul.f32 %v7640_v40, %v4801_v34  ;;  %v4740_v44 = vadd.f32 %v10829_v14, %v11352_v32  ;;  %v4772_v26 = vadd.f32 %v10829_v14, %v11353_v21  ;;  %v4804_v3 = vadd.f32 %v10829_v14, %v11354_v52 }
 0xbbf   :  { %v7644_v48 = vpop.eup %7643  ;;  %v5254_v5 = vadd.f32 %v7640_v40, %v5206_v35  ;;  %v5282_v31 = vmul.f32 %v7642_v11, %v5266_v29  ;;  %v5222_v56 = vadd.f32 %v5214_v1, %v5174_v45 }
 0xbc0   :  { %v7646_v33 = vpop.eup %7645  ;;  %v5177_v7 = vmul.f32 %v7644_v48, %v4748_v19  ;;  %v11358_v19 = vld [vmem:[#allocation93_spill] sm:$0xff] }
 0xbc1   :  { %v7648_v16 = vpop.eup %7647  ;;  %7661 = vrcp.f32 %v5254_v5  ;;  %v5209_v28 = vadd.f32 %v7646_v33, %v7644_v48  ;;  %v5270_v60 = vadd.f32 %v5262_v49, %v5222_v56  ;;  %v5217_v38 = vmul.f32 %v7646_v33, %v4780_v57 }
 0xbc2   :  { %v7650_v30 = vpop.eup %7649  ;;  %v5285_v9 = vmul.f32 %v7648_v16, %v5269_v62 }
 0xbc3   :  { %v7652_v22 = vpop.eup %7651  ;;  %v5257_v4 = vadd.f32 %v7650_v30, %v5209_v28  ;;  %v5225_v27 = vadd.f32 %v5217_v38, %v5177_v7  ;;  %v5265_v53 = vmul.f32 %v7650_v30, %v4812_v23  ;;  %v11359_v30 = vld [vmem:[#allocation90_spill] sm:$0xff] }
 0xbc4   :  { %v7654_v51 = vpop.eup %7653  ;;  %v5291_v0 = vpack.c.bf16 %v5285_v9, %v5284_v10  ;;  %v5175_v54 = vmul.f32 %v7652_v22, %v4740_v44  ;;  %v11356_v10 = vld [vmem:[#allocation87_spill] sm:$0xff] }
 0xbc5   :  { %v7656_v43 = vpop.eup %7655  ;;  %7663 = vrcp.f32 %v5257_v4  ;;  %v5283_v29 = vmul.f32 %v7654_v51, %v5267_v20  ;;  %v5273_v13 = vadd.f32 %v5265_v53, %v5225_v27  ;;  %v11361_v51 = vld [vmem:[#allocation92_spill] sm:$0xff] }
 0xbc6   :  { %v7658_v41 = vpop.eup %7657  ;;  %v5207_v39 = vadd.f32 %v7656_v43, %v7652_v22  ;;  %v5215_v62 = vmul.f32 %v7656_v43, %v4772_v26  ;;  %v11360_v22 = vld [vmem:[#allocation88_spill] sm:$0xff] }
 0xbc7   :  { %v7660_v63 = vpop.eup %7659  ;;  %v5290_v61 = vpack.c.bf16 %v5283_v29, %v5282_v31  ;;  %v5263_v50 = vmul.f32 %v7658_v41, %v4804_v3 }
 0xbc8   :  { %v5255_v6 = vadd.f32 %v7658_v41, %v5207_v39  ;;  %v5223_v36 = vadd.f32 %v5215_v62, %v5175_v54  ;;  %v5288_v46 = vmul.f32 %v7660_v63, %v5272_v42  ;;  %v11357_v42 = vld [vmem:[#allocation94_spill] sm:$0xff]  ;;  %v11362_v54 = vld [vmem:[#allocation63_spill] sm:$0xff] }
 0xbc9   :  { %7052 = vmatprep.mubr.msk.bf16.mxu0 %vm419_vm0, %v5290_v61 }
 0xbca   :  { %7665 = vrcp.f32 %v5255_v6  ;;  %7053 = vmatmul.mubr.msk.bf16.vlgmr.msra.gmra.mrb[152].mxu0 %vm419_vm0, %v5291_v0  ;;  %v5271_v47 = vadd.f32 %v5263_v50, %v5223_v36 }
 0xbcb   :  { %v7662_v37 = vpop.eup %7661 }
 0xbcc   :  { %v5286_v14 = vmul.f32 %v7662_v37, %v5270_v60 }
 0xbcf   :  { %v7664_v17 = vpop.eup %7663 }
 0xbd0   :  { %v5289_v2 = vmul.f32 %v7664_v17, %v5273_v13  ;;  %v7204_v17 = vld [vmem:[#allocation22 + $0x28] sm:$0xff]  }
 0xbd2   :  { %v5293_v20 = vpack.c.bf16 %v5289_v2, %v5288_v46  ;;  %v7205_v2 = vld [vmem:[#allocation22 + $0x30] sm:$0xff]  }
 0xbd4   :  { %v7666_v24 = vpop.eup %7665 }
 0xbd5   :  { %v5287_v58 = vmul.f32 %v7666_v24, %v5271_v47  ;;  %v7207_v24 = vld [vmem:[%s11111_s17 + $0x40] sm:$0xff]  }
 0xbd6   :  { %7076 = vmatprep.subr.bf16.mxu1 %v7207_v24 }
 0xbd7   :  { %v5292_v8 = vpack.c.bf16 %v5287_v58, %v5286_v14  ;;  %v7203_v14 = vld [vmem:[#allocation22 + $0x20] sm:$0xff]   ;;  %v7208_v58 = vld [vmem:[%s11111_s17 + $0x48] sm:$0xff]   ;;  %7077 = vmatpush3.bf16.msra.mxu1 %v7207_v24 }
 0xbd8   :  { %7060 = vmatprep.subr.bf16.mxu0 %v7203_v14  ;;  %7078 = vmatprep.subr.bf16.mxu1 %v7208_v58 }
 0xbd9   :  { %7056 = vmatprep.mubr.msk.bf16.mxu0 %vm419_vm0, %v5292_v8  ;;  %7061 = vmatpush3.bf16.msra.mxu0 %v7203_v14 }
 0xbda   :  { %7057 = vmatmul.mubr.msk.bf16.gmra.mrb[156].mxu0 %vm419_vm0, %v5293_v20  ;;  %7062 = vmatprep.subr.bf16.mxu0 %v7204_v17  ;;  %v7206_v20 = vld [vmem:[#allocation22 + $0x38] sm:$0xff]  }
 0xbdb   :  { %7079 = vmatpush3.bf16.msra.mxu1 %v7208_v58 }
 0xbdd   :  { %7063 = vmatpush3.bf16.msra.mxu0 %v7204_v17 }
 0xbde   :  { %7064 = vmatprep.subr.bf16.mxu0 %v7205_v2 }
 0xbe1   :  { %7065 = vmatpush3.bf16.msra.mxu0 %v7205_v2  ;;  %v6326_v2 = vld [vmem:[#allocation19 + $0x1] ss:$0 sm:$0xff] }
 0xbe2   :  { %7066 = vmatprep.subr.bf16.mxu0 %v7206_v20 }
 0xbe5   :  { %7067 = vmatpush3.bf16.msra.mxu0 %v7206_v20 }
 0xc9d   :  { %v7054_v45 = vpop.f32.mrb[152].mxu0 }
 0xc9e   :  { %v5406_v25 = vadd.f32 %v7054_v45, %v11355_v12  ;;  %v5373_v34 = vpop.f32.mrb[153].mxu0 }
 0xc9f   :  { %v5404_v40 = vadd.f32 %v5373_v34, %v11356_v10  ;;  %v7055_v35 = vpop.f32.mrb[154].mxu0 }
 0xca0   :  { %v10953_v1 = vadd.f32 %v6325_v15, %v5406_v25  ;;  %v5407_v11 = vadd.f32 %v7055_v35, %v11357_v42  ;;  %v5376_v18 = vpop.f32.mrb[155].mxu0 }
 0xca1   :  { %v5405_v49 = vadd.f32 %v5376_v18, %v11358_v19  ;;  %v10957_v48 = vadd.f32 %v6325_v15, %v5404_v40 }
 0xca2   :  { %v10959_v55 = vadd.f32 %v6325_v15, %v5407_v11  ;;  %v5438_v57 = vsel %vm419_vm0, %v10953_v1, 0.0  ;;  %v5466_v33 = vmul.f32 %v10953_v1, %v10953_v1 }
 0xca3   :  { %5439 = vadd.xlane.f32.xlu0 %v5438_v57  ;;  %v10963_v5 = vadd.f32 %v6325_v15, %v5405_v49  ;;  %v5432_v56 = vsel %vm419_vm0, %v10957_v48, 0.0  ;;  %v5464_v16 = vmul.f32 %v10957_v48, %v10957_v48 }
 0xca4   :  { %v5441_v31 = vsel %vm419_vm0, %v10959_v55, 0.0  ;;  %v5467_v23 = vmul.f32 %v10959_v55, %v10959_v55  ;;  %v5478_v7 = vsel %vm419_vm0, %v5466_v33, 0.0 }
 0xca5   :  { %5442 = vadd.xlane.f32.xlu1 %v5441_v31  ;;  %v5435_v59 = vsel %vm419_vm0, %v10963_v5, 0.0  ;;  %v5465_v60 = vmul.f32 %v10963_v5, %v10963_v5  ;;  %v5472_v9 = vsel %vm419_vm0, %v5464_v16, 0.0 }
 0xca6   :  { %v5481_v28 = vsel %vm419_vm0, %v5467_v23, 0.0 }
 0xca7   :  { %5433 = vadd.xlane.f32.xlu0 %v5432_v56  ;;  %v5475_v0 = vsel %vm419_vm0, %v5465_v60, 0.0 }
 0xca9   :  { %5436 = vadd.xlane.f32.xlu1 %v5435_v59 }
 0xcab   :  { %5479 = vadd.xlane.f32.xlu0 %v5478_v7 }
 0xcad   :  { %v7058_v38 = vpop.f32.mrb[156].mxu0  ;;  %5482 = vadd.xlane.f32.xlu1 %v5481_v28 }
 0xcae   :  { %v5410_v32 = vadd.f32 %v7058_v38, %v11359_v30  ;;  %v5389_v44 = vpop.f32.mrb[157].mxu0 }
 0xcaf   :  { %v5408_v4 = vadd.f32 %v5389_v44, %v11360_v22  ;;  %v7059_v27 = vpop.f32.mrb[158].mxu0  ;;  %5473 = vadd.xlane.f32.xlu0 %v5472_v9 }
 0xcb0   :  { %v10984_v53 = vadd.f32 %v6325_v15, %v5410_v32  ;;  %v5411_v21 = vadd.f32 %v7059_v27, %v11361_v51  ;;  %v5392_v26 = vpop.f32.mrb[159].mxu0 }
 0xcb1   :  { %v5409_v43 = vadd.f32 %v5392_v26, %v11362_v54  ;;  %5476 = vadd.xlane.f32.xlu1 %v5475_v0  ;;  %v10989_v52 = vadd.f32 %v6325_v15, %v5408_v4 }
 0xcb2   :  { %v10991_v3 = vadd.f32 %v6325_v15, %v5411_v21  ;;  %v5450_v29 = vsel %vm419_vm0, %v10984_v53, 0.0  ;;  %v5470_v6 = vmul.f32 %v10984_v53, %v10984_v53 }
 0xcb3   :  { %5451 = vadd.xlane.f32.xlu0 %v5450_v29  ;;  %v10995_v13 = vadd.f32 %v6325_v15, %v5409_v43  ;;  %v5444_v39 = vsel %vm419_vm0, %v10989_v52, 0.0  ;;  %v5468_v62 = vmul.f32 %v10989_v52, %v10989_v52 }
 0xcb4   :  { %v5453_v41 = vsel %vm419_vm0, %v10991_v3, 0.0  ;;  %v5471_v46 = vmul.f32 %v10991_v3, %v10991_v3  ;;  %v5490_v47 = vsel %vm419_vm0, %v5470_v6, 0.0 }
 0xcb5   :  { %5454 = vadd.xlane.f32.xlu1 %v5453_v41  ;;  %v5447_v63 = vsel %vm419_vm0, %v10995_v13, 0.0  ;;  %v5469_v61 = vmul.f32 %v10995_v13, %v10995_v13  ;;  %v5484_v50 = vsel %vm419_vm0, %v5468_v62, 0.0 }
 0xcb6   :  { %v5493_v37 = vsel %vm419_vm0, %v5471_v46, 0.0 }
 0xcb7   :  { %5445 = vadd.xlane.f32.xlu0 %v5444_v39  ;;  %v5487_v36 = vsel %vm419_vm0, %v5469_v61, 0.0 }
 0xcb9   :  { %5448 = vadd.xlane.f32.xlu1 %v5447_v63 }
 0xcbb   :  { %5485 = vadd.xlane.f32.xlu0 %v5484_v50 }
 0xcbd   :  { %5488 = vadd.xlane.f32.xlu1 %v5487_v36 }
 0xcbf   :  { %5491 = vadd.xlane.f32.xlu0 %v5490_v47 }
 0xcc1   :  { %5494 = vadd.xlane.f32.xlu1 %v5493_v37 }
 0xd30   :  { %v5440_v8 = vpop.xlane.xlu0 %5439 }
 0xd31   :  { %v5458_v12 = vmul.f32 0.015625, %v5440_v8 }
 0xd32   :  { %v5443_v45 = vpop.xlane.xlu1 %5442 }
 0xd33   :  { %v5459_v34 = vmul.f32 0.015625, %v5443_v45  ;;  %v5506_v40 = vmul.f32 %v5458_v12, %v5458_v12  ;;  %v5522_v61 = vsub.f32 %v10953_v1, %v5458_v12 }
 0xd34   :  { %v5434_v15 = vpop.xlane.xlu0 %5433 }
 0xd35   :  { %v5456_v35 = vmul.f32 0.015625, %v5434_v15  ;;  %v5507_v18 = vmul.f32 %v5459_v34, %v5459_v34  ;;  %v5523_v41 = vsub.f32 %v10959_v55, %v5459_v34 }
 0xd36   :  { %v5437_v25 = vpop.xlane.xlu1 %5436 }
 0xd37   :  { %v5457_v19 = vmul.f32 0.015625, %v5437_v25  ;;  %v5504_v56 = vmul.f32 %v5456_v35, %v5456_v35  ;;  %v5520_v46 = vsub.f32 %v10957_v48, %v5456_v35 }
 0xd38   :  { %v5480_v10 = vpop.xlane.xlu0 %5479 }
 0xd39   :  { %v5498_v42 = vmul.f32 0.015625, %v5480_v10  ;;  %v5505_v16 = vmul.f32 %v5457_v19, %v5457_v19  ;;  %v5521_v45 = vsub.f32 %v10963_v5, %v5457_v19 }
 0xd3a   :  { %v5483_v11 = vpop.xlane.xlu1 %5482 }
 0xd3b   :  { %v5514_v49 = vsub.f32 %v5498_v42, %v5506_v40  ;;  %v5499_v57 = vmul.f32 0.015625, %v5483_v11 }
 0xd3c   :  { %v5474_v31 = vpop.xlane.xlu0 %5473 }
 0xd3d   :  { %v5530_v33 = vadd.f32 1e-05, %v5514_v49  ;;  %v5515_v59 = vsub.f32 %v5499_v57, %v5507_v18  ;;  %v5496_v23 = vmul.f32 0.015625, %v5474_v31 }
 0xd3e   :  { %v5477_v7 = vpop.xlane.xlu1 %5476 }
 0xd3f   :  { %v5531_v28 = vadd.f32 1e-05, %v5515_v59  ;;  %v5512_v60 = vsub.f32 %v5496_v23, %v5504_v56  ;;  %v5497_v38 = vmul.f32 0.015625, %v5477_v7  ;;  %7667 = vrsqrt.f32 %v5530_v33  ;;  %v6327_v56 = vld [vmem:[#allocation20 + $0x1] ss:$0 sm:$0xff] }
 0xd40   :  { %v5452_v30 = vpop.xlane.xlu0 %5451 }
 0xd41   :  { %7669 = vrsqrt.f32 %v5531_v28  ;;  %v5528_v32 = vadd.f32 1e-05, %v5512_v60  ;;  %v5513_v44 = vsub.f32 %v5497_v38, %v5505_v16  ;;  %v11021_v26 = vmul.f32 0.015625, %v5452_v30 }
 0xd42   :  { %v5455_v9 = vpop.xlane.xlu1 %5454 }
 0xd43   :  { %7671 = vrsqrt.f32 %v5528_v32  ;;  %v5529_v22 = vadd.f32 1e-05, %v5513_v44  ;;  %v5463_v39 = vmul.f32 0.015625, %v5455_v9  ;;  %v5510_v37 = vmul.f32 %v11021_v26, %v11021_v26 }
 0xd44   :  { %v5446_v4 = vpop.xlane.xlu0 %5445 }
 0xd45   :  { %7673 = vrsqrt.f32 %v5529_v22  ;;  %v5460_v27 = vmul.f32 0.015625, %v5446_v4  ;;  %v5511_v12 = vmul.f32 %v5463_v39, %v5463_v39  ;;  %v5526_v22 = vsub.f32 %v10984_v53, %v11021_v26  ;;  %v7209_v26 = vld [vmem:[%s11111_s17 + $0x50] sm:$0xff]  }
 0xd46   :  { %v5449_v51 = vpop.xlane.xlu1 %5448  ;;  %7080 = vmatprep.subr.bf16.mxu1 %v7209_v26 }
 0xd47   :  { %v5461_v21 = vmul.f32 0.015625, %v5449_v51  ;;  %v5508_v54 = vmul.f32 %v5460_v27, %v5460_v27  ;;  %v5524_v38 = vsub.f32 %v10989_v52, %v5460_v27  ;;  %7081 = vmatpush3.bf16.msra.mxu1 %v7209_v26 }
 0xd48   :  { %v5486_v0 = vpop.xlane.xlu0 %5485 }
 0xd49   :  { %v5500_v43 = vmul.f32 0.015625, %v5486_v0  ;;  %v7668_v29 = vpop.eup %7667  ;;  %v5509_v50 = vmul.f32 %v5461_v21, %v5461_v21  ;;  %v5525_v32 = vsub.f32 %v10995_v13, %v5461_v21 }
 0xd4a   :  { %v5489_v62 = vpop.xlane.xlu1 %5488  ;;  %v5546_v20 = vmul.f32 %v7668_v29, %v5522_v61 }
 0xd4b   :  { %v7670_v63 = vpop.eup %7669  ;;  %v5516_v6 = vsub.f32 %v5500_v43, %v5508_v54  ;;  %v5501_v36 = vmul.f32 0.015625, %v5489_v62  ;;  %v5527_v54 = vsub.f32 %v10991_v3, %v5463_v39  ;;  %v7210_v39 = vld [vmem:[%s11111_s17 + $0x58] sm:$0xff]  }
 0xd4c   :  { %v5547_v47 = vmul.f32 %v7670_v63, %v5523_v41  ;;  %v5492_v14 = vpop.xlane.xlu0 %5491  ;;  %v5560_v49 = vmul.f32 %v6326_v2, %v5546_v20  ;;  %7082 = vmatprep.subr.bf16.mxu1 %v7210_v39  ;;  %v7216_v20 = vld [vmem:[#allocation25 + $0x8] sm:$0xff]  }
 0xd4d   :  { %v7672_v17 = vpop.eup %7671  ;;  %v5532_v24 = vadd.f32 1e-05, %v5516_v6  ;;  %v5517_v58 = vsub.f32 %v5501_v36, %v5509_v50  ;;  %v5502_v8 = vmul.f32 0.015625, %v5492_v14  ;;  %7083 = vmatpush3.bf16.msra.mxu1 %v7210_v39  ;;  %v7213_v14 = vld [vmem:[%s11111_s17 + $0x70] sm:$0xff]  }
 0xd4e   :  { %v5561_v15 = vmul.f32 %v6326_v2, %v5547_v47  ;;  %v5495_v25 = vpop.xlane.xlu1 %5494  ;;  %v5544_v34 = vmul.f32 %v7672_v17, %v5520_v46  ;;  %v5574_v16 = vadd.f32 %v6327_v56, %v5560_v49  ;;  %v7211_v47 = vld [vmem:[%s11111_s17 + $0x60] sm:$0xff]   ;;  %v7214_v17 = vld [vmem:[%s11111_s17 + $0x78] sm:$0xff]  }
 0xd4f   :  { %v7674_v10 = vpop.eup %7673  ;;  %7675 = vrsqrt.f32 %v5532_v24  ;;  %v5533_v40 = vadd.f32 1e-05, %v5517_v58  ;;  %v5518_v35 = vsub.f32 %v5502_v8, %v5510_v37  ;;  %v5503_v42 = vmul.f32 0.015625, %v5495_v25  ;;  %7084 = vmatprep.subr.bf16.mxu1 %v7211_v47  ;;  %v7212_v37 = vld [vmem:[%s11111_s17 + $0x68] sm:$0xff]   ;;  %v6328_v24 = vld [vmem:[#allocation23 + $0x1] ss:$0 sm:$0xff] }
 0xd50   :  { %v5545_v11 = vmul.f32 %v7674_v10, %v5521_v45  ;;  %v5558_v18 = vmul.f32 %v6326_v2, %v5544_v34  ;;  %v5575_v59 = vadd.f32 %v6327_v56, %v5561_v15 }
 0xd51   :  { %7677 = vrsqrt.f32 %v5533_v40  ;;  %v5534_v57 = vadd.f32 1e-05, %v5518_v35  ;;  %v5519_v31 = vsub.f32 %v5503_v42, %v5511_v12  ;;  %7085 = vmatpush3.bf16.msra.mxu1 %v7211_v47 }
 0xd52   :  { %v5559_v33 = vmul.f32 %v6326_v2, %v5545_v11  ;;  %v5572_v23 = vadd.f32 %v6327_v56, %v5558_v18  ;;  %v5581_v60 = vpack.c.bf16 %v5575_v59, %v5574_v16  ;;  %7086 = vmatprep.subr.bf16.mxu1 %v7212_v37 }
 0xd53   :  { %7679 = vrsqrt.f32 %v5534_v57  ;;  %v5535_v19 = vadd.f32 1e-05, %v5519_v31 }
 0xd54   :  { %v5573_v7 = vadd.f32 %v6327_v56, %v5559_v33 }
 0xd55   :  { %7681 = vrsqrt.f32 %v5535_v19  ;;  %7087 = vmatpush3.bf16.msra.mxu1 %v7212_v37 }
 0xd56   :  { %v5580_v28 = vpack.c.bf16 %v5573_v7, %v5572_v23  ;;  %7088 = vmatprep.subr.bf16.mxu1 %v7213_v14 }
 0xd58   :  { %7068 = vmatprep.mubr.msk.bf16.mxu0 %vm419_vm0, %v5580_v28 }
 0xd59   :  { %v7676_v30 = vpop.eup %7675  ;;  %7069 = vmatmul.mubr.msk.bf16.vlgmr.msra.gmra.mrb[160].mxu0 %vm419_vm0, %v5581_v60  ;;  %7089 = vmatpush3.bf16.msra.mxu1 %v7213_v14 }
 0xd5a   :  { %v5548_v44 = vmul.f32 %v7676_v30, %v5524_v38  ;;  %7090 = vmatprep.subr.bf16.mxu1 %v7214_v17 }
 0xd5b   :  { %v7678_v9 = vpop.eup %7677 }
 0xd5c   :  { %v5549_v4 = vmul.f32 %v7678_v9, %v5525_v32  ;;  %v5562_v51 = vmul.f32 %v6326_v2, %v5548_v44 }
 0xd5d   :  { %v7680_v0 = vpop.eup %7679  ;;  %7091 = vmatpush3.bf16.msra.mxu1 %v7214_v17 }
 0xd5e   :  { %v5563_v43 = vmul.f32 %v6326_v2, %v5549_v4  ;;  %v5550_v29 = vmul.f32 %v7680_v0, %v5526_v22  ;;  %v5576_v41 = vadd.f32 %v6327_v56, %v5562_v51 }
 0xd5f   :  { %v7682_v27 = vpop.eup %7681 }
 0xd60   :  { %v5577_v62 = vadd.f32 %v6327_v56, %v5563_v43  ;;  %v5551_v63 = vmul.f32 %v7682_v27, %v5527_v54  ;;  %v5564_v61 = vmul.f32 %v6326_v2, %v5550_v29 }
 0xd62   :  { %v5582_v50 = vpack.c.bf16 %v5577_v62, %v5576_v41  ;;  %v5565_v6 = vmul.f32 %v6326_v2, %v5551_v63  ;;  %v5578_v21 = vadd.f32 %v6327_v56, %v5564_v61  ;;  %v7215_v2 = vld [vmem:[#allocation25] sm:$0xff]  }
 0xd63   :  { %7100 = vmatprep.subr.bf16.mxu0 %v7215_v2 }
 0xd64   :  { %7072 = vmatprep.mubr.msk.bf16.mxu0 %vm419_vm0, %v5582_v50  ;;  %v5579_v36 = vadd.f32 %v6327_v56, %v5565_v6  ;;  %7101 = vmatpush3.bf16.msra.mxu0 %v7215_v2 }
 0xd65   :  { %7102 = vmatprep.subr.bf16.mxu0 %v7216_v20 }
 0xd66   :  { %v5583_v46 = vpack.c.bf16 %v5579_v36, %v5578_v21 }
 0xd68   :  { %7073 = vmatmul.mubr.msk.bf16.gmra.mrb[164].mxu0 %vm419_vm0, %v5583_v46 }
 0xd69   :  { %7103 = vmatpush3.bf16.msra.mxu0 %v7216_v20 }
 0xe2c   :  { %v7070_v58 = vpop.f32.mrb[160].mxu0 }
 0xe2d   :  { %v5680_v8 = vadd.f32 %v7070_v58, %v6328_v24  ;;  %v5671_v45 = vpop.f32.mrb[161].mxu0 }
 0xe2e   :  { %v5672_v15 = vadd.f32 %v6328_v24, %v5671_v45  ;;  %v7071_v12 = vpop.f32.mrb[162].mxu0 }
 0xe2f   :  { %v5712_v25 = vmul.f32 0.044715, %v5680_v8  ;;  %v5683_v34 = vadd.f32 %v7071_v12, %v6328_v24  ;;  %v5674_v10 = vpop.f32.mrb[163].mxu0  ;;  %v5704_v39 = vmul.f32 0.5, %v5680_v8 }
 0xe30   :  { %v5710_v40 = vmul.f32 0.044715, %v5672_v15  ;;  %v5675_v35 = vadd.f32 %v6328_v24, %v5674_v10  ;;  %v5702_v20 = vmul.f32 0.5, %v5672_v15 }
 0xe31   :  { %v5720_v42 = vmul.f32 %v5712_v25, %v5680_v8  ;;  %v5713_v11 = vmul.f32 0.044715, %v5683_v34  ;;  %v5705_v12 = vmul.f32 0.5, %v5683_v34 }
 0xe32   :  { %v5718_v18 = vmul.f32 %v5710_v40, %v5672_v15  ;;  %v5711_v49 = vmul.f32 0.044715, %v5675_v35 }
 0xe33   :  { %v5728_v57 = vmul.f32 %v5720_v42, %v5680_v8  ;;  %v5721_v31 = vmul.f32 %v5713_v11, %v5683_v34  ;;  %v5703_v42 = vmul.f32 0.5, %v5675_v35 }
 0xe34   :  { %v5726_v56 = vmul.f32 %v5718_v18, %v5672_v15  ;;  %v5719_v33 = vmul.f32 %v5711_v49, %v5675_v35 }
 0xe35   :  { %v5736_v59 = vadd.f32 %v5728_v57, %v5680_v8  ;;  %v5729_v19 = vmul.f32 %v5721_v31, %v5683_v34 }
 0xe36   :  { %v5727_v23 = vmul.f32 %v5719_v33, %v5675_v35  ;;  %v5734_v7 = vadd.f32 %v5726_v56, %v5672_v15 }
 0xe37   :  { %v5744_v16 = vmul.f32 0.7978846, %v5736_v59  ;;  %v5737_v28 = vadd.f32 %v5729_v19, %v5683_v34 }
 0xe38   :  { %v5735_v60 = vadd.f32 %v5727_v23, %v5675_v35  ;;  %v5742_v38 = vmul.f32 0.7978846, %v5734_v7 }
 0xe39   :  { %7683 = vtanh.f32 %v5744_v16  ;;  %v5745_v30 = vmul.f32 0.7978846, %v5737_v28 }
 0xe3a   :  { %v5743_v32 = vmul.f32 0.7978846, %v5735_v60  ;;  %7685 = vtanh.f32 %v5742_v38 }
 0xe3b   :  { %7687 = vtanh.f32 %v5745_v30  ;;  %v7074_v44 = vpop.f32.mrb[164].mxu0 }
 0xe3c   :  { %v5696_v9 = vadd.f32 %v7074_v44, %v6328_v24  ;;  %v5687_v22 = vpop.f32.mrb[165].mxu0  ;;  %7689 = vtanh.f32 %v5743_v32 }
 0xe3d   :  { %v5688_v4 = vadd.f32 %v6328_v24, %v5687_v22  ;;  %v7075_v51 = vpop.f32.mrb[166].mxu0 }
 0xe3e   :  { %v5716_v0 = vmul.f32 0.044715, %v5696_v9  ;;  %v5699_v54 = vadd.f32 %v7075_v51, %v6328_v24  ;;  %v5690_v43 = vpop.f32.mrb[167].mxu0  ;;  %v5708_v60 = vmul.f32 0.5, %v5696_v9 }
 0xe3f   :  { %v5714_v29 = vmul.f32 0.044715, %v5688_v4  ;;  %v5691_v27 = vadd.f32 %v6328_v24, %v5690_v43  ;;  %v5706_v32 = vmul.f32 0.5, %v5688_v4 }
 0xe40   :  { %v5724_v41 = vmul.f32 %v5716_v0, %v5696_v9  ;;  %v5717_v62 = vmul.f32 0.044715, %v5699_v54  ;;  %v5709_v38 = vmul.f32 0.5, %v5699_v54 }
 0xe41   :  { %v5722_v63 = vmul.f32 %v5714_v29, %v5688_v4  ;;  %v5715_v61 = vmul.f32 0.044715, %v5691_v27  ;;  %v5707_v44 = vmul.f32 0.5, %v5691_v27 }
 0xe42   :  { %v5732_v50 = vmul.f32 %v5724_v41, %v5696_v9  ;;  %v5725_v6 = vmul.f32 %v5717_v62, %v5699_v54 }
 0xe43   :  { %v7684_v21 = vpop.eup %7683  ;;  %v5730_v36 = vmul.f32 %v5722_v63, %v5688_v4  ;;  %v5723_v46 = vmul.f32 %v5715_v61, %v5691_v27  ;;  %v7217_v63 = vld [vmem:[#allocation25 + $0x10] sm:$0xff]   ;;  %v7218_v61 = vld [vmem:[#allocation25 + $0x18] sm:$0xff]  }
 0xe44   :  { %v7686_v26 = vpop.eup %7685  ;;  %v5733_v47 = vmul.f32 %v5725_v6, %v5699_v54  ;;  %v5760_v37 = vadd.f32 1.0, %v7684_v21  ;;  %v5740_v14 = vadd.f32 %v5732_v50, %v5696_v9  ;;  %7104 = vmatprep.subr.bf16.mxu0 %v7217_v63 }
 0xe45   :  { %v7688_v17 = vpop.eup %7687  ;;  %v5731_v2 = vmul.f32 %v5723_v46, %v5691_v27  ;;  %v5758_v58 = vadd.f32 1.0, %v7686_v26  ;;  %v5738_v45 = vadd.f32 %v5730_v36, %v5688_v4  ;;  %7105 = vmatpush3.bf16.msra.mxu0 %v7217_v63 }
 0xe46   :  { %v7690_v24 = vpop.eup %7689  ;;  %v5761_v25 = vadd.f32 1.0, %v7688_v17  ;;  %v5741_v10 = vadd.f32 %v5733_v47, %v5699_v54  ;;  %v5748_v40 = vmul.f32 0.7978846, %v5740_v14  ;;  %v5768_v57 = vmul.f32 %v5760_v37, %v5704_v39  ;;  %7106 = vmatprep.subr.bf16.mxu0 %v7218_v61 }
 0xe47   :  { %v5759_v11 = vadd.f32 1.0, %v7690_v24  ;;  %v5739_v18 = vadd.f32 %v5731_v2, %v5691_v27  ;;  %v5746_v49 = vmul.f32 0.7978846, %v5738_v45  ;;  %v5766_v56 = vmul.f32 %v5758_v58, %v5702_v20  ;;  %v6362_v27 = vld [vmem:[%s11332_s21 + $0x1] ss:$0 sm:$0xff]  ;;  %s6065_s21 = sshll.u32 %s8117_s0, 4  ;;  %s6066_s21 = int_to_ptr.vmem [resolvable:$true] %s6065_s21 }
 0xe48   :  { %v5769_v31 = vmul.f32 %v5761_v25, %v5705_v12  ;;  %v5749_v8 = vmul.f32 0.7978846, %v5741_v10  ;;  %7691 = vtanh.f32 %v5748_v40  ;;  %s8055_s29 = scalar_lea.vmem %s6066_s21, 1024  ;;  %p8060_p3 = scmp.lt.s32.totalorder %s6066_s21, %s6066_s21 }
 0xe49   :  { %v5767_v33 = vmul.f32 %v5759_v11, %v5703_v42  ;;  %v5747_v59 = vmul.f32 0.7978846, %v5739_v18  ;;  %7693 = vtanh.f32 %v5746_v49  ;;  %7107 = vmatpush3.bf16.msra.mxu0 %v7218_v61  ;;  %p8056_p2 = scmp.ne.s32.totalorder %s6066_s21, %s8055_s29  ;;  %p8061_p4 = scmp.lt.s32.totalorder %s8055_s29, %s8055_s29 }
 0xe4a   :  { %v5775_v15 = vpack.c.bf16 %v5769_v31, %v5768_v57  ;;  %7695 = vtanh.f32 %v5749_v8 }
 0xe4b   :  { %v5774_v19 = vpack.c.bf16 %v5767_v33, %v5766_v56  ;;  %7697 = vtanh.f32 %v5747_v59  ;;  %p8062_p5 = por %p8061_p4, %p8060_p3 }
 0xe4d   :  { %7092 = vmatprep.mubr.bf16.mxu1 %v5774_v19  ;;  %p8063_p6 = pnand %p8062_p5, %p8056_p2 }
 0xe4e   :  { %7093 = vmatmul.mubr.bf16.vlgmr.msra.gmra.mrb[168].mxu1 %v5775_v15 }
 0xe52   :  { %v7692_v34 = vpop.eup %7691 }
 0xe53   :  { %v7694_v23 = vpop.eup %7693  ;;  %v5764_v35 = vadd.f32 1.0, %v7692_v34 }
 0xe54   :  { %v7696_v7 = vpop.eup %7695  ;;  %v5762_v16 = vadd.f32 1.0, %v7694_v23 }
 0xe55   :  { %v7698_v28 = vpop.eup %7697  ;;  %v5765_v30 = vadd.f32 1.0, %v7696_v7  ;;  %v5772_v51 = vmul.f32 %v5764_v35, %v5708_v60 }
 0xe56   :  { %v5763_v22 = vadd.f32 1.0, %v7698_v28  ;;  %v5770_v43 = vmul.f32 %v5762_v16, %v5706_v32 }
 0xe57   :  { %v5773_v0 = vmul.f32 %v5765_v30, %v5709_v38 }
 0xe58   :  { %v5771_v29 = vmul.f32 %v5763_v22, %v5707_v44 }
 0xe59   :  { %v5777_v41 = vpack.c.bf16 %v5773_v0, %v5772_v51 }
 0xe5a   :  { %v5776_v62 = vpack.c.bf16 %v5771_v29, %v5770_v43 }
 0xe5c   :  { %7096 = vmatprep.mubr.bf16.mxu1 %v5776_v62 }
 0xe5d   :  { %7097 = vmatmul.mubr.bf16.gmra.mrb[172].mxu1 %v5777_v41 }
 0xf21   :  { %v7094_v9 = vpop.f32.mrb[168].mxu1 }
 0xf22   :  { %v5910_v54 = vadd.f32 %v7094_v9, %v10953_v1  ;;  %v5877_v4 = vpop.f32.mrb[169].mxu1 }
 0xf23   :  { %v5908_v50 = vadd.f32 %v5877_v4, %v10957_v48  ;;  %v7095_v6 = vpop.f32.mrb[170].mxu1 }
 0xf24   :  { %v5911_v21 = vadd.f32 %v7095_v6, %v10959_v55  ;;  %v5880_v36 = vpop.f32.mrb[171].mxu1  ;;  %v5926_v26 = vadd.f32 %v6362_v27, %v5910_v54 }
 0xf25   :  { %v5909_v46 = vadd.f32 %v5880_v36, %v10963_v5  ;;  %v5924_v47 = vadd.f32 %v6362_v27, %v5908_v50 }
 0xf26   :  { %v5927_v39 = vadd.f32 %v6362_v27, %v5911_v21 }
 0xf27   :  { %v5925_v37 = vadd.f32 %v6362_v27, %v5909_v46 }
 0xf28   :  { %v5933_v14 = vpack.c.bf16 %v5927_v39, %v5926_v26 }
 0xf29   :  { %v5932_v17 = vpack.c.bf16 %v5925_v37, %v5924_v47 }
 0xf2b   :  { %7108 = vmatprep.mubr.msk.bf16.mxu0 %vm419_vm0, %v5932_v17 }
 0xf2c   :  { %7109 = vmatmul.mubr.msk.bf16.vlgmr.msra.gmra.mrb[168].mxu0 %vm419_vm0, %v5933_v14 }
 0xf30   :  { %v7098_v1 = vpop.f32.mrb[172].mxu1 }
 0xf31   :  { %v5914_v2 = vadd.f32 %v7098_v1, %v10984_v53  ;;  %v5893_v48 = vpop.f32.mrb[173].mxu1  ;;  %v6363_v53 = vld [vmem:[%s11363_s9] ss:$0 sm:$0xff] }
 0xf32   :  { %v5912_v20 = vadd.f32 %v5893_v48, %v10989_v52  ;;  %v7099_v55 = vpop.f32.mrb[174].mxu1 }
 0xf33   :  { %v5915_v58 = vadd.f32 %v7099_v55, %v10991_v3  ;;  %v5896_v5 = vpop.f32.mrb[175].mxu1  ;;  %v5930_v24 = vadd.f32 %v6362_v27, %v5914_v2 }
 0xf34   :  { %v5913_v45 = vadd.f32 %v5896_v5, %v10995_v13  ;;  %v5928_v25 = vadd.f32 %v6362_v27, %v5912_v20 }
 0xf35   :  { %v5931_v12 = vadd.f32 %v6362_v27, %v5915_v58 }
 0xf36   :  { %v5929_v10 = vadd.f32 %v6362_v27, %v5913_v45 }
 0xf37   :  { %v5935_v40 = vpack.c.bf16 %v5931_v12, %v5930_v24 }
 0xf38   :  { %v5934_v42 = vpack.c.bf16 %v5929_v10, %v5928_v25 }
 0xf3a   :  { %7112 = vmatprep.mubr.msk.bf16.mxu0 %vm419_vm0, %v5934_v42 }
 0xf3b   :  { %7113 = vmatmul.mubr.msk.bf16.gmra.mrb[172].mxu0 %vm419_vm0, %v5935_v40 }
 0xfff   :  { %v7110_v52 = vpop.f32.mrb[168].mxu0 }
0x1000   :  { %v6030_v11 = vadd.f32 %v7110_v52, %v6363_v53  ;;  %v6021_v3 = vpop.f32.mrb[169].mxu0 }
0x1001   :  { %v6022_v18 = vadd.f32 %v6363_v53, %v6021_v3  ;;  %v7111_v49 = vpop.f32.mrb[170].mxu0 }
0x1002   :  { %6054 = vst.msk [vmem:[#allocation28 + $0x10] sm:$0xff] %vm419_vm0, %v6030_v11  ;;  %v6033_v13 = vadd.f32 %v7111_v49, %v6363_v53  ;;  %v6024_v57 = vpop.f32.mrb[171].mxu0 }
0x1003   :  { %6052 = vst.msk [vmem:[#allocation28] sm:$0xff] %vm419_vm0, %v6022_v18  ;;  %v6025_v31 = vadd.f32 %v6363_v53, %v6024_v57 }
0x1004   :  { %6055 = vst.msk [vmem:[#allocation28 + $0x18] sm:$0xff] %vm419_vm0, %v6033_v13 }
0x1005   :  { %6053 = vst.msk [vmem:[#allocation28 + $0x8] sm:$0xff] %vm419_vm0, %v6025_v31 }
0x100e   :  { %v7114_v8 = vpop.f32.mrb[172].mxu0 }
0x100f   :  { %v6046_v56 = vadd.f32 %v7114_v8, %v6363_v53  ;;  %v6037_v33 = vpop.f32.mrb[173].mxu0 }
0x1010   :  { %v6038_v59 = vadd.f32 %v6363_v53, %v6037_v33  ;;  %v7115_v15 = vpop.f32.mrb[174].mxu0 }
0x1011   :  { %6058 = vst.msk [vmem:[#allocation28 + $0x30] sm:$0xff] %vm419_vm0, %v6046_v56  ;;  %v6049_v19 = vadd.f32 %v7115_v15, %v6363_v53  ;;  %v6040_v34 = vpop.f32.mrb[175].mxu0 }
0x1012   :  { %6056 = vst.msk [vmem:[#allocation28 + $0x20] sm:$0xff] %vm419_vm0, %v6038_v59  ;;  %v6041_v23 = vadd.f32 %v6363_v53, %v6040_v34 }
0x1013   :  { %6059 = vst.msk [vmem:[#allocation28 + $0x38] sm:$0xff] %vm419_vm0, %v6049_v19 }
0x1014   :  { %6057 = vst.msk [vmem:[#allocation28 + $0x28] sm:$0xff] %vm419_vm0, %v6041_v23 }
0x1015   :  { %8066 = shalt.err (!%p8063_p6)
}
0x1016   :  { %s11364_s25 = sld [smem:[#allocation104_spill]] }
0x101c   :  { %s8067_s24 = scalar_lea.hbm %s11364_s25, 1024 }
0x101d   :  { %p8068_p7 = scmp.ne.s32.totalorder %s11364_s25, %s8067_s24  ;;  %p8071_p8 = scmp.lt.u32.totalorder %s8067_s24, %s11364_s25 }
0x101f   :  { %p8073_p9 = pnand %p8071_p8, %p8068_p7 }
0x1021   :  { %8076 = shalt.err (!%p8073_p9)
}
0x1022   :  { %s8118_s22 = smov 128   ;;  %s8119_s18 = smov 8  }
0x1023   :  { %6071 = dma.vmem_to_hbm [thread:$0]  %s6066_s21, 1024, %s11364_s25, [#allocation4], %s8118_s22, %s8118_s22, %s8119_s18  }
0x1024   :  { %8095 = dma.done.wait [#allocation4], 1024  }
0x1025   :  { %8096 = vsyncadd [#allocation4], 4294966272 }
0x1026   :  { %6075 = vsyncpa [#allocation3], 1 }
0x1027   :  { %6076 = vsyncpa [#allocation6], 1 }
0x1028   :  { %6077 = vsyncpa [#allocation9], 1 }
0x1029   :  { %6078 = vsyncpa [#allocation12], 1 }
0x102a   :  { %6079 = vsyncpa [#allocation15], 1 }
0x102b   :  { %6080 = vsyncpa [#allocation18], 1 }
0x102c   :  { %6081 = vsyncpa [#allocation21], 1 }
0x102d   :  { %6082 = vsyncpa [#allocation24], 1 }
0x102e   :  { %6083 = vsyncpa [#allocation27], 1 }
0x102f   :  { %6084 = vsyncpa [#allocation4], 1 }

</bundles_post_ra>
